<compile_context>
chip_gen: v7x
topology: tpu7x:2x2x1
jax: 0.10.0
libtpu: 0.0.40
codegen_flags: <defaults>
</compile_context>

<pallas_src>
import math

import jax
import jax.numpy as jnp
from jax.experimental import pallas as pl
from jax.experimental.pallas import tpu as pltpu

# ----------------------------- configuration -------------------------------
OBS_DIM = 16
N_OBS_STEPS = 2
HORIZON = 8
LATENT_DIM = 32
DEPTH = 2
HEADS = 2
DIM_HEAD = 16
POINT_DIM = 4
BATCH = 2

MODEL_DIM = LATENT_DIM * 2               # features dim fed to the IPT (64)
T_TOKENS = HORIZON + N_OBS_STEPS         # 10 tokens
NUM_ATTN_LOGITS = 2                      # scalar + point (no pairwise repr)
SCALAR_SCALE = (NUM_ATTN_LOGITS * DIM_HEAD) ** -0.5
POINT_SCALE = ((NUM_ATTN_LOGITS * POINT_DIM) * (9.0 / 2.0)) ** -0.5
MASK_NEG = -1e9

# fused q/k/v weight column layout (scalar q|k|v head-major, then point
# q|k|v coordinate-major: [x(all h,p), y(...), z(...)])
HDH = HEADS * DIM_HEAD                   # 32
HP = HEADS * POINT_DIM                   # 8
QS0, KS0, VS0 = 0, HDH, 2 * HDH
QP0 = 3 * HDH                            # 96
KP0 = QP0 + 3 * HP                       # 120
VP0 = KP0 + 3 * HP                       # 144
QKV_COLS = VP0 + 3 * HP                  # 168  (lane-dense, > 128)

# attention-output feature column layout fed into w_ao
FS0 = 0                                  # scalar out, width HDH
FP0 = HDH                                # local points (h-major, x|y|z), width H*3*P
FN0 = FP0 + HEADS * 3 * POINT_DIM        # point norms, width HP
ATTN_FEATS = FN0 + HP                    # 64

OUT_PAD = 8                              # final head padded 6 -> 8 lanes


# ------------------------------ small helpers -------------------------------
def _mish(y):
    sp = jnp.maximum(y, 0.0) + jnp.log1p(jnp.exp(-jnp.abs(y)))   # stable softplus
    return y * jnp.tanh(sp)


def _layernorm(x, g, b, eps=1e-5):
    mu = jnp.mean(x, axis=-1, keepdims=True)
    var = jnp.mean((x - mu) ** 2, axis=-1, keepdims=True)
    return (x - mu) * jax.lax.rsqrt(var + eps) * g + b


# ------------------------------ fused kernel --------------------------------
def fused_forward_kernel(
    # SMEM scalars
    gamma_ref,                                           # (DEPTH, HEADS) f32
    # tensors (all VMEM resident, batch flattened into rows)
    mask_ref,                                            # (B*T, B*T) additive bias
    obs_ref,                                             # (B*n_obs, OBS_DIM)
    tsin_ref,                                            # (B, LATENT)
    act_ref,                                             # (HORIZON, LATENT)
    rot_ref,                                             # (B*T, 9)
    trans_ref,                                           # (B*T, 3)
    # obs / time encoder weights
    ow1_ref, ob1_ref, ow2_ref, ob2_ref,
    tw1_ref, tb1_ref, tlg_ref, tlb_ref, tw2_ref, tb2_ref,
    # stacked per-layer IPA-block weights
    wqkv_ref, wao_ref, bao_ref, ln1g_ref, ln1b_ref,
    ffw1_ref, ffb1_ref, ffw2_ref, ffb2_ref, ln2g_ref, ln2b_ref,
    # final head
    outw_ref, outb_ref,
    # outputs
    feat_ref, v_ref,
    # scratch
    xb_scr, feats_scr,
):
    BT = rot_ref.shape[0]
    B = tsin_ref.shape[0]
    T = BT // B
    n_act = act_ref.shape[0]
    n_obs = obs_ref.shape[0] // B
    n_layers = wqkv_ref.shape[0]

    # ----- observation encoder (all B*n_obs rows at once): Linear->Mish->Linear
    h = jnp.dot(obs_ref[...], ow1_ref[...],
                preferred_element_type=jnp.float32) + ob1_ref[...]
    obs_lat = jnp.dot(_mish(h), ow2_ref[...],
                      preferred_element_type=jnp.float32) + ob2_ref[...]   # (B*n_obs, LAT)

    # ----- time encoder (all B rows at once): Linear->Mish->LayerNorm->Linear
    th = jnp.dot(tsin_ref[...], tw1_ref[...],
                 preferred_element_type=jnp.float32) + tb1_ref[...]
    th = _layernorm(_mish(th), tlg_ref[...], tlb_ref[...])
    t_emb = jnp.dot(th, tw2_ref[...],
                    preferred_element_type=jnp.float32) + tb2_ref[...]     # (B, LAT)

    act_feat = act_ref[...]                                                # (H, LAT)

    # ----- assemble token features (B*T, 2*LATENT) in VMEM scratch -----
    for b in range(B):
        r0 = b * T
        xb_scr[r0:r0 + n_act, 0:LATENT_DIM] = act_feat
        xb_scr[r0 + n_act:r0 + T, 0:LATENT_DIM] = obs_lat[b * n_obs:(b + 1) * n_obs, :]
        xb_scr[r0:r0 + T, LATENT_DIM:MODEL_DIM] = jnp.broadcast_to(
            t_emb[b:b + 1, :], (T, LATENT_DIM))
    x = xb_scr[...]

    mask_bias = mask_ref[...]

    # per-token rotation columns (row-major flatten: col 3r + c -> R[r, c]) and trans
    rot = rot_ref[...]                                                     # (BT, 9)
    rc = [rot[:, i:i + 1] for i in range(9)]
    tr = trans_ref[...]                                                    # (BT, 3)
    tx, ty, tz = tr[:, 0:1], tr[:, 1:2], tr[:, 2:3]

    for l in range(n_layers):
        # fused scalar+point q/k/v projection, one lane-dense matmul over all rows
        qkv = jnp.dot(x, wqkv_ref[l], preferred_element_type=jnp.float32)  # (BT, 168)

        def to_global(base):
            px = qkv[:, base:base + HP]
            py = qkv[:, base + HP:base + 2 * HP]
            pz = qkv[:, base + 2 * HP:base + 3 * HP]
            # lucidrains convention: g_r = sum_c p_c * R[c, r] + t_r
            gx = px * rc[0] + py * rc[3] + pz * rc[6] + tx
            gy = px * rc[1] + py * rc[4] + pz * rc[7] + ty
            gz = px * rc[2] + py * rc[5] + pz * rc[8] + tz
            return gx, gy, gz

        qgx, qgy, qgz = to_global(QP0)
        kgx, kgy, kgz = to_global(KP0)
        vgx, vgy, vgz = to_global(VP0)

        for hd in range(HEADS):
            sp = slice(hd * POINT_DIM, (hd + 1) * POINT_DIM)
            q_s = qkv[:, QS0 + hd * DIM_HEAD:QS0 + (hd + 1) * DIM_HEAD] * SCALAR_SCALE
            k_s = qkv[:, KS0 + hd * DIM_HEAD:KS0 + (hd + 1) * DIM_HEAD]
            v_s = qkv[:, VS0 + hd * DIM_HEAD:VS0 + (hd + 1) * DIM_HEAD]
            qx, qy, qz = qgx[:, sp], qgy[:, sp], qgz[:, sp]
            kx, ky, kz = kgx[:, sp], kgy[:, sp], kgz[:, sp]
            vx, vy, vz = vgx[:, sp], vgy[:, sp], vgz[:, sp]

            pw = POINT_SCALE * gamma_ref[l, hd]                            # SMEM scalar

            # scalar + squared-point-distance logits (block-diag mask keeps
            # attention within each batch's own token block)
            s_logits = jnp.dot(q_s, k_s.T, preferred_element_type=jnp.float32)
            cross = (jnp.dot(qx, kx.T, preferred_element_type=jnp.float32)
                     + jnp.dot(qy, ky.T, preferred_element_type=jnp.float32)
                     + jnp.dot(qz, kz.T, preferred_element_type=jnp.float32))
            q_sq = jnp.sum(qx * qx + qy * qy + qz * qz, axis=-1, keepdims=True)
            k_sq = jnp.sum(kx * kx + ky * ky + kz * kz, axis=-1, keepdims=True)
            p_logits = (-0.5 * pw) * (q_sq + k_sq.T) + pw * cross

            logits = s_logits + p_logits + mask_bias
            logits = logits - jnp.max(logits, axis=-1, keepdims=True)
            e = jnp.exp(logits)
            attn = e * pl.reciprocal(jnp.sum(e, axis=-1, keepdims=True),
                                     approx=False)

            o_s = jnp.dot(attn, v_s, preferred_element_type=jnp.float32)
            ogx = jnp.dot(attn, vx, preferred_element_type=jnp.float32)
            ogy = jnp.dot(attn, vy, preferred_element_type=jnp.float32)
            ogz = jnp.dot(attn, vz, preferred_element_type=jnp.float32)

            # back to the local frame: l_c = sum_r R[c, r] * (g - t)_r
            dgx, dgy, dgz = ogx - tx, ogy - ty, ogz - tz
            lx = dgx * rc[0] + dgy * rc[1] + dgz * rc[2]
            ly = dgx * rc[3] + dgy * rc[4] + dgz * rc[5]
            lz = dgx * rc[6] + dgy * rc[7] + dgz * rc[8]
            pnorm = jnp.sqrt(lx * lx + ly * ly + lz * lz + 1e-8)

            # scatter per-head features into the attn-output slab
            feats_scr[:, FS0 + hd * DIM_HEAD:FS0 + (hd + 1) * DIM_HEAD] = o_s
            pb = FP0 + hd * 3 * POINT_DIM
            feats_scr[:, pb:pb + POINT_DIM] = lx
            feats_scr[:, pb + POINT_DIM:pb + 2 * POINT_DIM] = ly
            feats_scr[:, pb + 2 * POINT_DIM:pb + 3 * POINT_DIM] = lz
            nb = FN0 + hd * POINT_DIM
            feats_scr[:, nb:nb + POINT_DIM] = pnorm

        # attention output projection + post-norm residual block (all rows)
        attn_out = jnp.dot(feats_scr[...], wao_ref[l],
                           preferred_element_type=jnp.float32) + bao_ref[l]
        x = _layernorm(x + attn_out, ln1g_ref[l], ln1b_ref[l])
        ff = jnp.maximum(
            jnp.dot(x, ffw1_ref[l], preferred_element_type=jnp.float32) + ffb1_ref[l],
            0.0)
        ff = jnp.dot(ff, ffw2_ref[l], preferred_element_type=jnp.float32) + ffb2_ref[l]
        x = _layernorm(x + ff, ln2g_ref[l], ln2b_ref[l])

    feat_ref[...] = x
    v_ref[...] = jnp.dot(x, outw_ref[...],
                         preferred_element_type=jnp.float32) + outb_ref[...]


# --------------------------- embeddings (wrapper) ---------------------------
def sinusoidal_pos_emb(t, dim):
    half = dim // 2
    scale = math.log(10000.0) / (half - 1)
    freqs = jnp.exp(jnp.arange(half, dtype=jnp.float32) * -scale)
    args = t.astype(jnp.float32)[:, None] * freqs[None, :]
    return jnp.concatenate([jnp.sin(args), jnp.cos(args)], axis=-1)


def make_positional_encoding(d_model, max_len):
    position = jnp.arange(max_len, dtype=jnp.float32)[:, None]
    div_term = jnp.exp(jnp.arange(0, d_model, 2, dtype=jnp.float32)
                       * -(math.log(10000.0) / d_model))
    pe = jnp.zeros((max_len, d_model), dtype=jnp.float32)
    pe = pe.at[:, 0::2].set(jnp.sin(position * div_term))
    pe = pe.at[:, 1::2].set(jnp.cos(position * div_term))
    return pe[None]                                     # (1, max_len, d_model)


# ------------------------------- full forward -------------------------------
@jax.jit
def flow_matching_ipt_forward(params, act_r, act_p, time, obs_f, obs_r, obs_p):
    B = act_r.shape[0]
    n_act = act_r.shape[1]
    n_obs = obs_r.shape[1]
    T = n_act + n_obs
    BT = B * T

    # tiny XLA glue only: time embedding, pose concat/flatten, softplus(gammas),
    # and the constant block-diagonal causal/conditioning mask (folded at compile).
    t_sin = sinusoidal_pos_emb(time, LATENT_DIM)                            # (B, LAT)
    act_feat = (params["action_features"] + params["pe"][0, :n_act]).astype(jnp.float32)
    rot = jnp.concatenate([act_r, obs_r], axis=1).reshape(BT, 9).astype(jnp.float32)
    trans = jnp.concatenate([act_p, obs_p], axis=1).reshape(BT, 3).astype(jnp.float32)
    obs_flat = obs_f.reshape(B * n_obs, OBS_DIM).astype(jnp.float32)
    gamma = jax.nn.softplus(params["point_weights"]).astype(jnp.float32)

    row = jnp.arange(BT, dtype=jnp.int32)[:, None]
    col = jnp.arange(BT, dtype=jnp.int32)[None, :]
    rb, cb = row // T, col // T
    rl, cl = row % T, col % T
    blocked = ((rb != cb)
               | ((rl < n_act) & (cl < n_act) & (cl > rl))       # causal within actions
               | ((rl >= n_act) & (cl < n_act)))                 # obs never sees actions
    mask_bias = jnp.where(blocked, MASK_NEG, 0.0).astype(jnp.float32)

    inputs = [gamma,
              mask_bias, obs_flat, t_sin, act_feat, rot, trans,
              params["obs_w1"], params["obs_b1"], params["obs_w2"], params["obs_b2"],
              params["time_w1"], params["time_b1"],
              params["time_ln_g"], params["time_ln_b"],
              params["time_w2"], params["time_b2"],
              params["wqkv"], params["wao"], params["bao"],
              params["ln1_g"], params["ln1_b"],
              params["ff_w1"], params["ff_b1"], params["ff_w2"], params["ff_b2"],
              params["ln2_g"], params["ln2_b"],
              params["out_w"], params["out_b"]]

    vmem = pl.BlockSpec(memory_space=pltpu.MemorySpace.VMEM)
    smem = pl.BlockSpec(memory_space=pltpu.MemorySpace.SMEM)

    feat_out, v_out = pl.pallas_call(
        fused_forward_kernel,
        out_shape=(jax.ShapeDtypeStruct((BT, MODEL_DIM), jnp.float32),
                   jax.ShapeDtypeStruct((BT, OUT_PAD), jnp.float32)),
        in_specs=[smem] + [vmem] * (len(inputs) - 1),
        out_specs=(vmem, vmem),
        scratch_shapes=[pltpu.VMEM((BT, MODEL_DIM), jnp.float32),   # token features
                        pltpu.VMEM((BT, ATTN_FEATS), jnp.float32)], # attn feature slab
    )(*inputs)

    feat_out = feat_out.reshape(B, T, MODEL_DIM)
    v_out = v_out.reshape(B, T, OUT_PAD)
    return {"v": v_out[:, :n_act, :6],
            "act_f": feat_out[:, :n_act, :],
            "obs_f": feat_out[:, n_act:, :]}


# ------------------------------ params / inputs -----------------------------
def init_params(key):
    keys = iter(jax.random.split(key, 16))

    def w(shape, scale=0.02):
        return (scale * jax.random.normal(next(keys), shape)).astype(jnp.float32)

    p = {}
    p["action_features"] = jax.random.normal(next(keys), (HORIZON, LATENT_DIM), jnp.float32)
    p["pe"] = make_positional_encoding(LATENT_DIM, HORIZON)

    p["obs_w1"] = w((OBS_DIM, 4 * LATENT_DIM))
    p["obs_b1"] = jnp.zeros((1, 4 * LATENT_DIM), jnp.float32)
    p["obs_w2"] = w((4 * LATENT_DIM, LATENT_DIM))
    p["obs_b2"] = jnp.zeros((1, LATENT_DIM), jnp.float32)

    p["time_w1"] = w((LATENT_DIM, 4 * LATENT_DIM))
    p["time_b1"] = jnp.zeros((1, 4 * LATENT_DIM), jnp.float32)
    p["time_ln_g"] = jnp.ones((1, 4 * LATENT_DIM), jnp.float32)
    p["time_ln_b"] = jnp.zeros((1, 4 * LATENT_DIM), jnp.float32)
    p["time_w2"] = w((4 * LATENT_DIM, LATENT_DIM))
    p["time_b2"] = jnp.zeros((1, LATENT_DIM), jnp.float32)

    # stacked per-layer IPA-block params (kernel indexes the leading layer dim)
    p["wqkv"] = w((DEPTH, MODEL_DIM, QKV_COLS))
    p["wao"] = w((DEPTH, ATTN_FEATS, MODEL_DIM))
    p["bao"] = jnp.zeros((DEPTH, 1, MODEL_DIM), jnp.float32)
    p["point_weights"] = jnp.full((DEPTH, HEADS), math.log(math.e - 1.0), jnp.float32)
    p["ln1_g"] = jnp.ones((DEPTH, 1, MODEL_DIM), jnp.float32)
    p["ln1_b"] = jnp.zeros((DEPTH, 1, MODEL_DIM), jnp.float32)
    p["ff_w1"] = w((DEPTH, MODEL_DIM, MODEL_DIM))
    p["ff_b1"] = jnp.zeros((DEPTH, 1, MODEL_DIM), jnp.float32)
    p["ff_w2"] = w((DEPTH, MODEL_DIM, MODEL_DIM))
    p["ff_b2"] = jnp.zeros((DEPTH, 1, MODEL_DIM), jnp.float32)
    p["ln2_g"] = jnp.ones((DEPTH, 1, MODEL_DIM), jnp.float32)
    p["ln2_b"] = jnp.zeros((DEPTH, 1, MODEL_DIM), jnp.float32)

    out_core = w((MODEL_DIM, 6))
    p["out_w"] = jnp.concatenate(
        [out_core, jnp.zeros((MODEL_DIM, OUT_PAD - 6), jnp.float32)], axis=1)
    p["out_b"] = jnp.zeros((1, OUT_PAD), jnp.float32)
    return p


if __name__ == "__main__":
    root = jax.random.PRNGKey(0)
    kp, k1, k2, k3, k4, k5, k6 = jax.random.split(root, 7)

    params = init_params(kp)

    act_r = jax.random.normal(k1, (BATCH, HORIZON, 3, 3), jnp.float32)
    act_p = jax.random.normal(k2, (BATCH, HORIZON, 3), jnp.float32)
    time_t = jax.random.uniform(k3, (BATCH,), jnp.float32)
    obs_f = jax.random.normal(k4, (BATCH, N_OBS_STEPS, OBS_DIM), jnp.float32)
    obs_r = jax.random.normal(k5, (BATCH, N_OBS_STEPS, 3, 3), jnp.float32)
    obs_p = jax.random.normal(k6, (BATCH, N_OBS_STEPS, 3), jnp.float32)

    out = flow_matching_ipt_forward(params, act_r, act_p, time_t, obs_f, obs_r, obs_p)
    jax.block_until_ready(out)

    assert out["v"].shape == (BATCH, HORIZON, 6)
    assert out["act_f"].shape == (BATCH, HORIZON, MODEL_DIM)
    assert out["obs_f"].shape == (BATCH, N_OBS_STEPS, MODEL_DIM)
    assert bool(jnp.all(jnp.isfinite(out["v"])))
    print("KERNEL_OK")
</pallas_src>

<mosaic_0001>
module attributes {stable_mosaic.version = 11 : i64} {
  func.func @fused_forward_kernel(%arg0: memref<2x2xf32, #tpu.memory_space<smem>>, %arg1: memref<20x20xf32, #tpu.memory_space<vmem>>, %arg2: memref<4x16xf32, #tpu.memory_space<vmem>>, %arg3: memref<2x32xf32, #tpu.memory_space<vmem>>, %arg4: memref<8x32xf32, #tpu.memory_space<vmem>>, %arg5: memref<20x9xf32, #tpu.memory_space<vmem>>, %arg6: memref<20x3xf32, #tpu.memory_space<vmem>>, %arg7: memref<16x128xf32, #tpu.memory_space<vmem>>, %arg8: memref<1x128xf32, #tpu.memory_space<vmem>>, %arg9: memref<128x32xf32, #tpu.memory_space<vmem>>, %arg10: memref<1x32xf32, #tpu.memory_space<vmem>>, %arg11: memref<32x128xf32, #tpu.memory_space<vmem>>, %arg12: memref<1x128xf32, #tpu.memory_space<vmem>>, %arg13: memref<1x128xf32, #tpu.memory_space<vmem>>, %arg14: memref<1x128xf32, #tpu.memory_space<vmem>>, %arg15: memref<128x32xf32, #tpu.memory_space<vmem>>, %arg16: memref<1x32xf32, #tpu.memory_space<vmem>>, %arg17: memref<2x64x168xf32, #tpu.memory_space<vmem>>, %arg18: memref<2x64x64xf32, #tpu.memory_space<vmem>>, %arg19: memref<2x1x64xf32, #tpu.memory_space<vmem>>, %arg20: memref<2x1x64xf32, #tpu.memory_space<vmem>>, %arg21: memref<2x1x64xf32, #tpu.memory_space<vmem>>, %arg22: memref<2x64x64xf32, #tpu.memory_space<vmem>>, %arg23: memref<2x1x64xf32, #tpu.memory_space<vmem>>, %arg24: memref<2x64x64xf32, #tpu.memory_space<vmem>>, %arg25: memref<2x1x64xf32, #tpu.memory_space<vmem>>, %arg26: memref<2x1x64xf32, #tpu.memory_space<vmem>>, %arg27: memref<2x1x64xf32, #tpu.memory_space<vmem>>, %arg28: memref<64x8xf32, #tpu.memory_space<vmem>>, %arg29: memref<1x8xf32, #tpu.memory_space<vmem>>, %arg30: memref<20x64xf32, #tpu.memory_space<vmem>>, %arg31: memref<20x8xf32, #tpu.memory_space<vmem>>, %arg32: memref<20x64xf32, #tpu.memory_space<vmem>>, %arg33: memref<20x64xf32, #tpu.memory_space<vmem>>) attributes {dimension_semantics = [], scalar_prefetch = 0 : i64, scratch_operands = 2 : i64, tpu.core_type = #tpu.core_type<tc>} {
    %c0 = arith.constant 0 : index
    %c0_0 = arith.constant 0 : index
    %0 = vector.load %arg2[%c0, %c0_0] : memref<4x16xf32, #tpu.memory_space<vmem>>, vector<4x16xf32>
    %c0_1 = arith.constant 0 : index
    %c0_2 = arith.constant 0 : index
    %1 = vector.load %arg7[%c0_1, %c0_2] : memref<16x128xf32, #tpu.memory_space<vmem>>, vector<16x128xf32>
    %cst = arith.constant dense<0.000000e+00> : vector<4x128xf32>
    %2 = tpu.matmul %0, %1, %cst {dimension_numbers = #tpu.dot_dimension_numbers<[1], [0], [0], [1], [0, 0, 1, 1], [], []>} : vector<4x16xf32>, vector<16x128xf32>, vector<4x128xf32> -> vector<4x128xf32>
    %c0_3 = arith.constant 0 : index
    %c0_4 = arith.constant 0 : index
    %3 = vector.load %arg8[%c0_3, %c0_4] : memref<1x128xf32, #tpu.memory_space<vmem>>, vector<1x128xf32>
    %4 = vector.broadcast %3 : vector<1x128xf32> to vector<4x128xf32>
    %5 = arith.addf %2, %4 : vector<4x128xf32>
    %cst_5 = arith.constant 0.000000e+00 : f32
    %6 = vector.broadcast %cst_5 : f32 to vector<4x128xf32>
    %7 = arith.maximumf %5, %6 : vector<4x128xf32>
    %8 = math.absf %5 : vector<4x128xf32>
    %cst_6 = arith.constant 0.000000e+00 : f32
    %9 = vector.broadcast %cst_6 : f32 to vector<4x128xf32>
    %10 = arith.subf %9, %8 : vector<4x128xf32>
    %11 = math.exp %10 : vector<4x128xf32>
    %12 = math.log1p %11 : vector<4x128xf32>
    %13 = arith.addf %7, %12 : vector<4x128xf32>
    %14 = math.tanh %13 : vector<4x128xf32>
    %15 = arith.mulf %5, %14 : vector<4x128xf32>
    %c0_7 = arith.constant 0 : index
    %c0_8 = arith.constant 0 : index
    %16 = vector.load %arg9[%c0_7, %c0_8] : memref<128x32xf32, #tpu.memory_space<vmem>>, vector<128x32xf32>
    %cst_9 = arith.constant dense<0.000000e+00> : vector<4x32xf32>
    %17 = tpu.matmul %15, %16, %cst_9 {dimension_numbers = #tpu.dot_dimension_numbers<[1], [0], [0], [1], [0, 0, 1, 1], [], []>} : vector<4x128xf32>, vector<128x32xf32>, vector<4x32xf32> -> vector<4x32xf32>
    %c0_10 = arith.constant 0 : index
    %c0_11 = arith.constant 0 : index
    %18 = vector.load %arg10[%c0_10, %c0_11] : memref<1x32xf32, #tpu.memory_space<vmem>>, vector<1x32xf32>
    %19 = vector.broadcast %18 : vector<1x32xf32> to vector<4x32xf32>
    %20 = arith.addf %17, %19 : vector<4x32xf32>
    %c0_12 = arith.constant 0 : index
    %c0_13 = arith.constant 0 : index
    %21 = vector.load %arg3[%c0_12, %c0_13] : memref<2x32xf32, #tpu.memory_space<vmem>>, vector<2x32xf32>
    %c0_14 = arith.constant 0 : index
    %c0_15 = arith.constant 0 : index
    %22 = vector.load %arg11[%c0_14, %c0_15] : memref<32x128xf32, #tpu.memory_space<vmem>>, vector<32x128xf32>
    %cst_16 = arith.constant dense<0.000000e+00> : vector<2x128xf32>
    %23 = tpu.matmul %21, %22, %cst_16 {dimension_numbers = #tpu.dot_dimension_numbers<[1], [0], [0], [1], [0, 0, 1, 1], [], []>} : vector<2x32xf32>, vector<32x128xf32>, vector<2x128xf32> -> vector<2x128xf32>
    %c0_17 = arith.constant 0 : index
    %c0_18 = arith.constant 0 : index
    %24 = vector.load %arg12[%c0_17, %c0_18] : memref<1x128xf32, #tpu.memory_space<vmem>>, vector<1x128xf32>
    %25 = vector.broadcast %24 : vector<1x128xf32> to vector<2x128xf32>
    %26 = arith.addf %23, %25 : vector<2x128xf32>
    %cst_19 = arith.constant 0.000000e+00 : f32
    %27 = vector.broadcast %cst_19 : f32 to vector<2x128xf32>
    %28 = arith.maximumf %26, %27 : vector<2x128xf32>
    %29 = math.absf %26 : vector<2x128xf32>
    %cst_20 = arith.constant 0.000000e+00 : f32
    %30 = vector.broadcast %cst_20 : f32 to vector<2x128xf32>
    %31 = arith.subf %30, %29 : vector<2x128xf32>
    %32 = math.exp %31 : vector<2x128xf32>
    %33 = math.log1p %32 : vector<2x128xf32>
    %34 = arith.addf %28, %33 : vector<2x128xf32>
    %35 = math.tanh %34 : vector<2x128xf32>
    %36 = arith.mulf %26, %35 : vector<2x128xf32>
    %c0_21 = arith.constant 0 : index
    %c0_22 = arith.constant 0 : index
    %37 = vector.load %arg13[%c0_21, %c0_22] : memref<1x128xf32, #tpu.memory_space<vmem>>, vector<1x128xf32>
    %c0_23 = arith.constant 0 : index
    %c0_24 = arith.constant 0 : index
    %38 = vector.load %arg14[%c0_23, %c0_24] : memref<1x128xf32, #tpu.memory_space<vmem>>, vector<1x128xf32>
    %cst_25 = arith.constant dense<0.000000e+00> : vector<2xf32>
    %39 = vector.multi_reduction <add>, %36, %cst_25 [1] : vector<2x128xf32> to vector<2xf32>
    %40 = vector.shape_cast %39 : vector<2xf32> to vector<2x1xf32>
    %cst_26 = arith.constant 1.280000e+02 : f32
    %41 = vector.broadcast %cst_26 : f32 to vector<2x1xf32>
    %42 = arith.divf %40, %41 : vector<2x1xf32>
    %43 = vector.broadcast %42 : vector<2x1xf32> to vector<2x128xf32>
    %44 = arith.subf %36, %43 : vector<2x128xf32>
    %45 = arith.mulf %44, %44 : vector<2x128xf32>
    %cst_27 = arith.constant dense<0.000000e+00> : vector<2xf32>
    %46 = vector.multi_reduction <add>, %45, %cst_27 [1] : vector<2x128xf32> to vector<2xf32>
    %47 = vector.shape_cast %46 : vector<2xf32> to vector<2x1xf32>
    %cst_28 = arith.constant 1.280000e+02 : f32
    %48 = vector.broadcast %cst_28 : f32 to vector<2x1xf32>
    %49 = arith.divf %47, %48 : vector<2x1xf32>
    %50 = vector.broadcast %42 : vector<2x1xf32> to vector<2x128xf32>
    %51 = arith.subf %36, %50 : vector<2x128xf32>
    %cst_29 = arith.constant 9.99999974E-6 : f32
    %52 = vector.broadcast %cst_29 : f32 to vector<2x1xf32>
    %53 = arith.addf %49, %52 : vector<2x1xf32>
    %54 = math.rsqrt %53 : vector<2x1xf32>
    %55 = vector.broadcast %54 : vector<2x1xf32> to vector<2x128xf32>
    %56 = arith.mulf %51, %55 : vector<2x128xf32>
    %57 = vector.broadcast %37 : vector<1x128xf32> to vector<2x128xf32>
    %58 = arith.mulf %56, %57 : vector<2x128xf32>
    %59 = vector.broadcast %38 : vector<1x128xf32> to vector<2x128xf32>
    %60 = arith.addf %58, %59 : vector<2x128xf32>
    %c0_30 = arith.constant 0 : index
    %c0_31 = arith.constant 0 : index
    %61 = vector.load %arg15[%c0_30, %c0_31] : memref<128x32xf32, #tpu.memory_space<vmem>>, vector<128x32xf32>
    %cst_32 = arith.constant dense<0.000000e+00> : vector<2x32xf32>
    %62 = tpu.matmul %60, %61, %cst_32 {dimension_numbers = #tpu.dot_dimension_numbers<[1], [0], [0], [1], [0, 0, 1, 1], [], []>} : vector<2x128xf32>, vector<128x32xf32>, vector<2x32xf32> -> vector<2x32xf32>
    %c0_33 = arith.constant 0 : index
    %c0_34 = arith.constant 0 : index
    %63 = vector.load %arg16[%c0_33, %c0_34] : memref<1x32xf32, #tpu.memory_space<vmem>>, vector<1x32xf32>
    %64 = vector.broadcast %63 : vector<1x32xf32> to vector<2x32xf32>
    %65 = arith.addf %62, %64 : vector<2x32xf32>
    %c0_35 = arith.constant 0 : index
    %c0_36 = arith.constant 0 : index
    %66 = vector.load %arg4[%c0_35, %c0_36] : memref<8x32xf32, #tpu.memory_space<vmem>>, vector<8x32xf32>
    %c0_37 = arith.constant 0 : index
    %c0_38 = arith.constant 0 : index
    %67 = vector.load %arg32[%c0_37, %c0_38] : memref<20x64xf32, #tpu.memory_space<vmem>>, vector<8x32xf32>
    tpu.vector_store %arg32[%c0_37, %c0_38], %66 {strides = array<i32>} : memref<20x64xf32, #tpu.memory_space<vmem>>, vector<8x32xf32>,
    %68 = vector.extract_strided_slice %20 {offsets = [0, 0], sizes = [2, 32], strides = [1, 1]} : vector<4x32xf32> to vector<2x32xf32>
    %c8 = arith.constant 8 : index
    %c0_39 = arith.constant 0 : index
    %69 = vector.load %arg32[%c8, %c0_39] : memref<20x64xf32, #tpu.memory_space<vmem>>, vector<2x32xf32>
    tpu.vector_store %arg32[%c8, %c0_39], %68 {strides = array<i32>} : memref<20x64xf32, #tpu.memory_space<vmem>>, vector<2x32xf32>,
    %70 = vector.extract_strided_slice %65 {offsets = [0, 0], sizes = [1, 32], strides = [1, 1]} : vector<2x32xf32> to vector<1x32xf32>
    %71 = vector.shape_cast %70 : vector<1x32xf32> to vector<1x32xf32>
    %72 = vector.broadcast %71 : vector<1x32xf32> to vector<10x32xf32>
    %c0_40 = arith.constant 0 : index
    %c32 = arith.constant 32 : index
    %73 = vector.load %arg32[%c0_40, %c32] : memref<20x64xf32, #tpu.memory_space<vmem>>, vector<10x32xf32>
    tpu.vector_store %arg32[%c0_40, %c32], %72 {strides = array<i32>} : memref<20x64xf32, #tpu.memory_space<vmem>>, vector<10x32xf32>,
    %c10 = arith.constant 10 : index
    %c0_41 = arith.constant 0 : index
    %74 = vector.load %arg32[%c10, %c0_41] : memref<20x64xf32, #tpu.memory_space<vmem>>, vector<8x32xf32>
    tpu.vector_store %arg32[%c10, %c0_41], %66 {strides = array<i32>} : memref<20x64xf32, #tpu.memory_space<vmem>>, vector<8x32xf32>,
    %75 = vector.extract_strided_slice %20 {offsets = [2, 0], sizes = [2, 32], strides = [1, 1]} : vector<4x32xf32> to vector<2x32xf32>
    %c18 = arith.constant 18 : index
    %c0_42 = arith.constant 0 : index
    %76 = vector.load %arg32[%c18, %c0_42] : memref<20x64xf32, #tpu.memory_space<vmem>>, vector<2x32xf32>
    tpu.vector_store %arg32[%c18, %c0_42], %75 {strides = array<i32>} : memref<20x64xf32, #tpu.memory_space<vmem>>, vector<2x32xf32>,
    %77 = vector.extract_strided_slice %65 {offsets = [1, 0], sizes = [1, 32], strides = [1, 1]} : vector<2x32xf32> to vector<1x32xf32>
    %78 = vector.shape_cast %77 : vector<1x32xf32> to vector<1x32xf32>
    %79 = vector.broadcast %78 : vector<1x32xf32> to vector<10x32xf32>
    %c10_43 = arith.constant 10 : index
    %c32_44 = arith.constant 32 : index
    %80 = vector.load %arg32[%c10_43, %c32_44] : memref<20x64xf32, #tpu.memory_space<vmem>>, vector<10x32xf32>
    tpu.vector_store %arg32[%c10_43, %c32_44], %79 {strides = array<i32>} : memref<20x64xf32, #tpu.memory_space<vmem>>, vector<10x32xf32>,
    %c0_45 = arith.constant 0 : index
    %c0_46 = arith.constant 0 : index
    %81 = vector.load %arg32[%c0_45, %c0_46] : memref<20x64xf32, #tpu.memory_space<vmem>>, vector<20x64xf32>
    %c0_47 = arith.constant 0 : index
    %c0_48 = arith.constant 0 : index
    %82 = vector.load %arg1[%c0_47, %c0_48] : memref<20x20xf32, #tpu.memory_space<vmem>>, vector<20x20xf32>
    %c0_49 = arith.constant 0 : index
    %c0_50 = arith.constant 0 : index
    %83 = vector.load %arg5[%c0_49, %c0_50] : memref<20x9xf32, #tpu.memory_space<vmem>>, vector<20x9xf32>
    %84 = vector.extract_strided_slice %83 {offsets = [0, 0], sizes = [20, 1], strides = [1, 1]} : vector<20x9xf32> to vector<20x1xf32>
    %85 = vector.extract_strided_slice %83 {offsets = [0, 1], sizes = [20, 1], strides = [1, 1]} : vector<20x9xf32> to vector<20x1xf32>
    %86 = vector.extract_strided_slice %83 {offsets = [0, 2], sizes = [20, 1], strides = [1, 1]} : vector<20x9xf32> to vector<20x1xf32>
    %87 = vector.extract_strided_slice %83 {offsets = [0, 3], sizes = [20, 1], strides = [1, 1]} : vector<20x9xf32> to vector<20x1xf32>
    %88 = vector.extract_strided_slice %83 {offsets = [0, 4], sizes = [20, 1], strides = [1, 1]} : vector<20x9xf32> to vector<20x1xf32>
    %89 = vector.extract_strided_slice %83 {offsets = [0, 5], sizes = [20, 1], strides = [1, 1]} : vector<20x9xf32> to vector<20x1xf32>
    %90 = vector.extract_strided_slice %83 {offsets = [0, 6], sizes = [20, 1], strides = [1, 1]} : vector<20x9xf32> to vector<20x1xf32>
    %91 = vector.extract_strided_slice %83 {offsets = [0, 7], sizes = [20, 1], strides = [1, 1]} : vector<20x9xf32> to vector<20x1xf32>
    %92 = vector.extract_strided_slice %83 {offsets = [0, 8], sizes = [20, 1], strides = [1, 1]} : vector<20x9xf32> to vector<20x1xf32>
    %c0_51 = arith.constant 0 : index
    %c0_52 = arith.constant 0 : index
    %93 = vector.load %arg6[%c0_51, %c0_52] : memref<20x3xf32, #tpu.memory_space<vmem>>, vector<20x3xf32>
    %94 = vector.extract_strided_slice %93 {offsets = [0, 0], sizes = [20, 1], strides = [1, 1]} : vector<20x3xf32> to vector<20x1xf32>
    %95 = vector.extract_strided_slice %93 {offsets = [0, 1], sizes = [20, 1], strides = [1, 1]} : vector<20x3xf32> to vector<20x1xf32>
    %96 = vector.extract_strided_slice %93 {offsets = [0, 2], sizes = [20, 1], strides = [1, 1]} : vector<20x3xf32> to vector<20x1xf32>
    %c0_53 = arith.constant 0 : index
    %c0_54 = arith.constant 0 : index
    %c0_55 = arith.constant 0 : index
    %97 = vector.load %arg17[%c0_53, %c0_54, %c0_55] : memref<2x64x168xf32, #tpu.memory_space<vmem>>, vector<1x64x168xf32>
    %98 = vector.shape_cast %97 : vector<1x64x168xf32> to vector<64x168xf32>
    %cst_56 = arith.constant dense<0.000000e+00> : vector<20x168xf32>
    %99 = tpu.matmul %81, %98, %cst_56 {dimension_numbers = #tpu.dot_dimension_numbers<[1], [0], [0], [1], [0, 0, 1, 1], [], []>} : vector<20x64xf32>, vector<64x168xf32>, vector<20x168xf32> -> vector<20x168xf32>
    %100 = vector.extract_strided_slice %99 {offsets = [0, 96], sizes = [20, 8], strides = [1, 1]} : vector<20x168xf32> to vector<20x8xf32>
    %101 = vector.extract_strided_slice %99 {offsets = [0, 104], sizes = [20, 8], strides = [1, 1]} : vector<20x168xf32> to vector<20x8xf32>
    %102 = vector.extract_strided_slice %99 {offsets = [0, 112], sizes = [20, 8], strides = [1, 1]} : vector<20x168xf32> to vector<20x8xf32>
    %103 = vector.broadcast %84 : vector<20x1xf32> to vector<20x8xf32>
    %104 = arith.mulf %100, %103 : vector<20x8xf32>
    %105 = vector.broadcast %87 : vector<20x1xf32> to vector<20x8xf32>
    %106 = arith.mulf %101, %105 : vector<20x8xf32>
    %107 = arith.addf %104, %106 : vector<20x8xf32>
    %108 = vector.broadcast %90 : vector<20x1xf32> to vector<20x8xf32>
    %109 = arith.mulf %102, %108 : vector<20x8xf32>
    %110 = arith.addf %107, %109 : vector<20x8xf32>
    %111 = vector.broadcast %94 : vector<20x1xf32> to vector<20x8xf32>
    %112 = arith.addf %110, %111 : vector<20x8xf32>
    %113 = vector.broadcast %85 : vector<20x1xf32> to vector<20x8xf32>
    %114 = arith.mulf %100, %113 : vector<20x8xf32>
    %115 = vector.broadcast %88 : vector<20x1xf32> to vector<20x8xf32>
    %116 = arith.mulf %101, %115 : vector<20x8xf32>
    %117 = arith.addf %114, %116 : vector<20x8xf32>
    %118 = vector.broadcast %91 : vector<20x1xf32> to vector<20x8xf32>
    %119 = arith.mulf %102, %118 : vector<20x8xf32>
    %120 = arith.addf %117, %119 : vector<20x8xf32>
    %121 = vector.broadcast %95 : vector<20x1xf32> to vector<20x8xf32>
    %122 = arith.addf %120, %121 : vector<20x8xf32>
    %123 = vector.broadcast %86 : vector<20x1xf32> to vector<20x8xf32>
    %124 = arith.mulf %100, %123 : vector<20x8xf32>
    %125 = vector.broadcast %89 : vector<20x1xf32> to vector<20x8xf32>
    %126 = arith.mulf %101, %125 : vector<20x8xf32>
    %127 = arith.addf %124, %126 : vector<20x8xf32>
    %128 = vector.broadcast %92 : vector<20x1xf32> to vector<20x8xf32>
    %129 = arith.mulf %102, %128 : vector<20x8xf32>
    %130 = arith.addf %127, %129 : vector<20x8xf32>
    %131 = vector.broadcast %96 : vector<20x1xf32> to vector<20x8xf32>
    %132 = arith.addf %130, %131 : vector<20x8xf32>
    %133 = vector.extract_strided_slice %99 {offsets = [0, 120], sizes = [20, 8], strides = [1, 1]} : vector<20x168xf32> to vector<20x8xf32>
    %134 = vector.extract_strided_slice %99 {offsets = [0, 128], sizes = [20, 8], strides = [1, 1]} : vector<20x168xf32> to vector<20x8xf32>
    %135 = vector.extract_strided_slice %99 {offsets = [0, 136], sizes = [20, 8], strides = [1, 1]} : vector<20x168xf32> to vector<20x8xf32>
    %136 = vector.broadcast %84 : vector<20x1xf32> to vector<20x8xf32>
    %137 = arith.mulf %133, %136 : vector<20x8xf32>
    %138 = vector.broadcast %87 : vector<20x1xf32> to vector<20x8xf32>
    %139 = arith.mulf %134, %138 : vector<20x8xf32>
    %140 = arith.addf %137, %139 : vector<20x8xf32>
    %141 = vector.broadcast %90 : vector<20x1xf32> to vector<20x8xf32>
    %142 = arith.mulf %135, %141 : vector<20x8xf32>
    %143 = arith.addf %140, %142 : vector<20x8xf32>
    %144 = vector.broadcast %94 : vector<20x1xf32> to vector<20x8xf32>
    %145 = arith.addf %143, %144 : vector<20x8xf32>
    %146 = vector.broadcast %85 : vector<20x1xf32> to vector<20x8xf32>
    %147 = arith.mulf %133, %146 : vector<20x8xf32>
    %148 = vector.broadcast %88 : vector<20x1xf32> to vector<20x8xf32>
    %149 = arith.mulf %134, %148 : vector<20x8xf32>
    %150 = arith.addf %147, %149 : vector<20x8xf32>
    %151 = vector.broadcast %91 : vector<20x1xf32> to vector<20x8xf32>
    %152 = arith.mulf %135, %151 : vector<20x8xf32>
    %153 = arith.addf %150, %152 : vector<20x8xf32>
    %154 = vector.broadcast %95 : vector<20x1xf32> to vector<20x8xf32>
    %155 = arith.addf %153, %154 : vector<20x8xf32>
    %156 = vector.broadcast %86 : vector<20x1xf32> to vector<20x8xf32>
    %157 = arith.mulf %133, %156 : vector<20x8xf32>
    %158 = vector.broadcast %89 : vector<20x1xf32> to vector<20x8xf32>
    %159 = arith.mulf %134, %158 : vector<20x8xf32>
    %160 = arith.addf %157, %159 : vector<20x8xf32>
    %161 = vector.broadcast %92 : vector<20x1xf32> to vector<20x8xf32>
    %162 = arith.mulf %135, %161 : vector<20x8xf32>
    %163 = arith.addf %160, %162 : vector<20x8xf32>
    %164 = vector.broadcast %96 : vector<20x1xf32> to vector<20x8xf32>
    %165 = arith.addf %163, %164 : vector<20x8xf32>
    %166 = vector.extract_strided_slice %99 {offsets = [0, 144], sizes = [20, 8], strides = [1, 1]} : vector<20x168xf32> to vector<20x8xf32>
    %167 = vector.extract_strided_slice %99 {offsets = [0, 152], sizes = [20, 8], strides = [1, 1]} : vector<20x168xf32> to vector<20x8xf32>
    %168 = vector.extract_strided_slice %99 {offsets = [0, 160], sizes = [20, 8], strides = [1, 1]} : vector<20x168xf32> to vector<20x8xf32>
    %169 = vector.broadcast %84 : vector<20x1xf32> to vector<20x8xf32>
    %170 = arith.mulf %166, %169 : vector<20x8xf32>
    %171 = vector.broadcast %87 : vector<20x1xf32> to vector<20x8xf32>
    %172 = arith.mulf %167, %171 : vector<20x8xf32>
    %173 = arith.addf %170, %172 : vector<20x8xf32>
    %174 = vector.broadcast %90 : vector<20x1xf32> to vector<20x8xf32>
    %175 = arith.mulf %168, %174 : vector<20x8xf32>
    %176 = arith.addf %173, %175 : vector<20x8xf32>
    %177 = vector.broadcast %94 : vector<20x1xf32> to vector<20x8xf32>
    %178 = arith.addf %176, %177 : vector<20x8xf32>
    %179 = vector.broadcast %85 : vector<20x1xf32> to vector<20x8xf32>
    %180 = arith.mulf %166, %179 : vector<20x8xf32>
    %181 = vector.broadcast %88 : vector<20x1xf32> to vector<20x8xf32>
    %182 = arith.mulf %167, %181 : vector<20x8xf32>
    %183 = arith.addf %180, %182 : vector<20x8xf32>
    %184 = vector.broadcast %91 : vector<20x1xf32> to vector<20x8xf32>
    %185 = arith.mulf %168, %184 : vector<20x8xf32>
    %186 = arith.addf %183, %185 : vector<20x8xf32>
    %187 = vector.broadcast %95 : vector<20x1xf32> to vector<20x8xf32>
    %188 = arith.addf %186, %187 : vector<20x8xf32>
    %189 = vector.broadcast %86 : vector<20x1xf32> to vector<20x8xf32>
    %190 = arith.mulf %166, %189 : vector<20x8xf32>
    %191 = vector.broadcast %89 : vector<20x1xf32> to vector<20x8xf32>
    %192 = arith.mulf %167, %191 : vector<20x8xf32>
    %193 = arith.addf %190, %192 : vector<20x8xf32>
    %194 = vector.broadcast %92 : vector<20x1xf32> to vector<20x8xf32>
    %195 = arith.mulf %168, %194 : vector<20x8xf32>
    %196 = arith.addf %193, %195 : vector<20x8xf32>
    %197 = vector.broadcast %96 : vector<20x1xf32> to vector<20x8xf32>
    %198 = arith.addf %196, %197 : vector<20x8xf32>
    %199 = vector.extract_strided_slice %99 {offsets = [0, 0], sizes = [20, 16], strides = [1, 1]} : vector<20x168xf32> to vector<20x16xf32>
    %cst_57 = arith.constant 0.176776692 : f32
    %200 = vector.broadcast %cst_57 : f32 to vector<20x16xf32>
    %201 = arith.mulf %199, %200 : vector<20x16xf32>
    %202 = vector.extract_strided_slice %99 {offsets = [0, 32], sizes = [20, 16], strides = [1, 1]} : vector<20x168xf32> to vector<20x16xf32>
    %203 = vector.extract_strided_slice %99 {offsets = [0, 64], sizes = [20, 16], strides = [1, 1]} : vector<20x168xf32> to vector<20x16xf32>
    %204 = vector.extract_strided_slice %112 {offsets = [0, 0], sizes = [20, 4], strides = [1, 1]} : vector<20x8xf32> to vector<20x4xf32>
    %205 = vector.extract_strided_slice %122 {offsets = [0, 0], sizes = [20, 4], strides = [1, 1]} : vector<20x8xf32> to vector<20x4xf32>
    %206 = vector.extract_strided_slice %132 {offsets = [0, 0], sizes = [20, 4], strides = [1, 1]} : vector<20x8xf32> to vector<20x4xf32>
    %207 = vector.extract_strided_slice %145 {offsets = [0, 0], sizes = [20, 4], strides = [1, 1]} : vector<20x8xf32> to vector<20x4xf32>
    %208 = vector.extract_strided_slice %155 {offsets = [0, 0], sizes = [20, 4], strides = [1, 1]} : vector<20x8xf32> to vector<20x4xf32>
    %209 = vector.extract_strided_slice %165 {offsets = [0, 0], sizes = [20, 4], strides = [1, 1]} : vector<20x8xf32> to vector<20x4xf32>
    %210 = vector.extract_strided_slice %178 {offsets = [0, 0], sizes = [20, 4], strides = [1, 1]} : vector<20x8xf32> to vector<20x4xf32>
    %211 = vector.extract_strided_slice %188 {offsets = [0, 0], sizes = [20, 4], strides = [1, 1]} : vector<20x8xf32> to vector<20x4xf32>
    %212 = vector.extract_strided_slice %198 {offsets = [0, 0], sizes = [20, 4], strides = [1, 1]} : vector<20x8xf32> to vector<20x4xf32>
    %c0_58 = arith.constant 0 : index
    %c0_59 = arith.constant 0 : index
    %213 = memref.load %arg0[%c0_58, %c0_59] : memref<2x2xf32, #tpu.memory_space<smem>>
    %cst_60 = arith.constant 0.166666672 : f32
    %214 = arith.mulf %cst_60, %213 : f32
    %215 = tpu.transpose %202, [1, 0] : vector<20x16xf32> -> vector<16x20xf32>
    %cst_61 = arith.constant dense<0.000000e+00> : vector<20x20xf32>
    %216 = tpu.matmul %201, %215, %cst_61 {dimension_numbers = #tpu.dot_dimension_numbers<[1], [0], [0], [1], [0, 0, 1, 1], [], []>} : vector<20x16xf32>, vector<16x20xf32>, vector<20x20xf32> -> vector<20x20xf32>
    %217 = tpu.transpose %207, [1, 0] : vector<20x4xf32> -> vector<4x20xf32>
    %cst_62 = arith.constant dense<0.000000e+00> : vector<20x20xf32>
    %218 = tpu.matmul %204, %217, %cst_62 {dimension_numbers = #tpu.dot_dimension_numbers<[1], [0], [0], [1], [0, 0, 1, 1], [], []>} : vector<20x4xf32>, vector<4x20xf32>, vector<20x20xf32> -> vector<20x20xf32>
    %219 = tpu.transpose %208, [1, 0] : vector<20x4xf32> -> vector<4x20xf32>
    %cst_63 = arith.constant dense<0.000000e+00> : vector<20x20xf32>
    %220 = tpu.matmul %205, %219, %cst_63 {dimension_numbers = #tpu.dot_dimension_numbers<[1], [0], [0], [1], [0, 0, 1, 1], [], []>} : vector<20x4xf32>, vector<4x20xf32>, vector<20x20xf32> -> vector<20x20xf32>
    %221 = arith.addf %218, %220 : vector<20x20xf32>
    %222 = tpu.transpose %209, [1, 0] : vector<20x4xf32> -> vector<4x20xf32>
    %cst_64 = arith.constant dense<0.000000e+00> : vector<20x20xf32>
    %223 = tpu.matmul %206, %222, %cst_64 {dimension_numbers = #tpu.dot_dimension_numbers<[1], [0], [0], [1], [0, 0, 1, 1], [], []>} : vector<20x4xf32>, vector<4x20xf32>, vector<20x20xf32> -> vector<20x20xf32>
    %224 = arith.addf %221, %223 : vector<20x20xf32>
    %225 = arith.mulf %204, %204 : vector<20x4xf32>
    %226 = arith.mulf %205, %205 : vector<20x4xf32>
    %227 = arith.addf %225, %226 : vector<20x4xf32>
    %228 = arith.mulf %206, %206 : vector<20x4xf32>
    %229 = arith.addf %227, %228 : vector<20x4xf32>
    %cst_65 = arith.constant dense<0.000000e+00> : vector<20xf32>
    %230 = vector.multi_reduction <add>, %229, %cst_65 [1] : vector<20x4xf32> to vector<20xf32>
    %231 = vector.shape_cast %230 : vector<20xf32> to vector<20x1xf32>
    %232 = arith.mulf %207, %207 : vector<20x4xf32>
    %233 = arith.mulf %208, %208 : vector<20x4xf32>
    %234 = arith.addf %232, %233 : vector<20x4xf32>
    %235 = arith.mulf %209, %209 : vector<20x4xf32>
    %236 = arith.addf %234, %235 : vector<20x4xf32>
    %cst_66 = arith.constant dense<0.000000e+00> : vector<20xf32>
    %237 = vector.multi_reduction <add>, %236, %cst_66 [1] : vector<20x4xf32> to vector<20xf32>
    %238 = vector.shape_cast %237 : vector<20xf32> to vector<20x1xf32>
    %cst_67 = arith.constant -5.000000e-01 : f32
    %239 = arith.mulf %cst_67, %214 : f32
    %240 = tpu.transpose %238, [1, 0] : vector<20x1xf32> -> vector<1x20xf32>
    %241 = vector.broadcast %231 : vector<20x1xf32> to vector<20x20xf32>
    %242 = vector.broadcast %240 : vector<1x20xf32> to vector<20x20xf32>
    %243 = arith.addf %241, %242 : vector<20x20xf32>
    %244 = vector.broadcast %239 : f32 to vector<20x20xf32>
    %245 = arith.mulf %244, %243 : vector<20x20xf32>
    %246 = vector.broadcast %214 : f32 to vector<20x20xf32>
    %247 = arith.mulf %246, %224 : vector<20x20xf32>
    %248 = arith.addf %245, %247 : vector<20x20xf32>
    %249 = arith.addf %216, %248 : vector<20x20xf32>
    %250 = arith.addf %249, %82 : vector<20x20xf32>
    %cst_68 = arith.constant dense<0xFF800000> : vector<20xf32>
    %251 = vector.multi_reduction <maximumf>, %250, %cst_68 [1] : vector<20x20xf32> to vector<20xf32>
    %252 = vector.shape_cast %251 : vector<20xf32> to vector<20x1xf32>
    %253 = vector.broadcast %252 : vector<20x1xf32> to vector<20x20xf32>
    %254 = arith.subf %250, %253 : vector<20x20xf32>
    %255 = math.exp %254 : vector<20x20xf32>
    %cst_69 = arith.constant dense<0.000000e+00> : vector<20xf32>
    %256 = vector.multi_reduction <add>, %255, %cst_69 [1] : vector<20x20xf32> to vector<20xf32>
    %257 = vector.shape_cast %256 : vector<20xf32> to vector<20x1xf32>
    %258 = tpu.reciprocal %257 : vector<20x1xf32> -> vector<20x1xf32>
    %259 = vector.broadcast %258 : vector<20x1xf32> to vector<20x20xf32>
    %260 = arith.mulf %255, %259 : vector<20x20xf32>
    %cst_70 = arith.constant dense<0.000000e+00> : vector<20x16xf32>
    %261 = tpu.matmul %260, %203, %cst_70 {dimension_numbers = #tpu.dot_dimension_numbers<[1], [0], [0], [1], [0, 0, 1, 1], [], []>} : vector<20x20xf32>, vector<20x16xf32>, vector<20x16xf32> -> vector<20x16xf32>
    %cst_71 = arith.constant dense<0.000000e+00> : vector<20x4xf32>
    %262 = tpu.matmul %260, %210, %cst_71 {dimension_numbers = #tpu.dot_dimension_numbers<[1], [0], [0], [1], [0, 0, 1, 1], [], []>} : vector<20x20xf32>, vector<20x4xf32>, vector<20x4xf32> -> vector<20x4xf32>
    %cst_72 = arith.constant dense<0.000000e+00> : vector<20x4xf32>
    %263 = tpu.matmul %260, %211, %cst_72 {dimension_numbers = #tpu.dot_dimension_numbers<[1], [0], [0], [1], [0, 0, 1, 1], [], []>} : vector<20x20xf32>, vector<20x4xf32>, vector<20x4xf32> -> vector<20x4xf32>
    %cst_73 = arith.constant dense<0.000000e+00> : vector<20x4xf32>
    %264 = tpu.matmul %260, %212, %cst_73 {dimension_numbers = #tpu.dot_dimension_numbers<[1], [0], [0], [1], [0, 0, 1, 1], [], []>} : vector<20x20xf32>, vector<20x4xf32>, vector<20x4xf32> -> vector<20x4xf32>
    %265 = vector.broadcast %94 : vector<20x1xf32> to vector<20x4xf32>
    %266 = arith.subf %262, %265 : vector<20x4xf32>
    %267 = vector.broadcast %95 : vector<20x1xf32> to vector<20x4xf32>
    %268 = arith.subf %263, %267 : vector<20x4xf32>
    %269 = vector.broadcast %96 : vector<20x1xf32> to vector<20x4xf32>
    %270 = arith.subf %264, %269 : vector<20x4xf32>
    %271 = vector.broadcast %84 : vector<20x1xf32> to vector<20x4xf32>
    %272 = arith.mulf %266, %271 : vector<20x4xf32>
    %273 = vector.broadcast %85 : vector<20x1xf32> to vector<20x4xf32>
    %274 = arith.mulf %268, %273 : vector<20x4xf32>
    %275 = arith.addf %272, %274 : vector<20x4xf32>
    %276 = vector.broadcast %86 : vector<20x1xf32> to vector<20x4xf32>
    %277 = arith.mulf %270, %276 : vector<20x4xf32>
    %278 = arith.addf %275, %277 : vector<20x4xf32>
    %279 = vector.broadcast %87 : vector<20x1xf32> to vector<20x4xf32>
    %280 = arith.mulf %266, %279 : vector<20x4xf32>
    %281 = vector.broadcast %88 : vector<20x1xf32> to vector<20x4xf32>
    %282 = arith.mulf %268, %281 : vector<20x4xf32>
    %283 = arith.addf %280, %282 : vector<20x4xf32>
    %284 = vector.broadcast %89 : vector<20x1xf32> to vector<20x4xf32>
    %285 = arith.mulf %270, %284 : vector<20x4xf32>
    %286 = arith.addf %283, %285 : vector<20x4xf32>
    %287 = vector.broadcast %90 : vector<20x1xf32> to vector<20x4xf32>
    %288 = arith.mulf %266, %287 : vector<20x4xf32>
    %289 = vector.broadcast %91 : vector<20x1xf32> to vector<20x4xf32>
    %290 = arith.mulf %268, %289 : vector<20x4xf32>
    %291 = arith.addf %288, %290 : vector<20x4xf32>
    %292 = vector.broadcast %92 : vector<20x1xf32> to vector<20x4xf32>
    %293 = arith.mulf %270, %292 : vector<20x4xf32>
    %294 = arith.addf %291, %293 : vector<20x4xf32>
    %295 = arith.mulf %278, %278 : vector<20x4xf32>
    %296 = arith.mulf %286, %286 : vector<20x4xf32>
    %297 = arith.addf %295, %296 : vector<20x4xf32>
    %298 = arith.mulf %294, %294 : vector<20x4xf32>
    %299 = arith.addf %297, %298 : vector<20x4xf32>
    %cst_74 = arith.constant 9.99999993E-9 : f32
    %300 = vector.broadcast %cst_74 : f32 to vector<20x4xf32>
    %301 = arith.addf %299, %300 : vector<20x4xf32>
    %302 = math.sqrt %301 : vector<20x4xf32>
    %c0_75 = arith.constant 0 : index
    %c0_76 = arith.constant 0 : index
    %303 = vector.load %arg33[%c0_75, %c0_76] : memref<20x64xf32, #tpu.memory_space<vmem>>, vector<20x16xf32>
    tpu.vector_store %arg33[%c0_75, %c0_76], %261 {strides = array<i32>} : memref<20x64xf32, #tpu.memory_space<vmem>>, vector<20x16xf32>,
    %c0_77 = arith.constant 0 : index
    %c32_78 = arith.constant 32 : index
    %304 = vector.load %arg33[%c0_77, %c32_78] : memref<20x64xf32, #tpu.memory_space<vmem>>, vector<20x4xf32>
    tpu.vector_store %arg33[%c0_77, %c32_78], %278 {strides = array<i32>} : memref<20x64xf32, #tpu.memory_space<vmem>>, vector<20x4xf32>,
    %c0_79 = arith.constant 0 : index
    %c36 = arith.constant 36 : index
    %305 = vector.load %arg33[%c0_79, %c36] : memref<20x64xf32, #tpu.memory_space<vmem>>, vector<20x4xf32>
    tpu.vector_store %arg33[%c0_79, %c36], %286 {strides = array<i32>} : memref<20x64xf32, #tpu.memory_space<vmem>>, vector<20x4xf32>,
    %c0_80 = arith.constant 0 : index
    %c40 = arith.constant 40 : index
    %306 = vector.load %arg33[%c0_80, %c40] : memref<20x64xf32, #tpu.memory_space<vmem>>, vector<20x4xf32>
    tpu.vector_store %arg33[%c0_80, %c40], %294 {strides = array<i32>} : memref<20x64xf32, #tpu.memory_space<vmem>>, vector<20x4xf32>,
    %c0_81 = arith.constant 0 : index
    %c56 = arith.constant 56 : index
    %307 = vector.load %arg33[%c0_81, %c56] : memref<20x64xf32, #tpu.memory_space<vmem>>, vector<20x4xf32>
    tpu.vector_store %arg33[%c0_81, %c56], %302 {strides = array<i32>} : memref<20x64xf32, #tpu.memory_space<vmem>>, vector<20x4xf32>,
    %308 = vector.extract_strided_slice %99 {offsets = [0, 16], sizes = [20, 16], strides = [1, 1]} : vector<20x168xf32> to vector<20x16xf32>
    %cst_82 = arith.constant 0.176776692 : f32
    %309 = vector.broadcast %cst_82 : f32 to vector<20x16xf32>
    %310 = arith.mulf %308, %309 : vector<20x16xf32>
    %311 = vector.extract_strided_slice %99 {offsets = [0, 48], sizes = [20, 16], strides = [1, 1]} : vector<20x168xf32> to vector<20x16xf32>
    %312 = vector.extract_strided_slice %99 {offsets = [0, 80], sizes = [20, 16], strides = [1, 1]} : vector<20x168xf32> to vector<20x16xf32>
    %313 = vector.extract_strided_slice %112 {offsets = [0, 4], sizes = [20, 4], strides = [1, 1]} : vector<20x8xf32> to vector<20x4xf32>
    %314 = vector.extract_strided_slice %122 {offsets = [0, 4], sizes = [20, 4], strides = [1, 1]} : vector<20x8xf32> to vector<20x4xf32>
    %315 = vector.extract_strided_slice %132 {offsets = [0, 4], sizes = [20, 4], strides = [1, 1]} : vector<20x8xf32> to vector<20x4xf32>
    %316 = vector.extract_strided_slice %145 {offsets = [0, 4], sizes = [20, 4], strides = [1, 1]} : vector<20x8xf32> to vector<20x4xf32>
    %317 = vector.extract_strided_slice %155 {offsets = [0, 4], sizes = [20, 4], strides = [1, 1]} : vector<20x8xf32> to vector<20x4xf32>
    %318 = vector.extract_strided_slice %165 {offsets = [0, 4], sizes = [20, 4], strides = [1, 1]} : vector<20x8xf32> to vector<20x4xf32>
    %319 = vector.extract_strided_slice %178 {offsets = [0, 4], sizes = [20, 4], strides = [1, 1]} : vector<20x8xf32> to vector<20x4xf32>
    %320 = vector.extract_strided_slice %188 {offsets = [0, 4], sizes = [20, 4], strides = [1, 1]} : vector<20x8xf32> to vector<20x4xf32>
    %321 = vector.extract_strided_slice %198 {offsets = [0, 4], sizes = [20, 4], strides = [1, 1]} : vector<20x8xf32> to vector<20x4xf32>
    %c0_83 = arith.constant 0 : index
    %c1 = arith.constant 1 : index
    %322 = memref.load %arg0[%c0_83, %c1] : memref<2x2xf32, #tpu.memory_space<smem>>
    %cst_84 = arith.constant 0.166666672 : f32
    %323 = arith.mulf %cst_84, %322 : f32
    %324 = tpu.transpose %311, [1, 0] : vector<20x16xf32> -> vector<16x20xf32>
    %cst_85 = arith.constant dense<0.000000e+00> : vector<20x20xf32>
    %325 = tpu.matmul %310, %324, %cst_85 {dimension_numbers = #tpu.dot_dimension_numbers<[1], [0], [0], [1], [0, 0, 1, 1], [], []>} : vector<20x16xf32>, vector<16x20xf32>, vector<20x20xf32> -> vector<20x20xf32>
    %326 = tpu.transpose %316, [1, 0] : vector<20x4xf32> -> vector<4x20xf32>
    %cst_86 = arith.constant dense<0.000000e+00> : vector<20x20xf32>
    %327 = tpu.matmul %313, %326, %cst_86 {dimension_numbers = #tpu.dot_dimension_numbers<[1], [0], [0], [1], [0, 0, 1, 1], [], []>} : vector<20x4xf32>, vector<4x20xf32>, vector<20x20xf32> -> vector<20x20xf32>
    %328 = tpu.transpose %317, [1, 0] : vector<20x4xf32> -> vector<4x20xf32>
    %cst_87 = arith.constant dense<0.000000e+00> : vector<20x20xf32>
    %329 = tpu.matmul %314, %328, %cst_87 {dimension_numbers = #tpu.dot_dimension_numbers<[1], [0], [0], [1], [0, 0, 1, 1], [], []>} : vector<20x4xf32>, vector<4x20xf32>, vector<20x20xf32> -> vector<20x20xf32>
    %330 = arith.addf %327, %329 : vector<20x20xf32>
    %331 = tpu.transpose %318, [1, 0] : vector<20x4xf32> -> vector<4x20xf32>
    %cst_88 = arith.constant dense<0.000000e+00> : vector<20x20xf32>
    %332 = tpu.matmul %315, %331, %cst_88 {dimension_numbers = #tpu.dot_dimension_numbers<[1], [0], [0], [1], [0, 0, 1, 1], [], []>} : vector<20x4xf32>, vector<4x20xf32>, vector<20x20xf32> -> vector<20x20xf32>
    %333 = arith.addf %330, %332 : vector<20x20xf32>
    %334 = arith.mulf %313, %313 : vector<20x4xf32>
    %335 = arith.mulf %314, %314 : vector<20x4xf32>
    %336 = arith.addf %334, %335 : vector<20x4xf32>
    %337 = arith.mulf %315, %315 : vector<20x4xf32>
    %338 = arith.addf %336, %337 : vector<20x4xf32>
    %cst_89 = arith.constant dense<0.000000e+00> : vector<20xf32>
    %339 = vector.multi_reduction <add>, %338, %cst_89 [1] : vector<20x4xf32> to vector<20xf32>
    %340 = vector.shape_cast %339 : vector<20xf32> to vector<20x1xf32>
    %341 = arith.mulf %316, %316 : vector<20x4xf32>
    %342 = arith.mulf %317, %317 : vector<20x4xf32>
    %343 = arith.addf %341, %342 : vector<20x4xf32>
    %344 = arith.mulf %318, %318 : vector<20x4xf32>
    %345 = arith.addf %343, %344 : vector<20x4xf32>
    %cst_90 = arith.constant dense<0.000000e+00> : vector<20xf32>
    %346 = vector.multi_reduction <add>, %345, %cst_90 [1] : vector<20x4xf32> to vector<20xf32>
    %347 = vector.shape_cast %346 : vector<20xf32> to vector<20x1xf32>
    %cst_91 = arith.constant -5.000000e-01 : f32
    %348 = arith.mulf %cst_91, %323 : f32
    %349 = tpu.transpose %347, [1, 0] : vector<20x1xf32> -> vector<1x20xf32>
    %350 = vector.broadcast %340 : vector<20x1xf32> to vector<20x20xf32>
    %351 = vector.broadcast %349 : vector<1x20xf32> to vector<20x20xf32>
    %352 = arith.addf %350, %351 : vector<20x20xf32>
    %353 = vector.broadcast %348 : f32 to vector<20x20xf32>
    %354 = arith.mulf %353, %352 : vector<20x20xf32>
    %355 = vector.broadcast %323 : f32 to vector<20x20xf32>
    %356 = arith.mulf %355, %333 : vector<20x20xf32>
    %357 = arith.addf %354, %356 : vector<20x20xf32>
    %358 = arith.addf %325, %357 : vector<20x20xf32>
    %359 = arith.addf %358, %82 : vector<20x20xf32>
    %cst_92 = arith.constant dense<0xFF800000> : vector<20xf32>
    %360 = vector.multi_reduction <maximumf>, %359, %cst_92 [1] : vector<20x20xf32> to vector<20xf32>
    %361 = vector.shape_cast %360 : vector<20xf32> to vector<20x1xf32>
    %362 = vector.broadcast %361 : vector<20x1xf32> to vector<20x20xf32>
    %363 = arith.subf %359, %362 : vector<20x20xf32>
    %364 = math.exp %363 : vector<20x20xf32>
    %cst_93 = arith.constant dense<0.000000e+00> : vector<20xf32>
    %365 = vector.multi_reduction <add>, %364, %cst_93 [1] : vector<20x20xf32> to vector<20xf32>
    %366 = vector.shape_cast %365 : vector<20xf32> to vector<20x1xf32>
    %367 = tpu.reciprocal %366 : vector<20x1xf32> -> vector<20x1xf32>
    %368 = vector.broadcast %367 : vector<20x1xf32> to vector<20x20xf32>
    %369 = arith.mulf %364, %368 : vector<20x20xf32>
    %cst_94 = arith.constant dense<0.000000e+00> : vector<20x16xf32>
    %370 = tpu.matmul %369, %312, %cst_94 {dimension_numbers = #tpu.dot_dimension_numbers<[1], [0], [0], [1], [0, 0, 1, 1], [], []>} : vector<20x20xf32>, vector<20x16xf32>, vector<20x16xf32> -> vector<20x16xf32>
    %cst_95 = arith.constant dense<0.000000e+00> : vector<20x4xf32>
    %371 = tpu.matmul %369, %319, %cst_95 {dimension_numbers = #tpu.dot_dimension_numbers<[1], [0], [0], [1], [0, 0, 1, 1], [], []>} : vector<20x20xf32>, vector<20x4xf32>, vector<20x4xf32> -> vector<20x4xf32>
    %cst_96 = arith.constant dense<0.000000e+00> : vector<20x4xf32>
    %372 = tpu.matmul %369, %320, %cst_96 {dimension_numbers = #tpu.dot_dimension_numbers<[1], [0], [0], [1], [0, 0, 1, 1], [], []>} : vector<20x20xf32>, vector<20x4xf32>, vector<20x4xf32> -> vector<20x4xf32>
    %cst_97 = arith.constant dense<0.000000e+00> : vector<20x4xf32>
    %373 = tpu.matmul %369, %321, %cst_97 {dimension_numbers = #tpu.dot_dimension_numbers<[1], [0], [0], [1], [0, 0, 1, 1], [], []>} : vector<20x20xf32>, vector<20x4xf32>, vector<20x4xf32> -> vector<20x4xf32>
    %374 = vector.broadcast %94 : vector<20x1xf32> to vector<20x4xf32>
    %375 = arith.subf %371, %374 : vector<20x4xf32>
    %376 = vector.broadcast %95 : vector<20x1xf32> to vector<20x4xf32>
    %377 = arith.subf %372, %376 : vector<20x4xf32>
    %378 = vector.broadcast %96 : vector<20x1xf32> to vector<20x4xf32>
    %379 = arith.subf %373, %378 : vector<20x4xf32>
    %380 = vector.broadcast %84 : vector<20x1xf32> to vector<20x4xf32>
    %381 = arith.mulf %375, %380 : vector<20x4xf32>
    %382 = vector.broadcast %85 : vector<20x1xf32> to vector<20x4xf32>
    %383 = arith.mulf %377, %382 : vector<20x4xf32>
    %384 = arith.addf %381, %383 : vector<20x4xf32>
    %385 = vector.broadcast %86 : vector<20x1xf32> to vector<20x4xf32>
    %386 = arith.mulf %379, %385 : vector<20x4xf32>
    %387 = arith.addf %384, %386 : vector<20x4xf32>
    %388 = vector.broadcast %87 : vector<20x1xf32> to vector<20x4xf32>
    %389 = arith.mulf %375, %388 : vector<20x4xf32>
    %390 = vector.broadcast %88 : vector<20x1xf32> to vector<20x4xf32>
    %391 = arith.mulf %377, %390 : vector<20x4xf32>
    %392 = arith.addf %389, %391 : vector<20x4xf32>
    %393 = vector.broadcast %89 : vector<20x1xf32> to vector<20x4xf32>
    %394 = arith.mulf %379, %393 : vector<20x4xf32>
    %395 = arith.addf %392, %394 : vector<20x4xf32>
    %396 = vector.broadcast %90 : vector<20x1xf32> to vector<20x4xf32>
    %397 = arith.mulf %375, %396 : vector<20x4xf32>
    %398 = vector.broadcast %91 : vector<20x1xf32> to vector<20x4xf32>
    %399 = arith.mulf %377, %398 : vector<20x4xf32>
    %400 = arith.addf %397, %399 : vector<20x4xf32>
    %401 = vector.broadcast %92 : vector<20x1xf32> to vector<20x4xf32>
    %402 = arith.mulf %379, %401 : vector<20x4xf32>
    %403 = arith.addf %400, %402 : vector<20x4xf32>
    %404 = arith.mulf %387, %387 : vector<20x4xf32>
    %405 = arith.mulf %395, %395 : vector<20x4xf32>
    %406 = arith.addf %404, %405 : vector<20x4xf32>
    %407 = arith.mulf %403, %403 : vector<20x4xf32>
    %408 = arith.addf %406, %407 : vector<20x4xf32>
    %cst_98 = arith.constant 9.99999993E-9 : f32
    %409 = vector.broadcast %cst_98 : f32 to vector<20x4xf32>
    %410 = arith.addf %408, %409 : vector<20x4xf32>
    %411 = math.sqrt %410 : vector<20x4xf32>
    %c0_99 = arith.constant 0 : index
    %c16 = arith.constant 16 : index
    %412 = vector.load %arg33[%c0_99, %c16] : memref<20x64xf32, #tpu.memory_space<vmem>>, vector<20x16xf32>
    tpu.vector_store %arg33[%c0_99, %c16], %370 {strides = array<i32>} : memref<20x64xf32, #tpu.memory_space<vmem>>, vector<20x16xf32>,
    %c0_100 = arith.constant 0 : index
    %c44 = arith.constant 44 : index
    %413 = vector.load %arg33[%c0_100, %c44] : memref<20x64xf32, #tpu.memory_space<vmem>>, vector<20x4xf32>
    tpu.vector_store %arg33[%c0_100, %c44], %387 {strides = array<i32>} : memref<20x64xf32, #tpu.memory_space<vmem>>, vector<20x4xf32>,
    %c0_101 = arith.constant 0 : index
    %c48 = arith.constant 48 : index
    %414 = vector.load %arg33[%c0_101, %c48] : memref<20x64xf32, #tpu.memory_space<vmem>>, vector<20x4xf32>
    tpu.vector_store %arg33[%c0_101, %c48], %395 {strides = array<i32>} : memref<20x64xf32, #tpu.memory_space<vmem>>, vector<20x4xf32>,
    %c0_102 = arith.constant 0 : index
    %c52 = arith.constant 52 : index
    %415 = vector.load %arg33[%c0_102, %c52] : memref<20x64xf32, #tpu.memory_space<vmem>>, vector<20x4xf32>
    tpu.vector_store %arg33[%c0_102, %c52], %403 {strides = array<i32>} : memref<20x64xf32, #tpu.memory_space<vmem>>, vector<20x4xf32>,
    %c0_103 = arith.constant 0 : index
    %c60 = arith.constant 60 : index
    %416 = vector.load %arg33[%c0_103, %c60] : memref<20x64xf32, #tpu.memory_space<vmem>>, vector<20x4xf32>
    tpu.vector_store %arg33[%c0_103, %c60], %411 {strides = array<i32>} : memref<20x64xf32, #tpu.memory_space<vmem>>, vector<20x4xf32>,
    %c0_104 = arith.constant 0 : index
    %c0_105 = arith.constant 0 : index
    %417 = vector.load %arg33[%c0_104, %c0_105] : memref<20x64xf32, #tpu.memory_space<vmem>>, vector<20x64xf32>
    %c0_106 = arith.constant 0 : index
    %c0_107 = arith.constant 0 : index
    %c0_108 = arith.constant 0 : index
    %418 = vector.load %arg18[%c0_106, %c0_107, %c0_108] : memref<2x64x64xf32, #tpu.memory_space<vmem>>, vector<1x64x64xf32>
    %419 = vector.shape_cast %418 : vector<1x64x64xf32> to vector<64x64xf32>
    %cst_109 = arith.constant dense<0.000000e+00> : vector<20x64xf32>
    %420 = tpu.matmul %417, %419, %cst_109 {dimension_numbers = #tpu.dot_dimension_numbers<[1], [0], [0], [1], [0, 0, 1, 1], [], []>} : vector<20x64xf32>, vector<64x64xf32>, vector<20x64xf32> -> vector<20x64xf32>
    %c0_110 = arith.constant 0 : index
    %c0_111 = arith.constant 0 : index
    %c0_112 = arith.constant 0 : index
    %421 = vector.load %arg19[%c0_110, %c0_111, %c0_112] : memref<2x1x64xf32, #tpu.memory_space<vmem>>, vector<1x1x64xf32>
    %422 = vector.shape_cast %421 : vector<1x1x64xf32> to vector<1x64xf32>
    %423 = vector.broadcast %422 : vector<1x64xf32> to vector<20x64xf32>
    %424 = arith.addf %420, %423 : vector<20x64xf32>
    %425 = arith.addf %81, %424 : vector<20x64xf32>
    %c0_113 = arith.constant 0 : index
    %c0_114 = arith.constant 0 : index
    %c0_115 = arith.constant 0 : index
    %426 = vector.load %arg20[%c0_113, %c0_114, %c0_115] : memref<2x1x64xf32, #tpu.memory_space<vmem>>, vector<1x1x64xf32>
    %427 = vector.shape_cast %426 : vector<1x1x64xf32> to vector<1x64xf32>
    %c0_116 = arith.constant 0 : index
    %c0_117 = arith.constant 0 : index
    %c0_118 = arith.constant 0 : index
    %428 = vector.load %arg21[%c0_116, %c0_117, %c0_118] : memref<2x1x64xf32, #tpu.memory_space<vmem>>, vector<1x1x64xf32>
    %429 = vector.shape_cast %428 : vector<1x1x64xf32> to vector<1x64xf32>
    %cst_119 = arith.constant dense<0.000000e+00> : vector<20xf32>
    %430 = vector.multi_reduction <add>, %425, %cst_119 [1] : vector<20x64xf32> to vector<20xf32>
    %431 = vector.shape_cast %430 : vector<20xf32> to vector<20x1xf32>
    %cst_120 = arith.constant 6.400000e+01 : f32
    %432 = vector.broadcast %cst_120 : f32 to vector<20x1xf32>
    %433 = arith.divf %431, %432 : vector<20x1xf32>
    %434 = vector.broadcast %433 : vector<20x1xf32> to vector<20x64xf32>
    %435 = arith.subf %425, %434 : vector<20x64xf32>
    %436 = arith.mulf %435, %435 : vector<20x64xf32>
    %cst_121 = arith.constant dense<0.000000e+00> : vector<20xf32>
    %437 = vector.multi_reduction <add>, %436, %cst_121 [1] : vector<20x64xf32> to vector<20xf32>
    %438 = vector.shape_cast %437 : vector<20xf32> to vector<20x1xf32>
    %cst_122 = arith.constant 6.400000e+01 : f32
    %439 = vector.broadcast %cst_122 : f32 to vector<20x1xf32>
    %440 = arith.divf %438, %439 : vector<20x1xf32>
    %441 = vector.broadcast %433 : vector<20x1xf32> to vector<20x64xf32>
    %442 = arith.subf %425, %441 : vector<20x64xf32>
    %cst_123 = arith.constant 9.99999974E-6 : f32
    %443 = vector.broadcast %cst_123 : f32 to vector<20x1xf32>
    %444 = arith.addf %440, %443 : vector<20x1xf32>
    %445 = math.rsqrt %444 : vector<20x1xf32>
    %446 = vector.broadcast %445 : vector<20x1xf32> to vector<20x64xf32>
    %447 = arith.mulf %442, %446 : vector<20x64xf32>
    %448 = vector.broadcast %427 : vector<1x64xf32> to vector<20x64xf32>
    %449 = arith.mulf %447, %448 : vector<20x64xf32>
    %450 = vector.broadcast %429 : vector<1x64xf32> to vector<20x64xf32>
    %451 = arith.addf %449, %450 : vector<20x64xf32>
    %c0_124 = arith.constant 0 : index
    %c0_125 = arith.constant 0 : index
    %c0_126 = arith.constant 0 : index
    %452 = vector.load %arg22[%c0_124, %c0_125, %c0_126] : memref<2x64x64xf32, #tpu.memory_space<vmem>>, vector<1x64x64xf32>
    %453 = vector.shape_cast %452 : vector<1x64x64xf32> to vector<64x64xf32>
    %cst_127 = arith.constant dense<0.000000e+00> : vector<20x64xf32>
    %454 = tpu.matmul %451, %453, %cst_127 {dimension_numbers = #tpu.dot_dimension_numbers<[1], [0], [0], [1], [0, 0, 1, 1], [], []>} : vector<20x64xf32>, vector<64x64xf32>, vector<20x64xf32> -> vector<20x64xf32>
    %c0_128 = arith.constant 0 : index
    %c0_129 = arith.constant 0 : index
    %c0_130 = arith.constant 0 : index
    %455 = vector.load %arg23[%c0_128, %c0_129, %c0_130] : memref<2x1x64xf32, #tpu.memory_space<vmem>>, vector<1x1x64xf32>
    %456 = vector.shape_cast %455 : vector<1x1x64xf32> to vector<1x64xf32>
    %457 = vector.broadcast %456 : vector<1x64xf32> to vector<20x64xf32>
    %458 = arith.addf %454, %457 : vector<20x64xf32>
    %cst_131 = arith.constant 0.000000e+00 : f32
    %459 = vector.broadcast %cst_131 : f32 to vector<20x64xf32>
    %460 = arith.maximumf %458, %459 : vector<20x64xf32>
    %c0_132 = arith.constant 0 : index
    %c0_133 = arith.constant 0 : index
    %c0_134 = arith.constant 0 : index
    %461 = vector.load %arg24[%c0_132, %c0_133, %c0_134] : memref<2x64x64xf32, #tpu.memory_space<vmem>>, vector<1x64x64xf32>
    %462 = vector.shape_cast %461 : vector<1x64x64xf32> to vector<64x64xf32>
    %cst_135 = arith.constant dense<0.000000e+00> : vector<20x64xf32>
    %463 = tpu.matmul %460, %462, %cst_135 {dimension_numbers = #tpu.dot_dimension_numbers<[1], [0], [0], [1], [0, 0, 1, 1], [], []>} : vector<20x64xf32>, vector<64x64xf32>, vector<20x64xf32> -> vector<20x64xf32>
    %c0_136 = arith.constant 0 : index
    %c0_137 = arith.constant 0 : index
    %c0_138 = arith.constant 0 : index
    %464 = vector.load %arg25[%c0_136, %c0_137, %c0_138] : memref<2x1x64xf32, #tpu.memory_space<vmem>>, vector<1x1x64xf32>
    %465 = vector.shape_cast %464 : vector<1x1x64xf32> to vector<1x64xf32>
    %466 = vector.broadcast %465 : vector<1x64xf32> to vector<20x64xf32>
    %467 = arith.addf %463, %466 : vector<20x64xf32>
    %468 = arith.addf %451, %467 : vector<20x64xf32>
    %c0_139 = arith.constant 0 : index
    %c0_140 = arith.constant 0 : index
    %c0_141 = arith.constant 0 : index
    %469 = vector.load %arg26[%c0_139, %c0_140, %c0_141] : memref<2x1x64xf32, #tpu.memory_space<vmem>>, vector<1x1x64xf32>
    %470 = vector.shape_cast %469 : vector<1x1x64xf32> to vector<1x64xf32>
    %c0_142 = arith.constant 0 : index
    %c0_143 = arith.constant 0 : index
    %c0_144 = arith.constant 0 : index
    %471 = vector.load %arg27[%c0_142, %c0_143, %c0_144] : memref<2x1x64xf32, #tpu.memory_space<vmem>>, vector<1x1x64xf32>
    %472 = vector.shape_cast %471 : vector<1x1x64xf32> to vector<1x64xf32>
    %cst_145 = arith.constant dense<0.000000e+00> : vector<20xf32>
    %473 = vector.multi_reduction <add>, %468, %cst_145 [1] : vector<20x64xf32> to vector<20xf32>
    %474 = vector.shape_cast %473 : vector<20xf32> to vector<20x1xf32>
    %cst_146 = arith.constant 6.400000e+01 : f32
    %475 = vector.broadcast %cst_146 : f32 to vector<20x1xf32>
    %476 = arith.divf %474, %475 : vector<20x1xf32>
    %477 = vector.broadcast %476 : vector<20x1xf32> to vector<20x64xf32>
    %478 = arith.subf %468, %477 : vector<20x64xf32>
    %479 = arith.mulf %478, %478 : vector<20x64xf32>
    %cst_147 = arith.constant dense<0.000000e+00> : vector<20xf32>
    %480 = vector.multi_reduction <add>, %479, %cst_147 [1] : vector<20x64xf32> to vector<20xf32>
    %481 = vector.shape_cast %480 : vector<20xf32> to vector<20x1xf32>
    %cst_148 = arith.constant 6.400000e+01 : f32
    %482 = vector.broadcast %cst_148 : f32 to vector<20x1xf32>
    %483 = arith.divf %481, %482 : vector<20x1xf32>
    %484 = vector.broadcast %476 : vector<20x1xf32> to vector<20x64xf32>
    %485 = arith.subf %468, %484 : vector<20x64xf32>
    %cst_149 = arith.constant 9.99999974E-6 : f32
    %486 = vector.broadcast %cst_149 : f32 to vector<20x1xf32>
    %487 = arith.addf %483, %486 : vector<20x1xf32>
    %488 = math.rsqrt %487 : vector<20x1xf32>
    %489 = vector.broadcast %488 : vector<20x1xf32> to vector<20x64xf32>
    %490 = arith.mulf %485, %489 : vector<20x64xf32>
    %491 = vector.broadcast %470 : vector<1x64xf32> to vector<20x64xf32>
    %492 = arith.mulf %490, %491 : vector<20x64xf32>
    %493 = vector.broadcast %472 : vector<1x64xf32> to vector<20x64xf32>
    %494 = arith.addf %492, %493 : vector<20x64xf32>
    %c1_150 = arith.constant 1 : index
    %c0_151 = arith.constant 0 : index
    %c0_152 = arith.constant 0 : index
    %495 = vector.load %arg17[%c1_150, %c0_151, %c0_152] : memref<2x64x168xf32, #tpu.memory_space<vmem>>, vector<1x64x168xf32>
    %496 = vector.shape_cast %495 : vector<1x64x168xf32> to vector<64x168xf32>
    %cst_153 = arith.constant dense<0.000000e+00> : vector<20x168xf32>
    %497 = tpu.matmul %494, %496, %cst_153 {dimension_numbers = #tpu.dot_dimension_numbers<[1], [0], [0], [1], [0, 0, 1, 1], [], []>} : vector<20x64xf32>, vector<64x168xf32>, vector<20x168xf32> -> vector<20x168xf32>
    %498 = vector.extract_strided_slice %497 {offsets = [0, 96], sizes = [20, 8], strides = [1, 1]} : vector<20x168xf32> to vector<20x8xf32>
    %499 = vector.extract_strided_slice %497 {offsets = [0, 104], sizes = [20, 8], strides = [1, 1]} : vector<20x168xf32> to vector<20x8xf32>
    %500 = vector.extract_strided_slice %497 {offsets = [0, 112], sizes = [20, 8], strides = [1, 1]} : vector<20x168xf32> to vector<20x8xf32>
    %501 = vector.broadcast %84 : vector<20x1xf32> to vector<20x8xf32>
    %502 = arith.mulf %498, %501 : vector<20x8xf32>
    %503 = vector.broadcast %87 : vector<20x1xf32> to vector<20x8xf32>
    %504 = arith.mulf %499, %503 : vector<20x8xf32>
    %505 = arith.addf %502, %504 : vector<20x8xf32>
    %506 = vector.broadcast %90 : vector<20x1xf32> to vector<20x8xf32>
    %507 = arith.mulf %500, %506 : vector<20x8xf32>
    %508 = arith.addf %505, %507 : vector<20x8xf32>
    %509 = vector.broadcast %94 : vector<20x1xf32> to vector<20x8xf32>
    %510 = arith.addf %508, %509 : vector<20x8xf32>
    %511 = vector.broadcast %85 : vector<20x1xf32> to vector<20x8xf32>
    %512 = arith.mulf %498, %511 : vector<20x8xf32>
    %513 = vector.broadcast %88 : vector<20x1xf32> to vector<20x8xf32>
    %514 = arith.mulf %499, %513 : vector<20x8xf32>
    %515 = arith.addf %512, %514 : vector<20x8xf32>
    %516 = vector.broadcast %91 : vector<20x1xf32> to vector<20x8xf32>
    %517 = arith.mulf %500, %516 : vector<20x8xf32>
    %518 = arith.addf %515, %517 : vector<20x8xf32>
    %519 = vector.broadcast %95 : vector<20x1xf32> to vector<20x8xf32>
    %520 = arith.addf %518, %519 : vector<20x8xf32>
    %521 = vector.broadcast %86 : vector<20x1xf32> to vector<20x8xf32>
    %522 = arith.mulf %498, %521 : vector<20x8xf32>
    %523 = vector.broadcast %89 : vector<20x1xf32> to vector<20x8xf32>
    %524 = arith.mulf %499, %523 : vector<20x8xf32>
    %525 = arith.addf %522, %524 : vector<20x8xf32>
    %526 = vector.broadcast %92 : vector<20x1xf32> to vector<20x8xf32>
    %527 = arith.mulf %500, %526 : vector<20x8xf32>
    %528 = arith.addf %525, %527 : vector<20x8xf32>
    %529 = vector.broadcast %96 : vector<20x1xf32> to vector<20x8xf32>
    %530 = arith.addf %528, %529 : vector<20x8xf32>
    %531 = vector.extract_strided_slice %497 {offsets = [0, 120], sizes = [20, 8], strides = [1, 1]} : vector<20x168xf32> to vector<20x8xf32>
    %532 = vector.extract_strided_slice %497 {offsets = [0, 128], sizes = [20, 8], strides = [1, 1]} : vector<20x168xf32> to vector<20x8xf32>
    %533 = vector.extract_strided_slice %497 {offsets = [0, 136], sizes = [20, 8], strides = [1, 1]} : vector<20x168xf32> to vector<20x8xf32>
    %534 = vector.broadcast %84 : vector<20x1xf32> to vector<20x8xf32>
    %535 = arith.mulf %531, %534 : vector<20x8xf32>
    %536 = vector.broadcast %87 : vector<20x1xf32> to vector<20x8xf32>
    %537 = arith.mulf %532, %536 : vector<20x8xf32>
    %538 = arith.addf %535, %537 : vector<20x8xf32>
    %539 = vector.broadcast %90 : vector<20x1xf32> to vector<20x8xf32>
    %540 = arith.mulf %533, %539 : vector<20x8xf32>
    %541 = arith.addf %538, %540 : vector<20x8xf32>
    %542 = vector.broadcast %94 : vector<20x1xf32> to vector<20x8xf32>
    %543 = arith.addf %541, %542 : vector<20x8xf32>
    %544 = vector.broadcast %85 : vector<20x1xf32> to vector<20x8xf32>
    %545 = arith.mulf %531, %544 : vector<20x8xf32>
    %546 = vector.broadcast %88 : vector<20x1xf32> to vector<20x8xf32>
    %547 = arith.mulf %532, %546 : vector<20x8xf32>
    %548 = arith.addf %545, %547 : vector<20x8xf32>
    %549 = vector.broadcast %91 : vector<20x1xf32> to vector<20x8xf32>
    %550 = arith.mulf %533, %549 : vector<20x8xf32>
    %551 = arith.addf %548, %550 : vector<20x8xf32>
    %552 = vector.broadcast %95 : vector<20x1xf32> to vector<20x8xf32>
    %553 = arith.addf %551, %552 : vector<20x8xf32>
    %554 = vector.broadcast %86 : vector<20x1xf32> to vector<20x8xf32>
    %555 = arith.mulf %531, %554 : vector<20x8xf32>
    %556 = vector.broadcast %89 : vector<20x1xf32> to vector<20x8xf32>
    %557 = arith.mulf %532, %556 : vector<20x8xf32>
    %558 = arith.addf %555, %557 : vector<20x8xf32>
    %559 = vector.broadcast %92 : vector<20x1xf32> to vector<20x8xf32>
    %560 = arith.mulf %533, %559 : vector<20x8xf32>
    %561 = arith.addf %558, %560 : vector<20x8xf32>
    %562 = vector.broadcast %96 : vector<20x1xf32> to vector<20x8xf32>
    %563 = arith.addf %561, %562 : vector<20x8xf32>
    %564 = vector.extract_strided_slice %497 {offsets = [0, 144], sizes = [20, 8], strides = [1, 1]} : vector<20x168xf32> to vector<20x8xf32>
    %565 = vector.extract_strided_slice %497 {offsets = [0, 152], sizes = [20, 8], strides = [1, 1]} : vector<20x168xf32> to vector<20x8xf32>
    %566 = vector.extract_strided_slice %497 {offsets = [0, 160], sizes = [20, 8], strides = [1, 1]} : vector<20x168xf32> to vector<20x8xf32>
    %567 = vector.broadcast %84 : vector<20x1xf32> to vector<20x8xf32>
    %568 = arith.mulf %564, %567 : vector<20x8xf32>
    %569 = vector.broadcast %87 : vector<20x1xf32> to vector<20x8xf32>
    %570 = arith.mulf %565, %569 : vector<20x8xf32>
    %571 = arith.addf %568, %570 : vector<20x8xf32>
    %572 = vector.broadcast %90 : vector<20x1xf32> to vector<20x8xf32>
    %573 = arith.mulf %566, %572 : vector<20x8xf32>
    %574 = arith.addf %571, %573 : vector<20x8xf32>
    %575 = vector.broadcast %94 : vector<20x1xf32> to vector<20x8xf32>
    %576 = arith.addf %574, %575 : vector<20x8xf32>
    %577 = vector.broadcast %85 : vector<20x1xf32> to vector<20x8xf32>
    %578 = arith.mulf %564, %577 : vector<20x8xf32>
    %579 = vector.broadcast %88 : vector<20x1xf32> to vector<20x8xf32>
    %580 = arith.mulf %565, %579 : vector<20x8xf32>
    %581 = arith.addf %578, %580 : vector<20x8xf32>
    %582 = vector.broadcast %91 : vector<20x1xf32> to vector<20x8xf32>
    %583 = arith.mulf %566, %582 : vector<20x8xf32>
    %584 = arith.addf %581, %583 : vector<20x8xf32>
    %585 = vector.broadcast %95 : vector<20x1xf32> to vector<20x8xf32>
    %586 = arith.addf %584, %585 : vector<20x8xf32>
    %587 = vector.broadcast %86 : vector<20x1xf32> to vector<20x8xf32>
    %588 = arith.mulf %564, %587 : vector<20x8xf32>
    %589 = vector.broadcast %89 : vector<20x1xf32> to vector<20x8xf32>
    %590 = arith.mulf %565, %589 : vector<20x8xf32>
    %591 = arith.addf %588, %590 : vector<20x8xf32>
    %592 = vector.broadcast %92 : vector<20x1xf32> to vector<20x8xf32>
    %593 = arith.mulf %566, %592 : vector<20x8xf32>
    %594 = arith.addf %591, %593 : vector<20x8xf32>
    %595 = vector.broadcast %96 : vector<20x1xf32> to vector<20x8xf32>
    %596 = arith.addf %594, %595 : vector<20x8xf32>
    %597 = vector.extract_strided_slice %497 {offsets = [0, 0], sizes = [20, 16], strides = [1, 1]} : vector<20x168xf32> to vector<20x16xf32>
    %cst_154 = arith.constant 0.176776692 : f32
    %598 = vector.broadcast %cst_154 : f32 to vector<20x16xf32>
    %599 = arith.mulf %597, %598 : vector<20x16xf32>
    %600 = vector.extract_strided_slice %497 {offsets = [0, 32], sizes = [20, 16], strides = [1, 1]} : vector<20x168xf32> to vector<20x16xf32>
    %601 = vector.extract_strided_slice %497 {offsets = [0, 64], sizes = [20, 16], strides = [1, 1]} : vector<20x168xf32> to vector<20x16xf32>
    %602 = vector.extract_strided_slice %510 {offsets = [0, 0], sizes = [20, 4], strides = [1, 1]} : vector<20x8xf32> to vector<20x4xf32>
    %603 = vector.extract_strided_slice %520 {offsets = [0, 0], sizes = [20, 4], strides = [1, 1]} : vector<20x8xf32> to vector<20x4xf32>
    %604 = vector.extract_strided_slice %530 {offsets = [0, 0], sizes = [20, 4], strides = [1, 1]} : vector<20x8xf32> to vector<20x4xf32>
    %605 = vector.extract_strided_slice %543 {offsets = [0, 0], sizes = [20, 4], strides = [1, 1]} : vector<20x8xf32> to vector<20x4xf32>
    %606 = vector.extract_strided_slice %553 {offsets = [0, 0], sizes = [20, 4], strides = [1, 1]} : vector<20x8xf32> to vector<20x4xf32>
    %607 = vector.extract_strided_slice %563 {offsets = [0, 0], sizes = [20, 4], strides = [1, 1]} : vector<20x8xf32> to vector<20x4xf32>
    %608 = vector.extract_strided_slice %576 {offsets = [0, 0], sizes = [20, 4], strides = [1, 1]} : vector<20x8xf32> to vector<20x4xf32>
    %609 = vector.extract_strided_slice %586 {offsets = [0, 0], sizes = [20, 4], strides = [1, 1]} : vector<20x8xf32> to vector<20x4xf32>
    %610 = vector.extract_strided_slice %596 {offsets = [0, 0], sizes = [20, 4], strides = [1, 1]} : vector<20x8xf32> to vector<20x4xf32>
    %c1_155 = arith.constant 1 : index
    %c0_156 = arith.constant 0 : index
    %611 = memref.load %arg0[%c1_155, %c0_156] : memref<2x2xf32, #tpu.memory_space<smem>>
    %cst_157 = arith.constant 0.166666672 : f32
    %612 = arith.mulf %cst_157, %611 : f32
    %613 = tpu.transpose %600, [1, 0] : vector<20x16xf32> -> vector<16x20xf32>
    %cst_158 = arith.constant dense<0.000000e+00> : vector<20x20xf32>
    %614 = tpu.matmul %599, %613, %cst_158 {dimension_numbers = #tpu.dot_dimension_numbers<[1], [0], [0], [1], [0, 0, 1, 1], [], []>} : vector<20x16xf32>, vector<16x20xf32>, vector<20x20xf32> -> vector<20x20xf32>
    %615 = tpu.transpose %605, [1, 0] : vector<20x4xf32> -> vector<4x20xf32>
    %cst_159 = arith.constant dense<0.000000e+00> : vector<20x20xf32>
    %616 = tpu.matmul %602, %615, %cst_159 {dimension_numbers = #tpu.dot_dimension_numbers<[1], [0], [0], [1], [0, 0, 1, 1], [], []>} : vector<20x4xf32>, vector<4x20xf32>, vector<20x20xf32> -> vector<20x20xf32>
    %617 = tpu.transpose %606, [1, 0] : vector<20x4xf32> -> vector<4x20xf32>
    %cst_160 = arith.constant dense<0.000000e+00> : vector<20x20xf32>
    %618 = tpu.matmul %603, %617, %cst_160 {dimension_numbers = #tpu.dot_dimension_numbers<[1], [0], [0], [1], [0, 0, 1, 1], [], []>} : vector<20x4xf32>, vector<4x20xf32>, vector<20x20xf32> -> vector<20x20xf32>
    %619 = arith.addf %616, %618 : vector<20x20xf32>
    %620 = tpu.transpose %607, [1, 0] : vector<20x4xf32> -> vector<4x20xf32>
    %cst_161 = arith.constant dense<0.000000e+00> : vector<20x20xf32>
    %621 = tpu.matmul %604, %620, %cst_161 {dimension_numbers = #tpu.dot_dimension_numbers<[1], [0], [0], [1], [0, 0, 1, 1], [], []>} : vector<20x4xf32>, vector<4x20xf32>, vector<20x20xf32> -> vector<20x20xf32>
    %622 = arith.addf %619, %621 : vector<20x20xf32>
    %623 = arith.mulf %602, %602 : vector<20x4xf32>
    %624 = arith.mulf %603, %603 : vector<20x4xf32>
    %625 = arith.addf %623, %624 : vector<20x4xf32>
    %626 = arith.mulf %604, %604 : vector<20x4xf32>
    %627 = arith.addf %625, %626 : vector<20x4xf32>
    %cst_162 = arith.constant dense<0.000000e+00> : vector<20xf32>
    %628 = vector.multi_reduction <add>, %627, %cst_162 [1] : vector<20x4xf32> to vector<20xf32>
    %629 = vector.shape_cast %628 : vector<20xf32> to vector<20x1xf32>
    %630 = arith.mulf %605, %605 : vector<20x4xf32>
    %631 = arith.mulf %606, %606 : vector<20x4xf32>
    %632 = arith.addf %630, %631 : vector<20x4xf32>
    %633 = arith.mulf %607, %607 : vector<20x4xf32>
    %634 = arith.addf %632, %633 : vector<20x4xf32>
    %cst_163 = arith.constant dense<0.000000e+00> : vector<20xf32>
    %635 = vector.multi_reduction <add>, %634, %cst_163 [1] : vector<20x4xf32> to vector<20xf32>
    %636 = vector.shape_cast %635 : vector<20xf32> to vector<20x1xf32>
    %cst_164 = arith.constant -5.000000e-01 : f32
    %637 = arith.mulf %cst_164, %612 : f32
    %638 = tpu.transpose %636, [1, 0] : vector<20x1xf32> -> vector<1x20xf32>
    %639 = vector.broadcast %629 : vector<20x1xf32> to vector<20x20xf32>
    %640 = vector.broadcast %638 : vector<1x20xf32> to vector<20x20xf32>
    %641 = arith.addf %639, %640 : vector<20x20xf32>
    %642 = vector.broadcast %637 : f32 to vector<20x20xf32>
    %643 = arith.mulf %642, %641 : vector<20x20xf32>
    %644 = vector.broadcast %612 : f32 to vector<20x20xf32>
    %645 = arith.mulf %644, %622 : vector<20x20xf32>
    %646 = arith.addf %643, %645 : vector<20x20xf32>
    %647 = arith.addf %614, %646 : vector<20x20xf32>
    %648 = arith.addf %647, %82 : vector<20x20xf32>
    %cst_165 = arith.constant dense<0xFF800000> : vector<20xf32>
    %649 = vector.multi_reduction <maximumf>, %648, %cst_165 [1] : vector<20x20xf32> to vector<20xf32>
    %650 = vector.shape_cast %649 : vector<20xf32> to vector<20x1xf32>
    %651 = vector.broadcast %650 : vector<20x1xf32> to vector<20x20xf32>
    %652 = arith.subf %648, %651 : vector<20x20xf32>
    %653 = math.exp %652 : vector<20x20xf32>
    %cst_166 = arith.constant dense<0.000000e+00> : vector<20xf32>
    %654 = vector.multi_reduction <add>, %653, %cst_166 [1] : vector<20x20xf32> to vector<20xf32>
    %655 = vector.shape_cast %654 : vector<20xf32> to vector<20x1xf32>
    %656 = tpu.reciprocal %655 : vector<20x1xf32> -> vector<20x1xf32>
    %657 = vector.broadcast %656 : vector<20x1xf32> to vector<20x20xf32>
    %658 = arith.mulf %653, %657 : vector<20x20xf32>
    %cst_167 = arith.constant dense<0.000000e+00> : vector<20x16xf32>
    %659 = tpu.matmul %658, %601, %cst_167 {dimension_numbers = #tpu.dot_dimension_numbers<[1], [0], [0], [1], [0, 0, 1, 1], [], []>} : vector<20x20xf32>, vector<20x16xf32>, vector<20x16xf32> -> vector<20x16xf32>
    %cst_168 = arith.constant dense<0.000000e+00> : vector<20x4xf32>
    %660 = tpu.matmul %658, %608, %cst_168 {dimension_numbers = #tpu.dot_dimension_numbers<[1], [0], [0], [1], [0, 0, 1, 1], [], []>} : vector<20x20xf32>, vector<20x4xf32>, vector<20x4xf32> -> vector<20x4xf32>
    %cst_169 = arith.constant dense<0.000000e+00> : vector<20x4xf32>
    %661 = tpu.matmul %658, %609, %cst_169 {dimension_numbers = #tpu.dot_dimension_numbers<[1], [0], [0], [1], [0, 0, 1, 1], [], []>} : vector<20x20xf32>, vector<20x4xf32>, vector<20x4xf32> -> vector<20x4xf32>
    %cst_170 = arith.constant dense<0.000000e+00> : vector<20x4xf32>
    %662 = tpu.matmul %658, %610, %cst_170 {dimension_numbers = #tpu.dot_dimension_numbers<[1], [0], [0], [1], [0, 0, 1, 1], [], []>} : vector<20x20xf32>, vector<20x4xf32>, vector<20x4xf32> -> vector<20x4xf32>
    %663 = vector.broadcast %94 : vector<20x1xf32> to vector<20x4xf32>
    %664 = arith.subf %660, %663 : vector<20x4xf32>
    %665 = vector.broadcast %95 : vector<20x1xf32> to vector<20x4xf32>
    %666 = arith.subf %661, %665 : vector<20x4xf32>
    %667 = vector.broadcast %96 : vector<20x1xf32> to vector<20x4xf32>
    %668 = arith.subf %662, %667 : vector<20x4xf32>
    %669 = vector.broadcast %84 : vector<20x1xf32> to vector<20x4xf32>
    %670 = arith.mulf %664, %669 : vector<20x4xf32>
    %671 = vector.broadcast %85 : vector<20x1xf32> to vector<20x4xf32>
    %672 = arith.mulf %666, %671 : vector<20x4xf32>
    %673 = arith.addf %670, %672 : vector<20x4xf32>
    %674 = vector.broadcast %86 : vector<20x1xf32> to vector<20x4xf32>
    %675 = arith.mulf %668, %674 : vector<20x4xf32>
    %676 = arith.addf %673, %675 : vector<20x4xf32>
    %677 = vector.broadcast %87 : vector<20x1xf32> to vector<20x4xf32>
    %678 = arith.mulf %664, %677 : vector<20x4xf32>
    %679 = vector.broadcast %88 : vector<20x1xf32> to vector<20x4xf32>
    %680 = arith.mulf %666, %679 : vector<20x4xf32>
    %681 = arith.addf %678, %680 : vector<20x4xf32>
    %682 = vector.broadcast %89 : vector<20x1xf32> to vector<20x4xf32>
    %683 = arith.mulf %668, %682 : vector<20x4xf32>
    %684 = arith.addf %681, %683 : vector<20x4xf32>
    %685 = vector.broadcast %90 : vector<20x1xf32> to vector<20x4xf32>
    %686 = arith.mulf %664, %685 : vector<20x4xf32>
    %687 = vector.broadcast %91 : vector<20x1xf32> to vector<20x4xf32>
    %688 = arith.mulf %666, %687 : vector<20x4xf32>
    %689 = arith.addf %686, %688 : vector<20x4xf32>
    %690 = vector.broadcast %92 : vector<20x1xf32> to vector<20x4xf32>
    %691 = arith.mulf %668, %690 : vector<20x4xf32>
    %692 = arith.addf %689, %691 : vector<20x4xf32>
    %693 = arith.mulf %676, %676 : vector<20x4xf32>
    %694 = arith.mulf %684, %684 : vector<20x4xf32>
    %695 = arith.addf %693, %694 : vector<20x4xf32>
    %696 = arith.mulf %692, %692 : vector<20x4xf32>
    %697 = arith.addf %695, %696 : vector<20x4xf32>
    %cst_171 = arith.constant 9.99999993E-9 : f32
    %698 = vector.broadcast %cst_171 : f32 to vector<20x4xf32>
    %699 = arith.addf %697, %698 : vector<20x4xf32>
    %700 = math.sqrt %699 : vector<20x4xf32>
    %c0_172 = arith.constant 0 : index
    %c0_173 = arith.constant 0 : index
    %701 = vector.load %arg33[%c0_172, %c0_173] : memref<20x64xf32, #tpu.memory_space<vmem>>, vector<20x16xf32>
    tpu.vector_store %arg33[%c0_172, %c0_173], %659 {strides = array<i32>} : memref<20x64xf32, #tpu.memory_space<vmem>>, vector<20x16xf32>,
    %c0_174 = arith.constant 0 : index
    %c32_175 = arith.constant 32 : index
    %702 = vector.load %arg33[%c0_174, %c32_175] : memref<20x64xf32, #tpu.memory_space<vmem>>, vector<20x4xf32>
    tpu.vector_store %arg33[%c0_174, %c32_175], %676 {strides = array<i32>} : memref<20x64xf32, #tpu.memory_space<vmem>>, vector<20x4xf32>,
    %c0_176 = arith.constant 0 : index
    %c36_177 = arith.constant 36 : index
    %703 = vector.load %arg33[%c0_176, %c36_177] : memref<20x64xf32, #tpu.memory_space<vmem>>, vector<20x4xf32>
    tpu.vector_store %arg33[%c0_176, %c36_177], %684 {strides = array<i32>} : memref<20x64xf32, #tpu.memory_space<vmem>>, vector<20x4xf32>,
    %c0_178 = arith.constant 0 : index
    %c40_179 = arith.constant 40 : index
    %704 = vector.load %arg33[%c0_178, %c40_179] : memref<20x64xf32, #tpu.memory_space<vmem>>, vector<20x4xf32>
    tpu.vector_store %arg33[%c0_178, %c40_179], %692 {strides = array<i32>} : memref<20x64xf32, #tpu.memory_space<vmem>>, vector<20x4xf32>,
    %c0_180 = arith.constant 0 : index
    %c56_181 = arith.constant 56 : index
    %705 = vector.load %arg33[%c0_180, %c56_181] : memref<20x64xf32, #tpu.memory_space<vmem>>, vector<20x4xf32>
    tpu.vector_store %arg33[%c0_180, %c56_181], %700 {strides = array<i32>} : memref<20x64xf32, #tpu.memory_space<vmem>>, vector<20x4xf32>,
    %706 = vector.extract_strided_slice %497 {offsets = [0, 16], sizes = [20, 16], strides = [1, 1]} : vector<20x168xf32> to vector<20x16xf32>
    %cst_182 = arith.constant 0.176776692 : f32
    %707 = vector.broadcast %cst_182 : f32 to vector<20x16xf32>
    %708 = arith.mulf %706, %707 : vector<20x16xf32>
    %709 = vector.extract_strided_slice %497 {offsets = [0, 48], sizes = [20, 16], strides = [1, 1]} : vector<20x168xf32> to vector<20x16xf32>
    %710 = vector.extract_strided_slice %497 {offsets = [0, 80], sizes = [20, 16], strides = [1, 1]} : vector<20x168xf32> to vector<20x16xf32>
    %711 = vector.extract_strided_slice %510 {offsets = [0, 4], sizes = [20, 4], strides = [1, 1]} : vector<20x8xf32> to vector<20x4xf32>
    %712 = vector.extract_strided_slice %520 {offsets = [0, 4], sizes = [20, 4], strides = [1, 1]} : vector<20x8xf32> to vector<20x4xf32>
    %713 = vector.extract_strided_slice %530 {offsets = [0, 4], sizes = [20, 4], strides = [1, 1]} : vector<20x8xf32> to vector<20x4xf32>
    %714 = vector.extract_strided_slice %543 {offsets = [0, 4], sizes = [20, 4], strides = [1, 1]} : vector<20x8xf32> to vector<20x4xf32>
    %715 = vector.extract_strided_slice %553 {offsets = [0, 4], sizes = [20, 4], strides = [1, 1]} : vector<20x8xf32> to vector<20x4xf32>
    %716 = vector.extract_strided_slice %563 {offsets = [0, 4], sizes = [20, 4], strides = [1, 1]} : vector<20x8xf32> to vector<20x4xf32>
    %717 = vector.extract_strided_slice %576 {offsets = [0, 4], sizes = [20, 4], strides = [1, 1]} : vector<20x8xf32> to vector<20x4xf32>
    %718 = vector.extract_strided_slice %586 {offsets = [0, 4], sizes = [20, 4], strides = [1, 1]} : vector<20x8xf32> to vector<20x4xf32>
    %719 = vector.extract_strided_slice %596 {offsets = [0, 4], sizes = [20, 4], strides = [1, 1]} : vector<20x8xf32> to vector<20x4xf32>
    %c1_183 = arith.constant 1 : index
    %c1_184 = arith.constant 1 : index
    %720 = memref.load %arg0[%c1_183, %c1_184] : memref<2x2xf32, #tpu.memory_space<smem>>
    %cst_185 = arith.constant 0.166666672 : f32
    %721 = arith.mulf %cst_185, %720 : f32
    %722 = tpu.transpose %709, [1, 0] : vector<20x16xf32> -> vector<16x20xf32>
    %cst_186 = arith.constant dense<0.000000e+00> : vector<20x20xf32>
    %723 = tpu.matmul %708, %722, %cst_186 {dimension_numbers = #tpu.dot_dimension_numbers<[1], [0], [0], [1], [0, 0, 1, 1], [], []>} : vector<20x16xf32>, vector<16x20xf32>, vector<20x20xf32> -> vector<20x20xf32>
    %724 = tpu.transpose %714, [1, 0] : vector<20x4xf32> -> vector<4x20xf32>
    %cst_187 = arith.constant dense<0.000000e+00> : vector<20x20xf32>
    %725 = tpu.matmul %711, %724, %cst_187 {dimension_numbers = #tpu.dot_dimension_numbers<[1], [0], [0], [1], [0, 0, 1, 1], [], []>} : vector<20x4xf32>, vector<4x20xf32>, vector<20x20xf32> -> vector<20x20xf32>
    %726 = tpu.transpose %715, [1, 0] : vector<20x4xf32> -> vector<4x20xf32>
    %cst_188 = arith.constant dense<0.000000e+00> : vector<20x20xf32>
    %727 = tpu.matmul %712, %726, %cst_188 {dimension_numbers = #tpu.dot_dimension_numbers<[1], [0], [0], [1], [0, 0, 1, 1], [], []>} : vector<20x4xf32>, vector<4x20xf32>, vector<20x20xf32> -> vector<20x20xf32>
    %728 = arith.addf %725, %727 : vector<20x20xf32>
    %729 = tpu.transpose %716, [1, 0] : vector<20x4xf32> -> vector<4x20xf32>
    %cst_189 = arith.constant dense<0.000000e+00> : vector<20x20xf32>
    %730 = tpu.matmul %713, %729, %cst_189 {dimension_numbers = #tpu.dot_dimension_numbers<[1], [0], [0], [1], [0, 0, 1, 1], [], []>} : vector<20x4xf32>, vector<4x20xf32>, vector<20x20xf32> -> vector<20x20xf32>
    %731 = arith.addf %728, %730 : vector<20x20xf32>
    %732 = arith.mulf %711, %711 : vector<20x4xf32>
    %733 = arith.mulf %712, %712 : vector<20x4xf32>
    %734 = arith.addf %732, %733 : vector<20x4xf32>
    %735 = arith.mulf %713, %713 : vector<20x4xf32>
    %736 = arith.addf %734, %735 : vector<20x4xf32>
    %cst_190 = arith.constant dense<0.000000e+00> : vector<20xf32>
    %737 = vector.multi_reduction <add>, %736, %cst_190 [1] : vector<20x4xf32> to vector<20xf32>
    %738 = vector.shape_cast %737 : vector<20xf32> to vector<20x1xf32>
    %739 = arith.mulf %714, %714 : vector<20x4xf32>
    %740 = arith.mulf %715, %715 : vector<20x4xf32>
    %741 = arith.addf %739, %740 : vector<20x4xf32>
    %742 = arith.mulf %716, %716 : vector<20x4xf32>
    %743 = arith.addf %741, %742 : vector<20x4xf32>
    %cst_191 = arith.constant dense<0.000000e+00> : vector<20xf32>
    %744 = vector.multi_reduction <add>, %743, %cst_191 [1] : vector<20x4xf32> to vector<20xf32>
    %745 = vector.shape_cast %744 : vector<20xf32> to vector<20x1xf32>
    %cst_192 = arith.constant -5.000000e-01 : f32
    %746 = arith.mulf %cst_192, %721 : f32
    %747 = tpu.transpose %745, [1, 0] : vector<20x1xf32> -> vector<1x20xf32>
    %748 = vector.broadcast %738 : vector<20x1xf32> to vector<20x20xf32>
    %749 = vector.broadcast %747 : vector<1x20xf32> to vector<20x20xf32>
    %750 = arith.addf %748, %749 : vector<20x20xf32>
    %751 = vector.broadcast %746 : f32 to vector<20x20xf32>
    %752 = arith.mulf %751, %750 : vector<20x20xf32>
    %753 = vector.broadcast %721 : f32 to vector<20x20xf32>
    %754 = arith.mulf %753, %731 : vector<20x20xf32>
    %755 = arith.addf %752, %754 : vector<20x20xf32>
    %756 = arith.addf %723, %755 : vector<20x20xf32>
    %757 = arith.addf %756, %82 : vector<20x20xf32>
    %cst_193 = arith.constant dense<0xFF800000> : vector<20xf32>
    %758 = vector.multi_reduction <maximumf>, %757, %cst_193 [1] : vector<20x20xf32> to vector<20xf32>
    %759 = vector.shape_cast %758 : vector<20xf32> to vector<20x1xf32>
    %760 = vector.broadcast %759 : vector<20x1xf32> to vector<20x20xf32>
    %761 = arith.subf %757, %760 : vector<20x20xf32>
    %762 = math.exp %761 : vector<20x20xf32>
    %cst_194 = arith.constant dense<0.000000e+00> : vector<20xf32>
    %763 = vector.multi_reduction <add>, %762, %cst_194 [1] : vector<20x20xf32> to vector<20xf32>
    %764 = vector.shape_cast %763 : vector<20xf32> to vector<20x1xf32>
    %765 = tpu.reciprocal %764 : vector<20x1xf32> -> vector<20x1xf32>
    %766 = vector.broadcast %765 : vector<20x1xf32> to vector<20x20xf32>
    %767 = arith.mulf %762, %766 : vector<20x20xf32>
    %cst_195 = arith.constant dense<0.000000e+00> : vector<20x16xf32>
    %768 = tpu.matmul %767, %710, %cst_195 {dimension_numbers = #tpu.dot_dimension_numbers<[1], [0], [0], [1], [0, 0, 1, 1], [], []>} : vector<20x20xf32>, vector<20x16xf32>, vector<20x16xf32> -> vector<20x16xf32>
    %cst_196 = arith.constant dense<0.000000e+00> : vector<20x4xf32>
    %769 = tpu.matmul %767, %717, %cst_196 {dimension_numbers = #tpu.dot_dimension_numbers<[1], [0], [0], [1], [0, 0, 1, 1], [], []>} : vector<20x20xf32>, vector<20x4xf32>, vector<20x4xf32> -> vector<20x4xf32>
    %cst_197 = arith.constant dense<0.000000e+00> : vector<20x4xf32>
    %770 = tpu.matmul %767, %718, %cst_197 {dimension_numbers = #tpu.dot_dimension_numbers<[1], [0], [0], [1], [0, 0, 1, 1], [], []>} : vector<20x20xf32>, vector<20x4xf32>, vector<20x4xf32> -> vector<20x4xf32>
    %cst_198 = arith.constant dense<0.000000e+00> : vector<20x4xf32>
    %771 = tpu.matmul %767, %719, %cst_198 {dimension_numbers = #tpu.dot_dimension_numbers<[1], [0], [0], [1], [0, 0, 1, 1], [], []>} : vector<20x20xf32>, vector<20x4xf32>, vector<20x4xf32> -> vector<20x4xf32>
    %772 = vector.broadcast %94 : vector<20x1xf32> to vector<20x4xf32>
    %773 = arith.subf %769, %772 : vector<20x4xf32>
    %774 = vector.broadcast %95 : vector<20x1xf32> to vector<20x4xf32>
    %775 = arith.subf %770, %774 : vector<20x4xf32>
    %776 = vector.broadcast %96 : vector<20x1xf32> to vector<20x4xf32>
    %777 = arith.subf %771, %776 : vector<20x4xf32>
    %778 = vector.broadcast %84 : vector<20x1xf32> to vector<20x4xf32>
    %779 = arith.mulf %773, %778 : vector<20x4xf32>
    %780 = vector.broadcast %85 : vector<20x1xf32> to vector<20x4xf32>
    %781 = arith.mulf %775, %780 : vector<20x4xf32>
    %782 = arith.addf %779, %781 : vector<20x4xf32>
    %783 = vector.broadcast %86 : vector<20x1xf32> to vector<20x4xf32>
    %784 = arith.mulf %777, %783 : vector<20x4xf32>
    %785 = arith.addf %782, %784 : vector<20x4xf32>
    %786 = vector.broadcast %87 : vector<20x1xf32> to vector<20x4xf32>
    %787 = arith.mulf %773, %786 : vector<20x4xf32>
    %788 = vector.broadcast %88 : vector<20x1xf32> to vector<20x4xf32>
    %789 = arith.mulf %775, %788 : vector<20x4xf32>
    %790 = arith.addf %787, %789 : vector<20x4xf32>
    %791 = vector.broadcast %89 : vector<20x1xf32> to vector<20x4xf32>
    %792 = arith.mulf %777, %791 : vector<20x4xf32>
    %793 = arith.addf %790, %792 : vector<20x4xf32>
    %794 = vector.broadcast %90 : vector<20x1xf32> to vector<20x4xf32>
    %795 = arith.mulf %773, %794 : vector<20x4xf32>
    %796 = vector.broadcast %91 : vector<20x1xf32> to vector<20x4xf32>
    %797 = arith.mulf %775, %796 : vector<20x4xf32>
    %798 = arith.addf %795, %797 : vector<20x4xf32>
    %799 = vector.broadcast %92 : vector<20x1xf32> to vector<20x4xf32>
    %800 = arith.mulf %777, %799 : vector<20x4xf32>
    %801 = arith.addf %798, %800 : vector<20x4xf32>
    %802 = arith.mulf %785, %785 : vector<20x4xf32>
    %803 = arith.mulf %793, %793 : vector<20x4xf32>
    %804 = arith.addf %802, %803 : vector<20x4xf32>
    %805 = arith.mulf %801, %801 : vector<20x4xf32>
    %806 = arith.addf %804, %805 : vector<20x4xf32>
    %cst_199 = arith.constant 9.99999993E-9 : f32
    %807 = vector.broadcast %cst_199 : f32 to vector<20x4xf32>
    %808 = arith.addf %806, %807 : vector<20x4xf32>
    %809 = math.sqrt %808 : vector<20x4xf32>
    %c0_200 = arith.constant 0 : index
    %c16_201 = arith.constant 16 : index
    %810 = vector.load %arg33[%c0_200, %c16_201] : memref<20x64xf32, #tpu.memory_space<vmem>>, vector<20x16xf32>
    tpu.vector_store %arg33[%c0_200, %c16_201], %768 {strides = array<i32>} : memref<20x64xf32, #tpu.memory_space<vmem>>, vector<20x16xf32>,
    %c0_202 = arith.constant 0 : index
    %c44_203 = arith.constant 44 : index
    %811 = vector.load %arg33[%c0_202, %c44_203] : memref<20x64xf32, #tpu.memory_space<vmem>>, vector<20x4xf32>
    tpu.vector_store %arg33[%c0_202, %c44_203], %785 {strides = array<i32>} : memref<20x64xf32, #tpu.memory_space<vmem>>, vector<20x4xf32>,
    %c0_204 = arith.constant 0 : index
    %c48_205 = arith.constant 48 : index
    %812 = vector.load %arg33[%c0_204, %c48_205] : memref<20x64xf32, #tpu.memory_space<vmem>>, vector<20x4xf32>
    tpu.vector_store %arg33[%c0_204, %c48_205], %793 {strides = array<i32>} : memref<20x64xf32, #tpu.memory_space<vmem>>, vector<20x4xf32>,
    %c0_206 = arith.constant 0 : index
    %c52_207 = arith.constant 52 : index
    %813 = vector.load %arg33[%c0_206, %c52_207] : memref<20x64xf32, #tpu.memory_space<vmem>>, vector<20x4xf32>
    tpu.vector_store %arg33[%c0_206, %c52_207], %801 {strides = array<i32>} : memref<20x64xf32, #tpu.memory_space<vmem>>, vector<20x4xf32>,
    %c0_208 = arith.constant 0 : index
    %c60_209 = arith.constant 60 : index
    %814 = vector.load %arg33[%c0_208, %c60_209] : memref<20x64xf32, #tpu.memory_space<vmem>>, vector<20x4xf32>
    tpu.vector_store %arg33[%c0_208, %c60_209], %809 {strides = array<i32>} : memref<20x64xf32, #tpu.memory_space<vmem>>, vector<20x4xf32>,
    %c0_210 = arith.constant 0 : index
    %c0_211 = arith.constant 0 : index
    %815 = vector.load %arg33[%c0_210, %c0_211] : memref<20x64xf32, #tpu.memory_space<vmem>>, vector<20x64xf32>
    %c1_212 = arith.constant 1 : index
    %c0_213 = arith.constant 0 : index
    %c0_214 = arith.constant 0 : index
    %816 = vector.load %arg18[%c1_212, %c0_213, %c0_214] : memref<2x64x64xf32, #tpu.memory_space<vmem>>, vector<1x64x64xf32>
    %817 = vector.shape_cast %816 : vector<1x64x64xf32> to vector<64x64xf32>
    %cst_215 = arith.constant dense<0.000000e+00> : vector<20x64xf32>
    %818 = tpu.matmul %815, %817, %cst_215 {dimension_numbers = #tpu.dot_dimension_numbers<[1], [0], [0], [1], [0, 0, 1, 1], [], []>} : vector<20x64xf32>, vector<64x64xf32>, vector<20x64xf32> -> vector<20x64xf32>
    %c1_216 = arith.constant 1 : index
    %c0_217 = arith.constant 0 : index
    %c0_218 = arith.constant 0 : index
    %819 = vector.load %arg19[%c1_216, %c0_217, %c0_218] : memref<2x1x64xf32, #tpu.memory_space<vmem>>, vector<1x1x64xf32>
    %820 = vector.shape_cast %819 : vector<1x1x64xf32> to vector<1x64xf32>
    %821 = vector.broadcast %820 : vector<1x64xf32> to vector<20x64xf32>
    %822 = arith.addf %818, %821 : vector<20x64xf32>
    %823 = arith.addf %494, %822 : vector<20x64xf32>
    %c1_219 = arith.constant 1 : index
    %c0_220 = arith.constant 0 : index
    %c0_221 = arith.constant 0 : index
    %824 = vector.load %arg20[%c1_219, %c0_220, %c0_221] : memref<2x1x64xf32, #tpu.memory_space<vmem>>, vector<1x1x64xf32>
    %825 = vector.shape_cast %824 : vector<1x1x64xf32> to vector<1x64xf32>
    %c1_222 = arith.constant 1 : index
    %c0_223 = arith.constant 0 : index
    %c0_224 = arith.constant 0 : index
    %826 = vector.load %arg21[%c1_222, %c0_223, %c0_224] : memref<2x1x64xf32, #tpu.memory_space<vmem>>, vector<1x1x64xf32>
    %827 = vector.shape_cast %826 : vector<1x1x64xf32> to vector<1x64xf32>
    %cst_225 = arith.constant dense<0.000000e+00> : vector<20xf32>
    %828 = vector.multi_reduction <add>, %823, %cst_225 [1] : vector<20x64xf32> to vector<20xf32>
    %829 = vector.shape_cast %828 : vector<20xf32> to vector<20x1xf32>
    %cst_226 = arith.constant 6.400000e+01 : f32
    %830 = vector.broadcast %cst_226 : f32 to vector<20x1xf32>
    %831 = arith.divf %829, %830 : vector<20x1xf32>
    %832 = vector.broadcast %831 : vector<20x1xf32> to vector<20x64xf32>
    %833 = arith.subf %823, %832 : vector<20x64xf32>
    %834 = arith.mulf %833, %833 : vector<20x64xf32>
    %cst_227 = arith.constant dense<0.000000e+00> : vector<20xf32>
    %835 = vector.multi_reduction <add>, %834, %cst_227 [1] : vector<20x64xf32> to vector<20xf32>
    %836 = vector.shape_cast %835 : vector<20xf32> to vector<20x1xf32>
    %cst_228 = arith.constant 6.400000e+01 : f32
    %837 = vector.broadcast %cst_228 : f32 to vector<20x1xf32>
    %838 = arith.divf %836, %837 : vector<20x1xf32>
    %839 = vector.broadcast %831 : vector<20x1xf32> to vector<20x64xf32>
    %840 = arith.subf %823, %839 : vector<20x64xf32>
    %cst_229 = arith.constant 9.99999974E-6 : f32
    %841 = vector.broadcast %cst_229 : f32 to vector<20x1xf32>
    %842 = arith.addf %838, %841 : vector<20x1xf32>
    %843 = math.rsqrt %842 : vector<20x1xf32>
    %844 = vector.broadcast %843 : vector<20x1xf32> to vector<20x64xf32>
    %845 = arith.mulf %840, %844 : vector<20x64xf32>
    %846 = vector.broadcast %825 : vector<1x64xf32> to vector<20x64xf32>
    %847 = arith.mulf %845, %846 : vector<20x64xf32>
    %848 = vector.broadcast %827 : vector<1x64xf32> to vector<20x64xf32>
    %849 = arith.addf %847, %848 : vector<20x64xf32>
    %c1_230 = arith.constant 1 : index
    %c0_231 = arith.constant 0 : index
    %c0_232 = arith.constant 0 : index
    %850 = vector.load %arg22[%c1_230, %c0_231, %c0_232] : memref<2x64x64xf32, #tpu.memory_space<vmem>>, vector<1x64x64xf32>
    %851 = vector.shape_cast %850 : vector<1x64x64xf32> to vector<64x64xf32>
    %cst_233 = arith.constant dense<0.000000e+00> : vector<20x64xf32>
    %852 = tpu.matmul %849, %851, %cst_233 {dimension_numbers = #tpu.dot_dimension_numbers<[1], [0], [0], [1], [0, 0, 1, 1], [], []>} : vector<20x64xf32>, vector<64x64xf32>, vector<20x64xf32> -> vector<20x64xf32>
    %c1_234 = arith.constant 1 : index
    %c0_235 = arith.constant 0 : index
    %c0_236 = arith.constant 0 : index
    %853 = vector.load %arg23[%c1_234, %c0_235, %c0_236] : memref<2x1x64xf32, #tpu.memory_space<vmem>>, vector<1x1x64xf32>
    %854 = vector.shape_cast %853 : vector<1x1x64xf32> to vector<1x64xf32>
    %855 = vector.broadcast %854 : vector<1x64xf32> to vector<20x64xf32>
    %856 = arith.addf %852, %855 : vector<20x64xf32>
    %cst_237 = arith.constant 0.000000e+00 : f32
    %857 = vector.broadcast %cst_237 : f32 to vector<20x64xf32>
    %858 = arith.maximumf %856, %857 : vector<20x64xf32>
    %c1_238 = arith.constant 1 : index
    %c0_239 = arith.constant 0 : index
    %c0_240 = arith.constant 0 : index
    %859 = vector.load %arg24[%c1_238, %c0_239, %c0_240] : memref<2x64x64xf32, #tpu.memory_space<vmem>>, vector<1x64x64xf32>
    %860 = vector.shape_cast %859 : vector<1x64x64xf32> to vector<64x64xf32>
    %cst_241 = arith.constant dense<0.000000e+00> : vector<20x64xf32>
    %861 = tpu.matmul %858, %860, %cst_241 {dimension_numbers = #tpu.dot_dimension_numbers<[1], [0], [0], [1], [0, 0, 1, 1], [], []>} : vector<20x64xf32>, vector<64x64xf32>, vector<20x64xf32> -> vector<20x64xf32>
    %c1_242 = arith.constant 1 : index
    %c0_243 = arith.constant 0 : index
    %c0_244 = arith.constant 0 : index
    %862 = vector.load %arg25[%c1_242, %c0_243, %c0_244] : memref<2x1x64xf32, #tpu.memory_space<vmem>>, vector<1x1x64xf32>
    %863 = vector.shape_cast %862 : vector<1x1x64xf32> to vector<1x64xf32>
    %864 = vector.broadcast %863 : vector<1x64xf32> to vector<20x64xf32>
    %865 = arith.addf %861, %864 : vector<20x64xf32>
    %866 = arith.addf %849, %865 : vector<20x64xf32>
    %c1_245 = arith.constant 1 : index
    %c0_246 = arith.constant 0 : index
    %c0_247 = arith.constant 0 : index
    %867 = vector.load %arg26[%c1_245, %c0_246, %c0_247] : memref<2x1x64xf32, #tpu.memory_space<vmem>>, vector<1x1x64xf32>
    %868 = vector.shape_cast %867 : vector<1x1x64xf32> to vector<1x64xf32>
    %c1_248 = arith.constant 1 : index
    %c0_249 = arith.constant 0 : index
    %c0_250 = arith.constant 0 : index
    %869 = vector.load %arg27[%c1_248, %c0_249, %c0_250] : memref<2x1x64xf32, #tpu.memory_space<vmem>>, vector<1x1x64xf32>
    %870 = vector.shape_cast %869 : vector<1x1x64xf32> to vector<1x64xf32>
    %cst_251 = arith.constant dense<0.000000e+00> : vector<20xf32>
    %871 = vector.multi_reduction <add>, %866, %cst_251 [1] : vector<20x64xf32> to vector<20xf32>
    %872 = vector.shape_cast %871 : vector<20xf32> to vector<20x1xf32>
    %cst_252 = arith.constant 6.400000e+01 : f32
    %873 = vector.broadcast %cst_252 : f32 to vector<20x1xf32>
    %874 = arith.divf %872, %873 : vector<20x1xf32>
    %875 = vector.broadcast %874 : vector<20x1xf32> to vector<20x64xf32>
    %876 = arith.subf %866, %875 : vector<20x64xf32>
    %877 = arith.mulf %876, %876 : vector<20x64xf32>
    %cst_253 = arith.constant dense<0.000000e+00> : vector<20xf32>
    %878 = vector.multi_reduction <add>, %877, %cst_253 [1] : vector<20x64xf32> to vector<20xf32>
    %879 = vector.shape_cast %878 : vector<20xf32> to vector<20x1xf32>
    %cst_254 = arith.constant 6.400000e+01 : f32
    %880 = vector.broadcast %cst_254 : f32 to vector<20x1xf32>
    %881 = arith.divf %879, %880 : vector<20x1xf32>
    %882 = vector.broadcast %874 : vector<20x1xf32> to vector<20x64xf32>
    %883 = arith.subf %866, %882 : vector<20x64xf32>
    %cst_255 = arith.constant 9.99999974E-6 : f32
    %884 = vector.broadcast %cst_255 : f32 to vector<20x1xf32>
    %885 = arith.addf %881, %884 : vector<20x1xf32>
    %886 = math.rsqrt %885 : vector<20x1xf32>
    %887 = vector.broadcast %886 : vector<20x1xf32> to vector<20x64xf32>
    %888 = arith.mulf %883, %887 : vector<20x64xf32>
    %889 = vector.broadcast %868 : vector<1x64xf32> to vector<20x64xf32>
    %890 = arith.mulf %888, %889 : vector<20x64xf32>
    %891 = vector.broadcast %870 : vector<1x64xf32> to vector<20x64xf32>
    %892 = arith.addf %890, %891 : vector<20x64xf32>
    %c0_256 = arith.constant 0 : index
    %c0_257 = arith.constant 0 : index
    %893 = vector.load %arg30[%c0_256, %c0_257] : memref<20x64xf32, #tpu.memory_space<vmem>>, vector<20x64xf32>
    tpu.vector_store %arg30[%c0_256, %c0_257], %892 {strides = array<i32>} : memref<20x64xf32, #tpu.memory_space<vmem>>, vector<20x64xf32>,
    %c0_258 = arith.constant 0 : index
    %c0_259 = arith.constant 0 : index
    %894 = vector.load %arg28[%c0_258, %c0_259] : memref<64x8xf32, #tpu.memory_space<vmem>>, vector<64x8xf32>
    %cst_260 = arith.constant dense<0.000000e+00> : vector<20x8xf32>
    %895 = tpu.matmul %892, %894, %cst_260 {dimension_numbers = #tpu.dot_dimension_numbers<[1], [0], [0], [1], [0, 0, 1, 1], [], []>} : vector<20x64xf32>, vector<64x8xf32>, vector<20x8xf32> -> vector<20x8xf32>
    %c0_261 = arith.constant 0 : index
    %c0_262 = arith.constant 0 : index
    %896 = vector.load %arg29[%c0_261, %c0_262] : memref<1x8xf32, #tpu.memory_space<vmem>>, vector<1x8xf32>
    %897 = vector.broadcast %896 : vector<1x8xf32> to vector<20x8xf32>
    %898 = arith.addf %895, %897 : vector<20x8xf32>
    %c0_263 = arith.constant 0 : index
    %c0_264 = arith.constant 0 : index
    %899 = vector.load %arg31[%c0_263, %c0_264] : memref<20x8xf32, #tpu.memory_space<vmem>>, vector<20x8xf32>
    tpu.vector_store %arg31[%c0_263, %c0_264], %898 {strides = array<i32>} : memref<20x8xf32, #tpu.memory_space<vmem>>, vector<20x8xf32>,
    return
  }
}

</mosaic_0001>

<bundles_post_ra>
// kernel: flow_matching_ipt_forward.1
= control target key start
LH: loop header
LB: loop body
LE: loop exit
PB: predicated region body
PF: predicated region fallthrough
CT: control target
= control target key end

     0   :  { %s9539_s6 = smov 1   ;;  %s9540_s10 = smov 2   ;;  %s12206_s0 = inlined_call_operand.smem [shape: u32[32], index: -1, kind: input, shape index: {}] }
   0x1   :  { %s9624_s5 = sld [smem:[%s12206_s0]]   ;;  %s9541_s14 = smov 3  }
   0x2   :  { %s9629_s9 = sld [smem:[%s12206_s0 + %s9539_s6]]   ;;  %s9542_s18 = smov 4  }
   0x3   :  { %s9634_s13 = sld [smem:[%s12206_s0 + %s9540_s10]]   ;;  %s9543_s22 = smov 5  }
   0x4   :  { %s9639_s17 = sld [smem:[%s12206_s0 + %s9541_s14]]   ;;  %s9544_s26 = smov 6  }
   0x5   :  { %s9644_s21 = sld [smem:[%s12206_s0 + %s9542_s18]]   ;;  %s9545_s30 = smov 7  }
   0x6   :  { %s9649_s25 = sld [smem:[%s12206_s0 + %s9543_s22]]   ;;  %s9546_s4 = smov 8  }
   0x7   :  { %s9654_s29 = sld [smem:[%s12206_s0 + %s9544_s26]]   ;;  %s9547_s10 = smov 9  }
   0x8   :  { %12345 = sst [smem:[#allocation34_spill]] %s9629_s9  ;;  %s9548_s15 = smov 10  }
   0x9   :  { %12346 = sst [smem:[#allocation35_spill]] %s9634_s13  ;;  %s9549_s20 = smov 11  }
   0xa   :  { %12347 = sst [smem:[#allocation36_spill]] %s9639_s17  ;;  %s9550_s26 = smov 12  }
   0xb   :  { %12348 = sst [smem:[#allocation37_spill]] %s9644_s21  ;;  %s9551_s1 = smov 13  }
   0xc   :  { %12349 = sst [smem:[#allocation38_spill]] %s9649_s25  ;;  %s9552_s7 = smov 14  }
   0xd   :  { %12350 = sst [smem:[#allocation39_spill]] %s9654_s29  ;;  %s9554_s22 = smov 16  }
   0xe   :  { %s9659_s3 = sld [smem:[%s12206_s0 + %s9545_s30]]   ;;  %s9555_s28 = smov 17  }
   0xf   :  { %s9664_s8 = sld [smem:[%s12206_s0 + %s9546_s4]]  }
  0x10   :  { %s9669_s14 = sld [smem:[%s12206_s0 + %s9547_s10]]  }
  0x11   :  { %s9674_s19 = sld [smem:[%s12206_s0 + %s9548_s15]]   ;;  %s9553_s15 = smov 15  }
  0x12   :  { %s9679_s24 = sld [smem:[%s12206_s0 + %s9549_s20]]  }
  0x13   :  { %s9684_s30 = sld [smem:[%s12206_s0 + %s9550_s26]]  }
  0x14   :  { %s9689_s6 = sld [smem:[%s12206_s0 + %s9551_s1]]  }
  0x15   :  { %s9694_s12 = sld [smem:[%s12206_s0 + %s9552_s7]]   ;;  %s9556_s7 = smov 18  }
  0x16   :  { %12351 = sst [smem:[#allocation40_spill]] %s9669_s14 }
  0x17   :  { %s9699_s20 = sld [smem:[%s12206_s0 + %s9553_s15]]   ;;  %s9557_s15 = smov 19  }
  0x18   :  { %s9704_s27 = sld [smem:[%s12206_s0 + %s9554_s22]]   ;;  %s9558_s22 = smov 20  }
  0x19   :  { %12352 = sst [smem:[#allocation41_spill]] %s9684_s30 }
  0x1a   :  { %12353 = sst [smem:[#allocation42_spill]] %s9689_s6 }
  0x1b   :  { %s9709_s4 = sld [smem:[%s12206_s0 + %s9555_s28]]   ;;  %s9559_s28 = smov 21  }
  0x1c   :  { %s9714_s9 = sld [smem:[%s12206_s0 + %s9556_s7]]   ;;  %s9560_s7 = smov 22  }
  0x1d   :  { %12354 = sst [smem:[#allocation43_spill]] %s9699_s20 }
  0x1e   :  { %s9719_s29 = sld [smem:[%s12206_s0 + %s9557_s15]]   ;;  %s9561_s15 = smov 23  }
  0x1f   :  { %s9724_s21 = sld [smem:[%s12206_s0 + %s9558_s22]]   ;;  %s9562_s22 = smov 24  }
  0x20   :  { %s9729_s25 = sld [smem:[%s12206_s0 + %s9559_s28]]   ;;  %s9563_s28 = smov 25  }
  0x21   :  { %12355 = sst [smem:[#allocation44_spill]] %s9709_s4 }
  0x22   :  { %12356 = sst [smem:[#allocation45_spill]] %s9714_s9 }
  0x23   :  { %s9734_s9 = sld [smem:[%s12206_s0 + %s9560_s7]]   ;;  %s9564_s7 = smov 26  }
  0x24   :  { %s9739_s4 = sld [smem:[%s12206_s0 + %s9561_s15]]   ;;  %s9565_s15 = smov 27  }
  0x25   :  { %s9744_s6 = sld [smem:[%s12206_s0 + %s9562_s22]]   ;;  %s9566_s22 = smov 28  }
  0x26   :  { %s9749_s20 = sld [smem:[%s12206_s0 + %s9563_s28]]   ;;  %s9567_s28 = smov 29  }
  0x27   :  { %s9759_s30 = sld [smem:[%s12206_s0 + %s9565_s15]]   ;;  %s9569_s15 = smov 31  }
  0x28   :  { %s9769_s14 = sld [smem:[%s12206_s0 + %s9567_s28]]  }
  0x29   :  { %12357 = sst [smem:[#allocation46_spill]] %s9734_s9 }
  0x2a   :  { %s9754_s9 = sld [smem:[%s12206_s0 + %s9564_s7]]   ;;  %s9568_s7 = smov 30  }
  0x2b   :  { %12358 = sst [smem:[#allocation47_spill]] %s9744_s6 }
  0x2c   :  { %s9764_s6 = sld [smem:[%s12206_s0 + %s9566_s22]]  }
  0x2d   :  { %s9774_s17 = sld [smem:[%s12206_s0 + %s9568_s7]]  }
  0x2e   :  { %s9779_s13 = sld [smem:[%s12206_s0 + %s9569_s15]]  }
  0x2f   :  { %69 = vsyncpa [#allocation6], 0 }
  0x30   :  { %70 = vsyncpa [#allocation5], 0 }
  0x31   :  { %71 = vsyncpa [#allocation9], 0 }
  0x32   :  { %72 = vsyncpa [#allocation12], 0 }
  0x33   :  { %73 = vsyncpa [#allocation15], 0 }
  0x34   :  { %74 = vsyncpa [#allocation18], 0 }
  0x35   :  { %75 = vsyncpa [#allocation21], 0 }
  0x36   :  { %76 = vsyncpa [#allocation24], 0  ;;  %s9570_s22 = smov [#allocation8]   ;;  %s9571_s26 = smov [#allocation11]  }
  0x37   :  { %s117_s23 = sshll.u32 %s9570_s22, 4  ;;  %s145_s28 = sshll.u32 %s9571_s26, 4  ;;  %s118_s23 = int_to_ptr.vmem [resolvable:$true] %s117_s23  ;;  %s146_s28 = int_to_ptr.vmem [resolvable:$true] %s145_s28 }
  0x38   :  { %s9225_s1 = scalar_lea.hbm %s9664_s8, 16 }
  0x39   :  { %p9226_p0 = scmp.ne.s32.totalorder %s9664_s8, %s9225_s1  ;;  %p9229_p1 = scmp.lt.u32.totalorder %s9225_s1, %s9664_s8 }
  0x3b   :  { %p9231_p2 = pnand %p9229_p1, %p9226_p0 }
  0x3d   :  { %9234 = shalt.err (!%p9231_p2)
}
  0x3e   :  { %s9235_s0 = scalar_lea.vmem %s118_s23, 16  ;;  %s9239_s2 = scalar_lea.vmem %s118_s23, 32 }
  0x3f   :  { %p9236_p3 = scmp.ne.s32.totalorder %s118_s23, %s9235_s0  ;;  %p9240_p4 = scmp.lt.s32.totalorder %s118_s23, %s118_s23 }
  0x40   :  { %p9241_p5 = scmp.lt.s32.totalorder %s9239_s2, %s9235_s0 }
  0x42   :  { %p9242_p6 = por %p9241_p5, %p9240_p4 }
  0x44   :  { %p9243_p7 = pnand %p9242_p6, %p9236_p3 }
  0x46   :  { %9246 = shalt.err (!%p9243_p7)
}
  0x47   :  { %120 = dma.hbm_to_vmem [thread:$0]  %s9664_s8, 16, %s118_s23, [#allocation9]  }
  0x48   :  { %s9247_s7 = scalar_lea.hbm %s9694_s12, 16 }
  0x49   :  { %p9248_p8 = scmp.ne.s32.totalorder %s9694_s12, %s9247_s7  ;;  %p9251_p9 = scmp.lt.u32.totalorder %s9247_s7, %s9694_s12 }
  0x4b   :  { %p9253_p10 = pnand %p9251_p9, %p9248_p8 }
  0x4d   :  { %9256 = shalt.err (!%p9253_p10)
}
  0x4e   :  { %s9257_s10 = scalar_lea.vmem %s146_s28, 16  ;;  %s9261_s11 = scalar_lea.vmem %s146_s28, 32 }
  0x4f   :  { %p9258_p11 = scmp.ne.s32.totalorder %s146_s28, %s9257_s10  ;;  %p9262_p12 = scmp.lt.s32.totalorder %s146_s28, %s146_s28 }
  0x50   :  { %p9263_p13 = scmp.lt.s32.totalorder %s9261_s11, %s9257_s10 }
  0x52   :  { %p9264_p0 = por %p9263_p13, %p9262_p12 }
  0x54   :  { %p9265_p1 = pnand %p9264_p0, %p9258_p11 }
  0x56   :  { %9268 = shalt.err (!%p9265_p1)
}
  0x57   :  { %148 = dma.hbm_to_vmem [thread:$0]  %s9694_s12, 16, %s146_s28, [#allocation12]  }
  0x58   :  { %s9572_s15 = smov [#allocation14]   ;;  %s9269_s16 = scalar_lea.hbm %s9719_s29, 32 }
  0x59   :  { %s170_s8 = sshll.u32 %s9572_s15, 4  ;;  %p9270_p2 = scmp.ne.s32.totalorder %s9719_s29, %s9269_s16  ;;  %s171_s8 = int_to_ptr.vmem [resolvable:$true] %s170_s8 }
  0x5a   :  { %p9273_p3 = scmp.lt.u32.totalorder %s9269_s16, %s9719_s29 }
  0x5c   :  { %p9275_p4 = pnand %p9273_p3, %p9270_p2 }
  0x5e   :  { %9278 = shalt.err (!%p9275_p4)
}
  0x5f   :  { %s9279_s18 = scalar_lea.vmem %s171_s8, 32  ;;  %p9284_p6 = scmp.lt.s32.totalorder %s171_s8, %s171_s8 }
  0x60   :  { %p9280_p5 = scmp.ne.s32.totalorder %s171_s8, %s9279_s18  ;;  %p9285_p7 = scmp.lt.s32.totalorder %s9279_s18, %s9279_s18 }
  0x62   :  { %p9286_p8 = por %p9285_p7, %p9284_p6 }
  0x64   :  { %p9287_p9 = pnand %p9286_p8, %p9280_p5 }
  0x66   :  { %9290 = shalt.err (!%p9287_p9)
}
  0x67   :  { %s9573_s22 = smov 16   ;;  %s9574_s12 = smov 1  }
  0x68   :  { %176 = dma.hbm_to_vmem [thread:$0]  %s9719_s29, 32, %s171_s8, [#allocation15], %s9573_s22, %s9573_s22, %s9574_s12  }
  0x69   :  { %s9575_s23 = smov [#allocation17]   ;;  %s9576_s28 = smov [#allocation20]  }
  0x6a   :  { %s194_s26 = sshll.u32 %s9575_s23, 4  ;;  %s222_s1 = sshll.u32 %s9576_s28, 4  ;;  %s195_s26 = int_to_ptr.vmem [resolvable:$true] %s194_s26  ;;  %s223_s1 = int_to_ptr.vmem [resolvable:$true] %s222_s1 }
  0x6b   :  { %s9291_s0 = scalar_lea.hbm %s9729_s25, 32 }
  0x6c   :  { %p9292_p10 = scmp.ne.s32.totalorder %s9729_s25, %s9291_s0  ;;  %p9295_p11 = scmp.lt.u32.totalorder %s9291_s0, %s9729_s25 }
  0x6e   :  { %p9297_p12 = pnand %p9295_p11, %p9292_p10 }
  0x70   :  { %9300 = shalt.err (!%p9297_p12)
}
  0x71   :  { %s9301_s2 = scalar_lea.vmem %s195_s26, 32  ;;  %p9306_p0 = scmp.lt.s32.totalorder %s195_s26, %s195_s26 }
  0x72   :  { %p9302_p13 = scmp.ne.s32.totalorder %s195_s26, %s9301_s2  ;;  %p9307_p1 = scmp.lt.s32.totalorder %s9301_s2, %s9301_s2 }
  0x74   :  { %p9308_p2 = por %p9307_p1, %p9306_p0 }
  0x76   :  { %p9309_p3 = pnand %p9308_p2, %p9302_p13 }
  0x78   :  { %9312 = shalt.err (!%p9309_p3)
}
  0x79   :  { %200 = dma.hbm_to_vmem [thread:$0]  %s9729_s25, 32, %s195_s26, [#allocation18], %s9573_s22, %s9573_s22, %s9574_s12  }
  0x7a   :  { %s9313_s29 = scalar_lea.hbm %s9749_s20, 32 }
  0x7b   :  { %p9314_p4 = scmp.ne.s32.totalorder %s9749_s20, %s9313_s29  ;;  %p9317_p5 = scmp.lt.u32.totalorder %s9313_s29, %s9749_s20 }
  0x7d   :  { %p9319_p6 = pnand %p9317_p5, %p9314_p4 }
  0x7f   :  { %9322 = shalt.err (!%p9319_p6)
}
  0x80   :  { %s9323_s7 = scalar_lea.vmem %s223_s1, 32  ;;  %p9328_p8 = scmp.lt.s32.totalorder %s223_s1, %s223_s1 }
  0x81   :  { %p9324_p7 = scmp.ne.s32.totalorder %s223_s1, %s9323_s7  ;;  %p9329_p9 = scmp.lt.s32.totalorder %s9323_s7, %s9323_s7 }
  0x83   :  { %p9330_p10 = por %p9329_p9, %p9328_p8 }
  0x85   :  { %p9331_p11 = pnand %p9330_p10, %p9324_p7 }
  0x87   :  { %9334 = shalt.err (!%p9331_p11)
}
  0x88   :  { %228 = dma.hbm_to_vmem [thread:$0]  %s9749_s20, 32, %s223_s1, [#allocation21], %s9573_s22, %s9573_s22, %s9574_s12  }
  0x89   :  { %s9577_s25 = smov [#allocation23]   ;;  %s83_s11 = sshll.u32 %s9624_s5, 4  ;;  %s84_s11 = int_to_ptr.vmem [resolvable:$true] %s83_s11 }
  0x8a   :  { %s246_s10 = sshll.u32 %s9577_s25, 4  ;;  %s9335_s15 = scalar_lea.hbm %s9759_s30, 32  ;;  %s247_s10 = int_to_ptr.vmem [resolvable:$true] %s246_s10 }
  0x8b   :  { %p9336_p12 = scmp.ne.s32.totalorder %s9759_s30, %s9335_s15  ;;  %p9339_p13 = scmp.lt.u32.totalorder %s9335_s15, %s9759_s30 }
  0x8d   :  { %p9341_p0 = pnand %p9339_p13, %p9336_p12 }
  0x8f   :  { %9344 = shalt.err (!%p9341_p0)
}
  0x90   :  { %s9345_s8 = scalar_lea.vmem %s247_s10, 32  ;;  %p9350_p2 = scmp.lt.s32.totalorder %s247_s10, %s247_s10 }
  0x91   :  { %p9346_p1 = scmp.ne.s32.totalorder %s247_s10, %s9345_s8  ;;  %p9351_p3 = scmp.lt.s32.totalorder %s9345_s8, %s9345_s8 }
  0x93   :  { %p9352_p4 = por %p9351_p3, %p9350_p2 }
  0x95   :  { %p9353_p5 = pnand %p9352_p4, %p9346_p1 }
  0x97   :  { %9356 = shalt.err (!%p9353_p5)
}
  0x98   :  { %252 = dma.hbm_to_vmem [thread:$0]  %s9759_s30, 32, %s247_s10, [#allocation24], %s9573_s22, %s9573_s22, %s9574_s12  }
  0x99   :  { %s9357_s5 = scalar_lea.vmem %s84_s11, 32  ;;  %p9362_p7 = scmp.lt.s32.totalorder %s84_s11, %s84_s11 }
  0x9a   :  { %p9358_p6 = scmp.ne.s32.totalorder %s84_s11, %s9357_s5  ;;  %p9363_p8 = scmp.lt.s32.totalorder %s9357_s5, %s9357_s5 }
  0x9c   :  { %p9364_p9 = por %p9363_p8, %p9362_p7 }
  0x9e   :  { %p9365_p10 = pnand %p9364_p9, %p9358_p6 }
  0xa0   :  { %9368 = shalt.err (!%p9365_p10)
}
  0xa1   :  { %s9578_s20 = smov [#allocation4]   ;;  %s9579_s16 = smov [#allocation7]  }
  0xa2   :  { %86 = dma.vmem_to_smem %s84_s11, 32, %s9578_s20, [#allocation6]  }
  0xa3   :  { %s104_s18 = sshll.u32 %s9579_s16, 4  ;;  %s9369_s23 = scalar_lea.hbm %s9659_s3, 256  ;;  %s105_s18 = int_to_ptr.vmem [resolvable:$true] %s104_s18 }
  0xa4   :  { %p9370_p11 = scmp.ne.s32.totalorder %s9659_s3, %s9369_s23  ;;  %p9373_p12 = scmp.lt.u32.totalorder %s9369_s23, %s9659_s3 }
  0xa6   :  { %p9375_p13 = pnand %p9373_p12, %p9370_p11 }
  0xa8   :  { %9378 = shalt.err (!%p9375_p13)
}
  0xa9   :  { %s9379_s30 = scalar_lea.vmem %s105_s18, 256  ;;  %p9384_p1 = scmp.lt.s32.totalorder %s105_s18, %s105_s18 }
  0xaa   :  { %p9380_p0 = scmp.ne.s32.totalorder %s105_s18, %s9379_s30  ;;  %p9385_p2 = scmp.lt.s32.totalorder %s9379_s30, %s9379_s30 }
  0xac   :  { %p9386_p3 = por %p9385_p2, %p9384_p1 }
  0xae   :  { %p9387_p4 = pnand %p9386_p3, %p9380_p0 }
  0xb0   :  { %9390 = shalt.err (!%p9387_p4)
}
  0xb1   :  { %s9580_s26 = smov 128   ;;  %s9581_s28 = smov 8  }
  0xb2   :  { %110 = dma.hbm_to_vmem [thread:$0]  %s9659_s3, 256, %s105_s18, [#allocation5], %s9580_s26, %s9580_s26, %s9581_s28  }
  0xb3   :  { %s9582_s1 = smov [#allocation10]   ;;  %s9583_s2 = smov [#allocation13]  }
  0xb4   :  { %s129_s0 = sshll.u32 %s9582_s1, 4  ;;  %s157_s29 = sshll.u32 %s9583_s2, 4  ;;  %s130_s0 = int_to_ptr.vmem [resolvable:$true] %s129_s0  ;;  %s158_s29 = int_to_ptr.vmem [resolvable:$true] %s157_s29 }
  0xb5   :  { %s9391_s7 = scalar_lea.hbm %s9674_s19, 16 }
  0xb6   :  { %p9392_p5 = scmp.ne.s32.totalorder %s9674_s19, %s9391_s7  ;;  %p9395_p6 = scmp.lt.u32.totalorder %s9391_s7, %s9674_s19 }
  0xb8   :  { %p9397_p7 = pnand %p9395_p6, %p9392_p5 }
  0xba   :  { %9400 = shalt.err (!%p9397_p7)
}
  0xbb   :  { %s9401_s25 = scalar_lea.vmem %s130_s0, 16  ;;  %s9405_s10 = scalar_lea.vmem %s130_s0, 32 }
  0xbc   :  { %p9402_p8 = scmp.ne.s32.totalorder %s130_s0, %s9401_s25  ;;  %p9406_p9 = scmp.lt.s32.totalorder %s130_s0, %s130_s0 }
  0xbd   :  { %p9407_p10 = scmp.lt.s32.totalorder %s9405_s10, %s9401_s25 }
  0xbf   :  { %p9408_p11 = por %p9407_p10, %p9406_p9 }
  0xc1   :  { %p9409_p12 = pnand %p9408_p11, %p9402_p8 }
  0xc3   :  { %9412 = shalt.err (!%p9409_p12)
}
  0xc4   :  { %132 = dma.hbm_to_vmem [thread:$0]  %s9674_s19, 16, %s130_s0, [#allocation9]  }
  0xc5   :  { %s9413_s3 = scalar_lea.hbm %s9704_s27, 16 }
  0xc6   :  { %p9414_p13 = scmp.ne.s32.totalorder %s9704_s27, %s9413_s3  ;;  %p9417_p0 = scmp.lt.u32.totalorder %s9413_s3, %s9704_s27 }
  0xc8   :  { %p9419_p1 = pnand %p9417_p0, %p9414_p13 }
  0xca   :  { %9422 = shalt.err (!%p9419_p1)
}
  0xcb   :  { %s9423_s11 = scalar_lea.vmem %s158_s29, 16  ;;  %s9427_s15 = scalar_lea.vmem %s158_s29, 32 }
  0xcc   :  { %p9424_p2 = scmp.ne.s32.totalorder %s158_s29, %s9423_s11  ;;  %p9428_p3 = scmp.lt.s32.totalorder %s158_s29, %s158_s29 }
  0xcd   :  { %p9429_p4 = scmp.lt.s32.totalorder %s9427_s15, %s9423_s11 }
  0xcf   :  { %p9430_p5 = por %p9429_p4, %p9428_p3 }
  0xd1   :  { %p9431_p6 = pnand %p9430_p5, %p9424_p2 }
  0xd3   :  { %9434 = shalt.err (!%p9431_p6)
}
  0xd4   :  { %160 = dma.hbm_to_vmem [thread:$0]  %s9704_s27, 16, %s158_s29, [#allocation12]  }
  0xd5   :  { %s9584_s8 = smov [#allocation16]   ;;  %s9585_s5 = smov [#allocation19]  }
  0xd6   :  { %s182_s19 = sshll.u32 %s9584_s8, 4  ;;  %s208_s20 = sshll.u32 %s9585_s5, 4  ;;  %s183_s19 = int_to_ptr.vmem [resolvable:$true] %s182_s19  ;;  %s9831_s20 = int_to_ptr.vmem [resolvable:$true] %s208_s20 }
  0xd7   :  { %s9435_s16 = scalar_lea.hbm %s9724_s21, 32 }
  0xd8   :  { %p9436_p7 = scmp.ne.s32.totalorder %s9724_s21, %s9435_s16  ;;  %p9439_p8 = scmp.lt.u32.totalorder %s9435_s16, %s9724_s21 }
  0xda   :  { %p9441_p9 = pnand %p9439_p8, %p9436_p7 }
  0xdc   :  { %9444 = shalt.err (!%p9441_p9)
}
  0xdd   :  { %s9445_s18 = scalar_lea.vmem %s183_s19, 32  ;;  %p9450_p11 = scmp.lt.s32.totalorder %s183_s19, %s183_s19 }
  0xde   :  { %p9446_p10 = scmp.ne.s32.totalorder %s183_s19, %s9445_s18  ;;  %p9451_p12 = scmp.lt.s32.totalorder %s9445_s18, %s9445_s18 }
  0xe0   :  { %p9452_p13 = por %p9451_p12, %p9450_p11 }
  0xe2   :  { %p9453_p0 = pnand %p9452_p13, %p9446_p10 }
  0xe4   :  { %9456 = shalt.err (!%p9453_p0)
}
  0xe5   :  { %188 = dma.hbm_to_vmem [thread:$0]  %s9724_s21, 32, %s183_s19, [#allocation15], %s9573_s22, %s9573_s22, %s9574_s12  }
  0xe6   :  { %s9457_s27 = scalar_lea.hbm %s9739_s4, 32 }
  0xe7   :  { %p9458_p1 = scmp.ne.s32.totalorder %s9739_s4, %s9457_s27  ;;  %p9461_p2 = scmp.lt.u32.totalorder %s9457_s27, %s9739_s4 }
  0xe9   :  { %p9463_p3 = pnand %p9461_p2, %p9458_p1 }
  0xeb   :  { %9466 = shalt.err (!%p9463_p3)
}
  0xec   :  { %s9467_s23 = scalar_lea.vmem %s9831_s20, 32  ;;  %p9472_p5 = scmp.lt.s32.totalorder %s9831_s20, %s9831_s20 }
  0xed   :  { %p9468_p4 = scmp.ne.s32.totalorder %s9831_s20, %s9467_s23  ;;  %p9473_p6 = scmp.lt.s32.totalorder %s9467_s23, %s9467_s23 }
  0xef   :  { %p9474_p7 = por %p9473_p6, %p9472_p5 }
  0xf1   :  { %p9475_p8 = pnand %p9474_p7, %p9468_p4 }
  0xf3   :  { %9478 = shalt.err (!%p9475_p8)
}
  0xf4   :  { %214 = dma.hbm_to_vmem [thread:$0]  %s9739_s4, 32, %s9831_s20, [#allocation18], %s9573_s22, %s9573_s22, %s9574_s12  }
  0xf5   :  { %s9586_s21 = smov [#allocation22]   ;;  %s9587_s26 = smov [#allocation25]  }
  0xf6   :  { %s234_s30 = sshll.u32 %s9586_s21, 4  ;;  %s261_s1 = sshll.u32 %s9587_s26, 4  ;;  %s235_s30 = int_to_ptr.vmem [resolvable:$true] %s234_s30  ;;  %s262_s1 = int_to_ptr.vmem [resolvable:$true] %s261_s1 }
  0xf7   :  { %s9479_s0 = scalar_lea.hbm %s9754_s9, 32 }
  0xf8   :  { %p9480_p9 = scmp.ne.s32.totalorder %s9754_s9, %s9479_s0  ;;  %p9483_p10 = scmp.lt.u32.totalorder %s9479_s0, %s9754_s9 }
  0xfa   :  { %p9485_p11 = pnand %p9483_p10, %p9480_p9 }
  0xfc   :  { %9488 = shalt.err (!%p9485_p11)
}
  0xfd   :  { %s9489_s2 = scalar_lea.vmem %s235_s30, 32  ;;  %p9494_p13 = scmp.lt.s32.totalorder %s235_s30, %s235_s30 }
  0xfe   :  { %p9490_p12 = scmp.ne.s32.totalorder %s235_s30, %s9489_s2  ;;  %p9495_p0 = scmp.lt.s32.totalorder %s9489_s2, %s9489_s2 }
 0x100   :  { %p9496_p1 = por %p9495_p0, %p9494_p13 }
 0x102   :  { %p9497_p2 = pnand %p9496_p1, %p9490_p12 }
 0x104   :  { %9500 = shalt.err (!%p9497_p2)
}
 0x105   :  { %240 = dma.hbm_to_vmem [thread:$0]  %s9754_s9, 32, %s235_s30, [#allocation21], %s9573_s22, %s9573_s22, %s9574_s12  }
 0x106   :  { %s9501_s4 = scalar_lea.hbm %s9769_s14, 16 }
 0x107   :  { %p9502_p3 = scmp.ne.s32.totalorder %s9769_s14, %s9501_s4  ;;  %p9505_p4 = scmp.lt.u32.totalorder %s9501_s4, %s9769_s14 }
 0x109   :  { %p9507_p5 = pnand %p9505_p4, %p9502_p3 }
 0x10b   :  { %9510 = shalt.err (!%p9507_p5)
}
 0x10c   :  { %s9511_s29 = scalar_lea.vmem %s262_s1, 16  ;;  %s9515_s7 = scalar_lea.vmem %s262_s1, 32 }
 0x10d   :  { %p9512_p6 = scmp.ne.s32.totalorder %s262_s1, %s9511_s29  ;;  %p9516_p7 = scmp.lt.s32.totalorder %s262_s1, %s262_s1 }
 0x10e   :  { %p9517_p8 = scmp.lt.s32.totalorder %s9515_s7, %s9511_s29 }
 0x110   :  { %p9518_p9 = por %p9517_p8, %p9516_p7 }
 0x112   :  { %p9519_p10 = pnand %p9518_p9, %p9512_p6 }
 0x114   :  { %9522 = shalt.err (!%p9519_p10)
}
 0x115   :  { %264 = dma.hbm_to_vmem [thread:$0]  %s9769_s14, 16, %s262_s1, [#allocation24]  }
 0x116   :  { %9523 = dma.done.wait [#allocation6], 32  }
 0x117   :  { %9524 = vsyncadd [#allocation6], 4294967264 }
 0x118   :  { %9525 = dma.done.wait [#allocation5], 256  }
 0x119   :  { %9526 = vsyncadd [#allocation5], 4294967040 }
 0x11a   :  { %9527 = dma.done.wait [#allocation9], 32  }
 0x11b   :  { %9528 = vsyncadd [#allocation9], 4294967264 }
 0x11c   :  { %9529 = dma.done.wait [#allocation12], 32  }
 0x11d   :  { %9530 = vsyncadd [#allocation12], 4294967264 }
 0x11e   :  { %9531 = dma.done.wait [#allocation15], 64  }
 0x11f   :  { %9532 = vsyncadd [#allocation15], 4294967232 }
 0x120   :  { %9533 = dma.done.wait [#allocation18], 64  }
 0x121   :  { %9534 = vsyncadd [#allocation18], 4294967232 }
 0x122   :  { %9535 = dma.done.wait [#allocation21], 64  }
 0x123   :  { %9536 = vsyncadd [#allocation21], 4294967232 }
 0x124   :  { %9537 = dma.done.wait [#allocation24], 48  }
 0x125   :  { %9538 = vsyncadd [#allocation24], 4294967248 }
 0x126   :  { %307 = sfence }
 0x127   :  { %v309_v0 = vld [vmem:[#allocation7] sm:$0xff]  ;;  %s12359_s9 = sld [smem:[#allocation35_spill]]  ;;  %v310_v1 = vld [vmem:[#allocation7 + $0x8] sm:$0xff]  ;;  %v12216_v2 = vmov 0.0|0.0   ;;  %vm9589_vm0 = vmmov 0   ;;  %v12218_v4 = vmov 0.0  }
 0x128   :  { %8514 = vmatprep.subr.bf16.mxu0 %v12216_v2  ;;  %v8515_v3 = vpack.c.bf16 %v310_v1, %v309_v0  ;;  %7775 = vmatprep.mubr.msk.f32.mxu0 %vm9589_vm0, %v12218_v4  ;;  %v503_v5 = vld [vmem:[%s9679_s24] sm:$0xff]  ;;  %v504_v6 = vld [vmem:[%s9679_s24 + $0x8] sm:$0xff]  ;;  %s12360_s14 = sld [smem:[#allocation36_spill]]  ;;  %vm318_vm1 = vcmask 130048   ;;  %s12361_s12 = sld [smem:[#allocation40_spill]]  ;;  %v505_v9 = vld [vmem:[%s9679_s24 + $0x10] sm:$0xff] }
 0x129   :  { %8517 = vmatprep.subr.bf16.mxu1 %v12216_v2  ;;  %7810 = vmatprep.mubr.msk.f32.mxu1 %vm9589_vm0, %v12218_v4  ;;  %v8542_v8 = vpack.c.bf16 %v504_v6, %v503_v5  ;;  %v506_v10 = vld [vmem:[%s9679_s24 + $0x18] sm:$0xff]  ;;  %vm514_vm2 = vcmask 261120   ;;  %s12362_s24 = sld [smem:[#allocation41_spill]]  ;;  %v7207_v37 = vld [vmem:[#allocation8] ss:$0 sm:$0xff]  ;;  %s12363_s25 = sld [smem:[#allocation43_spill]]  ;;  %vm10457_vm13 = vmpackc.low %vm318_vm1, %vm318_vm1 }
 0x12a   :  { %8516 = vmatpush3.bf16.msra.mxu0 %v8515_v3  ;;  %v8545_v11 = vpack.c.bf16 %v506_v10, %v505_v9  ;;  %vm607_vm5 = vcmask 1041408   ;;  %s12364_s10 = sld [smem:[#allocation42_spill]]  ;;  %vm731_vm6 = vcmask 254976   ;;  %vm746_vm7 = vcmask 257026   ;;  %s12365_s3 = sld [smem:[#allocation44_spill]] }
 0x12b   :  { %8541 = vmatprep.subr.bf16.mxu0 %v12216_v2  ;;  %s12366_s11 = sld [smem:[#allocation38_spill]]  ;;  %s12367_s15 = sld [smem:[#allocation37_spill]]  ;;  %vm741_vm8 = vcmask 523520   ;;  %vm743_vm9 = vcmask 517376   ;;  %vm786_vm10 = vcmask 523264   ;;  %vm1331_vm11 = vcmask 31744  }
 0x12c   :  { %s9592_s8 = smov 32   ;;  %s12369_s19 = sld [smem:[#allocation39_spill]]  ;;  %vm10434_vm12 = vmpackc.low %vm1331_vm11, %vm1331_vm11  ;;  %vm1680_vm14 = vcmask 27648   ;;  %vm1930_vm15 = vcmask 1043456  }
 0x12d   :  { %v308_v7 = vld [vmem:[%s12359_s9] sm:$0xf]  ;;  %s9601_s5 = smov 120   ;;  %s9602_s20 = smov 112  }
 0x12e   :  { %7776 = vmatmul.mubr.msk.f32.vlgmr.msra.gmra.mrb[0].mxu0 %vm318_vm1, %v308_v7  ;;  %v502_v12 = vld [vmem:[%s12360_s14] sm:$0x3]  ;;  %v410_v14 = vld [vmem:[%s12361_s12 + $0x8] sm:$0xff]  ;;  %v411_v16 = vld [vmem:[%s12361_s12 + $0x10] sm:$0xff]  ;;  %s9603_s16 = smov 96   ;;  %s9604_s18 = smov 64  }
 0x12f   :  { %8543 = vmatpush3.bf16.msra.mxu0 %v8542_v8  ;;  %7821 = vmatprep.mubr.msk.f32.mxu0 %vm9589_vm0, %v12218_v4  ;;  %v409_v13 = vld [vmem:[%s12361_s12] sm:$0xff]  ;;  %v412_v17 = vld [vmem:[%s12361_s12 + $0x18] sm:$0xff]  ;;  %v414_v20 = vld [vmem:[%s12361_s12 + $0x28] sm:$0xff]  ;;  %s9605_s27 = smov 4   ;;  %s9606_s23 = smov 80  }
 0x130   :  { %8544 = vmatprep.subr.bf16.mxu0 %v12216_v2  ;;  %v8518_v15 = vpack.c.bf16 %v410_v14, %v409_v13  ;;  %v8521_v18 = vpack.c.bf16 %v412_v17, %v411_v16  ;;  %v413_v19 = vld [vmem:[%s12361_s12 + $0x20] sm:$0xff]  ;;  %v415_v22 = vld [vmem:[%s12361_s12 + $0x30] sm:$0xff]  ;;  %v416_v23 = vld [vmem:[%s12361_s12 + $0x38] sm:$0xff]  ;;  %s9607_s21 = smov 28   ;;  %s1311_s30 = sld [smem:[#allocation4]] }
 0x131   :  { %v8524_v21 = vpack.c.bf16 %v414_v20, %v413_v19  ;;  %v8527_v24 = vpack.c.bf16 %v416_v23, %v415_v22  ;;  %v417_v25 = vld [vmem:[%s12361_s12 + $0x40] sm:$0xff]  ;;  %v418_v26 = vld [vmem:[%s12361_s12 + $0x48] sm:$0xff]  ;;  %v419_v28 = vld [vmem:[%s12361_s12 + $0x50] sm:$0xff]  ;;  %s12412_s0 = sld [smem:[#allocation34_spill]]  ;;  %s9608_s2 = smov 108  }
 0x132   :  { %8519 = vmatpush3.bf16.msra.mxu1 %v8518_v15  ;;  %v8530_v27 = vpack.c.bf16 %v418_v26, %v417_v25  ;;  %v420_v29 = vld [vmem:[%s12361_s12 + $0x58] sm:$0xff]  ;;  %v421_v31 = vld [vmem:[%s12361_s12 + $0x60] sm:$0xff]  ;;  %v422_v32 = vld [vmem:[%s12361_s12 + $0x68] sm:$0xff]  ;;  %s9609_s4 = smov 36   ;;  %s7258_s29 = sld [smem:[#allocation4 + $0x1]] }
 0x133   :  { %8546 = vmatpush3.bf16.msra.mxu0 %v8545_v11  ;;  %8520 = vmatprep.subr.bf16.mxu1 %v12216_v2  ;;  %v8533_v30 = vpack.c.bf16 %v420_v29, %v419_v28  ;;  %v8536_v33 = vpack.c.bf16 %v422_v32, %v421_v31  ;;  %v423_v34 = vld [vmem:[%s12361_s12 + $0x70] sm:$0xff]  ;;  %v424_v35 = vld [vmem:[%s12361_s12 + $0x78] sm:$0xff]  ;;  %v7210_v43 = vld [vmem:[%s12362_s24] ss:$0 sm:$0xff]  ;;  %s9610_s14 = smov 48   ;;  %s9611_s12 = smov 40  }
 0x134   :  { %8547 = vmatprep.subr.bf16.mxu0 %v12216_v2  ;;  %v8539_v36 = vpack.c.bf16 %v424_v35, %v423_v34  ;;  %v636_v16 = vld [vmem:[%s12363_s25] sm:$0xff]  ;;  %v637_v17 = vld [vmem:[%s12363_s25 + $0x8] sm:$0xff]  ;;  %v639_v20 = vld [vmem:[%s12363_s25 + $0x18] sm:$0xff]  ;;  %s9612_s24 = smov 56  }
 0x135   :  { %v8548_v19 = vpack.c.bf16 %v637_v17, %v636_v16  ;;  %v640_v22 = vld [vmem:[%s12363_s25 + $0x20] sm:$0xff]  ;;  %v641_v23 = vld [vmem:[%s12363_s25 + $0x28] sm:$0xff]  ;;  %v643_v31 = vld [vmem:[%s12363_s25 + $0x38] sm:$0xff]  ;;  %v733_v16 = vlaneseq }
 0x136   :  { %7822 = vmatmul.mubr.msk.f32.vlgmr.msra.gmra.mrb[2].mxu0 %vm514_vm2, %v502_v12  ;;  %8522 = vmatpush3.bf16.msra.mxu1 %v8521_v18  ;;  %v638_v18 = vld [vmem:[%s12363_s25 + $0x10] sm:$0xff]  ;;  %v645_v34 = vld [vmem:[%s12363_s25 + $0x48] sm:$0xff]  ;;  %s1312_s26 = smul.f32 0.16666667, %s1311_s30  ;;  %s12470_s30 = sld [smem:[#allocation47_spill]] }
 0x137   :  { %7856 = vmatprep.mubr.msk.f32.mxu0 %vm9589_vm0, %v12218_v4  ;;  %8523 = vmatprep.subr.bf16.mxu1 %v12216_v2 }
 0x138   :  { %8549 = vmatpush3.bf16.msra.mxu0 %v8548_v19  ;;  %v785_v19 = vld [vmem:[%s12365_s3 + $0x78] sm:$0xff]  ;;  %s1720_s1 = smul.f32 -0.5, %s1312_s26 }
 0x139   :  { %8550 = vmatprep.subr.bf16.mxu0 %v12216_v2  ;;  %s2458_s7 = smul.f32 0.16666667, %s7258_s29 }
 0x13a   :  { %8525 = vmatpush3.bf16.msra.mxu1 %v8524_v21  ;;  %v8551_v21 = vpack.c.bf16 %v639_v20, %v638_v18  ;;  %v783_v18 = vld [vmem:[%s12365_s3 + $0x68] sm:$0xff] }
 0x13b   :  { %8526 = vmatprep.subr.bf16.mxu1 %v12216_v2  ;;  %v8583_v20 = vpack.c.bf16 %v785_v19, %v783_v18  ;;  %s2810_s9 = smul.f32 -0.5, %s2458_s7 }
 0x13c   :  { %8552 = vmatpush3.bf16.msra.mxu0 %v8551_v21  ;;  %v782_v21 = vld [vmem:[%s12365_s3 + $0x60] sm:$0xff] }
 0x13d   :  { %8553 = vmatprep.subr.bf16.mxu0 %v12216_v2 }
 0x13e   :  { %8528 = vmatpush3.bf16.msra.mxu1 %v8527_v24  ;;  %v8554_v24 = vpack.c.bf16 %v641_v23, %v640_v22  ;;  %v784_v22 = vld [vmem:[%s12365_s3 + $0x70] sm:$0xff]  ;;  %v734_v23 = vshrl.u32 %v733_v16, 7 }
 0x13f   :  { %8529 = vmatprep.subr.bf16.mxu1 %v12216_v2 }
 0x140   :  { %8555 = vmatpush3.bf16.msra.mxu0 %v8554_v24  ;;  %v8585_v24 = vpack.c.bf16 %v784_v22, %v782_v21 }
 0x141   :  { %8556 = vmatprep.subr.bf16.mxu0 %v12216_v2 }
 0x142   :  { %8531 = vmatpush3.bf16.msra.mxu1 %v8530_v27 }
 0x143   :  { %8532 = vmatprep.subr.bf16.mxu1 %v12216_v2 }
 0x146   :  { %8534 = vmatpush3.bf16.msra.mxu1 %v8533_v30  ;;  %v642_v30 = vld [vmem:[%s12363_s25 + $0x30] sm:$0xff] }
 0x147   :  { %8535 = vmatprep.subr.bf16.mxu1 %v12216_v2  ;;  %v8557_v32 = vpack.c.bf16 %v643_v31, %v642_v30  ;;  %v750_v30 = vsub.s32 1, %v734_v23 }
 0x149   :  { %8558 = vmatpush3.bf16.msra.mxu0 %v8557_v32 }
 0x14a   :  { %8537 = vmatpush3.bf16.msra.mxu1 %v8536_v33  ;;  %8559 = vmatprep.subr.bf16.mxu0 %v12216_v2  ;;  %v644_v33 = vld [vmem:[%s12363_s25 + $0x40] sm:$0xff] }
 0x14b   :  { %8538 = vmatprep.subr.bf16.mxu1 %v12216_v2  ;;  %v8560_v35 = vpack.c.bf16 %v645_v34, %v644_v33  ;;  %v9593_v33 = vmov 5   ;;  %v765_v34 = vld [vmem:[%s12366_s11 + $0x8] sm:$0xff] }
 0x14d   :  { %8561 = vmatpush3.bf16.msra.mxu0 %v8560_v35  ;;  %v9594_v35 = vmov 8  }
 0x14e   :  { %8540 = vmatpush3.bf16.msra.mxu1 %v8539_v36  ;;  %v646_v36 = vld [vmem:[%s12363_s25 + $0x50] sm:$0xff]  ;;  %8562 = vmatprep.subr.bf16.mxu0 %v12216_v2 }
 0x201   :  { %v388_v38 = vpop.f32.mrb[0].mxu0 }
 0x202   :  { %v389_v39 = vadd.f32 %v7207_v37, %v388_v38  ;;  %v7777_v40 = vpop.f32.mrb[1].mxu0  ;;  %v647_v37 = vld [vmem:[%s12363_s25 + $0x58] sm:$0xff] }
 0x203   :  { %v8563_v38 = vpack.c.bf16 %v647_v37, %v646_v36  ;;  %v649_v40 = vld [vmem:[%s12363_s25 + $0x68] sm:$0xff]  ;;  %v9595_v36 = vmov 7   ;;  %v9596_v37 = vmov 1  }
 0x204   :  { %v393_v41 = vand.u32 2147483647, %v389_v39  ;;  %v392_v62 = vmax.f32 %v389_v39, 0.0 }
 0x205   :  { %8564 = vmatpush3.bf16.msra.mxu0 %v8563_v38  ;;  %v768_v38 = vld [vmem:[%s12369_s19 + $0x8] sm:$0xff] }
 0x206   :  { %v394_v42 = vsub.f32 0.0, %v393_v41  ;;  %8565 = vmatprep.subr.bf16.mxu0 %v12216_v2 }
 0x208   :  { %v395_v44 = vmul.f32 1.442695, %v394_v42  ;;  %v650_v42 = vld [vmem:[%s12363_s25 + $0x70] sm:$0xff] }
 0x209   :  { %v584_v45 = vpop.f32.mrb[2].mxu0 }
 0x20a   :  { %9109 = vpow2.f32 %v395_v44  ;;  %v585_v46 = vadd.f32 %v7210_v43, %v584_v45  ;;  %v7823_v47 = vpop.f32.mrb[3].mxu0  ;;  %v651_v43 = vld [vmem:[%s12363_s25 + $0x78] sm:$0xff]  ;;  %v7209_v45 = vld [vmem:[#allocation10] ss:$0 sm:$0xff] }
 0x20b   :  { %v8569_v44 = vpack.c.bf16 %v651_v43, %v650_v42  ;;  %v767_v42 = vld [vmem:[%s12369_s19] sm:$0xff]  ;;  %v9599_v43 = vmov 2  }
 0x20c   :  { %v589_v48 = vand.u32 2147483647, %v585_v46  ;;  %v588_v8 = vmax.f32 %v585_v46, 0.0 }
 0x20e   :  { %v590_v49 = vsub.f32 0.0, %v589_v48 }
 0x210   :  { %v591_v50 = vmul.f32 1.442695, %v590_v49 }
 0x212   :  { %9111 = vpow2.f32 %v591_v50 }
 0x214   :  { %v9110_v51 = vpop.eup %9109 }
 0x215   :  { %v397_v52 = vadd.f32 1.0, %v9110_v51  ;;  %v400_v53 = vmul.f32 -0.5, %v9110_v51  ;;  %v403_v57 = vand.u32 2147483647, %v9110_v51 }
 0x217   :  { %9113 = vlog2.f32 %v397_v52  ;;  %v401_v56 = vadd.f32 1.0, %v400_v53  ;;  %vm404_vm3 = vcmp.lt.f32.partialorder %v403_v57, 0.0004427343  ;;  %v7212_v53 = vld [vmem:[%s12364_s10] ss:$0 sm:$0xff]  ;;  %s9613_s10 = smov 44  }
 0x219   :  { %v402_v60 = vmul.f32 %v9110_v51, %v401_v56 }
 0x21c   :  { %v9112_v54 = vpop.eup %9111 }
 0x21d   :  { %v593_v55 = vadd.f32 1.0, %v9112_v54  ;;  %v596_v61 = vmul.f32 -0.5, %v9112_v54  ;;  %v599_v3 = vand.u32 2147483647, %v9112_v54 }
 0x21f   :  { %9115 = vlog2.f32 %v593_v55  ;;  %v597_v1 = vadd.f32 1.0, %v596_v61  ;;  %vm600_vm4 = vcmp.lt.f32.partialorder %v599_v3, 0.0004427343  ;;  %v7213_v55 = vld [vmem:[#allocation11] ss:$0 sm:$0xff]  ;;  %v777_v3 = vld [vmem:[%s12365_s3 + $0x38] sm:$0xff] }
 0x221   :  { %v9114_v58 = vpop.eup %9113  ;;  %v598_v7 = vmul.f32 %v9112_v54, %v597_v1 }
 0x222   :  { %v399_v59 = vmul.f32 0.6931472, %v9114_v58  ;;  %v771_v58 = vld [vmem:[%s12365_s3 + $0x8] sm:$0xff] }
 0x224   :  { %v405_v63 = vsel %vm404_vm3, %v402_v60, %v399_v59  ;;  %v773_v59 = vld [vmem:[%s12365_s3 + $0x18] sm:$0xff]  ;;  %v9591_v60 = vmov 4   ;;  %vm1885_vm3 = vcmask 158720  }
 0x225   :  { %v406_v0 = vadd.f32 %v405_v63, %v392_v62  ;;  %8925 = vset.pattern.permute.xlu1 %v9591_v60  ;;  %v8571_v61 = vpack.c.bf16 %v773_v59, %v771_v58  ;;  %8924 = vset.pattern.permute.xlu0 %v9591_v60  ;;  %v770_v62 = vld [vmem:[%s12365_s3] sm:$0xff]  ;;  %v772_v63 = vld [vmem:[%s12365_s3 + $0x10] sm:$0xff] }
 0x226   :  { %v8573_v1 = vpack.c.bf16 %v772_v63, %v770_v62 }
 0x227   :  { %9117 = vtanh.f32 %v406_v0  ;;  %8572 = vmatprep.subr.bf16.mxu1 %v8571_v61  ;;  %v775_v0 = vld [vmem:[%s12365_s3 + $0x28] sm:$0xff] }
 0x229   :  { %v9116_v5 = vpop.eup %9115 }
 0x22a   :  { %v595_v6 = vmul.f32 0.6931472, %v9116_v5  ;;  %v8575_v5 = vpack.c.bf16 %v777_v3, %v775_v0 }
 0x22c   :  { %v601_v9 = vsel %vm600_vm4, %v598_v7, %v595_v6  ;;  %v774_v6 = vld [vmem:[%s12365_s3 + $0x20] sm:$0xff]  ;;  %v776_v7 = vld [vmem:[%s12365_s3 + $0x30] sm:$0xff]  ;;  %vm12292_vm4 = vcmask 125952  }
 0x22d   :  { %v602_v10 = vadd.f32 %v601_v9, %v588_v8  ;;  %v9949_v8 = vld [vmem:[%s12366_s11] sm:$0xff]  ;;  %v8577_v9 = vpack.c.bf16 %v776_v7, %v774_v6 }
 0x22f   :  { %9119 = vtanh.f32 %v602_v10  ;;  %v729_v10 = vld [vmem:[%s12367_s15] sm:$0xff]  ;;  %s9615_s15 = smov 60  }
 0x230   :  { %730 = vst.msk [vmem:[#allocation2] sm:$0xff] %vm514_vm2, %v729_v10  ;;  %745 = vst.msk [vmem:[#allocation2 + $0xa] sm:$0xff] %vm514_vm2, %v729_v10  ;;  %vm1878_vm2 = vcmask 162816  }
 0x231   :  { %v9118_v11 = vpop.eup %9117 }
 0x232   :  { %v408_v12 = vmul.f32 %v9118_v11, %v389_v39  ;;  %v648_v39 = vld [vmem:[%s12363_s25 + $0x60] sm:$0xff]  ;;  %v779_v11 = vld [vmem:[%s12365_s3 + $0x48] sm:$0xff]  ;;  %s12461_s25 = sld [smem:[#allocation45_spill]] }
 0x233   :  { %v8566_v41 = vpack.c.bf16 %v649_v40, %v648_v39  ;;  %v9975_v39 = vld [vmem:[%s12366_s11 + $0x10] sm:$0xf]  ;;  %v9597_v40 = vmov 0   ;;  %s9614_s11 = smov 52  }
 0x234   :  { %7811 = vmatmul.mubr.f32.vlgmr.msra.gmra.mrb[0].mxu1 %v408_v12  ;;  %v781_v12 = vld [vmem:[%s12365_s3 + $0x58] sm:$0xff] }
 0x235   :  { %860 = vmatprep.mubr.f32.mxu1 %v12218_v4  ;;  %8567 = vmatpush3.bf16.msra.mxu0 %v8566_v41  ;;  %v9598_v41 = vmov 3  }
 0x236   :  { %8568 = vmatprep.subr.bf16.mxu0 %v12216_v2  ;;  %8574 = vmatpush1.bf16.msra.mxu1 %v8573_v1 }
 0x237   :  { %8576 = vmatprep.subr.bf16.mxu1 %v8575_v5 }
 0x239   :  { %v9120_v13 = vpop.eup %9119  ;;  %8570 = vmatpush3.bf16.msra.mxu0 %v8569_v44  ;;  %v9600_v44 = vmov 6  }
 0x23a   :  { %v604_v14 = vmul.f32 %v9120_v13, %v585_v46  ;;  %8587 = vmatprep.subr.bf16.mxu0 %v12216_v2  ;;  %8578 = vmatpush1.bf16.msra.mxu1 %v8577_v9  ;;  %v8579_v13 = vpack.c.bf16 %v781_v12, %v779_v11 }
 0x23c   :  { %v608_v15 = vsel %vm607_vm5, %v604_v14, 0.0  ;;  %8580 = vmatprep.subr.bf16.mxu1 %v8579_v13 }
 0x23d   :  { %609 = vadd.xlane.f32.xlu0 %v608_v15  ;;  %v780_v15 = vld [vmem:[%s12365_s3 + $0x50] sm:$0xff] }
 0x2ca   :  { %v610_v25 = vpop.xlane.xlu0 %609 }
 0x2cb   :  { %v612_v26 = vmul.f32 0.0078125, %v610_v25  ;;  %v7214_v25 = vld [vmem:[#allocation13] ss:$0 sm:$0xff] }
 0x2cd   :  { %v613_v27 = vsub.f32 %v604_v14, %v612_v26  ;;  %v778_v14 = vld [vmem:[%s12365_s3 + $0x40] sm:$0xff]  ;;  %v9964_v26 = vsub.s32 0, %v734_v23 }
 0x2ce   :  { %v8581_v17 = vpack.c.bf16 %v780_v15, %v778_v14 }
 0x2cf   :  { %v614_v28 = vmul.f32 %v613_v27, %v613_v27  ;;  %12368 = vst [vmem:[#allocation48_spill] sm:$0xff] %v9964_v26 }
 0x2d0   :  { %8582 = vmatpush1.bf16.msra.mxu1 %v8581_v17 }
 0x2d1   :  { %v615_v29 = vsel %vm607_vm5, %v614_v28, 0.0  ;;  %8584 = vmatprep.subr.bf16.mxu1 %v8583_v20 }
 0x2d2   :  { %616 = vadd.xlane.f32.xlu0 %v615_v29 }
 0x2d4   :  { %8586 = vmatpush1.bf16.msra.mxu1 %v8585_v24 }
 0x2d5   :  { %8599 = vmatprep.subr.bf16.mxu1 %v12216_v2 }
 0x2e8   :  { %991 = vperm.xlu0 %8924, %v9949_v8  }
 0x2ec   :  { %8933 = vset.pattern.permute.xlu0 %v9593_v33 }
 0x2ed   :  { %1081 = vperm.xlu0 %8933, %v9949_v8  }
 0x2f1   :  { %8936 = vset.pattern.permute.xlu0 %v9594_v35 }
 0x2f2   :  { %1115 = vperm.xlu0 %8936, %v765_v34  }
 0x2f6   :  { %8939 = vset.pattern.permute.xlu0 %v9596_v37 }
 0x2f7   :  { %976 = vperm.xlu0 %8939, %v9949_v8  }
 0x2fb   :  { %1055 = vperm.xlu0 %8939, %v768_v38  }
 0x2ff   :  { %8941 = vset.pattern.permute.xlu0 %v9597_v40 }
 0x300   :  { %881 = vperm.xlu0 %8941, %v9949_v8  }
 0x304   :  { %959 = vperm.xlu0 %8941, %v767_v42  }
 0x307   :  { %v498_v46 = vpop.f32.mrb[0].mxu1 }
 0x308   :  { %v499_v47 = vadd.f32 %v7209_v45, %v498_v46  ;;  %v7812_v48 = vpop.f32.mrb[1].mxu1  ;;  %891 = vperm.xlu0 %8941, %v9975_v39   ;;  %v9992_v45 = vld [vmem:[%s12369_s19 + $0x10] sm:$0xf]  ;;  %s12469_s19 = sld [smem:[#allocation46_spill]] }
 0x30a   :  { %732 = vst.msk [vmem:[#allocation2 + $0x8] sm:$0x3] %vm731_vm6, %v499_v47 }
 0x30b   :  { %747 = vst.msk [vmem:[#allocation2 + $0x10] sm:$0xc] %vm746_vm7, %v499_v47 }
 0x30c   :  { %8946 = vset.pattern.permute.xlu0 %v9599_v43 }
 0x30d   :  { %1070 = vperm.xlu0 %8946, %v765_v34  }
 0x311   :  { %1141 = vperm.xlu0 %8946, %v767_v42  }
 0x35f   :  { %v617_v49 = vpop.xlane.xlu0 %616 }
 0x360   :  { %v618_v50 = vmul.f32 0.0078125, %v617_v49 }
 0x362   :  { %v619_v51 = vadd.f32 1e-05, %v618_v50 }
 0x364   :  { %9121 = vrsqrt.f32 %v619_v51 }
 0x367   :  { %v10018_v58 = vpop.permute.xlu0 %991 }
 0x368   :  { %12377 = vst [vmem:[#allocation56_spill] sm:$0xff] %v10018_v58 }
 0x36c   :  { %v10056_v12 = vpop.permute.xlu0 %1081 }
 0x36d   :  { %12381 = vst [vmem:[#allocation60_spill] sm:$0xff] %v10056_v12 }
 0x36e   :  { %v9122_v52 = vpop.eup %9121 }
 0x36f   :  { %v621_v54 = vmul.f32 %v9122_v52, %v613_v27 }
 0x371   :  { %v628_v56 = vmul.f32 %v7212_v53, %v621_v54 }
 0x373   :  { %v635_v57 = vadd.f32 %v7213_v55, %v628_v56 }
 0x375   :  { %7857 = vmatmul.mubr.f32.vlgmr.msra.gmra.mrb[4].mxu0 %v635_v57 }
 0x376   :  { %7865 = vmatprep.mubr.msk.f32.mxu0 %vm9589_vm0, %v12218_v4 }
 0x448   :  { %v725_v27 = vpop.f32.mrb[4].mxu0 }
 0x449   :  { %v726_v28 = vadd.f32 %v7214_v25, %v725_v27  ;;  %v7858_v29 = vpop.f32.mrb[5].mxu0 }
 0x44b   :  { %v736_v31 = vrot.slane %v726_v28, %v9964_v26  ;;  %v751_v32 = vrot.slane %v726_v28, %v750_v30  ;;  %v10100_v28 = vpop.permute.xlu0 %1115 }
 0x44c   :  { %12384 = vst [vmem:[#allocation63_spill] sm:$0xff] %v10100_v28 }
 0x44d   :  { %738 = vrot.lane.b32.xlu1 %v736_v31, %s9592_s8 }
 0x451   :  { %753 = vrot.lane.b32.xlu1 %v751_v32, %s9592_s8 }
 0x455   :  { %995 = vperm.xlu1 %8925, %v765_v34  }
 0x459   :  { %8926 = vset.pattern.permute.xlu1 %v9595_v36 }
 0x45a   :  { %1021 = vperm.xlu1 %8926, %v9949_v8  }
 0x45e   :  { %1025 = vperm.xlu1 %8926, %v765_v34  }
 0x462   :  { %8927 = vset.pattern.permute.xlu1 %v9591_v60 }
 0x463   :  { %999 = vperm.xlu1 %8927, %v9975_v39  }
 0x467   :  { %8928 = vset.pattern.permute.xlu1 %v9598_v41 }
 0x468   :  { %898 = vperm.xlu1 %8928, %v9949_v8  }
 0x46c   :  { %902 = vperm.xlu1 %8928, %v765_v34  }
 0x470   :  { %8929 = vset.pattern.permute.xlu1 %v9595_v36 }
 0x471   :  { %1029 = vperm.xlu1 %8929, %v9975_v39  }
 0x475   :  { %8930 = vset.pattern.permute.xlu1 %v9600_v44 }
 0x476   :  { %928 = vperm.xlu1 %8930, %v9949_v8  }
 0x47a   :  { %932 = vperm.xlu1 %8930, %v765_v34  }
 0x47e   :  { %8931 = vset.pattern.permute.xlu1 %v9598_v41 }
 0x47f   :  { %906 = vperm.xlu1 %8931, %v9975_v39  }
 0x483   :  { %8932 = vset.pattern.permute.xlu1 %v9600_v44 }
 0x484   :  { %936 = vperm.xlu1 %8932, %v9975_v39  }
 0x488   :  { %8934 = vset.pattern.permute.xlu1 %v9593_v33 }
 0x489   :  { %1085 = vperm.xlu1 %8934, %v765_v34  }
 0x48d   :  { %8935 = vset.pattern.permute.xlu1 %v9594_v35 }
 0x48e   :  { %1111 = vperm.xlu1 %8935, %v9949_v8  }
 0x492   :  { %8937 = vset.pattern.permute.xlu1 %v9593_v33 }
 0x493   :  { %1089 = vperm.xlu1 %8937, %v9975_v39  }
 0x497   :  { %8938 = vset.pattern.permute.xlu1 %v9594_v35 }
 0x498   :  { %1119 = vperm.xlu1 %8938, %v9975_v39  }
 0x49c   :  { %8940 = vset.pattern.permute.xlu1 %v9596_v37 }
 0x49d   :  { %980 = vperm.xlu1 %8940, %v765_v34  }
 0x4a1   :  { %1051 = vperm.xlu1 %8940, %v767_v42  }
 0x4a5   :  { %984 = vperm.xlu1 %8940, %v9975_v39  }
 0x4a9   :  { %8942 = vset.pattern.permute.xlu1 %v9597_v40 }
 0x4aa   :  { %886 = vperm.xlu1 %8942, %v765_v34  }
 0x4ae   :  { %8943 = vset.pattern.permute.xlu1 %v9596_v37 }
 0x4af   :  { %1059 = vperm.xlu1 %8943, %v9992_v45  }
 0x4b3   :  { %8944 = vset.pattern.permute.xlu1 %v9597_v40 }
 0x4b4   :  { %964 = vperm.xlu1 %8944, %v768_v38  }
 0x4b8   :  { %8945 = vset.pattern.permute.xlu1 %v9599_v43 }
 0x4b9   :  { %1066 = vperm.xlu1 %8945, %v9949_v8  }
 0x4bd   :  { %8947 = vset.pattern.permute.xlu1 %v9597_v40 }
 0x4be   :  { %969 = vperm.xlu1 %8947, %v9992_v45  }
 0x4bf   :  { %v739_v46 = vpop.permute.xlu1 %738 }
 0x4c0   :  { %742 = vst.msk [vmem:[#allocation2] sm:$0xff] %vm741_vm8, %v739_v46 }
 0x4c1   :  { %744 = vst.msk [vmem:[#allocation2 + $0x8] sm:$0x3] %vm743_vm9, %v739_v46 }
 0x4c2   :  { %8948 = vset.pattern.permute.xlu1 %v9599_v43 }
 0x4c3   :  { %v754_v47 = vpop.permute.xlu1 %753  ;;  %1145 = vperm.xlu1 %8948, %v768_v38  }
 0x4c4   :  { %756 = vst.msk [vmem:[#allocation2 + $0xa] sm:$0xff] %vm741_vm8, %v754_v47 }
 0x4c5   :  { %757 = vst.msk [vmem:[#allocation2 + $0x12] sm:$0x3] %vm743_vm9, %v754_v47  ;;  %vm12293_vm9 = vcmask 294144  }
 0x4c7   :  { %v758_v48 = vld [vmem:[#allocation2] sm:$0xff] }
 0x4c8   :  { %7215 = vmatmul.mubr.msk.f32.vlgmr.msra.gmra.mrb[2].mxu1 %vm786_vm10, %v758_v48 }
 0x4c9   :  { %866 = vmatprep.mubr.f32.mxu1 %v12218_v4 }
 0x4cb   :  { %v759_v49 = vld [vmem:[#allocation2 + $0x8] sm:$0xff] }
 0x4cc   :  { %7216 = vmatmul.mubr.msk.f32.gmra.mrb[4].mxu1 %vm786_vm10, %v759_v49  ;;  %v760_v50 = vld [vmem:[#allocation2 + $0x10] sm:$0xf] }
 0x4cd   :  { %872 = vmatprep.mubr.f32.mxu1 %v12218_v4 }
 0x4d0   :  { %7217 = vmatmul.mubr.msk.f32.gmra.mrb[6].mxu1 %vm786_vm10, %v760_v50 }
 0x4d1   :  { %7910 = vmatprep.mubr.msk.f32.mxu1 %vm9589_vm0, %v12218_v4 }
 0x4d4   :  { %v10004_v51 = vpop.permute.xlu1 %995 }
 0x4d5   :  { %12370 = vst [vmem:[#allocation49_spill] sm:$0xff] %v10004_v51 }
 0x4d9   :  { %v10006_v52 = vpop.permute.xlu1 %1021 }
 0x4da   :  { %12371 = vst [vmem:[#allocation50_spill] sm:$0xff] %v10006_v52 }
 0x4dd   :  { %v10008_v53 = vpop.permute.xlu1 %1025 }
 0x4de   :  { %12372 = vst [vmem:[#allocation51_spill] sm:$0xff] %v10008_v53 }
 0x4e2   :  { %v10010_v54 = vpop.permute.xlu1 %999 }
 0x4e3   :  { %12373 = vst [vmem:[#allocation52_spill] sm:$0xff] %v10010_v54 }
 0x4e7   :  { %v10012_v55 = vpop.permute.xlu1 %898 }
 0x4e8   :  { %12374 = vst [vmem:[#allocation53_spill] sm:$0xff] %v10012_v55 }
 0x4eb   :  { %v10014_v56 = vpop.permute.xlu1 %902 }
 0x4ec   :  { %12375 = vst [vmem:[#allocation54_spill] sm:$0xff] %v10014_v56 }
 0x4f0   :  { %v10016_v57 = vpop.permute.xlu1 %1029 }
 0x4f1   :  { %12376 = vst [vmem:[#allocation55_spill] sm:$0xff] %v10016_v57 }
 0x4f5   :  { %v10020_v59 = vpop.permute.xlu1 %928 }
 0x4f6   :  { %12378 = vst [vmem:[#allocation57_spill] sm:$0xff] %v10020_v59 }
 0x4f9   :  { %v10040_v6 = vpop.permute.xlu1 %932 }
 0x4fa   :  { %12379 = vst [vmem:[#allocation58_spill] sm:$0xff] %v10040_v6 }
 0x4fe   :  { %v10054_v11 = vpop.permute.xlu1 %906 }
 0x4ff   :  { %12380 = vst [vmem:[#allocation59_spill] sm:$0xff] %v10054_v11 }
 0x503   :  { %v10072_v18 = vpop.permute.xlu1 %936 }
 0x504   :  { %12382 = vst [vmem:[#allocation61_spill] sm:$0xff] %v10072_v18 }
 0x508   :  { %v10082_v21 = vpop.permute.xlu1 %1085 }
 0x509   :  { %12383 = vst [vmem:[#allocation62_spill] sm:$0xff] %v10082_v21 }
 0x50d   :  { %v10114_v33 = vpop.permute.xlu1 %1111 }
 0x50e   :  { %12385 = vst [vmem:[#allocation64_spill] sm:$0xff] %v10114_v33 }
 0x512   :  { %v10128_v38 = vpop.permute.xlu1 %1089 }
 0x513   :  { %12386 = vst [vmem:[#allocation65_spill] sm:$0xff] %v10128_v38 }
 0x517   :  { %v10138_v42 = vpop.permute.xlu1 %1119 }
 0x518   :  { %12387 = vst [vmem:[#allocation66_spill] sm:$0xff] %v10138_v42 }
 0x59b   :  { %v10022_v60 = vpop.f32.mrb[2].mxu1 }
 0x59c   :  { %v10024_v61 = vpop.f32.mrb[3].mxu1  ;;  %v1002_v62 = vmul.f32 %v10018_v58, %v10022_v60  ;;  %v1032_v63 = vmul.f32 %v10006_v52, %v10022_v60  ;;  %v909_v31 = vmul.f32 %v10012_v55, %v10022_v60  ;;  %v939_v37 = vmul.f32 %v10020_v59, %v10022_v60 }
 0x59d   :  { %v1194_v3 = vmul.f32 %v10018_v58, %v10024_v61  ;;  %v1212_v5 = vmul.f32 %v10006_v52, %v10024_v61  ;;  %v1155_v9 = vmul.f32 %v10012_v55, %v10024_v61  ;;  %v1173_v10 = vmul.f32 %v10020_v59, %v10024_v61  ;;  %v10558_v52 = vld [vmem:[%s12412_s0] sm:$0xff] }
 0x59e   :  { %1008 = vrot.lane.b32.xlu1 %v1002_v62, %s9601_s5  ;;  %1038 = vrot.lane.b32.xlu0 %v1032_v63, %s9602_s20  ;;  %v1233_v13 = vmul.f32 %v10056_v12, %v10024_v61  ;;  %v1251_v35 = vmul.f32 %v10114_v33, %v10024_v61  ;;  %v1092_v46 = vmul.f32 %v10056_v12, %v10022_v60 }
 0x59f   :  { %v10032_v0 = vpop.f32.mrb[4].mxu1  ;;  %v1122_v47 = vmul.f32 %v10114_v33, %v10022_v60 }
 0x5a0   :  { %v10034_v1 = vpop.f32.mrb[5].mxu1  ;;  %v1033_v14 = vmul.f32 %v10008_v53, %v10032_v0  ;;  %v10064_v15 = vpack.i.bf16 %v10032_v0, %v10022_v60  ;;  %v1003_v16 = vmul.f32 %v10004_v51, %v10032_v0  ;;  %v910_v32 = vmul.f32 %v10014_v56, %v10032_v0 }
 0x5a1   :  { %v1195_v17 = vmul.f32 %v10004_v51, %v10034_v1  ;;  %v1213_v19 = vmul.f32 %v10008_v53, %v10034_v1  ;;  %v1156_v20 = vmul.f32 %v10014_v56, %v10034_v1  ;;  %v1174_v22 = vmul.f32 %v10040_v6, %v10034_v1 }
 0x5a2   :  { %1200 = vrot.lane.b32.xlu1 %v1194_v3, %s9601_s5  ;;  %1218 = vrot.lane.b32.xlu0 %v1212_v5, %s9602_s20  ;;  %v1234_v23 = vmul.f32 %v10082_v21, %v10034_v1  ;;  %v1252_v30 = vmul.f32 %v10100_v28, %v10034_v1  ;;  %v1093_v48 = vmul.f32 %v10082_v21, %v10032_v0  ;;  %v10170_v3 = vpop.permute.xlu0 %976 }
 0x5a3   :  { %v10044_v7 = vpop.f32.mrb[6].mxu1  ;;  %v1123_v49 = vmul.f32 %v10100_v28, %v10032_v0 }
 0x5a4   :  { %v10046_v8 = vpop.f32.mrb[7].mxu1  ;;  %v1004_v24 = vmul.f32 %v10010_v54, %v10044_v7  ;;  %v1034_v27 = vmul.f32 %v10016_v57, %v10044_v7  ;;  %v911_v40 = vmul.f32 %v10054_v11, %v10044_v7  ;;  %v941_v43 = vmul.f32 %v10072_v18, %v10044_v7 }
 0x5a5   :  { %v1196_v25 = vmul.f32 %v10010_v54, %v10046_v8  ;;  %v1214_v29 = vmul.f32 %v10016_v57, %v10046_v8  ;;  %v1157_v34 = vmul.f32 %v10054_v11, %v10046_v8  ;;  %v1175_v36 = vmul.f32 %v10072_v18, %v10046_v8 }
 0x5a6   :  { %1161 = vrot.lane.b32.xlu1 %v1155_v9, %s9601_s5  ;;  %1179 = vrot.lane.b32.xlu0 %v1173_v10, %s9602_s20  ;;  %v1235_v41 = vmul.f32 %v10128_v38, %v10046_v8  ;;  %v1253_v44 = vmul.f32 %v10138_v42, %v10046_v8  ;;  %v1094_v62 = vmul.f32 %v10128_v38, %v10044_v7  ;;  %v10174_v9 = vpop.permute.xlu0 %1055 }
 0x5a7   :  { %v1124_v63 = vmul.f32 %v10138_v42, %v10044_v7  ;;  %12390 = vst [vmem:[#allocation69_spill] sm:$0xff] %v10174_v9 }
 0x5aa   :  { %1239 = vrot.lane.b32.xlu1 %v1233_v13, %s9601_s5  ;;  %1040 = vrot.lane.b32.xlu0 %v1033_v14, %s9602_s20  ;;  %v10178_v13 = vpop.permute.xlu0 %881 }
 0x5ab   :  { %12392 = vst [vmem:[#allocation71_spill] sm:$0xff] %v10178_v13 }
 0x5ae   :  { %1010 = vrot.lane.b32.xlu1 %v1003_v16, %s9601_s5  ;;  %1202 = vrot.lane.b32.xlu0 %v1195_v17, %s9601_s5  ;;  %v10182_v16 = vpop.permute.xlu0 %959 }
 0x5b2   :  { %1220 = vrot.lane.b32.xlu1 %v1213_v19, %s9602_s20  ;;  %1163 = vrot.lane.b32.xlu0 %v1156_v20, %s9601_s5  ;;  %v10186_v19 = vpop.permute.xlu0 %891 }
 0x5b3   :  { %12395 = vst [vmem:[#allocation74_spill] sm:$0xff] %v10186_v19 }
 0x5b6   :  { %1181 = vrot.lane.b32.xlu1 %v1174_v22, %s9602_s20  ;;  %1241 = vrot.lane.b32.xlu0 %v1234_v23, %s9601_s5  ;;  %v10192_v23 = vpop.permute.xlu0 %1070 }
 0x5b7   :  { %12398 = vst [vmem:[#allocation77_spill] sm:$0xff] %v10192_v23 }
 0x5ba   :  { %1012 = vrot.lane.b32.xlu1 %v1004_v24, %s9601_s5  ;;  %1204 = vrot.lane.b32.xlu0 %v1196_v25, %s9601_s5  ;;  %v10194_v24 = vpop.permute.xlu0 %1141 }
 0x5bb   :  { %12399 = vst [vmem:[#allocation78_spill] sm:$0xff] %v10194_v24 }
 0x5be   :  { %1042 = vrot.lane.b32.xlu1 %v1034_v27, %s9602_s20  ;;  %1074 = vperm.xlu0 %8946, %v9975_v39   ;;  %v940_v39 = vmul.f32 %v10040_v6, %v10032_v0 }
 0x5c2   :  { %1222 = vrot.lane.b32.xlu1 %v1214_v29, %s9602_s20  ;;  %1259 = vrot.lane.b32.xlu0 %v1252_v30, %s9602_s20 }
 0x5c6   :  { %915 = vrot.lane.b32.xlu1 %v909_v31, %s9601_s5  ;;  %917 = vrot.lane.b32.xlu0 %v910_v32, %s9601_s5 }
 0x5ca   :  { %1165 = vrot.lane.b32.xlu0 %v1157_v34, %s9601_s5  ;;  %1257 = vrot.lane.b32.xlu1 %v1251_v35, %s9602_s20 }
 0x5ce   :  { %1183 = vrot.lane.b32.xlu0 %v1175_v36, %s9602_s20  ;;  %945 = vrot.lane.b32.xlu1 %v939_v37, %s9602_s20  ;;  %v987_v37 = vmul.f32 %v10170_v3, %v10022_v60 }
 0x5d2   :  { %1149 = vperm.xlu0 %8946, %v9992_v45   ;;  %947 = vrot.lane.b32.xlu1 %v940_v39, %s9602_s20  ;;  %v10148_v45 = vpop.permute.xlu1 %980  ;;  %v1284_v39 = vmul.f32 %v10170_v3, %v10024_v61 }
 0x5d3   :  { %12388 = vst [vmem:[#allocation67_spill] sm:$0xff] %v10148_v45 }
 0x5d6   :  { %919 = vrot.lane.b32.xlu1 %v911_v40, %s9601_s5  ;;  %1243 = vrot.lane.b32.xlu0 %v1235_v41, %s9601_s5  ;;  %v10160_v50 = vpop.permute.xlu1 %1051 }
 0x5da   :  { %949 = vrot.lane.b32.xlu1 %v941_v43, %s9602_s20  ;;  %1261 = vrot.lane.b32.xlu0 %v1253_v44, %s9602_s20  ;;  %v10172_v5 = vpop.permute.xlu1 %984  ;;  %v10208_v43 = vmul.f32 %v10178_v13, %v10022_v60 }
 0x5db   :  { %12389 = vst [vmem:[#allocation68_spill] sm:$0xff] %v10172_v5 }
 0x5de   :  { %1098 = vrot.lane.b32.xlu1 %v1092_v46, %s9601_s5  ;;  %1128 = vrot.lane.b32.xlu0 %v1122_v47, %s9602_s20  ;;  %v10176_v10 = vpop.permute.xlu1 %886  ;;  %v988_v47 = vmul.f32 %v10148_v45, %v10032_v0 }
 0x5df   :  { %12391 = vst [vmem:[#allocation70_spill] sm:$0xff] %v10176_v10  ;;  %v10219_v28 = vmul.f32 %v10176_v10, %v10032_v0  ;;  %v1273_v21 = vmul.f32 %v10176_v10, %v10034_v1 }
 0x5e2   :  { %1100 = vrot.lane.b32.xlu1 %v1093_v48, %s9601_s5  ;;  %1130 = vrot.lane.b32.xlu0 %v1123_v49, %s9602_s20  ;;  %v10180_v14 = vpop.permute.xlu1 %1059  ;;  %v1285_v48 = vmul.f32 %v10148_v45, %v10034_v1  ;;  %v1272_v49 = vmul.f32 %v10178_v13, %v10024_v61 }
 0x5e3   :  { %12393 = vst [vmem:[#allocation72_spill] sm:$0xff] %v10180_v14 }
 0x5e6   :  { %1102 = vrot.lane.b32.xlu1 %v1094_v62, %s9601_s5  ;;  %1132 = vrot.lane.b32.xlu0 %v1124_v63, %s9602_s20  ;;  %v10184_v17 = vpop.permute.xlu1 %964 }
 0x5e7   :  { %12394 = vst [vmem:[#allocation73_spill] sm:$0xff] %v10184_v17 }
 0x5ea   :  { %v10188_v20 = vpop.permute.xlu1 %1066 }
 0x5eb   :  { %12396 = vst [vmem:[#allocation75_spill] sm:$0xff] %v10188_v20 }
 0x5ee   :  { %v10190_v22 = vpop.permute.xlu1 %969 }
 0x5ef   :  { %12397 = vst [vmem:[#allocation76_spill] sm:$0xff] %v10190_v22 }
 0x5f2   :  { %v10196_v25 = vpop.permute.xlu1 %1145 }
 0x5f3   :  { %12400 = vst [vmem:[#allocation79_spill] sm:$0xff] %v10196_v25 }
 0x610   :  { %v10198_v27 = vpop.permute.xlu0 %1038  ;;  %v1009_v29 = vpop.permute.xlu1 %1008 }
 0x614   :  { %v1219_v30 = vpop.permute.xlu0 %1218  ;;  %v1201_v31 = vpop.permute.xlu1 %1200 }
 0x615   :  { %v1209_v40 = vadd.f32 %v1201_v31, %v987_v37  ;;  %v1287_v41 = vadd.f32 %v1284_v39, %v1201_v31 }
 0x617   :  { %v1227_v31 = vadd.f32 %v1219_v30, %v1209_v40  ;;  %v1290_v39 = vadd.f32 %v1287_v41, %v1219_v30 }
 0x618   :  { %v1180_v32 = vpop.permute.xlu0 %1179  ;;  %v1162_v34 = vpop.permute.xlu1 %1161 }
 0x619   :  { %v1170_v62 = vadd.f32 %v1162_v34, %v10208_v43  ;;  %v1275_v4 = vadd.f32 %v1272_v49, %v1162_v34  ;;  %v10229_v41 = vadd.f32 %v1227_v31, %v10160_v50  ;;  %v1017_v31 = vadd.f32 %v1009_v29, %v987_v37 }
 0x61b   :  { %v1188_v18 = vadd.f32 %v1180_v32, %v1170_v62  ;;  %v1278_v34 = vadd.f32 %v1275_v4, %v1180_v32 }
 0x61c   :  { %v1041_v35 = vpop.permute.xlu0 %1040  ;;  %v10200_v36 = vpop.permute.xlu1 %1239 }
 0x620   :  { %v1203_v44 = vpop.permute.xlu0 %1202  ;;  %v1011_v46 = vpop.permute.xlu1 %1010 }
 0x621   :  { %v1210_v63 = vadd.f32 %v1203_v44, %v988_v47  ;;  %v1288_v2 = vadd.f32 %v1285_v48, %v1203_v44  ;;  %v1293_v48 = vadd.f32 %v1290_v39, %v10160_v50 }
 0x624   :  { %v1164_v42 = vpop.permute.xlu0 %1163  ;;  %v1221_v38 = vpop.permute.xlu1 %1220 }
 0x625   :  { %v1228_v33 = vadd.f32 %v1221_v38, %v1210_v63  ;;  %v1291_v12 = vadd.f32 %v1288_v2, %v1221_v38  ;;  %v1171_v11 = vadd.f32 %v1164_v42, %v10219_v28  ;;  %v1276_v57 = vadd.f32 %v1273_v21, %v1164_v42 }
 0x626   :  { %v1018_v63 = vadd.f32 %v1011_v46, %v988_v47  ;;  %v1281_v42 = vadd.f32 %v1278_v34, %v10182_v16  ;;  %v1047_v34 = vadd.f32 %v10198_v27, %v1017_v31 }
 0x627   :  { %v10225_v44 = vadd.f32 %v1228_v33, %v10174_v9  ;;  %v1294_v30 = vadd.f32 %v1291_v12, %v10174_v9  ;;  %v10243_v12 = vadd.f32 %v1188_v18, %v10182_v16  ;;  %v989_v18 = vmul.f32 %v10172_v5, %v10044_v7 }
 0x628   :  { %v1182_v40 = vpop.permute.xlu1 %1181  ;;  %v1242_v2 = vpop.permute.xlu0 %1241  ;;  %v1048_v32 = vadd.f32 %v1041_v35, %v1018_v63  ;;  %v10276_v37 = vadd.f32 %v10160_v50, %v1047_v34  ;;  %v1077_v63 = vmul.f32 %v10188_v20, %v10022_v60 }
 0x629   :  { %v1189_v49 = vadd.f32 %v1182_v40, %v1171_v11  ;;  %v1279_v54 = vadd.f32 %v1276_v57, %v1182_v40  ;;  %v10234_v38 = vpack.i.bf16 %v10225_v44, %v10229_v41  ;;  %v10236_v21 = vpack.i.bf16 %v1294_v30, %v1293_v48 }
 0x62a   :  { %v10261_v62 = vadd.f32 %v10174_v9, %v1048_v32  ;;  %v1078_v32 = vmul.f32 %v10192_v23, %v10032_v0 }
 0x62b   :  { %v10239_v33 = vadd.f32 %v1189_v49, %v10184_v17  ;;  %v1282_v4 = vadd.f32 %v1279_v54, %v10184_v17  ;;  %8950 = vrot.lane.b32.xlu1 %v10234_v38, %s9581_s28 }
 0x62c   :  { %v1013_v57 = vpop.permute.xlu1 %1012  ;;  %v10254_v47 = vpop.permute.xlu0 %1204 }
 0x62d   :  { %v10250_v11 = vpack.i.bf16 %v10239_v33, %v10243_v12  ;;  %v10252_v46 = vpack.i.bf16 %v1282_v4, %v1281_v42  ;;  %v1211_v39 = vadd.f32 %v10254_v47, %v989_v18  ;;  %v1019_v49 = vadd.f32 %v1013_v57, %v989_v18 }
 0x62e   :  { %v1296_v42 = vmul.f32 %v10188_v20, %v10024_v61  ;;  %v1248_v57 = vadd.f32 %v10200_v36, %v1077_v63 }
 0x62f   :  { %8955 = vrot.lane.b32.xlu1 %v10250_v11, %s9581_s28 }
 0x630   :  { %v1043_v54 = vpop.permute.xlu1 %1042  ;;  %v1299_v18 = vadd.f32 %v1296_v42, %v10200_v36 }
 0x631   :  { %v1049_v29 = vadd.f32 %v1043_v54, %v1019_v49  ;;  %v1297_v54 = vmul.f32 %v10192_v23, %v10034_v1 }
 0x633   :  { %1318 = vrot.lane.b32.xlu1 %v10261_v62, %s9592_s8  ;;  %v10293_v31 = vadd.f32 %v10180_v14, %v1049_v29  ;;  %v1300_v61 = vadd.f32 %v1297_v54, %v1242_v2  ;;  %v896_v54 = vmul.f32 %v10186_v19, %v10044_v7 }
 0x634   :  { %v10266_v35 = vpop.permute.xlu1 %1222 }
 0x635   :  { %v1229_v30 = vadd.f32 %v10266_v35, %v1211_v39  ;;  %v1249_v39 = vadd.f32 %v1242_v2, %v1078_v32 }
 0x637   :  { %v10271_v40 = vadd.f32 %v1229_v30, %v10180_v14 }
 0x638   :  { %v916_v48 = vpop.permute.xlu1 %915 }
 0x639   :  { %1329 = vrot.lane.b32.xlu0 %v10271_v40, %s9581_s28 }
 0x63c   :  { %v1258_v4 = vpop.permute.xlu1 %1257 }
 0x63d   :  { %v10282_v27 = vpop.permute.xlu0 %1074  ;;  %1316 = vrot.lane.b32.xlu0 %v10276_v37, %s9592_s8  ;;  %v1266_v30 = vadd.f32 %v1258_v4, %v1248_v57  ;;  %v1302_v49 = vadd.f32 %v1299_v18, %v1258_v4 }
 0x63e   :  { %12401 = vst [vmem:[#allocation80_spill] sm:$0xff] %v10282_v27 }
 0x63f   :  { %v1269_v10 = vadd.f32 %v1266_v30, %v10194_v24  ;;  %v1305_v42 = vadd.f32 %v1302_v49, %v10194_v24  ;;  %v924_v49 = vadd.f32 %v916_v48, %v10208_v43 }
 0x640   :  { %v946_v34 = vpop.permute.xlu1 %945 }
 0x641   :  { %v1260_v20 = vpop.permute.xlu0 %1259  ;;  %1320 = vrot.lane.b32.xlu0 %v10293_v31, %s9592_s8  ;;  %v954_v23 = vadd.f32 %v946_v34, %v924_v49 }
 0x642   :  { %v1267_v6 = vadd.f32 %v1260_v20, %v1249_v39  ;;  %v1303_v56 = vadd.f32 %v1300_v61, %v1260_v20 }
 0x643   :  { %v10335_v43 = vadd.f32 %v10182_v16, %v954_v23 }
 0x644   :  { %v10299_v1 = vadd.f32 %v1267_v6, %v10196_v25  ;;  %v1306_v36 = vadd.f32 %v1303_v56, %v10196_v25  ;;  %v948_v29 = vpop.permute.xlu1 %947 }
 0x645   :  { %v918_v2 = vpop.permute.xlu0 %917 }
 0x646   :  { %v10304_v57 = vpack.i.bf16 %v10299_v1, %v1269_v10  ;;  %v10306_v4 = vpack.i.bf16 %v1306_v36, %v1305_v42 }
 0x648   :  { %8960 = vrot.lane.b32.xlu0 %v10304_v57, %s9581_s28  ;;  %v920_v20 = vpop.permute.xlu1 %919 }
 0x649   :  { %v10312_v6 = vpop.permute.xlu0 %1165  ;;  %v926_v18 = vadd.f32 %v920_v20, %v896_v54  ;;  %v925_v20 = vadd.f32 %v918_v2, %v10219_v28  ;;  %v1079_v28 = vmul.f32 %v10282_v27, %v10044_v7 }
 0x64a   :  { %v1172_v56 = vadd.f32 %v10312_v6, %v896_v54 }
 0x64b   :  { %v955_v48 = vadd.f32 %v948_v29, %v925_v20 }
 0x64c   :  { %8965 = vrot.lane.b32.xlu0 %v10064_v15, %s9603_s16  ;;  %v950_v39 = vpop.permute.xlu1 %949 }
 0x64d   :  { %v956_v61 = vadd.f32 %v950_v39, %v926_v18  ;;  %v10317_v30 = vpop.permute.xlu0 %1183  ;;  %v10344_v34 = vadd.f32 %v10184_v17, %v955_v48 }
 0x64e   :  { %v1190_v36 = vadd.f32 %v10317_v30, %v1172_v56 }
 0x64f   :  { %v10322_v42 = vadd.f32 %v10190_v22, %v956_v61 }
 0x650   :  { %v10326_v54 = vadd.f32 %v1190_v36, %v10190_v22  ;;  %v1099_v18 = vpop.permute.xlu1 %1098 }
 0x651   :  { %v10328_v53 = vpop.permute.xlu0 %1149  ;;  %1431 = vrot.lane.b32.xlu0 %v10322_v42, %s9592_s8  ;;  %v1107_v61 = vadd.f32 %v1099_v18, %v1077_v63  ;;  %v1684_v63 = vmul.f32 %v10243_v12, %v10243_v12 }
 0x652   :  { %12402 = vst [vmem:[#allocation81_spill] sm:$0xff] %v10328_v53  ;;  %1440 = vrot.lane.b32.xlu1 %v10326_v54, %s9581_s28  ;;  %v1686_v12 = vmul.f32 %v10326_v54, %v10326_v54 }
 0x654   :  { %v1101_v29 = vpop.permute.xlu1 %1100 }
 0x655   :  { %v10337_v56 = vpop.permute.xlu0 %1243  ;;  %v1108_v48 = vadd.f32 %v1101_v29, %v1078_v32  ;;  %v1687_v32 = vmul.f32 %v10229_v41, %v10229_v41  ;;  %v1693_v29 = vmul.f32 %v1269_v10, %v1269_v10 }
 0x656   :  { %1427 = vrot.lane.b32.xlu1 %v10335_v43, %s9592_s8  ;;  %v1250_v2 = vadd.f32 %v10337_v56, %v1079_v28 }
 0x658   :  { %v1103_v45 = vpop.permute.xlu1 %1102 }
 0x659   :  { %v10347_v39 = vpop.permute.xlu0 %1261  ;;  %v1109_v18 = vadd.f32 %v1103_v45, %v1079_v28  ;;  %v1689_v45 = vmul.f32 %v10271_v40, %v10271_v40  ;;  %v1688_v28 = vmul.f32 %v10225_v44, %v10225_v44 }
 0x65a   :  { %v1268_v23 = vadd.f32 %v10347_v39, %v1250_v2  ;;  %1429 = vrot.lane.b32.xlu1 %v10344_v34, %s9592_s8 }
 0x65b   :  { %v1692_v44 = vadd.f32 %v1689_v45, %v1686_v12 }
 0x65c   :  { %v10353_v49 = vadd.f32 %v1268_v23, %v10328_v53 }
 0x65d   :  { %v1129_v36 = vpop.permute.xlu0 %1128 }
 0x65e   :  { %v1137_v20 = vadd.f32 %v1129_v36, %v1107_v61  ;;  %1550 = vrot.lane.b32.xlu1 %v10353_v49, %s9581_s28 }
 0x660   :  { %v10358_v51 = vadd.f32 %v10194_v24, %v1137_v20  ;;  %v1690_v20 = vadd.f32 %v1687_v32, %v1684_v63  ;;  %v1647_v63 = vmul.f32 %v10335_v43, %v10335_v43  ;;  %v1650_v32 = vmul.f32 %v10276_v37, %v10276_v37 }
 0x661   :  { %v1131_v17 = vpop.permute.xlu0 %1130 }
 0x662   :  { %v1138_v2 = vadd.f32 %v1131_v17, %v1108_v48  ;;  %1778 = vrot.lane.b32.xlu1 %v10044_v7, %s9603_s16  ;;  %1537 = vrot.lane.b32.xlu0 %v10358_v51, %s9592_s8  ;;  %v1685_v17 = vmul.f32 %v10239_v33, %v10239_v33  ;;  %v10384_v41 = vadd.f32 %v1693_v29, %v1690_v20 }
 0x663   :  { %v1695_v33 = vmul.f32 %v10353_v49, %v10353_v49  ;;  %v1694_v48 = vmul.f32 %v10299_v1, %v10299_v1  ;;  %v1651_v1 = vmul.f32 %v10261_v62, %v10261_v62  ;;  %v1656_v29 = vmul.f32 %v10358_v51, %v10358_v51 }
 0x664   :  { %v10367_v23 = vadd.f32 %v10196_v25, %v1138_v2  ;;  %v1691_v2 = vadd.f32 %v1688_v28, %v1685_v17  ;;  %v1649_v20 = vmul.f32 %v10322_v42, %v10322_v42  ;;  %v1653_v45 = vadd.f32 %v1650_v32, %v1647_v63 }
 0x665   :  { %v1133_v61 = vpop.permute.xlu0 %1132  ;;  %v1652_v28 = vmul.f32 %v10293_v31, %v10293_v31 }
 0x666   :  { %v1139_v36 = vadd.f32 %v1133_v61, %v1109_v18  ;;  %1539 = vrot.lane.b32.xlu0 %v10367_v23, %s9592_s8  ;;  %v1648_v18 = vmul.f32 %v10344_v34, %v10344_v34  ;;  %v10404_v61 = vadd.f32 %v1695_v33, %v1692_v44  ;;  %v10406_v17 = vadd.f32 %v1694_v48, %v1691_v2 }
 0x667   :  { %v10422_v2 = vadd.f32 %v1656_v29, %v1653_v45  ;;  %v1655_v44 = vadd.f32 %v1652_v28, %v1649_v20 }
 0x668   :  { %v10382_v10 = vadd.f32 %v10328_v53, %v1139_v36  ;;  %v1657_v36 = vmul.f32 %v10367_v23, %v10367_v23  ;;  %v1654_v12 = vadd.f32 %v1651_v1, %v1648_v18  ;;  %v12403_v1 = vmov 0 }
 0x669   :  { %v12404_v1 = vsel %vm10434_vm12, 4294967295, %v12403_v1 }
 0x66a   :  { %1702 = vrot.lane.b32.xlu0 %v10384_v41, %s9581_s28  ;;  %1541 = vrot.lane.b32.xlu1 %v10382_v10, %s9592_s8  ;;  %v1658_v33 = vmul.f32 %v10382_v10, %v10382_v10  ;;  %v10420_v48 = vadd.f32 %v1657_v36, %v1654_v12  ;;  %12405 = vst [vmem:[#allocation82_spill] sm:$0xff] %v12404_v1  ;;  %v12406_v36 = vmov 0.0   ;;  %v12435_v1 = vld [vmem:[#allocation64_spill] sm:$0xff] }
 0x66c   :  { %v10428_v25 = vadd.f32 %v1658_v33, %v1655_v44  ;;  %v12407_v33 = vmov 0.0|0.0  }
 0x66e   :  { %1706 = vrot.lane.b32.xlu0 %v10404_v61, %s9581_s28  ;;  %1704 = vrot.lane.b32.xlu1 %v10406_v17, %s9581_s28 }
 0x672   :  { %1667 = vrot.lane.b32.xlu0 %v10420_v48, %s9592_s8  ;;  %1665 = vrot.lane.b32.xlu1 %v10422_v2, %s9592_s8 }
 0x676   :  { %1669 = vrot.lane.b32.xlu1 %v10428_v25, %s9592_s8 }
 0x69d   :  { %v8951_v63 = vpop.permute.xlu1 %8950 }
 0x69e   :  { %v8953_v18 = vunpack.i.h.bf16 %v8951_v63  ;;  %v8952_v32 = vunpack.i.l.bf16 %v8951_v63 }
 0x6a0   :  { %v8588_v29 = vpack.c.bf16 %v8953_v18, %v8952_v32 }
 0x6a1   :  { %v8956_v20 = vpop.permute.xlu1 %8955 }
 0x6a2   :  { %8590 = vmatpush3.bf16.xpose.msk.msra.mxu0 %vm10434_vm12, %v8588_v29  ;;  %v8958_v12 = vunpack.i.h.bf16 %v8956_v20  ;;  %v8957_v45 = vunpack.i.l.bf16 %v8956_v20 }
 0x6a3   :  { %7863 = vmatprep.subr.mxu0 %v12406_v36 }
 0x6a4   :  { %v8592_v44 = vpack.c.bf16 %v8958_v12, %v8957_v45 }
 0x6a5   :  { %v1319_v18 = vpop.permute.xlu1 %1318 }
 0x6ab   :  { %v1330_v28 = vpop.permute.xlu0 %1329 }
 0x6ac   :  { %7864 = vmatpush3.xpose.msk.msra.mxu0 %vm1331_vm11, %v1330_v28  ;;  %v12408_v28 = vmov 0 }
 0x6ad   :  { %8591 = vmatprep.subr.bf16.mxu0 %v12407_v33  ;;  %v12409_v28 = vsel %vm10457_vm13, 4294967295, %v12408_v28 }
 0x6ae   :  { %12410 = vst [vmem:[#allocation83_spill] sm:$0xff] %v12409_v28 }
 0x6af   :  { %v1317_v63 = vpop.permute.xlu0 %1316 }
 0x6b0   :  { %7866 = vmatmul.mubr.msk.f32.vlgmr.msra.gmra.mrb[6].mxu0 %vm1331_vm11, %v1317_v63 }
 0x6b1   :  { %8594 = vmatpush3.bf16.xpose.msk.msra.mxu0 %vm10434_vm12, %v8592_v44  ;;  %7868 = vmatprep.mubr.msk.f32.mxu0 %vm9589_vm0, %v12406_v36 }
 0x6b2   :  { %7878 = vmatprep.subr.mxu0 %v12406_v36 }
 0x6b3   :  { %v1321_v32 = vpop.permute.xlu0 %1320 }
 0x6b4   :  { %7869 = vmatmul.mubr.msk.f32.gmra.mrb[8].mxu0 %vm1331_vm11, %v1319_v18 }
 0x6b5   :  { %7871 = vmatprep.mubr.msk.f32.mxu0 %vm9589_vm0, %v12406_v36 }
 0x6b8   :  { %7872 = vmatmul.mubr.msk.f32.gmra.mrb[10].mxu0 %vm1331_vm11, %v1321_v32 }
 0x6b9   :  { %7880 = vmatprep.mubr.msk.f32.mxu0 %vm9589_vm0, %v12406_v36 }
 0x6ba   :  { %v8961_v29 = vpop.permute.xlu0 %8960 }
 0x6bb   :  { %v8963_v63 = vunpack.i.h.bf16 %v8961_v29  ;;  %v8962_v18 = vunpack.i.l.bf16 %v8961_v29 }
 0x6be   :  { %v8966_v20 = vpop.permute.xlu0 %8965 }
 0x6bf   :  { %v8968_v12 = vunpack.i.h.bf16 %v8966_v20  ;;  %v8967_v45 = vunpack.i.l.bf16 %v8966_v20  ;;  %v8596_v20 = vpack.c.bf16 %v8963_v63, %v8962_v18  ;;  %v10485_v63 = vmul.f32 0.17677669, %v10022_v60 }
 0x6c1   :  { %v8600_v44 = vpack.c.bf16 %v8968_v12, %v8967_v45 }
 0x6c3   :  { %8602 = vmatpush3.bf16.xpose.msk.msra.mxu1 %vm10457_vm13, %v8600_v44  ;;  %v1432_v12 = vpop.permute.xlu0 %1431 }
 0x6c4   :  { %v1441_v32 = vpop.permute.xlu1 %1440  ;;  %7908 = vmatprep.subr.mxu1 %v12406_v36 }
 0x6c5   :  { %7879 = vmatpush3.xpose.msk.msra.mxu0 %vm1331_vm11, %v1441_v32  ;;  %v10494_v32 = vmul.f32 0.17677669, %v10032_v0 }
 0x6c6   :  { %8595 = vmatprep.subr.bf16.mxu0 %v12407_v33 }
 0x6c8   :  { %v1428_v24 = vpop.permute.xlu1 %1427 }
 0x6c9   :  { %7881 = vmatmul.mubr.msk.f32.vlgmr.msra.gmra.mrb[6].mxu0 %vm1331_vm11, %v1428_v24 }
 0x6ca   :  { %8598 = vmatpush3.bf16.xpose.msk.msra.mxu0 %vm10434_vm12, %v8596_v20  ;;  %7883 = vmatprep.mubr.msk.f32.mxu0 %vm9589_vm0, %v12406_v36 }
 0x6cb   :  { %7893 = vmatprep.subr.mxu0 %v12406_v36 }
 0x6cc   :  { %v1430_v29 = vpop.permute.xlu1 %1429 }
 0x6cd   :  { %7884 = vmatmul.mubr.msk.f32.gmra.mrb[8].mxu0 %vm1331_vm11, %v1430_v29 }
 0x6ce   :  { %7886 = vmatprep.mubr.msk.f32.mxu0 %vm9589_vm0, %v12406_v36 }
 0x6d0   :  { %v1551_v45 = vpop.permute.xlu1 %1550 }
 0x6d1   :  { %7887 = vmatmul.mubr.msk.f32.gmra.mrb[10].mxu0 %vm1331_vm11, %v1432_v12  ;;  %v10505_v12 = vmul.f32 0.17677669, %v10044_v7 }
 0x6d2   :  { %7894 = vmatpush3.xpose.msk.msra.mxu0 %vm1331_vm11, %v1551_v45  ;;  %7895 = vmatprep.mubr.msk.f32.mxu0 %vm9589_vm0, %v12406_v36 }
 0x6d3   :  { %8609 = vmatprep.subr.bf16.mxu0 %v12407_v33 }
 0x6d4   :  { %v1538_v24 = vpop.permute.xlu0 %1537  ;;  %v1779_v44 = vpop.permute.xlu1 %1778 }
 0x6d5   :  { %7896 = vmatmul.mubr.msk.f32.vlgmr.msra.gmra.mrb[6].mxu0 %vm1331_vm11, %v1538_v24  ;;  %7909 = vmatpush3.xpose.msk.msra.mxu1 %vm318_vm1, %v1779_v44 }
 0x6d6   :  { %7898 = vmatprep.mubr.msk.f32.mxu0 %vm9589_vm0, %v12406_v36  ;;  %8603 = vmatprep.subr.bf16.mxu1 %v12407_v33 }
 0x6d8   :  { %v1540_v18 = vpop.permute.xlu0 %1539  ;;  %7911 = vmatmul.mubr.msk.f32.vlgmr.msra.gmra.mrb[8].mxu1 %vm318_vm1, %v10485_v63 }
 0x6d9   :  { %7899 = vmatmul.mubr.msk.f32.gmra.mrb[8].mxu0 %vm1331_vm11, %v1540_v18  ;;  %7913 = vmatprep.mubr.msk.f32.mxu1 %vm9589_vm0, %v12406_v36 }
 0x6da   :  { %7901 = vmatprep.mubr.msk.f32.mxu0 %vm9589_vm0, %v12406_v36 }
 0x6dc   :  { %v1703_v20 = vpop.permute.xlu0 %1702  ;;  %7914 = vmatmul.mubr.msk.f32.gmra.mrb[10].mxu1 %vm318_vm1, %v10494_v32  ;;  %v1542_v60 = vpop.permute.xlu1 %1541 }
 0x6dd   :  { %7902 = vmatmul.mubr.msk.f32.gmra.mrb[10].mxu0 %vm1331_vm11, %v1542_v60  ;;  %v1711_v29 = vsel %vm1331_vm11, %v1703_v20, 0.0  ;;  %7916 = vmatprep.mubr.msk.f32.mxu1 %vm9589_vm0, %v12406_v36 }
 0x6de   :  { %1712 = vadd.xlane.f32.xlu0 %v1711_v29  ;;  %7955 = vmatprep.mubr.msk.f32.mxu0 %vm9589_vm0, %v12406_v36 }
 0x6e0   :  { %v1707_v0 = vpop.permute.xlu0 %1706  ;;  %7917 = vmatmul.mubr.msk.f32.gmra.mrb[12].mxu1 %vm318_vm1, %v10505_v12  ;;  %v1705_v45 = vpop.permute.xlu1 %1704 }
 0x6e1   :  { %v1717_v24 = vsel %vm1680_vm14, %v1707_v0, 0.0  ;;  %v1714_v44 = vsel %vm1331_vm11, %v1705_v45, 0.0  ;;  %7925 = vmatprep.mubr.msk.f32.mxu1 %vm9589_vm0, %v12406_v36  ;;  %v1286_v0 = vmul.f32 %v10172_v5, %v10046_v8 }
 0x6e2   :  { %1718 = vadd.xlane.f32.xlu0 %v1717_v24  ;;  %1715 = vadd.xlane.f32.xlu1 %v1714_v44 }
 0x6e3   :  { %v1289_v45 = vadd.f32 %v1286_v0, %v10254_v47 }
 0x6e4   :  { %v1668_v18 = vpop.permute.xlu0 %1667  ;;  %v1666_v20 = vpop.permute.xlu1 %1665 }
 0x6e5   :  { %v1677_v60 = vsel %vm1331_vm11, %v1668_v18, 0.0  ;;  %v1674_v29 = vsel %vm1331_vm11, %v1666_v20, 0.0  ;;  %v1292_v24 = vadd.f32 %v1289_v45, %v10266_v35 }
 0x6e6   :  { %1678 = vadd.xlane.f32.xlu1 %v1677_v60  ;;  %1675 = vadd.xlane.f32.xlu0 %v1674_v29 }
 0x6e7   :  { %v10525_v44 = vadd.f32 %v1292_v24, %v10180_v14 }
 0x6e8   :  { %v1670_v59 = vpop.permute.xlu1 %1669 }
 0x6e9   :  { %v1681_v55 = vsel %vm1680_vm14, %v1670_v59, 0.0  ;;  %12411 = vst [vmem:[#allocation84_spill] sm:$0xff] %v10525_v44 }
 0x6ea   :  { %1682 = vadd.xlane.f32.xlu0 %v1681_v55 }
 0x700   :  { %8970 = vrot.lane.b32.xlu0 %v10236_v21, %s9602_s20 }
 0x704   :  { %2113 = vrot.lane.b32.xlu0 %v10525_v44, %s9602_s20 }
 0x76b   :  { %v1713_v18 = vpop.xlane.xlu0 %1712 }
 0x76c   :  { %1721 = vxpose.xlu1.b32.start [1/3] (short) (narrow) %v1713_v18, 8 }
 0x76f   :  { %v1719_v59 = vpop.xlane.xlu0 %1718  ;;  %v1716_v55 = vpop.xlane.xlu1 %1715 }
 0x770   :  { %1722 = vxpose.xlu1.b32.cont [2/3] (short) (narrow) %v1716_v55, 8 }
 0x773   :  { %v1676_v20 = vpop.xlane.xlu0 %1675 }
 0x774   :  { %1723 = vxpose.xlu1.b32.end [3/3] (short) (narrow) %v1719_v59, 8 }
 0x777   :  { %v1683_v60 = vpop.xlane.xlu0 %1682 }
 0x77b   :  { %v8971_v47 = vpop.permute.xlu0 %8970 }
 0x77c   :  { %v8973_v29 = vunpack.i.h.bf16 %v8971_v47  ;;  %v8972_v35 = vunpack.i.l.bf16 %v8971_v47 }
 0x77e   :  { %v8610_v0 = vpack.c.bf16 %v8973_v29, %v8972_v35 }
 0x77f   :  { %v2114_v45 = vpop.permute.xlu0 %2113 }
 0x780   :  { %8611 = vmatpush3.bf16.msra.mxu0 %v8610_v0 }
 0x781   :  { %7953 = vmatprep.subr.mxu0 %v12406_v36 }
 0x784   :  { %7954 = vmatpush3.msk.msra.mxu0 %vm1930_vm15, %v2114_v45  ;;  %v1764_v45 = vstv %s1312_s26 }
 0x785   :  { %8615 = vmatprep.subr.bf16.mxu0 %v12407_v33 }
 0x792   :  { %1917 = vrot.lane.b32.xlu1 %v10044_v7, %s9604_s18 }
 0x796   :  { %2573 = vrot.lane.b32.xlu1 %v10326_v54, %s9605_s27 }
 0x79a   :  { %9000 = vrot.lane.b32.xlu1 %v10304_v57, %s9605_s27 }
 0x79e   :  { %9005 = vrot.lane.b32.xlu1 %v10064_v15, %s9606_s23 }
 0x7a2   :  { %2567 = vrot.lane.b32.xlu1 %v10322_v42, %s9607_s21 }
 0x7a6   :  { %2667 = vrot.lane.b32.xlu1 %v10358_v51, %s9607_s21 }
 0x7a8   :  { %v1630_v24 = vpop.f32.mrb[6].mxu0 }
 0x7a9   :  { %v7897_v18 = vpop.f32.mrb[7].mxu0 }
 0x7aa   :  { %2669 = vrot.lane.b32.xlu1 %v10367_v23, %s9607_s21  ;;  %v1679_v23 = vpop.xlane.xlu1 %1678  ;;  %v1760_v18 = vstv %s1720_s1 }
 0x7ab   :  { %v1861_v54 = vpop.f32.mrb[8].mxu1 }
 0x7ac   :  { %v1635_v59 = vpop.f32.mrb[8].mxu0  ;;  %v7912_v55 = vpop.f32.mrb[9].mxu1 }
 0x7ad   :  { %v7900_v57 = vpop.f32.mrb[9].mxu0 }
 0x7ae   :  { %2671 = vrot.lane.b32.xlu1 %v10382_v10, %s9607_s21 }
 0x7af   :  { %v1866_v47 = vpop.f32.mrb[10].mxu1 }
 0x7b0   :  { %v1640_v29 = vpop.f32.mrb[10].mxu0  ;;  %v7915_v35 = vpop.f32.mrb[11].mxu1 }
 0x7b1   :  { %v7903_v0 = vpop.f32.mrb[11].mxu0  ;;  %v1765_v35 = vmul.f32 %v1764_v45, %v1630_v24 }
 0x7b2   :  { %2865 = vrot.lane.b32.xlu1 %v10505_v12, %s9602_s20  ;;  %v1766_v0 = vmul.f32 %v1764_v45, %v1635_v59 }
 0x7b3   :  { %v1871_v51 = vpop.f32.mrb[12].mxu1 }
 0x7b4   :  { %v7918_v42 = vpop.f32.mrb[13].mxu1 }
 0x7b6   :  { %2794 = vrot.lane.b32.xlu1 %v10406_v17, %s9605_s27 }
 0x7ba   :  { %2774 = vrot.lane.b32.xlu1 %v10422_v2, %s9607_s21  ;;  %v1767_v2 = vmul.f32 %v1764_v45, %v1640_v29  ;;  %v10567_v29 = vld [vmem:[%s12412_s0 + $0x10] sm:$0xf] }
 0x7be   :  { %2778 = vrot.lane.b32.xlu1 %v10428_v25, %s9607_s21 }
 0x7ec   :  { %v1737_v10 = vpop.trf.xlu1 }
 0x7ed   :  { %v1756_v12 = vrot.slane %v1737_v10, %v9964_v26 }
 0x7ef   :  { %v1757_v55 = vadd.f32 %v1756_v12, %v1676_v20  ;;  %v1758_v57 = vadd.f32 %v1756_v12, %v1679_v23  ;;  %v1759_v17 = vadd.f32 %v1756_v12, %v1683_v60  ;;  %v10561_v20 = vld [vmem:[%s12412_s0 + $0x8] sm:$0xff] }
 0x7f1   :  { %v1761_v42 = vmul.f32 %v1760_v18, %v1757_v55  ;;  %v1762_v25 = vmul.f32 %v1760_v18, %v1758_v57  ;;  %v1763_v44 = vmul.f32 %v1760_v18, %v1759_v17  ;;  %v1274_v18 = vmul.f32 %v10186_v19, %v10046_v8 }
 0x7f3   :  { %v1768_v5 = vadd.f32 %v1765_v35, %v1761_v42  ;;  %v1769_v14 = vadd.f32 %v1766_v0, %v1762_v25  ;;  %v1770_v13 = vadd.f32 %v1767_v2, %v1763_v44  ;;  %v1277_v55 = vadd.f32 %v1274_v18, %v10312_v6 }
 0x7f5   :  { %v1862_v9 = vadd.f32 %v1861_v54, %v1768_v5  ;;  %v1867_v58 = vadd.f32 %v1866_v47, %v1769_v14  ;;  %v1872_v10 = vadd.f32 %v1871_v51, %v1770_v13  ;;  %v1280_v17 = vadd.f32 %v1277_v55, %v10317_v30 }
 0x7f7   :  { %v1875_v60 = vadd.f32 %v1862_v9, %v10558_v52  ;;  %v1876_v59 = vadd.f32 %v1867_v58, %v10561_v20  ;;  %v1877_v44 = vadd.f32 %v1872_v10, %v10567_v29  ;;  %v10606_v35 = vadd.f32 %v1280_v17, %v10190_v22 }
 0x7f9   :  { %v1879_v24 = vsel %vm1878_vm2, %v1875_v60, -inf  ;;  %v1882_v23 = vsel %vm1878_vm2, %v1876_v59, -inf  ;;  %v1886_v5 = vsel %vm1885_vm3, %v1877_v44, -inf }
 0x7fa   :  { %1880 = vmax.xlane.f32.xlu0 %v1879_v24 }
 0x7fe   :  { %1883 = vmax.xlane.f32.xlu0 %v1882_v23 }
 0x802   :  { %1887 = vmax.xlane.f32.xlu0 %v1886_v5 }
 0x804   :  { %v1918_v13 = vpop.permute.xlu1 %1917 }
 0x808   :  { %v10572_v14 = vpop.permute.xlu1 %2573 }
 0x80c   :  { %v10574_v9 = vpop.permute.xlu1 %9000 }
 0x810   :  { %v10576_v54 = vpop.permute.xlu1 %9005 }
 0x814   :  { %v10578_v58 = vpop.permute.xlu1 %2567 }
 0x818   :  { %v10580_v47 = vpop.permute.xlu1 %2667  ;;  %8975 = vrot.lane.b32.xlu0 %v10064_v15, %s9604_s18 }
 0x81c   :  { %v10584_v51 = vpop.permute.xlu1 %2669  ;;  %8980 = vrot.lane.b32.xlu0 %v10234_v38, %s9605_s27 }
 0x820   :  { %v10588_v45 = vpop.permute.xlu1 %2671  ;;  %8985 = vrot.lane.b32.xlu0 %v10252_v46, %s9602_s20 }
 0x824   :  { %v10592_v12 = vpop.permute.xlu1 %2865  ;;  %2469 = vrot.lane.b32.xlu0 %v10271_v40, %s9605_s27 }
 0x828   :  { %v2795_v57 = vpop.permute.xlu1 %2794  ;;  %8990 = vrot.lane.b32.xlu0 %v10250_v11, %s9605_s27 }
 0x829   :  { %v2804_v38 = vsel %vm1331_vm11, %v2795_v57, 0.0 }
 0x82a   :  { %2805 = vadd.xlane.f32.xlu1 %v2804_v38  ;;  %v1298_v38 = vmul.f32 %v10282_v27, %v10046_v8 }
 0x82c   :  { %2459 = vrot.lane.b32.xlu0 %v10276_v37, %s9607_s21  ;;  %v1301_v17 = vadd.f32 %v1298_v38, %v10337_v56 }
 0x830   :  { %2020 = vrot.lane.b32.xlu0 %v10606_v35, %s9602_s20 }
 0x834   :  { %8995 = vrot.lane.b32.xlu0 %v10306_v4, %s9602_s20 }
 0x887   :  { %v1881_v40 = vpop.xlane.xlu0 %1880 }
 0x888   :  { %v1889_v6 = vsub.f32 %v1875_v60, %v1881_v40  ;;  %v1304_v40 = vadd.f32 %v1301_v17, %v10347_v39 }
 0x88a   :  { %v1892_v11 = vmul.f32 1.442695, %v1889_v6 }
 0x88b   :  { %v1884_v0 = vpop.xlane.xlu0 %1883 }
 0x88c   :  { %9123 = vpow2.f32 %v1892_v11  ;;  %v1890_v2 = vsub.f32 %v1876_v59, %v1884_v0 }
 0x88e   :  { %v1894_v30 = vmul.f32 1.442695, %v1890_v2 }
 0x88f   :  { %v1888_v42 = vpop.xlane.xlu0 %1887 }
 0x890   :  { %9125 = vpow2.f32 %v1894_v30  ;;  %v1891_v25 = vsub.f32 %v1877_v44, %v1888_v42 }
 0x892   :  { %v1896_v37 = vmul.f32 1.442695, %v1891_v25 }
 0x893   :  { %v8976_v10 = vpop.permute.xlu0 %8975 }
 0x894   :  { %9127 = vpow2.f32 %v1896_v37  ;;  %v8978_v24 = vunpack.i.h.bf16 %v8976_v10  ;;  %v8977_v23 = vunpack.i.l.bf16 %v8976_v10 }
 0x896   :  { %v9124_v5 = vpop.eup %9123  ;;  %v8604_v18 = vpack.c.bf16 %v8978_v24, %v8977_v23 }
 0x897   :  { %v1898_v55 = vsel %vm1878_vm2, %v9124_v5, 0.0  ;;  %v8981_v8 = vpop.permute.xlu0 %8980 }
 0x898   :  { %1899 = vadd.xlane.f32.xlu0 %v1898_v55  ;;  %8605 = vmatpush3.bf16.msra.mxu1 %v8604_v18 }
 0x899   :  { %7923 = vmatprep.subr.mxu1 %v12406_v36 }
 0x89a   :  { %v9126_v60 = vpop.eup %9125 }
 0x89b   :  { %v1901_v59 = vsel %vm1878_vm2, %v9126_v60, 0.0 }
 0x89c   :  { %1902 = vadd.xlane.f32.xlu0 %v1901_v59  ;;  %7924 = vmatpush3.msk.msra.mxu1 %vm1930_vm15, %v1918_v13  ;;  %v10627_v13 = vadd.f32 %v1304_v40, %v10328_v53 }
 0x89d   :  { %8606 = vmatprep.subr.bf16.mxu1 %v12407_v33 }
 0x89e   :  { %v9128_v44 = vpop.eup %9127 }
 0x89f   :  { %v1904_v57 = vsel %vm1885_vm3, %v9128_v44, 0.0 }
 0x8a0   :  { %1905 = vadd.xlane.f32.xlu0 %v1904_v57 }
 0x8b6   :  { %2461 = vrot.lane.b32.xlu0 %v10261_v62, %s9607_s21  ;;  %v8986_v62 = vpop.permute.xlu0 %8985 }
 0x8b7   :  { %v8988_v11 = vunpack.i.h.bf16 %v8986_v62  ;;  %v8987_v0 = vunpack.i.l.bf16 %v8986_v62  ;;  %v9002_v62 = vunpack.i.l.bf16 %v10574_v9 }
 0x8b9   :  { %v8607_v42 = vpack.c.bf16 %v8988_v11, %v8987_v0 }
 0x8ba   :  { %2463 = vrot.lane.b32.xlu0 %v10293_v31, %s9607_s21  ;;  %v2470_v31 = vpop.permute.xlu0 %2469 }
 0x8be   :  { %2206 = vrot.lane.b32.xlu0 %v10627_v13, %s9602_s20 }
 0x8c2   :  { %2563 = vrot.lane.b32.xlu0 %v10335_v43, %s9607_s21  ;;  %v8991_v43 = vpop.permute.xlu0 %8990 }
 0x8c3   :  { %v8993_v18 = vunpack.i.h.bf16 %v8991_v43  ;;  %v8992_v55 = vunpack.i.l.bf16 %v8991_v43  ;;  %v9007_v43 = vunpack.i.l.bf16 %v10576_v54 }
 0x8c6   :  { %2565 = vrot.lane.b32.xlu0 %v10344_v34, %s9607_s21  ;;  %v2460_v56 = vpop.permute.xlu0 %2459 }
 0x8ca   :  { %2677 = vrot.lane.b32.xlu0 %v10353_v49, %s9605_s27  ;;  %v2021_v34 = vpop.permute.xlu0 %2020 }
 0x8ce   :  { %2871 = vrot.lane.b32.xlu0 %v10044_v7, %s9606_s23  ;;  %v8996_v39 = vpop.permute.xlu0 %8995 }
 0x8cf   :  { %v8997_v59 = vunpack.i.l.bf16 %v8996_v39 }
 0x8d2   :  { %2861 = vrot.lane.b32.xlu0 %v10485_v63, %s9602_s20 }
 0x8d6   :  { %2863 = vrot.lane.b32.xlu0 %v10494_v32, %s9602_s20  ;;  %v8983_v32 = vunpack.i.h.bf16 %v8981_v8 }
 0x8da   :  { %2792 = vrot.lane.b32.xlu0 %v10384_v41, %s9605_s27  ;;  %v8982_v41 = vunpack.i.l.bf16 %v8981_v8  ;;  %v9003_v8 = vunpack.i.h.bf16 %v10574_v9 }
 0x8dc   :  { %v8616_v30 = vpack.c.bf16 %v8983_v32, %v8982_v41  ;;  %v8624_v9 = vpack.c.bf16 %v9003_v8, %v9002_v62  ;;  %v12415_v8 = vld [vmem:[#allocation50_spill] sm:$0xff] }
 0x8de   :  { %2796 = vrot.lane.b32.xlu0 %v10404_v61, %s9605_s27 }
 0x8e2   :  { %2776 = vrot.lane.b32.xlu0 %v10420_v48, %s9607_s21 }
 0x925   :  { %v1900_v49 = vpop.xlane.xlu0 %1899 }
 0x926   :  { %9129 = vrcp.f32 %v1900_v49 }
 0x929   :  { %v1903_v63 = vpop.xlane.xlu0 %1902 }
 0x92a   :  { %9131 = vrcp.f32 %v1903_v63 }
 0x92d   :  { %v1906_v6 = vpop.xlane.xlu0 %1905 }
 0x92e   :  { %9133 = vrcp.f32 %v1906_v6 }
 0x930   :  { %v9130_v61 = vpop.eup %9129 }
 0x931   :  { %v10649_v2 = vmul.f32 %v9130_v61, %v9124_v5  ;;  %v2462_v48 = vpop.permute.xlu0 %2461 }
 0x933   :  { %7926 = vmatmul.mubr.msk.f32.vlgmr.msra.gmra.mrb[14].mxu1 %vm1878_vm2, %v10649_v2  ;;  %7956 = vmatmul.mubr.msk.f32.vlgmr.msra.gmra.mrb[12].mxu0 %vm1878_vm2, %v10649_v2 }
 0x934   :  { %v9132_v25 = vpop.eup %9131  ;;  %8608 = vmatpush3.bf16.msra.mxu1 %v8607_v42  ;;  %8618 = vmatpush3.bf16.xpose.msk.msra.mxu0 %vm10434_vm12, %v8616_v30 }
 0x935   :  { %v2464_v37 = vpop.permute.xlu0 %2463  ;;  %7928 = vmatprep.mubr.msk.f32.mxu1 %vm9589_vm0, %v12406_v36  ;;  %7938 = vmatprep.subr.mxu1 %v12406_v36  ;;  %v10660_v10 = vmul.f32 %v9132_v25, %v9126_v60  ;;  %v8998_v60 = vunpack.i.h.bf16 %v8996_v39 }
 0x936   :  { %7958 = vmatprep.mubr.msk.f32.mxu0 %vm9589_vm0, %v12406_v36  ;;  %7983 = vmatprep.subr.mxu0 %v12406_v36 }
 0x937   :  { %7929 = vmatmul.mubr.msk.f32.gmra.mrb[16].mxu1 %vm1878_vm2, %v10660_v10  ;;  %7959 = vmatmul.mubr.msk.f32.gmra.mrb[14].mxu0 %vm1878_vm2, %v10660_v10  ;;  %v8613_v38 = vpack.c.bf16 %v8998_v60, %v8997_v59 }
 0x938   :  { %v9134_v24 = vpop.eup %9133  ;;  %7939 = vmatpush3.msk.msra.mxu1 %vm1930_vm15, %v2021_v34  ;;  %7931 = vmatprep.mubr.msk.f32.mxu1 %vm9589_vm0, %v12406_v36 }
 0x939   :  { %v2207_v23 = vpop.permute.xlu0 %2206  ;;  %7961 = vmatprep.mubr.msk.f32.mxu0 %vm9589_vm0, %v12406_v36  ;;  %v1912_v5 = vmul.f32 %v9134_v24, %v9128_v44  ;;  %8612 = vmatprep.subr.bf16.mxu1 %v12407_v33  ;;  %v8620_v44 = vpack.c.bf16 %v8993_v18, %v8992_v55 }
 0x93b   :  { %7932 = vmatmul.mubr.msk.f32.gmra.mrb[18].mxu1 %vm1878_vm2, %v1912_v5  ;;  %7962 = vmatmul.mubr.msk.f32.gmra.mrb[16].mxu0 %vm1878_vm2, %v1912_v5 }
 0x93c   :  { %7984 = vmatpush3.xpose.msk.msra.mxu0 %vm1331_vm11, %v2470_v31  ;;  %7940 = vmatprep.mubr.msk.f32.mxu1 %vm9589_vm0, %v12406_v36  ;;  %v9008_v31 = vunpack.i.h.bf16 %v10576_v54 }
 0x93d   :  { %v2564_v57 = vpop.permute.xlu0 %2563  ;;  %7985 = vmatprep.mubr.msk.f32.mxu0 %vm9589_vm0, %v12406_v36  ;;  %8619 = vmatprep.subr.bf16.mxu0 %v12407_v33 }
 0x93e   :  { %v8628_v34 = vpack.c.bf16 %v9008_v31, %v9007_v43  ;;  %v12416_v31 = vld [vmem:[#allocation71_spill] sm:$0xff] }
 0x93f   :  { %7941 = vmatmul.mubr.msk.f32.vlgmr.msra.gmra.mrb[20].mxu1 %vm1878_vm2, %v10649_v2  ;;  %7986 = vmatmul.mubr.msk.f32.vlgmr.msra.gmra.mrb[18].mxu0 %vm1331_vm11, %v2460_v56 }
 0x940   :  { %8614 = vmatpush3.bf16.msra.mxu1 %v8613_v38  ;;  %8622 = vmatpush3.bf16.xpose.msk.msra.mxu0 %vm10434_vm12, %v8620_v44  ;;  %v12413_v38 = vld [vmem:[#allocation56_spill] sm:$0xff] }
 0x941   :  { %v2566_v17 = vpop.permute.xlu0 %2565  ;;  %7943 = vmatprep.mubr.msk.f32.mxu1 %vm9589_vm0, %v12406_v36  ;;  %7968 = vmatprep.subr.mxu1 %v12406_v36 }
 0x942   :  { %7988 = vmatprep.mubr.msk.f32.mxu0 %vm9589_vm0, %v12406_v36  ;;  %7998 = vmatprep.subr.mxu0 %v12406_v36 }
 0x943   :  { %7944 = vmatmul.mubr.msk.f32.gmra.mrb[22].mxu1 %vm1878_vm2, %v10660_v10  ;;  %7989 = vmatmul.mubr.msk.f32.gmra.mrb[20].mxu0 %vm1331_vm11, %v2462_v48 }
 0x944   :  { %7969 = vmatpush3.msk.msra.mxu1 %vm1930_vm15, %v2207_v23  ;;  %7946 = vmatprep.mubr.msk.f32.mxu1 %vm9589_vm0, %v12406_v36 }
 0x945   :  { %v2678_v40 = vpop.permute.xlu0 %2677  ;;  %7991 = vmatprep.mubr.msk.f32.mxu0 %vm9589_vm0, %v12406_v36  ;;  %8627 = vmatprep.subr.bf16.mxu1 %v12407_v33 }
 0x947   :  { %7947 = vmatmul.mubr.msk.f32.gmra.mrb[24].mxu1 %vm1878_vm2, %v1912_v5  ;;  %7992 = vmatmul.mubr.msk.f32.gmra.mrb[22].mxu0 %vm1331_vm11, %v2464_v37 }
 0x948   :  { %7999 = vmatpush3.xpose.msk.msra.mxu0 %vm1331_vm11, %v10572_v14  ;;  %7970 = vmatprep.mubr.msk.f32.mxu1 %vm9589_vm0, %v12406_v36 }
 0x949   :  { %v2872_v56 = vpop.permute.xlu0 %2871  ;;  %8000 = vmatprep.mubr.msk.f32.mxu0 %vm9589_vm0, %v12406_v36  ;;  %8623 = vmatprep.subr.bf16.mxu0 %v12407_v33 }
 0x94b   :  { %7971 = vmatmul.mubr.msk.f32.vlgmr.msra.gmra.mrb[26].mxu1 %vm1878_vm2, %v10649_v2  ;;  %8001 = vmatmul.mubr.msk.f32.vlgmr.msra.gmra.mrb[18].mxu0 %vm1331_vm11, %v2564_v57 }
 0x94c   :  { %8626 = vmatpush3.bf16.xpose.msk.msra.mxu0 %vm10434_vm12, %v8624_v9  ;;  %8630 = vmatpush3.bf16.xpose.msk.msra.mxu1 %vm10457_vm13, %v8628_v34  ;;  %v12418_v34 = vld [vmem:[#allocation57_spill] sm:$0xff] }
 0x94d   :  { %v2862_v14 = vpop.permute.xlu0 %2861  ;;  %7973 = vmatprep.mubr.msk.f32.mxu1 %vm9589_vm0, %v12406_v36  ;;  %8003 = vmatprep.mubr.msk.f32.mxu0 %vm9589_vm0, %v12406_v36 }
 0x94e   :  { %8013 = vmatprep.subr.mxu0 %v12406_v36  ;;  %8028 = vmatprep.subr.mxu1 %v12406_v36 }
 0x94f   :  { %7974 = vmatmul.mubr.msk.f32.gmra.mrb[28].mxu1 %vm1878_vm2, %v10660_v10  ;;  %8004 = vmatmul.mubr.msk.f32.gmra.mrb[20].mxu0 %vm1331_vm11, %v2566_v17 }
 0x950   :  { %7976 = vmatprep.mubr.msk.f32.mxu1 %vm9589_vm0, %v12406_v36  ;;  %8006 = vmatprep.mubr.msk.f32.mxu0 %vm9589_vm0, %v12406_v36 }
 0x951   :  { %v2864_v54 = vpop.permute.xlu0 %2863 }
 0x953   :  { %7977 = vmatmul.mubr.msk.f32.gmra.mrb[30].mxu1 %vm1878_vm2, %v1912_v5  ;;  %8007 = vmatmul.mubr.msk.f32.gmra.mrb[22].mxu0 %vm1331_vm11, %v10578_v58  ;;  %v2775_v58 = vpop.permute.xlu1 %2774 }
 0x954   :  { %8014 = vmatpush3.xpose.msk.msra.mxu0 %vm1331_vm11, %v2678_v40  ;;  %8029 = vmatpush3.xpose.msk.msra.mxu1 %vm318_vm1, %v2872_v56  ;;  %v2783_v6 = vsel %vm1331_vm11, %v2775_v58, 0.0  ;;  %v12417_v56 = vld [vmem:[#allocation53_spill] sm:$0xff] }
 0x955   :  { %v2793_v39 = vpop.permute.xlu0 %2792  ;;  %8015 = vmatprep.mubr.msk.f32.mxu0 %vm9589_vm0, %v12406_v36  ;;  %8030 = vmatprep.mubr.msk.f32.mxu1 %vm9589_vm0, %v12406_v36 }
 0x956   :  { %v2801_v49 = vsel %vm1331_vm11, %v2793_v39, 0.0  ;;  %8637 = vmatprep.subr.bf16.mxu0 %v12407_v33  ;;  %8631 = vmatprep.subr.bf16.mxu1 %v12407_v33 }
 0x957   :  { %2802 = vadd.xlane.f32.xlu0 %v2801_v49  ;;  %8016 = vmatmul.mubr.msk.f32.vlgmr.msra.gmra.mrb[18].mxu0 %vm1331_vm11, %v10580_v47  ;;  %v2779_v11 = vpop.permute.xlu1 %2778 }
 0x958   :  { %8031 = vmatmul.mubr.msk.f32.vlgmr.msra.gmra.mrb[32].mxu1 %vm318_vm1, %v2862_v14  ;;  %8018 = vmatprep.mubr.msk.f32.mxu0 %vm9589_vm0, %v12406_v36 }
 0x959   :  { %v2797_v63 = vpop.permute.xlu0 %2796  ;;  %8033 = vmatprep.mubr.msk.f32.mxu1 %vm9589_vm0, %v12406_v36 }
 0x95a   :  { %v2807_v32 = vsel %vm1680_vm14, %v2797_v63, 0.0  ;;  %v12419_v63 = vld [vmem:[#allocation73_spill] sm:$0xff] }
 0x95b   :  { %2808 = vadd.xlane.f32.xlu0 %v2807_v32  ;;  %8019 = vmatmul.mubr.msk.f32.gmra.mrb[20].mxu0 %vm1331_vm11, %v10584_v51  ;;  %v2789_v51 = vsel %vm1680_vm14, %v2779_v11, 0.0  ;;  %v2806_v61 = vpop.xlane.xlu1 %2805  ;;  %v12421_v11 = vld [vmem:[#allocation49_spill] sm:$0xff] }
 0x95c   :  { %8034 = vmatmul.mubr.msk.f32.gmra.mrb[34].mxu1 %vm318_vm1, %v2864_v54  ;;  %8021 = vmatprep.mubr.msk.f32.mxu0 %vm9589_vm0, %v12406_v36 }
 0x95d   :  { %v2777_v47 = vpop.permute.xlu0 %2776  ;;  %8036 = vmatprep.mubr.msk.f32.mxu1 %vm9589_vm0, %v12406_v36 }
 0x95e   :  { %v2786_v41 = vsel %vm1331_vm11, %v2777_v47, 0.0 }
 0x95f   :  { %2784 = vadd.xlane.f32.xlu0 %v2783_v6  ;;  %2787 = vadd.xlane.f32.xlu1 %v2786_v41  ;;  %v12420_v6 = vld [vmem:[#allocation67_spill] sm:$0xff] }
 0x960   :  { %8022 = vmatmul.mubr.msk.f32.gmra.mrb[22].mxu0 %vm1331_vm11, %v10588_v45  ;;  %8037 = vmatmul.mubr.msk.f32.gmra.mrb[36].mxu1 %vm318_vm1, %v10592_v12 }
 0x961   :  { %8045 = vmatprep.mubr.msk.f32.mxu1 %vm9589_vm0, %v12406_v36  ;;  %8075 = vmatprep.mubr.msk.f32.mxu0 %vm9589_vm0, %v12406_v36 }
 0x963   :  { %2790 = vadd.xlane.f32.xlu0 %v2789_v51 }
 0x9e4   :  { %v2803_v0 = vpop.xlane.xlu0 %2802 }
 0x9e5   :  { %2811 = vxpose.xlu1.b32.start [1/3] (short) (narrow) %v2803_v0, 8  ;;  %v12422_v0 = vld [vmem:[#allocation72_spill] sm:$0xff] }
 0x9e8   :  { %v2809_v2 = vpop.xlane.xlu0 %2808 }
 0x9e9   :  { %2812 = vxpose.xlu1.b32.cont [2/3] (short) (narrow) %v2806_v61, 8 }
 0x9ed   :  { %2813 = vxpose.xlu1.b32.end [3/3] (short) (narrow) %v2809_v2, 8  ;;  %v12423_v2 = vld [vmem:[#allocation51_spill] sm:$0xff] }
 0xa06   :  { %v1999_v48 = vpop.f32.mrb[14].mxu1  ;;  %v2185_v45 = vpop.f32.mrb[12].mxu0 }
 0xa07   :  { %2385 = vst.msk [vmem:[#allocation3] sm:$0xff] %vm318_vm1, %v1999_v48  ;;  %v7927_v12 = vpop.f32.mrb[15].mxu1  ;;  %v7957_v30 = vpop.f32.mrb[13].mxu0  ;;  %v2295_v55 = vsub.f32 %v2185_v45, %v10160_v50  ;;  %v12424_v45 = vld [vmem:[#allocation70_spill] sm:$0xff] }
 0xa08   :  { %v12425_v30 = vld [vmem:[#allocation54_spill] sm:$0xff] }
 0xa09   :  { %v2304_v44 = vmul.f32 %v2295_v55, %v10170_v3  ;;  %v2319_v17 = vmul.f32 %v2295_v55, %v12413_v38  ;;  %v2334_v62 = vmul.f32 %v2295_v55, %v12415_v8 }
 0xa0a   :  { %v2004_v42 = vpop.f32.mrb[16].mxu1  ;;  %v2190_v25 = vpop.f32.mrb[14].mxu0 }
 0xa0b   :  { %2386 = vst.msk [vmem:[#allocation3 + $0x8] sm:$0xff] %vm318_vm1, %v2004_v42  ;;  %9020 = vrot.lane.b32.xlu1 %v10236_v21, %s9608_s2  ;;  %v7930_v37 = vpop.f32.mrb[17].mxu1  ;;  %v7960_v10 = vpop.f32.mrb[15].mxu0  ;;  %v12414_v21 = vld [vmem:[#allocation69_spill] sm:$0xff] }
 0xa0c   :  { %v2296_v40 = vsub.f32 %v2190_v25, %v12414_v21  ;;  %v12426_v25 = vld [vmem:[#allocation58_spill] sm:$0xff] }
 0xa0e   :  { %v2009_v24 = vpop.f32.mrb[18].mxu1  ;;  %v2195_v23 = vpop.f32.mrb[16].mxu0  ;;  %v2305_v41 = vmul.f32 %v2296_v40, %v12420_v6  ;;  %v2320_v51 = vmul.f32 %v2296_v40, %v12421_v11  ;;  %v2335_v48 = vmul.f32 %v2296_v40, %v12423_v2 }
 0xa0f   :  { %2388 = vst.msk [vmem:[#allocation3 + $0x10] sm:$0xf] %vm12292_vm4, %v2009_v24  ;;  %v7933_v5 = vpop.f32.mrb[19].mxu1  ;;  %v7963_v18 = vpop.f32.mrb[17].mxu0  ;;  %v2297_v61 = vsub.f32 %v2195_v23, %v12422_v0  ;;  %v12429_v23 = vld [vmem:[#allocation55_spill] sm:$0xff]  ;;  %vm12297_vm4 = vcmask 322848  }
 0xa12   :  { %v2092_v60 = vpop.f32.mrb[20].mxu1 }
 0xa13   :  { %v2292_v59 = vsub.f32 %v2092_v60, %v10182_v16  ;;  %v7942_v57 = vpop.f32.mrb[21].mxu1 }
 0xa15   :  { %v2301_v43 = vmul.f32 %v2292_v59, %v12416_v31  ;;  %v2316_v9 = vmul.f32 %v2292_v59, %v12417_v56  ;;  %v2331_v14 = vmul.f32 %v2292_v59, %v12418_v34  ;;  %v12427_v59 = vld [vmem:[#allocation68_spill] sm:$0xff] }
 0xa16   :  { %v2097_v54 = vpop.f32.mrb[22].mxu1  ;;  %v2306_v57 = vmul.f32 %v2297_v61, %v12427_v59 }
 0xa17   :  { %v2307_v39 = vadd.f32 %v2304_v44, %v2301_v43  ;;  %v2322_v49 = vadd.f32 %v2319_v17, %v2316_v9  ;;  %v2337_v58 = vadd.f32 %v2334_v62, %v2331_v14  ;;  %v2293_v32 = vsub.f32 %v2097_v54, %v12419_v63  ;;  %v7945_v47 = vpop.f32.mrb[23].mxu1  ;;  %v12428_v44 = vld [vmem:[#allocation52_spill] sm:$0xff]  ;;  %v12430_v43 = vld [vmem:[#allocation59_spill] sm:$0xff]  ;;  %v12431_v14 = vld [vmem:[#allocation61_spill] sm:$0xff] }
 0xa18   :  { %v2321_v17 = vmul.f32 %v2297_v61, %v12428_v44  ;;  %v2336_v62 = vmul.f32 %v2297_v61, %v12429_v23 }
 0xa19   :  { %v2302_v12 = vmul.f32 %v2293_v32, %v12424_v45  ;;  %v2317_v42 = vmul.f32 %v2293_v32, %v12425_v30  ;;  %v2332_v37 = vmul.f32 %v2293_v32, %v12426_v25 }
 0xa1a   :  { %v2102_v10 = vpop.f32.mrb[24].mxu1 }
 0xa1b   :  { %v2308_v24 = vadd.f32 %v2305_v41, %v2302_v12  ;;  %v2323_v5 = vadd.f32 %v2320_v51, %v2317_v42  ;;  %v2338_v18 = vadd.f32 %v2335_v48, %v2332_v37  ;;  %v2294_v55 = vsub.f32 %v2102_v10, %v10190_v22  ;;  %v7948_v60 = vpop.f32.mrb[25].mxu1  ;;  %v12432_v48 = vld [vmem:[#allocation78_spill] sm:$0xff]  ;;  %v12433_v37 = vld [vmem:[#allocation75_spill] sm:$0xff] }
 0xa1c   :  { %v12434_v60 = vld [vmem:[#allocation60_spill] sm:$0xff] }
 0xa1d   :  { %v2303_v40 = vmul.f32 %v2294_v55, %v10186_v19  ;;  %v2318_v9 = vmul.f32 %v2294_v55, %v12430_v43  ;;  %v2333_v54 = vmul.f32 %v2294_v55, %v12431_v14  ;;  %v12436_v55 = vld [vmem:[#allocation79_spill] sm:$0xff] }
 0xa1e   :  { %v2278_v32 = vpop.f32.mrb[26].mxu1 }
 0xa1f   :  { %v2309_v47 = vadd.f32 %v2306_v57, %v2303_v40  ;;  %v2324_v41 = vadd.f32 %v2321_v17, %v2318_v9  ;;  %v2339_v51 = vadd.f32 %v2336_v62, %v2333_v54  ;;  %v2298_v12 = vsub.f32 %v2278_v32, %v12432_v48  ;;  %v7972_v42 = vpop.f32.mrb[27].mxu1  ;;  %v12437_v9 = vld [vmem:[#allocation77_spill] sm:$0xff]  ;;  %v12438_v32 = vld [vmem:[#allocation62_spill] sm:$0xff] }
 0xa20   :  { %v12439_v42 = vld [vmem:[#allocation63_spill] sm:$0xff] }
 0xa21   :  { %v2310_v10 = vmul.f32 %v2298_v12, %v12433_v37  ;;  %v2325_v28 = vmul.f32 %v2298_v12, %v12434_v60  ;;  %v2340_v44 = vmul.f32 %v2298_v12, %v12435_v1 }
 0xa22   :  { %v2283_v61 = vpop.f32.mrb[28].mxu1 }
 0xa23   :  { %v10807_v23 = vadd.f32 %v2310_v10, %v2307_v39  ;;  %v10809_v19 = vadd.f32 %v2325_v28, %v2322_v49  ;;  %v10811_v43 = vadd.f32 %v2340_v44, %v2337_v58  ;;  %v2299_v57 = vsub.f32 %v2283_v61, %v12436_v55  ;;  %v7975_v17 = vpop.f32.mrb[29].mxu1 }
 0xa25   :  { %v2346_v62 = vmul.f32 %v10807_v23, %v10807_v23  ;;  %v2349_v40 = vmul.f32 %v10809_v19, %v10809_v19  ;;  %v2311_v54 = vmul.f32 %v2299_v57, %v12437_v9  ;;  %v2326_v12 = vmul.f32 %v2299_v57, %v12438_v32 }
 0xa26   :  { %v2341_v39 = vmul.f32 %v2299_v57, %v12439_v42  ;;  %v2288_v10 = vpop.f32.mrb[30].mxu1  ;;  %v2355_v49 = vmul.f32 %v10811_v43, %v10811_v43 }
 0xa27   :  { %v2352_v28 = vadd.f32 %v2349_v40, %v2346_v62  ;;  %v10823_v58 = vadd.f32 %v2311_v54, %v2308_v24  ;;  %v2300_v44 = vsub.f32 %v2288_v10, %v10328_v53  ;;  %v7978_v61 = vpop.f32.mrb[31].mxu1  ;;  %v10826_v17 = vadd.f32 %v2326_v12, %v2323_v5  ;;  %v12440_v62 = vld [vmem:[#allocation65_spill] sm:$0xff]  ;;  %v12441_v54 = vld [vmem:[#allocation66_spill] sm:$0xff]  ;;  %v2785_v53 = vpop.xlane.xlu0 %2784 }
 0xa28   :  { %v10828_v55 = vadd.f32 %v2341_v39, %v2338_v18 }
 0xa29   :  { %v10830_v1 = vadd.f32 %v2355_v49, %v2352_v28  ;;  %v2347_v32 = vmul.f32 %v10823_v58, %v10823_v58  ;;  %v2312_v57 = vmul.f32 %v2300_v44, %v10282_v27  ;;  %v2327_v40 = vmul.f32 %v2300_v44, %v12440_v62 }
 0xa2a   :  { %v2350_v24 = vmul.f32 %v10826_v17, %v10826_v17  ;;  %v2342_v42 = vmul.f32 %v2300_v44, %v12441_v54  ;;  %v2757_v10 = vpop.f32.mrb[18].mxu0  ;;  %v2356_v28 = vmul.f32 %v10828_v55, %v10828_v55 }
 0xa2b   :  { %v10839_v61 = vadd.f32 %v2312_v57, %v2309_v47  ;;  %v10841_v5 = vadd.f32 %v2327_v40, %v2324_v41  ;;  %v2951_v18 = vpop.f32.mrb[32].mxu1  ;;  %v8017_v12 = vpop.f32.mrb[19].mxu0 }
 0xa2c   :  { %v2353_v39 = vadd.f32 %v2350_v24, %v2347_v32  ;;  %v10845_v49 = vadd.f32 %v2342_v42, %v2339_v51  ;;  %v8032_v27 = vpop.f32.mrb[33].mxu1  ;;  %v2788_v24 = vpop.xlane.xlu1 %2787  ;;  %v2854_v51 = vstv %s2458_s7 }
 0xa2d   :  { %12442 = vst [vmem:[#allocation85_spill] sm:$0xff] %v10841_v5  ;;  %2413 = vrot.lane.b32.xlu1 %v10841_v5, %s9609_s4  ;;  %v2791_v9 = vpop.xlane.xlu0 %2790 }
 0xa2e   :  { %v10849_v62 = vadd.f32 %v2356_v28, %v2353_v39  ;;  %v2762_v44 = vpop.f32.mrb[20].mxu0  ;;  %v2850_v39 = vstv %s2810_s9 }
 0xa2f   :  { %v2956_v47 = vpop.f32.mrb[34].mxu1  ;;  %v8020_v57 = vpop.f32.mrb[21].mxu0 }
 0xa30   :  { %v8035_v41 = vpop.f32.mrb[35].mxu1  ;;  %v2855_v57 = vmul.f32 %v2854_v51, %v2757_v10 }
 0xa31   :  { %v2856_v41 = vmul.f32 %v2854_v51, %v2762_v44 }
 0xa33   :  { %v2767_v40 = vpop.f32.mrb[22].mxu0  ;;  %v2961_v54 = vpop.f32.mrb[36].mxu1 }
 0xa34   :  { %v8023_v12 = vpop.f32.mrb[23].mxu0  ;;  %v8038_v32 = vpop.f32.mrb[37].mxu1  ;;  %v2857_v48 = vmul.f32 %v2854_v51, %v2767_v40 }
 0xa65   :  { %v2827_v27 = vpop.trf.xlu1 }
 0xa66   :  { %v2846_v42 = vrot.slane %v2827_v27, %v9964_v26  ;;  %v3552_v26 = vld [vmem:[%s12461_s25 + $0x8] sm:$0xff] }
 0xa68   :  { %v2847_v28 = vadd.f32 %v2846_v42, %v2785_v53  ;;  %v2848_v60 = vadd.f32 %v2846_v42, %v2788_v24  ;;  %v2849_v37 = vadd.f32 %v2846_v42, %v2791_v9 }
 0xa6a   :  { %v2851_v5 = vmul.f32 %v2850_v39, %v2847_v28  ;;  %v2852_v12 = vmul.f32 %v2850_v39, %v2848_v60  ;;  %v2853_v32 = vmul.f32 %v2850_v39, %v2849_v37  ;;  %v2361_v39 = vadd.f32 1e-08, %v10830_v1  ;;  %v12443_v28 = vld [vmem:[#allocation84_spill] sm:$0xff] }
 0xa6c   :  { %v2858_v14 = vadd.f32 %v2855_v57, %v2851_v5  ;;  %v2859_v59 = vadd.f32 %v2856_v41, %v2852_v12  ;;  %v2860_v22 = vadd.f32 %v2857_v48, %v2853_v32  ;;  %v2362_v41 = vadd.f32 1e-08, %v10849_v62 }
 0xa6d   :  { %vm2366_vm5 = vcmp.eq.f32.partialorder %v2361_v39, inf  ;;  %vm2368_vm6 = vcmp.eq.f32.partialorder %v2361_v39, 0.0 }
 0xa6e   :  { %v2952_v25 = vadd.f32 %v2951_v18, %v2858_v14  ;;  %v2957_v30 = vadd.f32 %v2956_v47, %v2859_v59  ;;  %v2962_v45 = vadd.f32 %v2961_v54, %v2860_v22  ;;  %vm2373_vm7 = vcmp.eq.f32.partialorder %v2362_v41, inf }
 0xa6f   :  { %v2376_v62 = vand.u32 2147483648, %v2362_v41  ;;  %vm2375_vm8 = vcmp.eq.f32.partialorder %v2362_v41, 0.0 }
 0xa70   :  { %v2965_v2 = vadd.f32 %v2952_v25, %v10558_v52  ;;  %v2966_v53 = vadd.f32 %v2957_v30, %v10561_v20  ;;  %v2967_v10 = vadd.f32 %v2962_v45, %v10567_v29 }
 0xa72   :  { %v2968_v27 = vsel %vm1878_vm2, %v2965_v2, -inf  ;;  %v2971_v9 = vsel %vm1878_vm2, %v2966_v53, -inf  ;;  %v2974_v37 = vsel %vm1885_vm3, %v2967_v10, -inf }
 0xa73   :  { %2969 = vmax.xlane.f32.xlu0 %v2968_v27 }
 0xa77   :  { %2972 = vmax.xlane.f32.xlu0 %v2971_v9 }
 0xa7b   :  { %2975 = vmax.xlane.f32.xlu0 %v2974_v37 }
 0xa7d   :  { %v9021_v60 = vpop.permute.xlu1 %9020 }
 0xa7e   :  { %v9023_v48 = vunpack.i.h.bf16 %v9021_v60  ;;  %v9022_v14 = vunpack.i.l.bf16 %v9021_v60 }
 0xa80   :  { %v8638_v59 = vpack.c.bf16 %v9023_v48, %v9022_v14 }
 0xa82   :  { %8639 = vmatpush3.bf16.msra.mxu0 %v8638_v59 }
 0xa83   :  { %8073 = vmatprep.subr.mxu0 %v12406_v36 }
 0xa91   :  { %9010 = vrot.lane.b32.xlu0 %v10064_v15, %s9610_s14 }
 0xa95   :  { %3005 = vrot.lane.b32.xlu0 %v10044_v7, %s9610_s14 }
 0xa99   :  { %9015 = vrot.lane.b32.xlu0 %v10252_v46, %s9608_s2 }
 0xb00   :  { %v2970_v52 = vpop.xlane.xlu0 %2969 }
 0xb01   :  { %v2977_v22 = vsub.f32 %v2965_v2, %v2970_v52 }
 0xb03   :  { %v2980_v20 = vmul.f32 1.442695, %v2977_v22 }
 0xb04   :  { %v2973_v29 = vpop.xlane.xlu0 %2972 }
 0xb05   :  { %9135 = vpow2.f32 %v2980_v20  ;;  %v2978_v45 = vsub.f32 %v2966_v53, %v2973_v29 }
 0xb07   :  { %v2982_v30 = vmul.f32 1.442695, %v2978_v45 }
 0xb08   :  { %v2976_v25 = vpop.xlane.xlu0 %2975 }
 0xb09   :  { %9137 = vpow2.f32 %v2982_v30  ;;  %v2979_v54 = vsub.f32 %v2967_v10, %v2976_v25 }
 0xb0b   :  { %v2984_v5 = vmul.f32 1.442695, %v2979_v54 }
 0xb0c   :  { %v9011_v18 = vpop.permute.xlu0 %9010 }
 0xb0d   :  { %9139 = vpow2.f32 %v2984_v5  ;;  %v9013_v15 = vunpack.i.h.bf16 %v9011_v18  ;;  %v9012_v44 = vunpack.i.l.bf16 %v9011_v18 }
 0xb0e   :  { %9141 = vrsqrt.f32 %v2361_v39 }
 0xb0f   :  { %v9136_v47 = vpop.eup %9135  ;;  %v8632_v7 = vpack.c.bf16 %v9013_v15, %v9012_v44  ;;  %9143 = vrsqrt.f32 %v2362_v41 }
 0xb10   :  { %v2986_v40 = vsel %vm1878_vm2, %v9136_v47, 0.0  ;;  %v3006_v2 = vpop.permute.xlu0 %3005 }
 0xb11   :  { %2987 = vadd.xlane.f32.xlu0 %v2986_v40  ;;  %8633 = vmatpush3.bf16.msra.mxu1 %v8632_v7 }
 0xb12   :  { %8043 = vmatprep.subr.mxu1 %v12406_v36 }
 0xb13   :  { %v9138_v46 = vpop.eup %9137 }
 0xb14   :  { %v2989_v24 = vsel %vm1878_vm2, %v9138_v46, 0.0 }
 0xb15   :  { %2990 = vadd.xlane.f32.xlu0 %v2989_v24  ;;  %8044 = vmatpush3.msk.msra.mxu1 %vm1930_vm15, %v3006_v2  ;;  %v2414_v2 = vpop.permute.xlu1 %2413 }
 0xb16   :  { %8634 = vmatprep.subr.bf16.mxu1 %v12407_v33 }
 0xb17   :  { %v9140_v51 = vpop.eup %9139 }
 0xb18   :  { %v2992_v42 = vsel %vm1885_vm3, %v9140_v51, 0.0  ;;  %v9142_v57 = vpop.eup %9141 }
 0xb19   :  { %2993 = vadd.xlane.f32.xlu0 %v2992_v42  ;;  %v2365_v1 = vmul.f32 %v9142_v57, %v2361_v39 }
 0xb2f   :  { %3104 = vrot.lane.b32.xlu0 %v10606_v35, %s9608_s2  ;;  %v2369_v35 = vand.u32 2147483648, %v2361_v39 }
 0xb33   :  { %9025 = vrot.lane.b32.xlu0 %v10306_v4, %s9608_s2  ;;  %v2367_v4 = vsel %vm2366_vm5, %v2361_v39, %v2365_v1  ;;  %vm12301_vm5 = vcmask 326944  }
 0xb37   :  { %3194 = vrot.lane.b32.xlu0 %v12443_v28, %s9608_s2 }
 0xb3b   :  { %3284 = vrot.lane.b32.xlu0 %v10627_v13, %s9608_s2  ;;  %v2370_v13 = vsel %vm2368_vm6, %v2369_v35, %v2367_v4  ;;  %vm12300_vm6 = vcmask 359744  }
 0xb3f   :  { %2392 = vrot.lane.b32.xlu0 %v10807_v23, %s9592_s8  ;;  %v9144_v23 = vpop.eup %9143 }
 0xb43   :  { %2409 = vrot.lane.b32.xlu0 %v10809_v19, %s9609_s4  ;;  %v2372_v19 = vmul.f32 %v9144_v23, %v2362_v41 }
 0xb47   :  { %2426 = vrot.lane.b32.xlu0 %v10811_v43, %s9611_s12  ;;  %v2374_v43 = vsel %vm2373_vm7, %v2362_v41, %v2372_v19  ;;  %vm12299_vm7 = vcmask 490944  }
 0xb48   :  { %v2377_v12 = vsel %vm2375_vm8, %v2376_v62, %v2374_v43  ;;  %vm12298_vm8 = vcmask 290048  }
 0xb4b   :  { %2443 = vrot.lane.b32.xlu0 %v2370_v13, %s9612_s24 }
 0xb4f   :  { %2394 = vrot.lane.b32.xlu0 %v10823_v58, %s9592_s8  ;;  %v9016_v58 = vpop.permute.xlu0 %9015 }
 0xb50   :  { %v9018_v53 = vunpack.i.h.bf16 %v9016_v58 }
 0xb53   :  { %2411 = vrot.lane.b32.xlu0 %v10826_v17, %s9609_s4 }
 0xb57   :  { %2428 = vrot.lane.b32.xlu0 %v10828_v55, %s9611_s12  ;;  %v9017_v55 = vunpack.i.l.bf16 %v9016_v58 }
 0xb59   :  { %v8635_v60 = vpack.c.bf16 %v9018_v53, %v9017_v55 }
 0xb5b   :  { %2445 = vrot.lane.b32.xlu0 %v2377_v12, %s9612_s24 }
 0xb5f   :  { %2396 = vrot.lane.b32.xlu0 %v10839_v61, %s9592_s8 }
 0xb63   :  { %2430 = vrot.lane.b32.xlu0 %v10845_v49, %s9611_s12 }
 0xb9e   :  { %v2988_v32 = vpop.xlane.xlu0 %2987 }
 0xb9f   :  { %9145 = vrcp.f32 %v2988_v32 }
 0xba2   :  { %v2991_v17 = vpop.xlane.xlu0 %2990 }
 0xba3   :  { %9147 = vrcp.f32 %v2991_v17 }
 0xba6   :  { %v2994_v27 = vpop.xlane.xlu0 %2993 }
 0xba7   :  { %9149 = vrcp.f32 %v2994_v27 }
 0xba9   :  { %v9146_v9 = vpop.eup %9145 }
 0xbaa   :  { %v2998_v10 = vmul.f32 %v9146_v9, %v9136_v47  ;;  %v3105_v37 = vpop.permute.xlu0 %3104 }
 0xbac   :  { %8046 = vmatmul.mubr.msk.f32.vlgmr.msra.gmra.mrb[38].mxu1 %vm1878_vm2, %v2998_v10 }
 0xbad   :  { %v9148_v48 = vpop.eup %9147  ;;  %8636 = vmatpush3.bf16.msra.mxu1 %v8635_v60  ;;  %8048 = vmatprep.mubr.msk.f32.mxu1 %vm9589_vm0, %v12406_v36 }
 0xbae   :  { %v9026_v14 = vpop.permute.xlu0 %9025  ;;  %8058 = vmatprep.subr.mxu1 %v12406_v36  ;;  %v2999_v59 = vmul.f32 %v9148_v48, %v9138_v46 }
 0xbaf   :  { %v9028_v29 = vunpack.i.h.bf16 %v9026_v14  ;;  %v9027_v45 = vunpack.i.l.bf16 %v9026_v14 }
 0xbb0   :  { %8049 = vmatmul.mubr.msk.f32.gmra.mrb[40].mxu1 %vm1878_vm2, %v2999_v59 }
 0xbb1   :  { %v9150_v52 = vpop.eup %9149  ;;  %8059 = vmatpush3.msk.msra.mxu1 %vm1930_vm15, %v3105_v37  ;;  %8051 = vmatprep.mubr.msk.f32.mxu1 %vm9589_vm0, %v12406_v36  ;;  %v8641_v25 = vpack.c.bf16 %v9028_v29, %v9027_v45  ;;  %v12444_v45 = vld [vmem:[#allocation51_spill] sm:$0xff] }
 0xbb2   :  { %v3195_v22 = vpop.permute.xlu0 %3194  ;;  %v3000_v20 = vmul.f32 %v9150_v52, %v9140_v51  ;;  %8640 = vmatprep.subr.bf16.mxu1 %v12407_v33 }
 0xbb3   :  { %8074 = vmatpush3.msk.msra.mxu0 %vm1930_vm15, %v3195_v22 }
 0xbb4   :  { %8052 = vmatmul.mubr.msk.f32.gmra.mrb[42].mxu1 %vm1878_vm2, %v3000_v20  ;;  %8076 = vmatmul.mubr.msk.f32.vlgmr.msra.gmra.mrb[24].mxu0 %vm1878_vm2, %v2998_v10 }
 0xbb5   :  { %8060 = vmatprep.mubr.msk.f32.mxu1 %vm9589_vm0, %v12406_v36  ;;  %8078 = vmatprep.mubr.msk.f32.mxu0 %vm9589_vm0, %v12406_v36 }
 0xbb6   :  { %v3285_v30 = vpop.permute.xlu0 %3284  ;;  %8643 = vmatprep.subr.bf16.mxu0 %v12407_v33 }
 0xbb8   :  { %8061 = vmatmul.mubr.msk.f32.vlgmr.msra.gmra.mrb[44].mxu1 %vm1878_vm2, %v2998_v10  ;;  %8079 = vmatmul.mubr.msk.f32.gmra.mrb[26].mxu0 %vm1878_vm2, %v2999_v59 }
 0xbb9   :  { %8642 = vmatpush3.bf16.msra.mxu1 %v8641_v25  ;;  %8063 = vmatprep.mubr.msk.f32.mxu1 %vm9589_vm0, %v12406_v36  ;;  %v12445_v25 = vld [vmem:[#allocation70_spill] sm:$0xff] }
 0xbba   :  { %v2393_v54 = vpop.permute.xlu0 %2392  ;;  %8081 = vmatprep.mubr.msk.f32.mxu0 %vm9589_vm0, %v12406_v36  ;;  %8088 = vmatprep.subr.mxu1 %v12406_v36 }
 0xbbb   :  { %2402 = vst.msk [vmem:[#allocation3] sm:$0xff] %vm12293_vm9, %v2393_v54 }
 0xbbc   :  { %8064 = vmatmul.mubr.msk.f32.gmra.mrb[46].mxu1 %vm1878_vm2, %v2999_v59  ;;  %8082 = vmatmul.mubr.msk.f32.gmra.mrb[28].mxu0 %vm1878_vm2, %v3000_v20 }
 0xbbd   :  { %8089 = vmatpush3.msk.msra.mxu1 %vm1930_vm15, %v3285_v30  ;;  %8066 = vmatprep.mubr.msk.f32.mxu1 %vm9589_vm0, %v12406_v36 }
 0xbbe   :  { %v2410_v5 = vpop.permute.xlu0 %2409  ;;  %8115 = vmatprep.mubr.msk.f32.mxu0 %vm9589_vm0, %v12406_v36  ;;  %8655 = vmatprep.subr.bf16.mxu1 %v12407_v33 }
 0xbbf   :  { %2419 = vst.msk [vmem:[#allocation3] sm:$0xff] %vm12301_vm5, %v2410_v5  ;;  %v12446_v5 = vld [vmem:[#allocation54_spill] sm:$0xff] }
 0xbc0   :  { %8067 = vmatmul.mubr.msk.f32.gmra.mrb[48].mxu1 %vm1878_vm2, %v3000_v20 }
 0xbc1   :  { %8090 = vmatprep.mubr.msk.f32.mxu1 %vm9589_vm0, %v12406_v36 }
 0xbc2   :  { %v2427_v18 = vpop.permute.xlu0 %2426 }
 0xbc3   :  { %2436 = vst.msk [vmem:[#allocation3] sm:$0xff] %vm12300_vm6, %v2427_v18 }
 0xbc4   :  { %8091 = vmatmul.mubr.msk.f32.vlgmr.msra.gmra.mrb[50].mxu1 %vm1878_vm2, %v2998_v10 }
 0xbc5   :  { %8093 = vmatprep.mubr.msk.f32.mxu1 %vm9589_vm0, %v12406_v36 }
 0xbc6   :  { %v2444_v15 = vpop.permute.xlu0 %2443 }
 0xbc7   :  { %2453 = vst.msk [vmem:[#allocation3] sm:$0xff] %vm12299_vm7, %v2444_v15  ;;  %v12447_v15 = vld [vmem:[#allocation58_spill] sm:$0xff] }
 0xbc8   :  { %8094 = vmatmul.mubr.msk.f32.gmra.mrb[52].mxu1 %vm1878_vm2, %v2999_v59 }
 0xbc9   :  { %8096 = vmatprep.mubr.msk.f32.mxu1 %vm9589_vm0, %v12406_v36 }
 0xbca   :  { %v2395_v44 = vpop.permute.xlu0 %2394 }
 0xbcb   :  { %2403 = vst.msk [vmem:[#allocation3 + $0x8] sm:$0xff] %vm12293_vm9, %v2395_v44  ;;  %vm12296_vm9 = vcmask 355648  }
 0xbcc   :  { %8097 = vmatmul.mubr.msk.f32.gmra.mrb[54].mxu1 %vm1878_vm2, %v3000_v20 }
 0xbcd   :  { %8140 = vmatprep.mubr.msk.f32.mxu1 %vm9589_vm0, %v12406_v36 }
 0xbce   :  { %v2412_v47 = vpop.permute.xlu0 %2411 }
 0xbcf   :  { %2420 = vst.msk [vmem:[#allocation3 + $0x8] sm:$0xff] %vm12301_vm5, %v2412_v47 }
 0xbd2   :  { %v2429_v7 = vpop.permute.xlu0 %2428 }
 0xbd3   :  { %2437 = vst.msk [vmem:[#allocation3 + $0x8] sm:$0xff] %vm12300_vm6, %v2429_v7 }
 0xbd6   :  { %v2446_v40 = vpop.permute.xlu0 %2445 }
 0xbd7   :  { %2454 = vst.msk [vmem:[#allocation3 + $0x8] sm:$0xff] %vm12299_vm7, %v2446_v40 }
 0xbda   :  { %v2397_v46 = vpop.permute.xlu0 %2396 }
 0xbdb   :  { %2405 = vst.msk [vmem:[#allocation3 + $0x10] sm:$0xf] %vm12298_vm8, %v2397_v46 }
 0xbdc   :  { %2422 = vst.msk [vmem:[#allocation3 + $0x10] sm:$0xf] %vm12297_vm4, %v2414_v2  ;;  %v12448_v2 = vld [vmem:[#allocation76_spill] sm:$0xff] }
 0xbde   :  { %v2431_v24 = vpop.permute.xlu0 %2430 }
 0xbdf   :  { %2439 = vst.msk [vmem:[#allocation3 + $0x10] sm:$0xf] %vm12296_vm9, %v2431_v24 }
 0xc7f   :  { %v3086_v51 = vpop.f32.mrb[38].mxu1 }
 0xc80   :  { %3466 = vrot.lane.b32.xlu1 %v3086_v51, %s9573_s22  ;;  %v8047_v42 = vpop.f32.mrb[39].mxu1 }
 0xc81   :  { %v12449_v42 = vld [vmem:[#allocation68_spill] sm:$0xff] }
 0xc83   :  { %v3091_v39 = vpop.f32.mrb[40].mxu1 }
 0xc84   :  { %3468 = vrot.lane.b32.xlu0 %v3091_v39, %s9573_s22  ;;  %v8050_v28 = vpop.f32.mrb[41].mxu1 }
 0xc85   :  { %v12450_v28 = vld [vmem:[#allocation52_spill] sm:$0xff] }
 0xc87   :  { %v10956_v57 = vpop.f32.mrb[42].mxu1  ;;  %v3266_v41 = vpop.f32.mrb[24].mxu0 }
 0xc88   :  { %v8053_v1 = vpop.f32.mrb[43].mxu1  ;;  %v8077_v4 = vpop.f32.mrb[25].mxu0  ;;  %v3373_v35 = vsub.f32 %v3266_v41, %v10160_v50 }
 0xc89   :  { %v12451_v1 = vld [vmem:[#allocation55_spill] sm:$0xff] }
 0xc8a   :  { %v3382_v12 = vmul.f32 %v3373_v35, %v10170_v3  ;;  %v3397_v58 = vmul.f32 %v3373_v35, %v12413_v38  ;;  %v3412_v17 = vmul.f32 %v3373_v35, %v12415_v8  ;;  %v12452_v35 = vld [vmem:[#allocation74_spill] sm:$0xff] }
 0xc8b   :  { %v3176_v13 = vpop.f32.mrb[44].mxu1  ;;  %v3271_v23 = vpop.f32.mrb[26].mxu0 }
 0xc8c   :  { %v3370_v19 = vsub.f32 %v3176_v13, %v10182_v16  ;;  %v8062_v43 = vpop.f32.mrb[45].mxu1  ;;  %v8080_v62 = vpop.f32.mrb[27].mxu0  ;;  %v3374_v32 = vsub.f32 %v3271_v23, %v12414_v21  ;;  %v12453_v23 = vld [vmem:[#allocation59_spill] sm:$0xff] }
 0xc8d   :  { %v12454_v43 = vld [vmem:[#allocation61_spill] sm:$0xff] }
 0xc8e   :  { %v3379_v27 = vmul.f32 %v3370_v19, %v12416_v31  ;;  %v3394_v53 = vmul.f32 %v3370_v19, %v12417_v56  ;;  %v3409_v55 = vmul.f32 %v3370_v19, %v12418_v34  ;;  %v3383_v22 = vmul.f32 %v3374_v32, %v12420_v6 }
 0xc8f   :  { %v3181_v9 = vpop.f32.mrb[46].mxu1  ;;  %v3276_v10 = vpop.f32.mrb[28].mxu0  ;;  %v3398_v20 = vmul.f32 %v3374_v32, %v12421_v11  ;;  %v3413_v30 = vmul.f32 %v3374_v32, %v12444_v45 }
 0xc90   :  { %v3385_v37 = vadd.f32 %v3382_v12, %v3379_v27  ;;  %v3400_v60 = vadd.f32 %v3397_v58, %v3394_v53  ;;  %v3415_v48 = vadd.f32 %v3412_v17, %v3409_v55  ;;  %v3371_v14 = vsub.f32 %v3181_v9, %v12419_v63  ;;  %v8065_v59 = vpop.f32.mrb[47].mxu1  ;;  %v8083_v52 = vpop.f32.mrb[29].mxu0  ;;  %v12455_v58 = vld [vmem:[#allocation85_spill] sm:$0xff]  ;;  %v12456_v9 = vld [vmem:[#allocation78_spill] sm:$0xff] }
 0xc91   :  { %v3375_v29 = vsub.f32 %v3276_v10, %v12422_v0  ;;  %v2348_v12 = vmul.f32 %v10839_v61, %v10839_v61  ;;  %v2351_v32 = vmul.f32 %v12455_v58, %v12455_v58  ;;  %v12457_v59 = vld [vmem:[#allocation75_spill] sm:$0xff] }
 0xc92   :  { %v3380_v54 = vmul.f32 %v3371_v14, %v12445_v25  ;;  %v3395_v18 = vmul.f32 %v3371_v14, %v12446_v5  ;;  %v3410_v44 = vmul.f32 %v3371_v14, %v12447_v15 }
 0xc93   :  { %v3186_v47 = vpop.f32.mrb[48].mxu1  ;;  %v3384_v39 = vmul.f32 %v3375_v29, %v12449_v42  ;;  %v3399_v41 = vmul.f32 %v3375_v29, %v12450_v28  ;;  %v3414_v4 = vmul.f32 %v3375_v29, %v12451_v1  ;;  %v12459_v29 = vld [vmem:[#allocation64_spill] sm:$0xff] }
 0xc94   :  { %v3386_v7 = vadd.f32 %v3383_v22, %v3380_v54  ;;  %v3401_v40 = vadd.f32 %v3398_v20, %v3395_v18  ;;  %v3416_v46 = vadd.f32 %v3413_v30, %v3410_v44  ;;  %v3372_v24 = vsub.f32 %v3186_v47, %v12448_v2  ;;  %v8068_v51 = vpop.f32.mrb[49].mxu1  ;;  %v12458_v22 = vld [vmem:[#allocation60_spill] sm:$0xff] }
 0xc95   :  { %v2354_v54 = vadd.f32 %v2351_v32, %v2348_v12  ;;  %v12463_v12 = vld [vmem:[#allocation62_spill] sm:$0xff] }
 0xc96   :  { %v3381_v13 = vmul.f32 %v3372_v24, %v12452_v35  ;;  %v3396_v19 = vmul.f32 %v3372_v24, %v12453_v23  ;;  %v3411_v62 = vmul.f32 %v3372_v24, %v12454_v43  ;;  %v12460_v24 = vld [vmem:[#allocation79_spill] sm:$0xff]  ;;  %v3554_v35 = vld [vmem:[%s12461_s25 + $0x18] sm:$0xff] }
 0xc97   :  { %v3356_v17 = vpop.f32.mrb[50].mxu1 }
 0xc98   :  { %v3387_v27 = vadd.f32 %v3384_v39, %v3381_v13  ;;  %v3402_v53 = vadd.f32 %v3399_v41, %v3396_v19  ;;  %v3417_v55 = vadd.f32 %v3414_v4, %v3411_v62  ;;  %v3376_v10 = vsub.f32 %v3356_v17, %v12456_v9  ;;  %v8092_v14 = vpop.f32.mrb[51].mxu1  ;;  %v12462_v13 = vld [vmem:[#allocation77_spill] sm:$0xff] }
 0xc99   :  { %v2357_v39 = vmul.f32 %v10845_v49, %v10845_v49  ;;  %v12465_v14 = vld [vmem:[#allocation81_spill] sm:$0xff] }
 0xc9a   :  { %v3388_v52 = vmul.f32 %v3376_v10, %v12457_v59  ;;  %v3403_v20 = vmul.f32 %v3376_v10, %v12458_v22  ;;  %v3418_v30 = vmul.f32 %v3376_v10, %v12459_v29 }
 0xc9b   :  { %v3361_v18 = vpop.f32.mrb[52].mxu1  ;;  %v2360_v62 = vadd.f32 %v2357_v39, %v2354_v54  ;;  %v12466_v54 = vld [vmem:[#allocation80_spill] sm:$0xff] }
 0xc9c   :  { %v3391_v44 = vadd.f32 %v3388_v52, %v3385_v37  ;;  %v3406_v61 = vadd.f32 %v3403_v20, %v3400_v60  ;;  %v3421_v47 = vadd.f32 %v3418_v30, %v3415_v48  ;;  %v3377_v51 = vsub.f32 %v3361_v18, %v12460_v24  ;;  %v8095_v58 = vpop.f32.mrb[53].mxu1  ;;  %v12464_v60 = vld [vmem:[#allocation63_spill] sm:$0xff]  ;;  %v12467_v24 = vld [vmem:[#allocation65_spill] sm:$0xff] }
 0xc9d   :  { %v3551_v58 = vld [vmem:[%s12461_s25] sm:$0xff] }
 0xc9e   :  { %v3424_v41 = vmul.f32 %v3391_v44, %v3391_v44  ;;  %v3427_v4 = vmul.f32 %v3406_v61, %v3406_v61  ;;  %v3389_v19 = vmul.f32 %v3377_v51, %v12462_v13  ;;  %3483 = vrot.lane.b32.xlu1 %v3391_v44, %s9613_s10  ;;  %v3404_v37 = vmul.f32 %v3377_v51, %v12463_v12 }
 0xc9f   :  { %v3419_v48 = vmul.f32 %v3377_v51, %v12464_v60  ;;  %v3366_v32 = vpop.f32.mrb[54].mxu1  ;;  %v3433_v10 = vmul.f32 %v3421_v47, %v3421_v47  ;;  %v3553_v51 = vld [vmem:[%s12461_s25 + $0x10] sm:$0xff] }
 0xca0   :  { %v3430_v17 = vadd.f32 %v3427_v4, %v3424_v41  ;;  %v3392_v49 = vadd.f32 %v3389_v19, %v3386_v7  ;;  %v3378_v52 = vsub.f32 %v3366_v32, %v12465_v14  ;;  %v8098_v20 = vpop.f32.mrb[55].mxu1  ;;  %v3407_v30 = vadd.f32 %v3404_v37, %v3401_v40  ;;  %v12468_v4 = vld [vmem:[#allocation66_spill] sm:$0xff] }
 0xca1   :  { %v3422_v18 = vadd.f32 %v3419_v48, %v3416_v46  ;;  %v8644_v19 = vpack.c.bf16 %v3552_v26, %v3551_v58  ;;  %v11007_v40 = vadd.f32 1e-08, %v2360_v62 }
 0xca2   :  { %v3436_v2 = vadd.f32 %v3433_v10, %v3430_v17  ;;  %v3425_v44 = vmul.f32 %v3392_v49, %v3392_v49  ;;  %v3390_v39 = vmul.f32 %v3378_v52, %v12466_v54  ;;  %v3405_v9 = vmul.f32 %v3378_v52, %v12467_v24  ;;  %3500 = vrot.lane.b32.xlu1 %v3406_v61, %s9610_s14 }
 0xca3   :  { %v3428_v41 = vmul.f32 %v3407_v30, %v3407_v30  ;;  %v3420_v7 = vmul.f32 %v3378_v52, %v12468_v4  ;;  %3485 = vrot.lane.b32.xlu0 %v3392_v49, %s9613_s10  ;;  %v3434_v17 = vmul.f32 %v3422_v18, %v3422_v18  ;;  %8645 = vmatpush3.bf16.msra.mxu0 %v8644_v19  ;;  %v3557_v49 = vld [vmem:[%s12461_s25 + $0x30] sm:$0xff]  ;;  %vm2380_vm6 = vcmp.eq.f32.partialorder %v11007_v40, inf }
 0xca4   :  { %v3439_v46 = vadd.f32 1e-08, %v3436_v2  ;;  %v11009_v37 = vadd.f32 %v3390_v39, %v3387_v27  ;;  %v3408_v48 = vadd.f32 %v3405_v9, %v3402_v53  ;;  %v8647_v61 = vpack.c.bf16 %v3554_v35, %v3553_v51  ;;  %8646 = vmatprep.subr.bf16.mxu0 %v12407_v33  ;;  %v3555_v35 = vld [vmem:[%s12461_s25 + $0x20] sm:$0xff]  ;;  %v3556_v53 = vld [vmem:[%s12461_s25 + $0x28] sm:$0xff] }
 0xca5   :  { %v3431_v32 = vadd.f32 %v3428_v41, %v3425_v44  ;;  %v11011_v10 = vadd.f32 %v3420_v7, %v3417_v55  ;;  %v8650_v9 = vpack.c.bf16 %v3556_v53, %v3555_v35  ;;  %vm2382_vm5 = vcmp.eq.f32.partialorder %v11007_v40, 0.0 }
 0xca6   :  { %v3426_v52 = vmul.f32 %v11009_v37, %v11009_v37  ;;  %v3429_v20 = vmul.f32 %v3408_v48, %v3408_v48  ;;  %3517 = vrot.lane.b32.xlu1 %v3421_v47, %s9614_s11  ;;  %9151 = vrsqrt.f32 %v3439_v46  ;;  %vm3444_vm9 = vcmp.eq.f32.partialorder %v3439_v46, inf }
 0xca7   :  { %v3437_v26 = vadd.f32 %v3434_v17, %v3431_v32  ;;  %3519 = vrot.lane.b32.xlu0 %v3422_v18, %s9614_s11  ;;  %v3435_v27 = vmul.f32 %v11011_v10, %v11011_v10  ;;  %9153 = vrsqrt.f32 %v11007_v40  ;;  %8648 = vmatpush3.bf16.msra.mxu0 %v8647_v61  ;;  %v3558_v18 = vld [vmem:[%s12461_s25 + $0x38] sm:$0xff]  ;;  %vm3446_vm4 = vcmp.eq.f32.partialorder %v3439_v46, 0.0 }
 0xca8   :  { %v3432_v2 = vadd.f32 %v3429_v20, %v3426_v52  ;;  %8649 = vmatprep.subr.bf16.mxu0 %v12407_v33  ;;  %v8653_v58 = vpack.c.bf16 %v3558_v18, %v3557_v49 }
 0xca9   :  { %v3440_v55 = vadd.f32 1e-08, %v3437_v26 }
 0xcaa   :  { %v3438_v47 = vadd.f32 %v3435_v27, %v3432_v2  ;;  %3502 = vrot.lane.b32.xlu1 %v3407_v30, %s9610_s14  ;;  %v3447_v30 = vand.u32 2147483648, %v3439_v46  ;;  %v2383_v2 = vand.u32 2147483648, %v11007_v40 }
 0xcab   :  { %3470 = vrot.lane.b32.xlu0 %v10956_v57, %s9573_s22  ;;  %9155 = vrsqrt.f32 %v3440_v55  ;;  %8651 = vmatpush3.bf16.msra.mxu0 %v8650_v9  ;;  %vm3451_vm8 = vcmp.eq.f32.partialorder %v3440_v55, inf  ;;  %vm3453_vm7 = vcmp.eq.f32.partialorder %v3440_v55, 0.0 }
 0xcac   :  { %v3441_v62 = vadd.f32 1e-08, %v3438_v47  ;;  %8652 = vmatprep.subr.bf16.mxu0 %v12407_v33 }
 0xcae   :  { %9157 = vrsqrt.f32 %v3441_v62  ;;  %v3461_v26 = vand.u32 2147483648, %v3441_v62 }
 0xcaf   :  { %3504 = vrot.lane.b32.xlu0 %v3408_v48, %s9610_s14  ;;  %8654 = vmatpush3.bf16.msra.mxu0 %v8653_v58  ;;  %v3454_v48 = vand.u32 2147483648, %v3440_v55 }
 0xcb0   :  { %v9152_v44 = vpop.eup %9151  ;;  %8667 = vmatprep.subr.bf16.mxu0 %v12407_v33 }
 0xcb1   :  { %v3443_v39 = vmul.f32 %v9152_v44, %v3439_v46  ;;  %v9154_v51 = vpop.eup %9153 }
 0xcb2   :  { %v2379_v32 = vmul.f32 %v9154_v51, %v11007_v40 }
 0xcb3   :  { %v3445_v57 = vsel %vm3444_vm9, %v3439_v46, %v3443_v39  ;;  %vm3460_vm9 = vcmp.eq.f32.partialorder %v3441_v62, 0.0 }
 0xcb4   :  { %v3448_v41 = vsel %vm3446_vm4, %v3447_v30, %v3445_v57  ;;  %v2381_v46 = vsel %vm2380_vm6, %v11007_v40, %v2379_v32  ;;  %vm3458_vm4 = vcmp.eq.f32.partialorder %v3441_v62, inf  ;;  %vm12306_vm6 = vcmask 261248  }
 0xcb5   :  { %v9156_v7 = vpop.eup %9155  ;;  %3534 = vrot.lane.b32.xlu1 %v3448_v41, %s9615_s15  ;;  %v2384_v53 = vsel %vm2382_vm5, %v2383_v2, %v2381_v46  ;;  %vm12304_vm5 = vcmask 425344  }
 0xcb6   :  { %v3450_v19 = vmul.f32 %v9156_v7, %v3440_v55 }
 0xcb8   :  { %v9158_v17 = vpop.eup %9157  ;;  %v3452_v61 = vsel %vm3451_vm8, %v3440_v55, %v3450_v19  ;;  %vm12303_vm8 = vcmask 458144  }
 0xcb9   :  { %v3455_v52 = vsel %vm3453_vm7, %v3454_v48, %v3452_v61  ;;  %v3457_v20 = vmul.f32 %v9158_v17, %v3441_v62  ;;  %vm12302_vm7 = vcmask 392544   ;;  %v7299_v48 = vld [vmem:[#allocation14] ss:$0 sm:$0xff] }
 0xcba   :  { %3536 = vrot.lane.b32.xlu1 %v3455_v52, %s9615_s15 }
 0xcbb   :  { %v3459_v27 = vsel %vm3458_vm4, %v3441_v62, %v3457_v20  ;;  %vm12305_vm4 = vcmask 523744   ;;  %v9219_v20 = vld [vmem:[#allocation2] sm:$0xff] }
 0xcbc   :  { %v3462_v35 = vsel %vm3460_vm9, %v3461_v26, %v3459_v27  ;;  %vm2455_vm9 = vcmask 486848  }
 0xcbd   :  { %3538 = vrot.lane.b32.xlu0 %v3462_v35, %s9615_s15 }
 0xcbe   :  { %2447 = vrot.lane.b32.xlu1 %v2384_v53, %s9612_s24  ;;  %v9220_v53 = vld [vmem:[#allocation2 + $0x8] sm:$0xff] }
 0xcc2   :  { %3487 = vrot.lane.b32.xlu1 %v11009_v37, %s9613_s10 }
 0xcc6   :  { %3521 = vrot.lane.b32.xlu1 %v11011_v10, %s9614_s11 }
 0xcf2   :  { %v3467_v55 = vpop.permute.xlu1 %3466 }
 0xcf3   :  { %3476 = vst.msk [vmem:[#allocation3] sm:$0xff] %vm12306_vm6, %v3467_v55 }
 0xcf6   :  { %v3469_v9 = vpop.permute.xlu0 %3468 }
 0xcf7   :  { %3477 = vst.msk [vmem:[#allocation3 + $0x8] sm:$0xff] %vm12306_vm6, %v3469_v9  ;;  %vm12307_vm6 = vcmask 519648  }
 0xd10   :  { %v3484_v40 = vpop.permute.xlu1 %3483 }
 0xd11   :  { %3493 = vst.msk [vmem:[#allocation3] sm:$0xff] %vm12302_vm7, %v3484_v40 }
 0xd14   :  { %v3501_v47 = vpop.permute.xlu1 %3500 }
 0xd15   :  { %3510 = vst.msk [vmem:[#allocation3] sm:$0xff] %vm12304_vm5, %v3501_v47  ;;  %v3486_v62 = vpop.permute.xlu0 %3485 }
 0xd16   :  { %3494 = vst.msk [vmem:[#allocation3 + $0x8] sm:$0xff] %vm12302_vm7, %v3486_v62  ;;  %vm3478_vm7 = vcmask 257152  }
 0xd18   :  { %v3518_v37 = vpop.permute.xlu1 %3517 }
 0xd19   :  { %3527 = vst.msk [vmem:[#allocation3] sm:$0xff] %vm12303_vm8, %v3518_v37  ;;  %v3520_v49 = vpop.permute.xlu0 %3519  ;;  %v9221_v37 = vld [vmem:[#allocation2 + $0x10] sm:$0xf] }
 0xd1c   :  { %v3503_v10 = vpop.permute.xlu1 %3502 }
 0xd1d   :  { %3511 = vst.msk [vmem:[#allocation3 + $0x8] sm:$0xff] %vm12304_vm5, %v3503_v10  ;;  %v3471_v44 = vpop.permute.xlu0 %3470  ;;  %vm3512_vm5 = vcmask 421248  }
 0xd1e   :  { %3528 = vst.msk [vmem:[#allocation3 + $0x8] sm:$0xff] %vm12303_vm8, %v3520_v49  ;;  %vm3495_vm8 = vcmask 388448  }
 0xd21   :  { %v3505_v41 = vpop.permute.xlu0 %3504 }
 0xd27   :  { %v3535_v18 = vpop.permute.xlu1 %3534 }
 0xd28   :  { %3544 = vst.msk [vmem:[#allocation3] sm:$0xff] %vm12305_vm4, %v3535_v18 }
 0xd2c   :  { %v3537_v58 = vpop.permute.xlu1 %3536 }
 0xd2d   :  { %3545 = vst.msk [vmem:[#allocation3 + $0x8] sm:$0xff] %vm12305_vm4, %v3537_v58  ;;  %vm3529_vm4 = vcmask 454048  }
 0xd2f   :  { %v3548_v39 = vld [vmem:[#allocation3] sm:$0xff]  ;;  %v3539_v19 = vpop.permute.xlu0 %3538 }
 0xd30   :  { %v2448_v30 = vpop.permute.xlu1 %2447  ;;  %8116 = vmatmul.mubr.msk.f32.vlgmr.msra.gmra.mrb[30].mxu0 %vm786_vm10, %v3548_v39 }
 0xd31   :  { %2456 = vst.msk [vmem:[#allocation3 + $0x10] sm:$0xf] %vm2455_vm9, %v2448_v30  ;;  %8118 = vmatprep.mubr.msk.f32.mxu0 %vm9589_vm0, %v12406_v36 }
 0xd32   :  { %3479 = vst.msk [vmem:[#allocation3 + $0x10] sm:$0xf] %vm3478_vm7, %v3471_v44 }
 0xd34   :  { %v3488_v51 = vpop.permute.xlu1 %3487  ;;  %v3549_v57 = vld [vmem:[#allocation3 + $0x8] sm:$0xff] }
 0xd35   :  { %3496 = vst.msk [vmem:[#allocation3 + $0x10] sm:$0xf] %vm3495_vm8, %v3488_v51  ;;  %8119 = vmatmul.mubr.msk.f32.gmra.mrb[32].mxu0 %vm786_vm10, %v3549_v57 }
 0xd36   :  { %3513 = vst.msk [vmem:[#allocation3 + $0x10] sm:$0xf] %vm3512_vm5, %v3505_v41  ;;  %8121 = vmatprep.mubr.msk.f32.mxu0 %vm9589_vm0, %v12406_v36 }
 0xd38   :  { %v3522_v7 = vpop.permute.xlu1 %3521 }
 0xd39   :  { %3530 = vst.msk [vmem:[#allocation3 + $0x10] sm:$0xf] %vm3529_vm4, %v3522_v7 }
 0xd3a   :  { %3547 = vst.msk [vmem:[#allocation3 + $0x10] sm:$0xf] %vm12307_vm6, %v3539_v19  ;;  %vm3666_vm6 = vcmask 519168  }
 0xd41   :  { %v3550_v32 = vld [vmem:[#allocation3 + $0x10] sm:$0xf] }
 0xd42   :  { %8122 = vmatmul.mubr.msk.f32.gmra.mrb[34].mxu0 %vm786_vm10, %v3550_v32 }
 0xd43   :  { %8165 = vmatprep.mubr.msk.f32.mxu0 %vm9589_vm0, %v12406_v36 }
 0xe03   :  { %v3641_v17 = vpop.f32.mrb[30].mxu0 }
 0xe04   :  { %v3642_v61 = vadd.f32 %v7299_v48, %v3641_v17  ;;  %v8117_v52 = vpop.f32.mrb[31].mxu0 }
 0xe06   :  { %v3655_v46 = vadd.f32 %v9219_v20, %v3642_v61  ;;  %v3719_v20 = vld [vmem:[%s12469_s19] sm:$0xff] }
 0xe08   :  { %v3646_v26 = vpop.f32.mrb[32].mxu0  ;;  %v3660_v2 = vsel %vm786_vm10, %v3655_v46, 0.0 }
 0xe09   :  { %v3647_v27 = vadd.f32 %v7299_v48, %v3646_v26  ;;  %v8120_v35 = vpop.f32.mrb[33].mxu0  ;;  %3661 = vadd.xlane.f32.xlu1 %v3660_v2  ;;  %v3721_v2 = vld [vmem:[%s12469_s19 + $0x10] sm:$0xff] }
 0xe0a   :  { %v3723_v35 = vld [vmem:[%s12469_s19 + $0x20] sm:$0xff] }
 0xe0b   :  { %v3656_v55 = vadd.f32 %v9220_v53, %v3647_v27  ;;  %v3722_v27 = vld [vmem:[%s12469_s19 + $0x18] sm:$0xff] }
 0xe0c   :  { %v8659_v53 = vpack.c.bf16 %v3722_v27, %v3721_v2  ;;  %v7304_v2 = vld [vmem:[#allocation17] ss:$0 sm:$0xff] }
 0xe0d   :  { %v3663_v9 = vsel %vm786_vm10, %v3656_v55, 0.0 }
 0xe0e   :  { %3664 = vadd.xlane.f32.xlu0 %v3663_v9 }
 0xe15   :  { %v3651_v40 = vpop.f32.mrb[34].mxu0 }
 0xe16   :  { %v3652_v47 = vadd.f32 %v7299_v48, %v3651_v40  ;;  %v8123_v62 = vpop.f32.mrb[35].mxu0  ;;  %v3725_v40 = vld [vmem:[%s12469_s19 + $0x30] sm:$0xff] }
 0xe18   :  { %v3657_v10 = vadd.f32 %v9221_v37, %v3652_v47  ;;  %v3726_v47 = vld [vmem:[%s12469_s19 + $0x38] sm:$0xff]  ;;  %v3826_v37 = vld [vmem:[%s12470_s30] sm:$0xff] }
 0xe19   :  { %v8665_v62 = vpack.c.bf16 %v3726_v47, %v3725_v40 }
 0xe1a   :  { %v3667_v49 = vsel %vm3666_vm6, %v3657_v10, 0.0 }
 0xe1b   :  { %3668 = vadd.xlane.f32.xlu0 %v3667_v49  ;;  %v3828_v49 = vld [vmem:[%s12470_s30 + $0x10] sm:$0xff] }
 0xe96   :  { %v3662_v18 = vpop.xlane.xlu1 %3661 }
 0xe97   :  { %v3671_v58 = vmul.f32 0.015625, %v3662_v18 }
 0xe99   :  { %v3674_v44 = vsub.f32 %v3655_v46, %v3671_v58  ;;  %v3720_v46 = vld [vmem:[%s12469_s19 + $0x8] sm:$0xff]  ;;  %v3829_v58 = vld [vmem:[%s12470_s30 + $0x18] sm:$0xff] }
 0xe9a   :  { %v8656_v26 = vpack.c.bf16 %v3720_v46, %v3719_v20  ;;  %v7303_v46 = vld [vmem:[#allocation16] ss:$0 sm:$0xff] }
 0xe9b   :  { %v3665_v39 = vpop.xlane.xlu0 %3664  ;;  %v3677_v30 = vmul.f32 %v3674_v44, %v3674_v44 }
 0xe9c   :  { %v3672_v51 = vmul.f32 0.015625, %v3665_v39  ;;  %8657 = vmatpush3.bf16.msra.mxu1 %v8656_v26  ;;  %v8671_v39 = vpack.c.bf16 %v3829_v58, %v3828_v49  ;;  %v3833_v58 = vld [vmem:[%s12470_s30 + $0x38] sm:$0xff] }
 0xe9d   :  { %v3680_v57 = vsel %vm786_vm10, %v3677_v30, 0.0  ;;  %8658 = vmatprep.subr.bf16.mxu1 %v12407_v33  ;;  %v3830_v30 = vld [vmem:[%s12470_s30 + $0x20] sm:$0xff] }
 0xe9e   :  { %v11074_v41 = vsub.f32 %v3656_v55, %v3672_v51  ;;  %3681 = vadd.xlane.f32.xlu1 %v3680_v57  ;;  %v3724_v55 = vld [vmem:[%s12469_s19 + $0x28] sm:$0xff] }
 0xe9f   :  { %v8662_v9 = vpack.c.bf16 %v3724_v55, %v3723_v35  ;;  %v3831_v51 = vld [vmem:[%s12470_s30 + $0x28] sm:$0xff] }
 0xea0   :  { %v3678_v7 = vmul.f32 %v11074_v41, %v11074_v41  ;;  %8660 = vmatpush3.bf16.msra.mxu1 %v8659_v53  ;;  %v8674_v57 = vpack.c.bf16 %v3831_v51, %v3830_v30  ;;  %v7305_v30 = vld [vmem:[#allocation19] ss:$0 sm:$0xff] }
 0xea1   :  { %8661 = vmatprep.subr.bf16.mxu1 %v12407_v33 }
 0xea2   :  { %v3683_v19 = vsel %vm786_vm10, %v3678_v7, 0.0 }
 0xea3   :  { %3684 = vadd.xlane.f32.xlu0 %v3683_v19 }
 0xea4   :  { %8663 = vmatpush3.bf16.msra.mxu1 %v8662_v9 }
 0xea5   :  { %8664 = vmatprep.subr.bf16.mxu1 %v12407_v33 }
 0xea8   :  { %v3669_v32 = vpop.xlane.xlu0 %3668  ;;  %8666 = vmatpush3.bf16.msra.mxu1 %v8665_v62 }
 0xea9   :  { %v3673_v48 = vmul.f32 0.015625, %v3669_v32 }
 0xeab   :  { %v11079_v17 = vsub.f32 %v3657_v10, %v3673_v48  ;;  %v3827_v10 = vld [vmem:[%s12470_s30 + $0x8] sm:$0xff] }
 0xeac   :  { %v8668_v18 = vpack.c.bf16 %v3827_v10, %v3826_v37 }
 0xead   :  { %v3679_v61 = vmul.f32 %v11079_v17, %v11079_v17 }
 0xeae   :  { %8669 = vmatpush3.bf16.msra.mxu0 %v8668_v18 }
 0xeaf   :  { %v3686_v52 = vsel %vm3666_vm6, %v3679_v61, 0.0  ;;  %8670 = vmatprep.subr.bf16.mxu0 %v12407_v33 }
 0xeb0   :  { %3687 = vadd.xlane.f32.xlu1 %v3686_v52 }
 0xeb2   :  { %8672 = vmatpush3.bf16.msra.mxu0 %v8671_v39 }
 0xeb3   :  { %8673 = vmatprep.subr.bf16.mxu0 %v12407_v33 }
 0xeb6   :  { %8675 = vmatpush3.bf16.msra.mxu0 %v8674_v57 }
 0xeb7   :  { %8676 = vmatprep.subr.bf16.mxu0 %v12407_v33 }
 0xf2b   :  { %v3682_v7 = vpop.xlane.xlu1 %3681 }
 0xf2c   :  { %v3689_v19 = vmul.f32 0.015625, %v3682_v7 }
 0xf2e   :  { %v3692_v32 = vadd.f32 1e-05, %v3689_v19 }
 0xf30   :  { %9159 = vrsqrt.f32 %v3692_v32  ;;  %v3685_v48 = vpop.xlane.xlu0 %3684 }
 0xf31   :  { %v3690_v61 = vmul.f32 0.015625, %v3685_v48 }
 0xf33   :  { %v3693_v52 = vadd.f32 1e-05, %v3690_v61 }
 0xf35   :  { %9161 = vrsqrt.f32 %v3693_v52 }
 0xf3a   :  { %v9160_v20 = vpop.eup %9159 }
 0xf3b   :  { %v3698_v26 = vmul.f32 %v9160_v20, %v3674_v44 }
 0xf3d   :  { %v3707_v27 = vmul.f32 %v7303_v46, %v3698_v26  ;;  %v3688_v35 = vpop.xlane.xlu1 %3687 }
 0xf3e   :  { %v3691_v53 = vmul.f32 0.015625, %v3688_v35 }
 0xf3f   :  { %v9162_v55 = vpop.eup %9161  ;;  %v3716_v9 = vadd.f32 %v7304_v2, %v3707_v27 }
 0xf40   :  { %v3694_v40 = vadd.f32 1e-05, %v3691_v53  ;;  %v3699_v47 = vmul.f32 %v9162_v55, %v11074_v41  ;;  %v3832_v41 = vld [vmem:[%s12470_s30 + $0x30] sm:$0xff] }
 0xf41   :  { %8141 = vmatmul.mubr.msk.f32.vlgmr.msra.gmra.mrb[56].mxu1 %vm786_vm10, %v3716_v9  ;;  %v8677_v39 = vpack.c.bf16 %v3833_v58, %v3832_v41 }
 0xf42   :  { %9163 = vrsqrt.f32 %v3694_v40  ;;  %8143 = vmatprep.mubr.msk.f32.mxu1 %vm9589_vm0, %v12406_v36  ;;  %v3708_v62 = vmul.f32 %v7303_v46, %v3699_v47 }
 0xf43   :  { %8678 = vmatpush3.bf16.msra.mxu0 %v8677_v39 }
 0xf44   :  { %v3717_v37 = vadd.f32 %v7304_v2, %v3708_v62  ;;  %8695 = vmatprep.subr.bf16.mxu0 %v12407_v33 }
 0xf46   :  { %8144 = vmatmul.mubr.msk.f32.gmra.mrb[58].mxu1 %vm786_vm10, %v3717_v37 }
 0xf47   :  { %8146 = vmatprep.mubr.msk.f32.mxu1 %vm9589_vm0, %v12406_v36 }
 0xf4c   :  { %v9164_v44 = vpop.eup %9163 }
 0xf4d   :  { %v3700_v10 = vmul.f32 %v9164_v44, %v11079_v17 }
 0xf4f   :  { %v3709_v49 = vmul.f32 %v7303_v46, %v3700_v10 }
 0xf51   :  { %v3718_v18 = vadd.f32 %v7304_v2, %v3709_v49  ;;  %v7309_v2 = vld [vmem:[#allocation20] ss:$0 sm:$0xff] }
 0xf53   :  { %8147 = vmatmul.mubr.msk.f32.gmra.mrb[60].mxu1 %vm786_vm10, %v3718_v18 }
 0xf54   :  { %4082 = vmatprep.mubr.f32.mxu1 %v12406_v36 }
0x1014   :  { %v3809_v51 = vpop.f32.mrb[56].mxu1 }
0x1015   :  { %v3810_v57 = vadd.f32 %v7305_v30, %v3809_v51  ;;  %v8142_v7 = vpop.f32.mrb[57].mxu1 }
0x1017   :  { %v3823_v19 = vmax.f32 %v3810_v57, 0.0 }
0x1019   :  { %v3814_v32 = vpop.f32.mrb[58].mxu1  ;;  %8166 = vmatmul.mubr.msk.f32.vlgmr.msra.gmra.mrb[36].mxu0 %vm786_vm10, %v3823_v19 }
0x101a   :  { %v3815_v17 = vadd.f32 %v7305_v30, %v3814_v32  ;;  %v8145_v48 = vpop.f32.mrb[59].mxu1  ;;  %8168 = vmatprep.mubr.msk.f32.mxu0 %vm9589_vm0, %v12406_v36 }
0x101c   :  { %v3824_v61 = vmax.f32 %v3815_v17, 0.0 }
0x101e   :  { %8169 = vmatmul.mubr.msk.f32.gmra.mrb[38].mxu0 %vm786_vm10, %v3824_v61 }
0x101f   :  { %8171 = vmatprep.mubr.msk.f32.mxu0 %vm9589_vm0, %v12406_v36 }
0x1026   :  { %v3819_v52 = vpop.f32.mrb[60].mxu1 }
0x1027   :  { %v3820_v20 = vadd.f32 %v7305_v30, %v3819_v52  ;;  %v8148_v46 = vpop.f32.mrb[61].mxu1 }
0x1029   :  { %v3825_v26 = vmax.f32 %v3820_v20, 0.0 }
0x102b   :  { %8172 = vmatmul.mubr.msk.f32.gmra.mrb[40].mxu0 %vm786_vm10, %v3825_v26 }
0x102c   :  { %8180 = vmatprep.mubr.msk.f32.mxu0 %vm9589_vm0, %v12406_v36 }
0x10ec   :  { %v3916_v27 = vpop.f32.mrb[36].mxu0 }
0x10ed   :  { %v3917_v35 = vadd.f32 %v7309_v2, %v3916_v27  ;;  %v8167_v53 = vpop.f32.mrb[37].mxu0  ;;  %v7316_v27 = vld [vmem:[%s12365_s3 + $0x88] sm:$0xff] }
0x10ef   :  { %v3930_v55 = vadd.f32 %v3917_v35, %v3716_v9  ;;  %v7318_v35 = vld [vmem:[%s12365_s3 + $0x98] sm:$0xff] }
0x10f0   :  { %v8679_v53 = vpack.c.bf16 %v7318_v35, %v7316_v27 }
0x10f1   :  { %v3921_v40 = vpop.f32.mrb[38].mxu0  ;;  %v3935_v47 = vsel %vm786_vm10, %v3930_v55, 0.0 }
0x10f2   :  { %v3922_v62 = vadd.f32 %v7309_v2, %v3921_v40  ;;  %v8170_v44 = vpop.f32.mrb[39].mxu0  ;;  %3936 = vadd.xlane.f32.xlu0 %v3935_v47  ;;  %v7317_v40 = vld [vmem:[%s12365_s3 + $0x90] sm:$0xff]  ;;  %8680 = vmatprep.subr.bf16.mxu1 %v8679_v53 }
0x10f3   :  { %v7322_v44 = vld [vmem:[%s12365_s3 + $0xb8] sm:$0xff] }
0x10f4   :  { %v3931_v10 = vadd.f32 %v3922_v62, %v3717_v37  ;;  %v7320_v62 = vld [vmem:[%s12365_s3 + $0xa8] sm:$0xff] }
0x10f6   :  { %v3938_v49 = vsel %vm786_vm10, %v3931_v10, 0.0 }
0x10f7   :  { %3939 = vadd.xlane.f32.xlu1 %v3938_v49  ;;  %v7319_v49 = vld [vmem:[%s12365_s3 + $0xa0] sm:$0xff] }
0x10fe   :  { %v3926_v41 = vpop.f32.mrb[40].mxu0 }
0x10ff   :  { %v3927_v58 = vadd.f32 %v7309_v2, %v3926_v41  ;;  %v8173_v39 = vpop.f32.mrb[41].mxu0  ;;  %v7321_v41 = vld [vmem:[%s12365_s3 + $0xb0] sm:$0xff] }
0x1100   :  { %v8685_v39 = vpack.c.bf16 %v7321_v41, %v7319_v49 }
0x1101   :  { %v3932_v30 = vadd.f32 %v3927_v58, %v3718_v18  ;;  %v7324_v58 = vld [vmem:[%s12365_s3 + $0xc8] sm:$0xff] }
0x1103   :  { %v3941_v51 = vsel %vm3666_vm6, %v3932_v30, 0.0 }
0x1104   :  { %3942 = vadd.xlane.f32.xlu0 %v3941_v51  ;;  %v7323_v51 = vld [vmem:[%s12365_s3 + $0xc0] sm:$0xff] }
0x117f   :  { %v3937_v57 = vpop.xlane.xlu0 %3936 }
0x1180   :  { %v3944_v7 = vmul.f32 0.015625, %v3937_v57  ;;  %v7325_v57 = vld [vmem:[%s12365_s3 + $0xd0] sm:$0xff] }
0x1182   :  { %v3947_v9 = vsub.f32 %v3930_v55, %v3944_v7  ;;  %v7315_v55 = vld [vmem:[%s12365_s3 + $0x80] sm:$0xff] }
0x1183   :  { %v8681_v47 = vpack.c.bf16 %v7317_v40, %v7315_v55  ;;  %v7313_v40 = vld [vmem:[#allocation22] ss:$0 sm:$0xff] }
0x1184   :  { %v3940_v19 = vpop.xlane.xlu1 %3939  ;;  %v3950_v32 = vmul.f32 %v3947_v9, %v3947_v9 }
0x1185   :  { %v3945_v17 = vmul.f32 0.015625, %v3940_v19  ;;  %8682 = vmatpush1.bf16.msra.mxu1 %v8681_v47  ;;  %v8689_v19 = vpack.c.bf16 %v7325_v57, %v7323_v51 }
0x1186   :  { %v3953_v37 = vsel %vm786_vm10, %v3950_v32, 0.0  ;;  %v7328_v32 = vld [vmem:[%s12365_s3 + $0xe8] sm:$0xff] }
0x1187   :  { %v3948_v48 = vsub.f32 %v3931_v10, %v3945_v17  ;;  %3954 = vadd.xlane.f32.xlu1 %v3953_v37  ;;  %v8683_v10 = vpack.c.bf16 %v7322_v44, %v7320_v62  ;;  %v7330_v17 = vld [vmem:[%s12365_s3 + $0xf8] sm:$0xff]  ;;  %v7327_v37 = vld [vmem:[%s12365_s3 + $0xe0] sm:$0xff]  ;;  %v7314_v62 = vld [vmem:[#allocation23] ss:$0 sm:$0xff] }
0x1189   :  { %v3951_v61 = vmul.f32 %v3948_v48, %v3948_v48  ;;  %8684 = vmatprep.subr.bf16.mxu1 %v8683_v10 }
0x118a   :  { %8686 = vmatpush1.bf16.msra.mxu1 %v8685_v39 }
0x118b   :  { %v3956_v18 = vsel %vm786_vm10, %v3951_v61, 0.0  ;;  %v8691_v61 = vpack.c.bf16 %v7330_v17, %v7328_v32 }
0x118c   :  { %3957 = vadd.xlane.f32.xlu0 %v3956_v18  ;;  %v7329_v18 = vld [vmem:[%s12365_s3 + $0xf0] sm:$0xff] }
0x1191   :  { %v3943_v52 = vpop.xlane.xlu0 %3942 }
0x1192   :  { %v3946_v20 = vmul.f32 0.015625, %v3943_v52  ;;  %v8693_v52 = vpack.c.bf16 %v7329_v18, %v7327_v37 }
0x1194   :  { %v11131_v46 = vsub.f32 %v3932_v30, %v3946_v20  ;;  %v7326_v30 = vld [vmem:[%s12365_s3 + $0xd8] sm:$0xff] }
0x1195   :  { %v8687_v7 = vpack.c.bf16 %v7326_v30, %v7324_v58 }
0x1196   :  { %v3952_v26 = vmul.f32 %v11131_v46, %v11131_v46 }
0x1197   :  { %8688 = vmatprep.subr.bf16.mxu1 %v8687_v7 }
0x1198   :  { %v3959_v2 = vsel %vm3666_vm6, %v3952_v26, 0.0  ;;  %8690 = vmatpush1.bf16.msra.mxu1 %v8689_v19 }
0x1199   :  { %3960 = vadd.xlane.f32.xlu1 %v3959_v2  ;;  %8692 = vmatprep.subr.bf16.mxu1 %v8691_v61 }
0x119c   :  { %8694 = vmatpush1.bf16.msra.mxu1 %v8693_v52 }
0x119d   :  { %8707 = vmatprep.subr.bf16.mxu1 %v12407_v33 }
0x1214   :  { %v3955_v20 = vpop.xlane.xlu1 %3954 }
0x1215   :  { %v3962_v26 = vmul.f32 0.015625, %v3955_v20 }
0x1217   :  { %v3965_v2 = vadd.f32 1e-05, %v3962_v26 }
0x1219   :  { %9165 = vrsqrt.f32 %v3965_v2  ;;  %v3958_v27 = vpop.xlane.xlu0 %3957 }
0x121a   :  { %v3963_v35 = vmul.f32 0.015625, %v3958_v27 }
0x121c   :  { %v3966_v53 = vadd.f32 1e-05, %v3963_v35 }
0x121e   :  { %9167 = vrsqrt.f32 %v3966_v53 }
0x1223   :  { %v9166_v55 = vpop.eup %9165 }
0x1224   :  { %v3971_v47 = vmul.f32 %v9166_v55, %v3947_v9 }
0x1226   :  { %v3980_v44 = vmul.f32 %v7313_v40, %v3971_v47  ;;  %v3961_v10 = vpop.xlane.xlu1 %3960 }
0x1227   :  { %v3964_v49 = vmul.f32 0.015625, %v3961_v10 }
0x1228   :  { %v9168_v41 = vpop.eup %9167  ;;  %v11153_v58 = vadd.f32 %v7314_v62, %v3980_v44 }
0x1229   :  { %v3967_v39 = vadd.f32 1e-05, %v3964_v49  ;;  %v3972_v30 = vmul.f32 %v9168_v41, %v3948_v48 }
0x122a   :  { %12471 = vst [vmem:[#allocation84_spill] sm:$0xff] %v11153_v58  ;;  %7331 = vmatmul.mubr.msk.f32.vlgmr.msra.gmra.mrb[62].mxu1 %vm786_vm10, %v11153_v58 }
0x122b   :  { %9169 = vrsqrt.f32 %v3967_v39  ;;  %4088 = vmatprep.mubr.f32.mxu1 %v12406_v36  ;;  %v3981_v51 = vmul.f32 %v7313_v40, %v3972_v30 }
0x122d   :  { %v11158_v57 = vadd.f32 %v7314_v62, %v3981_v51 }
0x122f   :  { %12472 = vst [vmem:[#allocation85_spill] sm:$0xff] %v11158_v57  ;;  %7332 = vmatmul.mubr.msk.f32.gmra.mrb[64].mxu1 %vm786_vm10, %v11158_v57 }
0x1230   :  { %4094 = vmatprep.mubr.f32.mxu1 %v12406_v36 }
0x1235   :  { %v9170_v9 = vpop.eup %9169 }
0x1236   :  { %v3973_v7 = vmul.f32 %v9170_v9, %v11131_v46 }
0x1238   :  { %v3982_v19 = vmul.f32 %v7313_v40, %v3973_v7 }
0x123a   :  { %v11164_v32 = vadd.f32 %v7314_v62, %v3982_v19 }
0x123c   :  { %12473 = vst [vmem:[#allocation86_spill] sm:$0xff] %v11164_v32  ;;  %7333 = vmatmul.mubr.msk.f32.gmra.mrb[66].mxu1 %vm786_vm10, %v11164_v32 }
0x123d   :  { %8225 = vmatprep.mubr.msk.f32.mxu1 %vm9589_vm0, %v12406_v36 }
0x12fd   :  { %v11170_v48 = vpop.f32.mrb[62].mxu1 }
0x12fe   :  { %v11172_v17 = vpop.f32.mrb[63].mxu1  ;;  %v4164_v37 = vmul.f32 %v11170_v48, %v12415_v8  ;;  %v4146_v61 = vmul.f32 %v11170_v48, %v12413_v38  ;;  %v4122_v7 = vmul.f32 %v11170_v48, %v12418_v34 }
0x12ff   :  { %v4266_v18 = vmul.f32 %v11172_v17, %v12413_v38  ;;  %v4284_v52 = vmul.f32 %v11172_v17, %v12415_v8  ;;  %v4227_v26 = vmul.f32 %v11172_v17, %v12417_v56  ;;  %v4245_v35 = vmul.f32 %v11172_v17, %v12418_v34 }
0x1300   :  { %4170 = vrot.lane.b32.xlu0 %v4164_v37, %s9602_s20  ;;  %4152 = vrot.lane.b32.xlu1 %v4146_v61, %s9601_s5  ;;  %v4323_v39 = vmul.f32 %v11172_v17, %v12459_v29  ;;  %v4305_v19 = vmul.f32 %v11172_v17, %v12458_v22  ;;  %v4104_v37 = vmul.f32 %v11170_v48, %v12417_v56 }
0x1302   :  { %v11180_v46 = vpop.f32.mrb[64].mxu1 }
0x1303   :  { %v11186_v20 = vpop.f32.mrb[65].mxu1  ;;  %v4147_v2 = vmul.f32 %v11180_v46, %v12421_v11  ;;  %v11196_v27 = vpack.i.bf16 %v11180_v46, %v11170_v48  ;;  %v4165_v55 = vmul.f32 %v11180_v46, %v12444_v45 }
0x1304   :  { %4272 = vrot.lane.b32.xlu0 %v4266_v18, %s9601_s5  ;;  %4290 = vrot.lane.b32.xlu1 %v4284_v52, %s9602_s20  ;;  %v4267_v53 = vmul.f32 %v11186_v20, %v12421_v11  ;;  %v4228_v40 = vmul.f32 %v11186_v20, %v12446_v5  ;;  %v4285_v44 = vmul.f32 %v11186_v20, %v12444_v45 }
0x1305   :  { %v4246_v10 = vmul.f32 %v11186_v20, %v12447_v15  ;;  %v4306_v49 = vmul.f32 %v11186_v20, %v12463_v12  ;;  %v4324_v18 = vmul.f32 %v11186_v20, %v12464_v60 }
0x1308   :  { %4233 = vrot.lane.b32.xlu0 %v4227_v26, %s9601_s5  ;;  %4154 = vrot.lane.b32.xlu1 %v4147_v2, %s9601_s5  ;;  %v4105_v26 = vmul.f32 %v11180_v46, %v12446_v5  ;;  %v4123_v2 = vmul.f32 %v11180_v46, %v12447_v15 }
0x130c   :  { %4251 = vrot.lane.b32.xlu0 %v4245_v35, %s9602_s20  ;;  %4274 = vrot.lane.b32.xlu1 %v4267_v53, %s9601_s5 }
0x130f   :  { %v11210_v47 = vpop.f32.mrb[66].mxu1 }
0x1310   :  { %v11212_v62 = vpop.f32.mrb[67].mxu1  ;;  %4172 = vrot.lane.b32.xlu0 %v4165_v55, %s9602_s20  ;;  %4235 = vrot.lane.b32.xlu1 %v4228_v40, %s9601_s5  ;;  %v4148_v41 = vmul.f32 %v11210_v47, %v12450_v28  ;;  %v4166_v30 = vmul.f32 %v11210_v47, %v12451_v1  ;;  %v4106_v35 = vmul.f32 %v11210_v47, %v12453_v23 }
0x1311   :  { %v4286_v51 = vmul.f32 %v11212_v62, %v12451_v1  ;;  %v4268_v9 = vmul.f32 %v11212_v62, %v12450_v28  ;;  %v4229_v61 = vmul.f32 %v11212_v62, %v12453_v23  ;;  %v4247_v52 = vmul.f32 %v11212_v62, %v12454_v43 }
0x1312   :  { %v4307_v53 = vmul.f32 %v11212_v62, %v12467_v24  ;;  %v4124_v55 = vmul.f32 %v11210_v47, %v12454_v43  ;;  %v4325_v40 = vmul.f32 %v11212_v62, %v12468_v4 }
0x1314   :  { %4292 = vrot.lane.b32.xlu0 %v4285_v44, %s9602_s20  ;;  %4253 = vrot.lane.b32.xlu1 %v4246_v10, %s9602_s20  ;;  %v4188_v44 = vmul.f32 %v11170_v48, %v12458_v22  ;;  %v4206_v10 = vmul.f32 %v11170_v48, %v12459_v29 }
0x1318   :  { %4313 = vrot.lane.b32.xlu0 %v4306_v49, %s9601_s5  ;;  %4156 = vrot.lane.b32.xlu1 %v4148_v41, %s9601_s5  ;;  %v4189_v49 = vmul.f32 %v11180_v46, %v12463_v12  ;;  %v4207_v41 = vmul.f32 %v11180_v46, %v12464_v60 }
0x131c   :  { %4329 = vrot.lane.b32.xlu0 %v4323_v39, %s9602_s20  ;;  %4174 = vrot.lane.b32.xlu1 %v4166_v30, %s9602_s20  ;;  %v4190_v39 = vmul.f32 %v11210_v47, %v12467_v24  ;;  %v4208_v30 = vmul.f32 %v11210_v47, %v12468_v4 }
0x1320   :  { %4294 = vrot.lane.b32.xlu0 %v4286_v51, %s9602_s20  ;;  %4276 = vrot.lane.b32.xlu1 %v4268_v9, %s9601_s5 }
0x1324   :  { %4128 = vrot.lane.b32.xlu0 %v4122_v7, %s9602_s20  ;;  %4311 = vrot.lane.b32.xlu1 %v4305_v19, %s9601_s5 }
0x1328   :  { %4110 = vrot.lane.b32.xlu1 %v4104_v37, %s9601_s5  ;;  %4237 = vrot.lane.b32.xlu0 %v4229_v61, %s9601_s5 }
0x132c   :  { %4331 = vrot.lane.b32.xlu1 %v4324_v18, %s9602_s20  ;;  %4255 = vrot.lane.b32.xlu0 %v4247_v52, %s9602_s20  ;;  %v4143_v18 = vmul.f32 %v11170_v48, %v10170_v3 }
0x1330   :  { %4112 = vrot.lane.b32.xlu1 %v4105_v26, %s9601_s5  ;;  %4130 = vrot.lane.b32.xlu0 %v4123_v2, %s9602_s20  ;;  %v4356_v2 = vmul.f32 %v11172_v17, %v10170_v3 }
0x1334   :  { %4114 = vrot.lane.b32.xlu1 %v4106_v35, %s9601_s5  ;;  %4315 = vrot.lane.b32.xlu0 %v4307_v53, %s9601_s5 }
0x1338   :  { %4132 = vrot.lane.b32.xlu1 %v4124_v55, %s9602_s20  ;;  %4333 = vrot.lane.b32.xlu0 %v4325_v40, %s9602_s20  ;;  %v11302_v55 = vmul.f32 %v11170_v48, %v12416_v31 }
0x133c   :  { %4194 = vrot.lane.b32.xlu1 %v4188_v44, %s9601_s5  ;;  %4212 = vrot.lane.b32.xlu0 %v4206_v10, %s9602_s20  ;;  %v4144_v10 = vmul.f32 %v11180_v46, %v12420_v6 }
0x1340   :  { %4196 = vrot.lane.b32.xlu1 %v4189_v49, %s9601_s5  ;;  %4214 = vrot.lane.b32.xlu0 %v4207_v41, %s9602_s20  ;;  %v4344_v49 = vmul.f32 %v11172_v17, %v12416_v31  ;;  %v11310_v41 = vmul.f32 %v11180_v46, %v12445_v25 }
0x1344   :  { %4198 = vrot.lane.b32.xlu1 %v4190_v39, %s9601_s5  ;;  %4216 = vrot.lane.b32.xlu0 %v4208_v30, %s9602_s20  ;;  %v4345_v39 = vmul.f32 %v11186_v20, %v12445_v25 }
0x1372   :  { %v4153_v51 = vpop.permute.xlu1 %4152  ;;  %v11294_v9 = vpop.permute.xlu0 %4170 }
0x1376   :  { %v4291_v7 = vpop.permute.xlu1 %4290  ;;  %v4273_v19 = vpop.permute.xlu0 %4272 }
0x1377   :  { %v4281_v35 = vadd.f32 %v4273_v19, %v4143_v18  ;;  %v4359_v53 = vadd.f32 %v4356_v2, %v4273_v19  ;;  %v4357_v2 = vmul.f32 %v11186_v20, %v12420_v6 }
0x1379   :  { %v4299_v30 = vadd.f32 %v4291_v7, %v4281_v35  ;;  %v4362_v24 = vadd.f32 %v4359_v53, %v4291_v7  ;;  %v4161_v53 = vadd.f32 %v4153_v51, %v4143_v18  ;;  %v4368_v18 = vmul.f32 %v11172_v17, %v12457_v59 }
0x137a   :  { %v4155_v37 = vpop.permute.xlu1 %4154  ;;  %v4234_v61 = vpop.permute.xlu0 %4233 }
0x137b   :  { %v4242_v19 = vadd.f32 %v4234_v61, %v11302_v55  ;;  %v4347_v32 = vadd.f32 %v4344_v49, %v4234_v61  ;;  %v11319_v15 = vadd.f32 %v4299_v30, %v10160_v50  ;;  %v4365_v7 = vadd.f32 %v4362_v24, %v10160_v50 }
0x137e   :  { %v4275_v52 = vpop.permute.xlu1 %4274  ;;  %v4252_v26 = vpop.permute.xlu0 %4251 }
0x137f   :  { %v4282_v57 = vadd.f32 %v4275_v52, %v4144_v10  ;;  %v4360_v60 = vadd.f32 %v4357_v2, %v4275_v52  ;;  %v4260_v12 = vadd.f32 %v4252_v26, %v4242_v19  ;;  %v4350_v43 = vadd.f32 %v4347_v32, %v4252_v26 }
0x1380   :  { %v4179_v2 = vadd.f32 %v11294_v9, %v4161_v53  ;;  %v12474_v53 = vld [vmem:[#allocation74_spill] sm:$0xff] }
0x1381   :  { %v11330_v52 = vadd.f32 %v4260_v12, %v10182_v16 }
0x1382   :  { %v4236_v40 = vpop.permute.xlu1 %4235  ;;  %v4173_v44 = vpop.permute.xlu0 %4172  ;;  %v11381_v9 = vadd.f32 %v4179_v2, %v10160_v50 }
0x1383   :  { %v4243_v58 = vadd.f32 %v4236_v40, %v11310_v41  ;;  %v4348_v4 = vadd.f32 %v4345_v39, %v4236_v40 }
0x1386   :  { %v4254_v29 = vpop.permute.xlu1 %4253  ;;  %v4293_v22 = vpop.permute.xlu0 %4292 }
0x1387   :  { %v4261_v23 = vadd.f32 %v4254_v29, %v4243_v58  ;;  %v4351_v1 = vadd.f32 %v4348_v4, %v4254_v29  ;;  %v4300_v28 = vadd.f32 %v4293_v22, %v4282_v57  ;;  %v4363_v35 = vadd.f32 %v4360_v60, %v4293_v22 }
0x1388   :  { %v4353_v60 = vadd.f32 %v4350_v43, %v10182_v16  ;;  %v4162_v58 = vadd.f32 %v4155_v37, %v4144_v10  ;;  %v4145_v43 = vmul.f32 %v11210_v47, %v12449_v42 }
0x1389   :  { %v11322_v5 = vadd.f32 %v4261_v23, %v12419_v63  ;;  %v4354_v61 = vadd.f32 %v4351_v1, %v12419_v63  ;;  %v11326_v40 = vadd.f32 %v4300_v28, %v12414_v21  ;;  %v4366_v29 = vadd.f32 %v4363_v35, %v12414_v21 }
0x138a   :  { %v4157_v4 = vpop.permute.xlu1 %4156  ;;  %v4314_v22 = vpop.permute.xlu0 %4313  ;;  %v4180_v32 = vadd.f32 %v4173_v44, %v4162_v58  ;;  %v11365_v44 = vmul.f32 %v11170_v48, %v12457_v59 }
0x138b   :  { %v11336_v23 = vpack.i.bf16 %v11326_v40, %v11319_v15  ;;  %v11340_v28 = vpack.i.bf16 %v11322_v5, %v11330_v52  ;;  %v11342_v1 = vpack.i.bf16 %v4366_v29, %v4365_v7  ;;  %v11346_v24 = vpack.i.bf16 %v4354_v61, %v4353_v60 }
0x138c   :  { %v11357_v10 = vadd.f32 %v4180_v32, %v12414_v21  ;;  %v4163_v61 = vadd.f32 %v4157_v4, %v4145_v43  ;;  %v4186_v7 = vmul.f32 %v11180_v46, %v12462_v13  ;;  %v4369_v32 = vmul.f32 %v11186_v20, %v12462_v13  ;;  %v12475_v13 = vld [vmem:[#allocation78_spill] sm:$0xff] }
0x138d   :  { %9030 = vrot.lane.b32.xlu1 %v11336_v23, %s9581_s28  ;;  %v4103_v4 = vmul.f32 %v11210_v47, %v12474_v53 }
0x138e   :  { %v4175_v12 = vpop.permute.xlu1 %4174  ;;  %v4330_v57 = vpop.permute.xlu0 %4329 }
0x138f   :  { %v4181_v17 = vadd.f32 %v4175_v12, %v4163_v61 }
0x1391   :  { %9035 = vrot.lane.b32.xlu1 %v11340_v28, %s9581_s28  ;;  %v11394_v20 = vadd.f32 %v4181_v17, %v12422_v0 }
0x1392   :  { %v11352_v37 = vpop.permute.xlu1 %4276  ;;  %v11354_v26 = vpop.permute.xlu0 %4294 }
0x1393   :  { %v4283_v49 = vadd.f32 %v11352_v37, %v4145_v43 }
0x1395   :  { %v4301_v39 = vadd.f32 %v11354_v26, %v4283_v49  ;;  %4390 = vrot.lane.b32.xlu1 %v11357_v10, %s9592_s8  ;;  %v4321_v49 = vadd.f32 %v4314_v22, %v4186_v7 }
0x1396   :  { %v4312_v30 = vpop.permute.xlu1 %4311  ;;  %v4129_v19 = vpop.permute.xlu0 %4128 }
0x1397   :  { %v11369_v51 = vadd.f32 %v4301_v39, %v12422_v0  ;;  %v4320_v35 = vadd.f32 %v4312_v30, %v11365_v44  ;;  %v4371_v29 = vadd.f32 %v4368_v18, %v4312_v30  ;;  %v4372_v39 = vadd.f32 %v4369_v32, %v4314_v22 }
0x1399   :  { %4401 = vrot.lane.b32.xlu0 %v11369_v51, %s9581_s28  ;;  %v4338_v43 = vadd.f32 %v4330_v57, %v4320_v35  ;;  %v4374_v18 = vadd.f32 %v4371_v29, %v4330_v57  ;;  %v12477_v57 = vld [vmem:[#allocation76_spill] sm:$0xff] }
0x139a   :  { %v4111_v60 = vpop.permute.xlu1 %4110  ;;  %v11378_v58 = vpop.permute.xlu0 %4237 }
0x139b   :  { %v4119_v59 = vadd.f32 %v4111_v60, %v11302_v55  ;;  %v4244_v30 = vadd.f32 %v11378_v58, %v4103_v4  ;;  %v4341_v22 = vadd.f32 %v4338_v43, %v12475_v13  ;;  %v12476_v55 = vld [vmem:[#allocation79_spill] sm:$0xff]  ;;  %v4377_v17 = vadd.f32 %v4374_v18, %v12475_v13 }
0x139d   :  { %4388 = vrot.lane.b32.xlu0 %v11381_v9, %s9592_s8  ;;  %v4137_v32 = vadd.f32 %v4129_v19, %v4119_v59 }
0x139e   :  { %v4332_v2 = vpop.permute.xlu1 %4331  ;;  %v11391_v25 = vpop.permute.xlu0 %4255 }
0x139f   :  { %v4339_v12 = vadd.f32 %v4332_v2, %v4321_v49  ;;  %v4375_v61 = vadd.f32 %v4372_v39, %v4332_v2  ;;  %v4262_v35 = vadd.f32 %v11391_v25, %v4244_v30  ;;  %v11414_v43 = vadd.f32 %v4137_v32, %v10182_v16 }
0x13a1   :  { %v4342_v60 = vadd.f32 %v4339_v12, %v12476_v55  ;;  %v4378_v45 = vadd.f32 %v4375_v61, %v12476_v55  ;;  %4392 = vrot.lane.b32.xlu0 %v11394_v20, %s9592_s8  ;;  %v11403_v29 = vadd.f32 %v4262_v35, %v12477_v57 }
0x13a2   :  { %v4113_v11 = vpop.permute.xlu1 %4112  ;;  %v4131_v49 = vpop.permute.xlu0 %4130 }
0x13a3   :  { %v4120_v39 = vadd.f32 %v4113_v11, %v11310_v41  ;;  %4511 = vrot.lane.b32.xlu1 %v11403_v29, %s9581_s28  ;;  %v11409_v59 = vpack.i.bf16 %v4342_v60, %v4341_v22  ;;  %v11411_v19 = vpack.i.bf16 %v4378_v45, %v4377_v17  ;;  %v4187_v11 = vmul.f32 %v11210_v47, %v12466_v54 }
0x13a5   :  { %v4138_v30 = vadd.f32 %v4131_v49, %v4120_v39  ;;  %9040 = vrot.lane.b32.xlu0 %v11409_v59, %s9581_s28 }
0x13a6   :  { %v4115_v2 = vpop.permute.xlu1 %4114  ;;  %v11418_v18 = vpop.permute.xlu0 %4315 }
0x13a7   :  { %4498 = vrot.lane.b32.xlu1 %v11414_v43, %s9592_s8  ;;  %v11425_v41 = vadd.f32 %v4138_v30, %v12419_v63  ;;  %v4121_v45 = vadd.f32 %v4115_v2, %v4103_v4  ;;  %v4322_v12 = vadd.f32 %v11418_v18, %v4187_v11 }
0x13a9   :  { %9045 = vrot.lane.b32.xlu0 %v11196_v27, %s9603_s16 }
0x13aa   :  { %v4133_v61 = vpop.permute.xlu1 %4132  ;;  %v11430_v35 = vpop.permute.xlu0 %4333 }
0x13ab   :  { %v4139_v32 = vadd.f32 %v4133_v61, %v4121_v45  ;;  %v4340_v17 = vadd.f32 %v11430_v35, %v4322_v12  ;;  %4500 = vrot.lane.b32.xlu1 %v11425_v41, %s9592_s8 }
0x13ad   :  { %v11436_v49 = vadd.f32 %v4139_v32, %v12477_v57  ;;  %v11439_v39 = vadd.f32 %v4340_v17, %v12465_v14 }
0x13ae   :  { %v4195_v4 = vpop.permute.xlu1 %4194  ;;  %v4213_v30 = vpop.permute.xlu0 %4212 }
0x13af   :  { %v4203_v2 = vadd.f32 %v4195_v4, %v11365_v44  ;;  %4502 = vrot.lane.b32.xlu0 %v11436_v49, %s9592_s8  ;;  %4621 = vrot.lane.b32.xlu1 %v11439_v39, %s9581_s28  ;;  %v4754_v44 = vmul.f32 %v11330_v52, %v11330_v52 }
0x13b1   :  { %v4221_v45 = vadd.f32 %v4213_v30, %v4203_v2  ;;  %v4757_v2 = vmul.f32 %v11319_v15, %v11319_v15 }
0x13b2   :  { %v4197_v12 = vpop.permute.xlu1 %4196  ;;  %v4215_v61 = vpop.permute.xlu0 %4214 }
0x13b3   :  { %v11447_v6 = vadd.f32 %v4221_v45, %v12475_v13  ;;  %v4204_v32 = vadd.f32 %v4197_v12, %v4186_v7  ;;  %4848 = vrot.lane.b32.xlu1 %v11210_v47, %s9603_s16  ;;  %v4763_v45 = vmul.f32 %v4341_v22, %v4341_v22  ;;  %v4755_v12 = vmul.f32 %v11322_v5, %v11322_v5 }
0x13b4   :  { %v4760_v52 = vadd.f32 %v4757_v2, %v4754_v44  ;;  %v4765_v5 = vmul.f32 %v11439_v39, %v11439_v39  ;;  %v4719_v44 = vmul.f32 %v11425_v41, %v11425_v41 }
0x13b5   :  { %v4222_v17 = vadd.f32 %v4215_v61, %v4204_v32  ;;  %4608 = vrot.lane.b32.xlu0 %v11447_v6, %s9592_s8  ;;  %v4758_v61 = vmul.f32 %v11326_v40, %v11326_v40  ;;  %v4764_v40 = vmul.f32 %v4342_v60, %v4342_v60  ;;  %v4722_v60 = vmul.f32 %v11357_v10, %v11357_v10 }
0x13b6   :  { %v4199_v4 = vpop.permute.xlu1 %4198  ;;  %v4217_v7 = vpop.permute.xlu0 %4216  ;;  %v11473_v22 = vadd.f32 %v4763_v45, %v4760_v52  ;;  %v4721_v45 = vmul.f32 %v11381_v9, %v11381_v9  ;;  %v4720_v52 = vmul.f32 %v11436_v49, %v11436_v49 }
0x13b7   :  { %v11456_v63 = vadd.f32 %v4222_v17, %v12476_v55  ;;  %v4205_v30 = vadd.f32 %v4199_v4, %v4187_v11  ;;  %v4756_v17 = vmul.f32 %v11403_v29, %v11403_v29  ;;  %v4759_v11 = vmul.f32 %v11369_v51, %v11369_v51 }
0x13b8   :  { %v4761_v4 = vadd.f32 %v4758_v61, %v4755_v12  ;;  %v4723_v55 = vmul.f32 %v11394_v20, %v11394_v20 }
0x13b9   :  { %v4223_v32 = vadd.f32 %v4217_v7, %v4205_v30  ;;  %4610 = vrot.lane.b32.xlu0 %v11456_v63, %s9592_s8  ;;  %v4718_v30 = vmul.f32 %v11414_v43, %v11414_v43  ;;  %v4762_v2 = vadd.f32 %v4759_v11, %v4756_v17  ;;  %v4727_v7 = vmul.f32 %v11447_v6, %v11447_v6 }
0x13ba   :  { %v4728_v12 = vmul.f32 %v11456_v63, %v11456_v63  ;;  %v4725_v17 = vadd.f32 %v4722_v60, %v4719_v44 }
0x13bb   :  { %v11471_v15 = vadd.f32 %v4223_v32, %v12465_v14  ;;  %v11493_v61 = vadd.f32 %v4765_v5, %v4762_v2  ;;  %v11495_v32 = vadd.f32 %v4764_v40, %v4761_v4  ;;  %v4724_v11 = vadd.f32 %v4721_v45, %v4718_v30 }
0x13bc   :  { %v11507_v2 = vadd.f32 %v4728_v12, %v4725_v17  ;;  %v4726_v4 = vadd.f32 %v4723_v55, %v4720_v52 }
0x13bd   :  { %4772 = vrot.lane.b32.xlu0 %v11473_v22, %s9581_s28  ;;  %4612 = vrot.lane.b32.xlu1 %v11471_v15, %s9592_s8  ;;  %v4729_v5 = vmul.f32 %v11471_v15, %v11471_v15  ;;  %v11509_v40 = vadd.f32 %v4727_v7, %v4724_v11 }
0x13bf   :  { %v11515_v13 = vadd.f32 %v4729_v5, %v4726_v4 }
0x13c1   :  { %4776 = vrot.lane.b32.xlu0 %v11493_v61, %s9581_s28  ;;  %4774 = vrot.lane.b32.xlu1 %v11495_v32, %s9581_s28  ;;  %s7334_s28 = sld [smem:[#allocation4 + $0x80]] }
0x13c5   :  { %4738 = vrot.lane.b32.xlu0 %v11507_v2, %s9592_s8  ;;  %4736 = vrot.lane.b32.xlu1 %v11509_v40, %s9592_s8 }
0x13c7   :  { %s4384_s3 = smul.f32 0.16666667, %s7334_s28 }
0x13c9   :  { %4740 = vrot.lane.b32.xlu1 %v11515_v13, %s9592_s8  ;;  %s4790_s5 = smul.f32 -0.5, %s4384_s3 }
0x13ff   :  { %v9031_v30 = vpop.permute.xlu1 %9030 }
0x1400   :  { %v9033_v44 = vunpack.i.h.bf16 %v9031_v30  ;;  %v9032_v45 = vunpack.i.l.bf16 %v9031_v30 }
0x1402   :  { %v8696_v60 = vpack.c.bf16 %v9033_v44, %v9032_v45 }
0x1403   :  { %v9036_v7 = vpop.permute.xlu1 %9035 }
0x1404   :  { %8698 = vmatpush3.bf16.xpose.msk.msra.mxu0 %vm10434_vm12, %v8696_v60  ;;  %v9038_v17 = vunpack.i.h.bf16 %v9036_v7  ;;  %v9037_v11 = vunpack.i.l.bf16 %v9036_v7 }
0x1405   :  { %8178 = vmatprep.subr.mxu0 %v12406_v36 }
0x1406   :  { %v8700_v55 = vpack.c.bf16 %v9038_v17, %v9037_v11 }
0x1407   :  { %v4391_v5 = vpop.permute.xlu1 %4390 }
0x140b   :  { %v4402_v34 = vpop.permute.xlu0 %4401 }
0x140c   :  { %8179 = vmatpush3.xpose.msk.msra.mxu0 %vm1331_vm11, %v4402_v34 }
0x140d   :  { %8699 = vmatprep.subr.bf16.mxu0 %v12407_v33 }
0x140f   :  { %v4389_v52 = vpop.permute.xlu0 %4388 }
0x1410   :  { %8181 = vmatmul.mubr.msk.f32.vlgmr.msra.gmra.mrb[42].mxu0 %vm1331_vm11, %v4389_v52 }
0x1411   :  { %8702 = vmatpush3.bf16.xpose.msk.msra.mxu0 %vm10434_vm12, %v8700_v55  ;;  %8183 = vmatprep.mubr.msk.f32.mxu0 %vm9589_vm0, %v12406_v36 }
0x1412   :  { %8193 = vmatprep.subr.mxu0 %v12406_v36 }
0x1413   :  { %v4393_v4 = vpop.permute.xlu0 %4392 }
0x1414   :  { %8184 = vmatmul.mubr.msk.f32.gmra.mrb[44].mxu0 %vm1331_vm11, %v4391_v5 }
0x1415   :  { %v4512_v30 = vpop.permute.xlu1 %4511  ;;  %8186 = vmatprep.mubr.msk.f32.mxu0 %vm9589_vm0, %v12406_v36 }
0x1417   :  { %v9041_v34 = vpop.permute.xlu0 %9040 }
0x1418   :  { %v9043_v44 = vunpack.i.h.bf16 %v9041_v34  ;;  %v9042_v45 = vunpack.i.l.bf16 %v9041_v34  ;;  %8187 = vmatmul.mubr.msk.f32.gmra.mrb[46].mxu0 %vm1331_vm11, %v4393_v4 }
0x1419   :  { %8194 = vmatpush3.xpose.msk.msra.mxu0 %vm1331_vm11, %v4512_v30  ;;  %v4499_v60 = vpop.permute.xlu1 %4498  ;;  %8195 = vmatprep.mubr.msk.f32.mxu0 %vm9589_vm0, %v12406_v36 }
0x141a   :  { %v8704_v7 = vpack.c.bf16 %v9043_v44, %v9042_v45  ;;  %8703 = vmatprep.subr.bf16.mxu0 %v12407_v33 }
0x141b   :  { %v9046_v17 = vpop.permute.xlu0 %9045 }
0x141c   :  { %v9048_v11 = vunpack.i.h.bf16 %v9046_v17  ;;  %v9047_v55 = vunpack.i.l.bf16 %v9046_v17  ;;  %8196 = vmatmul.mubr.msk.f32.vlgmr.msra.gmra.mrb[42].mxu0 %vm1331_vm11, %v4499_v60  ;;  %v11560_v60 = vmul.f32 0.17677669, %v11170_v48  ;;  %v11571_v17 = vmul.f32 0.17677669, %v11180_v46 }
0x141d   :  { %8706 = vmatpush3.bf16.xpose.msk.msra.mxu0 %vm10434_vm12, %v8704_v7  ;;  %v4501_v52 = vpop.permute.xlu1 %4500  ;;  %8198 = vmatprep.mubr.msk.f32.mxu0 %vm9589_vm0, %v12406_v36 }
0x141e   :  { %v8708_v5 = vpack.c.bf16 %v9048_v11, %v9047_v55  ;;  %8208 = vmatprep.subr.mxu0 %v12406_v36 }
0x1420   :  { %8199 = vmatmul.mubr.msk.f32.gmra.mrb[44].mxu0 %vm1331_vm11, %v4501_v52  ;;  %8710 = vmatpush3.bf16.xpose.msk.msra.mxu1 %vm10457_vm13, %v8708_v5  ;;  %v4382_v52 = vmul.f32 0.17677669, %v11210_v47 }
0x1421   :  { %v4622_v30 = vpop.permute.xlu1 %4621  ;;  %8201 = vmatprep.mubr.msk.f32.mxu0 %vm9589_vm0, %v12406_v36  ;;  %8223 = vmatprep.subr.mxu1 %v12406_v36  ;;  %v4503_v34 = vpop.permute.xlu0 %4502 }
0x1424   :  { %8202 = vmatmul.mubr.msk.f32.gmra.mrb[46].mxu0 %vm1331_vm11, %v4503_v34 }
0x1425   :  { %8209 = vmatpush3.xpose.msk.msra.mxu0 %vm1331_vm11, %v4622_v30  ;;  %8210 = vmatprep.mubr.msk.f32.mxu0 %vm9589_vm0, %v12406_v36  ;;  %v4849_v44 = vpop.permute.xlu1 %4848 }
0x1426   :  { %8717 = vmatprep.subr.bf16.mxu0 %v12407_v33 }
0x1427   :  { %v4609_v45 = vpop.permute.xlu0 %4608 }
0x1428   :  { %8211 = vmatmul.mubr.msk.f32.vlgmr.msra.gmra.mrb[42].mxu0 %vm1331_vm11, %v4609_v45  ;;  %8224 = vmatpush3.xpose.msk.msra.mxu1 %vm318_vm1, %v4849_v44 }
0x1429   :  { %8213 = vmatprep.mubr.msk.f32.mxu0 %vm9589_vm0, %v12406_v36  ;;  %8711 = vmatprep.subr.bf16.mxu1 %v12407_v33 }
0x142b   :  { %v4611_v7 = vpop.permute.xlu0 %4610  ;;  %8226 = vmatmul.mubr.msk.f32.vlgmr.msra.gmra.mrb[68].mxu1 %vm318_vm1, %v11560_v60 }
0x142c   :  { %8214 = vmatmul.mubr.msk.f32.gmra.mrb[44].mxu0 %vm1331_vm11, %v4611_v7  ;;  %8228 = vmatprep.mubr.msk.f32.mxu1 %vm9589_vm0, %v12406_v36 }
0x142d   :  { %8216 = vmatprep.mubr.msk.f32.mxu0 %vm9589_vm0, %v12406_v36 }
0x142f   :  { %v4613_v11 = vpop.permute.xlu1 %4612  ;;  %v4773_v48 = vpop.permute.xlu0 %4772  ;;  %8229 = vmatmul.mubr.msk.f32.gmra.mrb[70].mxu1 %vm318_vm1, %v11571_v17 }
0x1430   :  { %8217 = vmatmul.mubr.msk.f32.gmra.mrb[46].mxu0 %vm1331_vm11, %v4613_v11  ;;  %v4781_v55 = vsel %vm1331_vm11, %v4773_v48, 0.0  ;;  %8231 = vmatprep.mubr.msk.f32.mxu1 %vm9589_vm0, %v12406_v36 }
0x1431   :  { %4782 = vadd.xlane.f32.xlu0 %v4781_v55  ;;  %8270 = vmatprep.mubr.msk.f32.mxu0 %vm9589_vm0, %v12406_v36 }
0x1433   :  { %v4775_v46 = vpop.permute.xlu1 %4774  ;;  %v4777_v5 = vpop.permute.xlu0 %4776  ;;  %8232 = vmatmul.mubr.msk.f32.gmra.mrb[72].mxu1 %vm318_vm1, %v4382_v52 }
0x1434   :  { %v4784_v30 = vsel %vm1331_vm11, %v4775_v46, 0.0  ;;  %v4787_v34 = vsel %vm1680_vm14, %v4777_v5, 0.0  ;;  %8240 = vmatprep.mubr.msk.f32.mxu1 %vm9589_vm0, %v12406_v36  ;;  %v4358_v46 = vmul.f32 %v11212_v62, %v12449_v42 }
0x1435   :  { %4785 = vadd.xlane.f32.xlu1 %v4784_v30  ;;  %4788 = vadd.xlane.f32.xlu0 %v4787_v34 }
0x1436   :  { %v4361_v5 = vadd.f32 %v4358_v46, %v11352_v37 }
0x1437   :  { %v4737_v44 = vpop.permute.xlu1 %4736  ;;  %v4739_v45 = vpop.permute.xlu0 %4738 }
0x1438   :  { %v4745_v7 = vsel %vm1331_vm11, %v4737_v44, 0.0  ;;  %v4748_v11 = vsel %vm1331_vm11, %v4739_v45, 0.0  ;;  %v4364_v30 = vadd.f32 %v4361_v5, %v11354_v26 }
0x1439   :  { %4746 = vadd.xlane.f32.xlu0 %v4745_v7  ;;  %4749 = vadd.xlane.f32.xlu1 %v4748_v11 }
0x143a   :  { %v11597_v34 = vadd.f32 %v4364_v30, %v12422_v0 }
0x143b   :  { %v4741_v48 = vpop.permute.xlu1 %4740 }
0x143c   :  { %v4751_v55 = vsel %vm1680_vm14, %v4741_v48, 0.0  ;;  %12480 = vst [vmem:[#allocation82_spill] sm:$0xff] %v11597_v34 }
0x143d   :  { %4752 = vadd.xlane.f32.xlu0 %v4751_v55 }
0x1453   :  { %9050 = vrot.lane.b32.xlu0 %v11342_v1, %s9602_s20 }
0x1457   :  { %5180 = vrot.lane.b32.xlu0 %v11597_v34, %s9602_s20 }
0x14be   :  { %v4783_v44 = vpop.xlane.xlu0 %4782 }
0x14bf   :  { %4791 = vxpose.xlu1.b32.start [1/3] (short) (narrow) %v4783_v44, 8 }
0x14c2   :  { %v4786_v45 = vpop.xlane.xlu1 %4785  ;;  %v4789_v7 = vpop.xlane.xlu0 %4788 }
0x14c3   :  { %4792 = vxpose.xlu1.b32.cont [2/3] (short) (narrow) %v4786_v45, 8 }
0x14c6   :  { %v4747_v11 = vpop.xlane.xlu0 %4746 }
0x14c7   :  { %4793 = vxpose.xlu1.b32.end [3/3] (short) (narrow) %v4789_v7, 8 }
0x14ca   :  { %v4753_v48 = vpop.xlane.xlu0 %4752 }
0x14ce   :  { %v9051_v37 = vpop.permute.xlu0 %9050 }
0x14cf   :  { %v9053_v55 = vunpack.i.h.bf16 %v9051_v37  ;;  %v9052_v26 = vunpack.i.l.bf16 %v9051_v37 }
0x14d1   :  { %v8718_v46 = vpack.c.bf16 %v9053_v55, %v9052_v26 }
0x14d2   :  { %v5181_v5 = vpop.permute.xlu0 %5180 }
0x14d3   :  { %8719 = vmatpush3.bf16.msra.mxu0 %v8718_v46 }
0x14d4   :  { %8268 = vmatprep.subr.mxu0 %v12406_v36 }
0x14d7   :  { %8269 = vmatpush3.msk.msra.mxu0 %vm1930_vm15, %v5181_v5  ;;  %v4834_v5 = vstv %s4384_s3 }
0x14d8   :  { %8723 = vmatprep.subr.bf16.mxu0 %v12407_v33 }
0x14e5   :  { %4985 = vrot.lane.b32.xlu1 %v11210_v47, %s9604_s18 }
0x14e9   :  { %5631 = vrot.lane.b32.xlu1 %v11403_v29, %s9605_s27 }
0x14ed   :  { %9080 = vrot.lane.b32.xlu1 %v11409_v59, %s9605_s27 }
0x14f1   :  { %9085 = vrot.lane.b32.xlu1 %v11196_v27, %s9606_s23 }
0x14f5   :  { %5625 = vrot.lane.b32.xlu1 %v11436_v49, %s9607_s21 }
0x14f9   :  { %5725 = vrot.lane.b32.xlu1 %v11447_v6, %s9607_s21 }
0x14fb   :  { %v4701_v30 = vpop.f32.mrb[42].mxu0 }
0x14fc   :  { %v8212_v44 = vpop.f32.mrb[43].mxu0 }
0x14fd   :  { %5727 = vrot.lane.b32.xlu1 %v11456_v63, %s9607_s21  ;;  %v4750_v63 = vpop.xlane.xlu1 %4749  ;;  %v12481_v44 = vld [vmem:[#allocation48_spill] sm:$0xff] }
0x14fe   :  { %v4931_v45 = vpop.f32.mrb[68].mxu1 }
0x14ff   :  { %v4706_v7 = vpop.f32.mrb[44].mxu0  ;;  %v8227_v29 = vpop.f32.mrb[69].mxu1 }
0x1500   :  { %v8215_v37 = vpop.f32.mrb[45].mxu0 }
0x1501   :  { %5729 = vrot.lane.b32.xlu1 %v11471_v15, %s9607_s21 }
0x1502   :  { %v4936_v59 = vpop.f32.mrb[70].mxu1 }
0x1503   :  { %v4711_v55 = vpop.f32.mrb[46].mxu0  ;;  %v8230_v26 = vpop.f32.mrb[71].mxu1 }
0x1504   :  { %v8218_v46 = vpop.f32.mrb[47].mxu0 }
0x1505   :  { %5923 = vrot.lane.b32.xlu1 %v4382_v52, %s9602_s20  ;;  %v4830_v52 = vstv %s4790_s5 }
0x1506   :  { %v4941_v49 = vpop.f32.mrb[72].mxu1 }
0x1507   :  { %v8233_v6 = vpop.f32.mrb[73].mxu1 }
0x1508   :  { %v4836_v6 = vmul.f32 %v4834_v5, %v4706_v7 }
0x1509   :  { %5852 = vrot.lane.b32.xlu1 %v11495_v32, %s9605_s27  ;;  %v4835_v32 = vmul.f32 %v4834_v5, %v4701_v30 }
0x150d   :  { %5832 = vrot.lane.b32.xlu1 %v11509_v40, %s9607_s21  ;;  %v4837_v40 = vmul.f32 %v4834_v5, %v4711_v55  ;;  %v11639_v55 = vld [vmem:[%s12412_s0 + $0x10] sm:$0xf]  ;;  %v4346_v5 = vmul.f32 %v11212_v62, %v12474_v53 }
0x1511   :  { %5836 = vrot.lane.b32.xlu1 %v11515_v13, %s9607_s21 }
0x153f   :  { %v4807_v15 = vpop.trf.xlu1 }
0x1540   :  { %v4826_v29 = vrot.slane %v4807_v15, %v12481_v44  ;;  %v11629_v15 = vld [vmem:[%s12412_s0] sm:$0xff] }
0x1542   :  { %v4827_v37 = vadd.f32 %v4826_v29, %v4747_v11  ;;  %v4828_v26 = vadd.f32 %v4826_v29, %v4750_v63  ;;  %v4829_v46 = vadd.f32 %v4826_v29, %v4753_v48  ;;  %v11634_v63 = vld [vmem:[%s12412_s0 + $0x8] sm:$0xff]  ;;  %v4349_v29 = vadd.f32 %v4346_v5, %v11378_v58 }
0x1544   :  { %v4831_v34 = vmul.f32 %v4830_v52, %v4827_v37  ;;  %v4832_v13 = vmul.f32 %v4830_v52, %v4828_v26  ;;  %v4833_v42 = vmul.f32 %v4830_v52, %v4829_v46  ;;  %v4352_v37 = vadd.f32 %v4349_v29, %v11391_v25 }
0x1546   :  { %v4838_v0 = vadd.f32 %v4835_v32, %v4831_v34  ;;  %v4839_v56 = vadd.f32 %v4836_v6, %v4832_v13  ;;  %v4840_v31 = vadd.f32 %v4837_v40, %v4833_v42  ;;  %v11677_v26 = vadd.f32 %v4352_v37, %v12477_v57 }
0x1548   :  { %v4932_v8 = vadd.f32 %v4931_v45, %v4838_v0  ;;  %v4937_v21 = vadd.f32 %v4936_v59, %v4839_v56  ;;  %v4942_v38 = vadd.f32 %v4941_v49, %v4840_v31 }
0x154a   :  { %v4945_v11 = vadd.f32 %v11629_v15, %v4932_v8  ;;  %v4946_v30 = vadd.f32 %v11634_v63, %v4937_v21  ;;  %v4947_v42 = vadd.f32 %v11639_v55, %v4942_v38 }
0x154c   :  { %v4948_v48 = vsel %vm1878_vm2, %v4945_v11, -inf  ;;  %v4951_v7 = vsel %vm1878_vm2, %v4946_v30, -inf  ;;  %v4954_v31 = vsel %vm1885_vm3, %v4947_v42, -inf }
0x154d   :  { %4949 = vmax.xlane.f32.xlu0 %v4948_v48 }
0x1551   :  { %4952 = vmax.xlane.f32.xlu0 %v4951_v7 }
0x1555   :  { %4955 = vmax.xlane.f32.xlu0 %v4954_v31 }
0x1557   :  { %v4986_v56 = vpop.permute.xlu1 %4985 }
0x155b   :  { %v11643_v0 = vpop.permute.xlu1 %5631 }
0x155f   :  { %v11645_v8 = vpop.permute.xlu1 %9080 }
0x1563   :  { %v11647_v34 = vpop.permute.xlu1 %9085 }
0x1567   :  { %v11649_v45 = vpop.permute.xlu1 %5625 }
0x156b   :  { %v11651_v21 = vpop.permute.xlu1 %5725  ;;  %9055 = vrot.lane.b32.xlu0 %v11196_v27, %s9604_s18 }
0x156f   :  { %v11655_v59 = vpop.permute.xlu1 %5727  ;;  %9060 = vrot.lane.b32.xlu0 %v11336_v23, %s9605_s27 }
0x1573   :  { %v11659_v38 = vpop.permute.xlu1 %5729  ;;  %9065 = vrot.lane.b32.xlu0 %v11346_v24, %s9602_s20 }
0x1577   :  { %v11663_v49 = vpop.permute.xlu1 %5923  ;;  %5527 = vrot.lane.b32.xlu0 %v11369_v51, %s9605_s27 }
0x157b   :  { %v5853_v52 = vpop.permute.xlu1 %5852  ;;  %9070 = vrot.lane.b32.xlu0 %v11340_v28, %s9605_s27 }
0x157c   :  { %v5862_v23 = vsel %vm1331_vm11, %v5853_v52, 0.0 }
0x157d   :  { %5863 = vadd.xlane.f32.xlu1 %v5862_v23  ;;  %v4370_v23 = vmul.f32 %v11212_v62, %v12466_v54 }
0x157f   :  { %5517 = vrot.lane.b32.xlu0 %v11381_v9, %s9607_s21  ;;  %v4373_v37 = vadd.f32 %v4370_v23, %v11418_v18 }
0x1583   :  { %5087 = vrot.lane.b32.xlu0 %v11677_v26, %s9602_s20 }
0x1587   :  { %9075 = vrot.lane.b32.xlu0 %v11411_v19, %s9602_s20 }
0x15da   :  { %v4950_v51 = vpop.xlane.xlu0 %4949 }
0x15db   :  { %v4957_v58 = vsub.f32 %v4945_v11, %v4950_v51  ;;  %v4376_v51 = vadd.f32 %v4373_v37, %v11430_v35 }
0x15dd   :  { %v4960_v28 = vmul.f32 1.442695, %v4957_v58 }
0x15de   :  { %v4953_v46 = vpop.xlane.xlu0 %4952 }
0x15df   :  { %9171 = vpow2.f32 %v4960_v28  ;;  %v4958_v32 = vsub.f32 %v4946_v30, %v4953_v46 }
0x15e1   :  { %v4962_v25 = vmul.f32 1.442695, %v4958_v32 }
0x15e2   :  { %v4956_v6 = vpop.xlane.xlu0 %4955 }
0x15e3   :  { %9173 = vpow2.f32 %v4962_v25  ;;  %v4959_v40 = vsub.f32 %v4947_v42, %v4956_v6 }
0x15e5   :  { %v4964_v9 = vmul.f32 1.442695, %v4959_v40 }
0x15e6   :  { %v9056_v13 = vpop.permute.xlu0 %9055 }
0x15e7   :  { %9175 = vpow2.f32 %v4964_v9  ;;  %v9058_v48 = vunpack.i.h.bf16 %v9056_v13  ;;  %v9057_v7 = vunpack.i.l.bf16 %v9056_v13 }
0x15e9   :  { %v9172_v31 = vpop.eup %9171  ;;  %v8712_v5 = vpack.c.bf16 %v9058_v48, %v9057_v7 }
0x15ea   :  { %v4966_v29 = vsel %vm1878_vm2, %v9172_v31, 0.0  ;;  %v9061_v62 = vpop.permute.xlu0 %9060 }
0x15eb   :  { %4967 = vadd.xlane.f32.xlu0 %v4966_v29  ;;  %8713 = vmatpush3.bf16.msra.mxu1 %v8712_v5 }
0x15ec   :  { %8238 = vmatprep.subr.mxu1 %v12406_v36 }
0x15ed   :  { %v9174_v11 = vpop.eup %9173 }
0x15ee   :  { %v4969_v30 = vsel %vm1878_vm2, %v9174_v11, 0.0 }
0x15ef   :  { %4970 = vadd.xlane.f32.xlu0 %v4969_v30  ;;  %8239 = vmatpush3.msk.msra.mxu1 %vm1930_vm15, %v4986_v56  ;;  %v11698_v56 = vadd.f32 %v4376_v51, %v12465_v14 }
0x15f0   :  { %8714 = vmatprep.subr.bf16.mxu1 %v12407_v33 }
0x15f1   :  { %v9176_v42 = vpop.eup %9175 }
0x15f2   :  { %v4972_v52 = vsel %vm1885_vm3, %v9176_v42, 0.0 }
0x15f3   :  { %4973 = vadd.xlane.f32.xlu0 %v4972_v52 }
0x1609   :  { %5519 = vrot.lane.b32.xlu0 %v11357_v10, %s9607_s21  ;;  %v9066_v10 = vpop.permute.xlu0 %9065 }
0x160a   :  { %v9068_v28 = vunpack.i.h.bf16 %v9066_v10  ;;  %v9067_v46 = vunpack.i.l.bf16 %v9066_v10  ;;  %v9082_v10 = vunpack.i.l.bf16 %v11645_v8 }
0x160c   :  { %v8715_v6 = vpack.c.bf16 %v9068_v28, %v9067_v46 }
0x160d   :  { %5521 = vrot.lane.b32.xlu0 %v11394_v20, %s9607_s21  ;;  %v5528_v20 = vpop.permute.xlu0 %5527 }
0x1611   :  { %5273 = vrot.lane.b32.xlu0 %v11698_v56, %s9602_s20 }
0x1615   :  { %5621 = vrot.lane.b32.xlu0 %v11414_v43, %s9607_s21  ;;  %v9071_v43 = vpop.permute.xlu0 %9070 }
0x1616   :  { %v9073_v5 = vunpack.i.h.bf16 %v9071_v43  ;;  %v9072_v29 = vunpack.i.l.bf16 %v9071_v43  ;;  %v9087_v43 = vunpack.i.l.bf16 %v11647_v34 }
0x1619   :  { %5623 = vrot.lane.b32.xlu0 %v11425_v41, %s9607_s21  ;;  %v5518_v18 = vpop.permute.xlu0 %5517 }
0x161d   :  { %5735 = vrot.lane.b32.xlu0 %v11439_v39, %s9605_s27  ;;  %v5088_v41 = vpop.permute.xlu0 %5087 }
0x1621   :  { %5929 = vrot.lane.b32.xlu0 %v11210_v47, %s9606_s23  ;;  %v9076_v35 = vpop.permute.xlu0 %9075 }
0x1622   :  { %v9077_v30 = vunpack.i.l.bf16 %v9076_v35 }
0x1625   :  { %5919 = vrot.lane.b32.xlu0 %v11560_v60, %s9602_s20 }
0x1629   :  { %5921 = vrot.lane.b32.xlu0 %v11571_v17, %s9602_s20  ;;  %v9063_v17 = vunpack.i.h.bf16 %v9061_v62  ;;  %s7375_s20 = sld [smem:[#allocation4 + $0x81]] }
0x162d   :  { %5850 = vrot.lane.b32.xlu0 %v11473_v22, %s9605_s27  ;;  %v9062_v22 = vunpack.i.l.bf16 %v9061_v62  ;;  %v9083_v62 = vunpack.i.h.bf16 %v11645_v8 }
0x162f   :  { %v8724_v25 = vpack.c.bf16 %v9063_v17, %v9062_v22  ;;  %v8732_v8 = vpack.c.bf16 %v9083_v62, %v9082_v10  ;;  %v12486_v62 = vld [vmem:[#allocation71_spill] sm:$0xff]  ;;  %s5516_s16 = smul.f32 0.16666667, %s7375_s20 }
0x1631   :  { %5854 = vrot.lane.b32.xlu0 %v11493_v61, %s9605_s27  ;;  %s5868_s18 = smul.f32 -0.5, %s5516_s16 }
0x1635   :  { %5834 = vrot.lane.b32.xlu0 %v11507_v2, %s9607_s21 }
0x1678   :  { %v4968_v39 = vpop.xlane.xlu0 %4967 }
0x1679   :  { %9177 = vrcp.f32 %v4968_v39 }
0x167c   :  { %v4971_v60 = vpop.xlane.xlu0 %4970 }
0x167d   :  { %9179 = vrcp.f32 %v4971_v60 }
0x1680   :  { %v4974_v58 = vpop.xlane.xlu0 %4973 }
0x1681   :  { %9181 = vrcp.f32 %v4974_v58 }
0x1683   :  { %v9178_v61 = vpop.eup %9177 }
0x1684   :  { %v11720_v32 = vmul.f32 %v9178_v61, %v9172_v31  ;;  %v5520_v2 = vpop.permute.xlu0 %5519 }
0x1686   :  { %8241 = vmatmul.mubr.msk.f32.vlgmr.msra.gmra.mrb[74].mxu1 %vm1878_vm2, %v11720_v32  ;;  %8271 = vmatmul.mubr.msk.f32.vlgmr.msra.gmra.mrb[48].mxu0 %vm1878_vm2, %v11720_v32 }
0x1687   :  { %v9180_v40 = vpop.eup %9179  ;;  %8716 = vmatpush3.bf16.msra.mxu1 %v8715_v6  ;;  %8726 = vmatpush3.bf16.xpose.msk.msra.mxu0 %vm10434_vm12, %v8724_v25 }
0x1688   :  { %v5522_v9 = vpop.permute.xlu0 %5521  ;;  %8243 = vmatprep.mubr.msk.f32.mxu1 %vm9589_vm0, %v12406_v36  ;;  %8253 = vmatprep.subr.mxu1 %v12406_v36  ;;  %v11731_v13 = vmul.f32 %v9180_v40, %v9174_v11  ;;  %v9078_v11 = vunpack.i.h.bf16 %v9076_v35 }
0x1689   :  { %8273 = vmatprep.mubr.msk.f32.mxu0 %vm9589_vm0, %v12406_v36  ;;  %8298 = vmatprep.subr.mxu0 %v12406_v36 }
0x168a   :  { %8244 = vmatmul.mubr.msk.f32.gmra.mrb[76].mxu1 %vm1878_vm2, %v11731_v13  ;;  %8274 = vmatmul.mubr.msk.f32.gmra.mrb[50].mxu0 %vm1878_vm2, %v11731_v13  ;;  %v8721_v23 = vpack.c.bf16 %v9078_v11, %v9077_v30 }
0x168b   :  { %v9182_v48 = vpop.eup %9181  ;;  %8254 = vmatpush3.msk.msra.mxu1 %vm1930_vm15, %v5088_v41  ;;  %8246 = vmatprep.mubr.msk.f32.mxu1 %vm9589_vm0, %v12406_v36 }
0x168c   :  { %v5274_v7 = vpop.permute.xlu0 %5273  ;;  %8276 = vmatprep.mubr.msk.f32.mxu0 %vm9589_vm0, %v12406_v36  ;;  %v4980_v31 = vmul.f32 %v9182_v48, %v9176_v42  ;;  %8720 = vmatprep.subr.bf16.mxu1 %v12407_v33  ;;  %v8728_v42 = vpack.c.bf16 %v9073_v5, %v9072_v29 }
0x168e   :  { %8247 = vmatmul.mubr.msk.f32.gmra.mrb[78].mxu1 %vm1878_vm2, %v4980_v31  ;;  %8277 = vmatmul.mubr.msk.f32.gmra.mrb[52].mxu0 %vm1878_vm2, %v4980_v31 }
0x168f   :  { %8299 = vmatpush3.xpose.msk.msra.mxu0 %vm1331_vm11, %v5528_v20  ;;  %8255 = vmatprep.mubr.msk.f32.mxu1 %vm9589_vm0, %v12406_v36  ;;  %v9088_v20 = vunpack.i.h.bf16 %v11647_v34 }
0x1690   :  { %v5622_v52 = vpop.permute.xlu0 %5621  ;;  %8300 = vmatprep.mubr.msk.f32.mxu0 %vm9589_vm0, %v12406_v36  ;;  %8727 = vmatprep.subr.bf16.mxu0 %v12407_v33 }
0x1691   :  { %v8736_v41 = vpack.c.bf16 %v9088_v20, %v9087_v43  ;;  %v12487_v20 = vld [vmem:[#allocation53_spill] sm:$0xff] }
0x1692   :  { %8256 = vmatmul.mubr.msk.f32.vlgmr.msra.gmra.mrb[80].mxu1 %vm1878_vm2, %v11720_v32  ;;  %8301 = vmatmul.mubr.msk.f32.vlgmr.msra.gmra.mrb[54].mxu0 %vm1331_vm11, %v5518_v18 }
0x1693   :  { %8722 = vmatpush3.bf16.msra.mxu1 %v8721_v23  ;;  %8730 = vmatpush3.bf16.xpose.msk.msra.mxu0 %vm10434_vm12, %v8728_v42  ;;  %v12484_v23 = vld [vmem:[#allocation69_spill] sm:$0xff] }
0x1694   :  { %v5624_v37 = vpop.permute.xlu0 %5623  ;;  %8258 = vmatprep.mubr.msk.f32.mxu1 %vm9589_vm0, %v12406_v36  ;;  %8283 = vmatprep.subr.mxu1 %v12406_v36 }
0x1695   :  { %8303 = vmatprep.mubr.msk.f32.mxu0 %vm9589_vm0, %v12406_v36  ;;  %8313 = vmatprep.subr.mxu0 %v12406_v36 }
0x1696   :  { %8259 = vmatmul.mubr.msk.f32.gmra.mrb[82].mxu1 %vm1878_vm2, %v11731_v13  ;;  %8304 = vmatmul.mubr.msk.f32.gmra.mrb[56].mxu0 %vm1331_vm11, %v5520_v2 }
0x1697   :  { %8284 = vmatpush3.msk.msra.mxu1 %vm1930_vm15, %v5274_v7  ;;  %8261 = vmatprep.mubr.msk.f32.mxu1 %vm9589_vm0, %v12406_v36 }
0x1698   :  { %v5736_v51 = vpop.permute.xlu0 %5735  ;;  %8306 = vmatprep.mubr.msk.f32.mxu0 %vm9589_vm0, %v12406_v36  ;;  %8735 = vmatprep.subr.bf16.mxu1 %v12407_v33 }
0x169a   :  { %8262 = vmatmul.mubr.msk.f32.gmra.mrb[84].mxu1 %vm1878_vm2, %v4980_v31  ;;  %8307 = vmatmul.mubr.msk.f32.gmra.mrb[58].mxu0 %vm1331_vm11, %v5522_v9 }
0x169b   :  { %8314 = vmatpush3.xpose.msk.msra.mxu0 %vm1331_vm11, %v11643_v0  ;;  %8285 = vmatprep.mubr.msk.f32.mxu1 %vm9589_vm0, %v12406_v36 }
0x169c   :  { %v5930_v18 = vpop.permute.xlu0 %5929  ;;  %8315 = vmatprep.mubr.msk.f32.mxu0 %vm9589_vm0, %v12406_v36  ;;  %8731 = vmatprep.subr.bf16.mxu0 %v12407_v33 }
0x169e   :  { %8286 = vmatmul.mubr.msk.f32.vlgmr.msra.gmra.mrb[86].mxu1 %vm1878_vm2, %v11720_v32  ;;  %8316 = vmatmul.mubr.msk.f32.vlgmr.msra.gmra.mrb[54].mxu0 %vm1331_vm11, %v5622_v52  ;;  %v12483_v52 = vld [vmem:[#allocation56_spill] sm:$0xff] }
0x169f   :  { %8734 = vmatpush3.bf16.xpose.msk.msra.mxu0 %vm10434_vm12, %v8732_v8  ;;  %8738 = vmatpush3.bf16.xpose.msk.msra.mxu1 %vm10457_vm13, %v8736_v41 }
0x16a0   :  { %v5920_v0 = vpop.permute.xlu0 %5919  ;;  %8288 = vmatprep.mubr.msk.f32.mxu1 %vm9589_vm0, %v12406_v36  ;;  %8318 = vmatprep.mubr.msk.f32.mxu0 %vm9589_vm0, %v12406_v36 }
0x16a1   :  { %8328 = vmatprep.subr.mxu0 %v12406_v36  ;;  %8343 = vmatprep.subr.mxu1 %v12406_v36 }
0x16a2   :  { %8289 = vmatmul.mubr.msk.f32.gmra.mrb[88].mxu1 %vm1878_vm2, %v11731_v13  ;;  %8319 = vmatmul.mubr.msk.f32.gmra.mrb[56].mxu0 %vm1331_vm11, %v5624_v37  ;;  %v12485_v37 = vld [vmem:[#allocation50_spill] sm:$0xff] }
0x16a3   :  { %8291 = vmatprep.mubr.msk.f32.mxu1 %vm9589_vm0, %v12406_v36  ;;  %8321 = vmatprep.mubr.msk.f32.mxu0 %vm9589_vm0, %v12406_v36 }
0x16a4   :  { %v5922_v12 = vpop.permute.xlu0 %5921 }
0x16a6   :  { %8292 = vmatmul.mubr.msk.f32.gmra.mrb[90].mxu1 %vm1878_vm2, %v4980_v31  ;;  %8322 = vmatmul.mubr.msk.f32.gmra.mrb[58].mxu0 %vm1331_vm11, %v11649_v45  ;;  %v5833_v45 = vpop.permute.xlu1 %5832 }
0x16a7   :  { %8329 = vmatpush3.xpose.msk.msra.mxu0 %vm1331_vm11, %v5736_v51  ;;  %8344 = vmatpush3.xpose.msk.msra.mxu1 %vm318_vm1, %v5930_v18  ;;  %v5841_v60 = vsel %vm1331_vm11, %v5833_v45, 0.0  ;;  %v12488_v18 = vld [vmem:[#allocation57_spill] sm:$0xff] }
0x16a8   :  { %v5851_v4 = vpop.permute.xlu0 %5850  ;;  %8330 = vmatprep.mubr.msk.f32.mxu0 %vm9589_vm0, %v12406_v36  ;;  %8345 = vmatprep.mubr.msk.f32.mxu1 %vm9589_vm0, %v12406_v36 }
0x16a9   :  { %v5859_v34 = vsel %vm1331_vm11, %v5851_v4, 0.0  ;;  %8745 = vmatprep.subr.bf16.mxu0 %v12407_v33  ;;  %8739 = vmatprep.subr.bf16.mxu1 %v12407_v33 }
0x16aa   :  { %5860 = vadd.xlane.f32.xlu0 %v5859_v34  ;;  %8331 = vmatmul.mubr.msk.f32.vlgmr.msra.gmra.mrb[54].mxu0 %vm1331_vm11, %v11651_v21  ;;  %v5837_v58 = vpop.permute.xlu1 %5836  ;;  %v12489_v34 = vld [vmem:[#allocation73_spill] sm:$0xff] }
0x16ab   :  { %8346 = vmatmul.mubr.msk.f32.vlgmr.msra.gmra.mrb[92].mxu1 %vm318_vm1, %v5920_v0  ;;  %8333 = vmatprep.mubr.msk.f32.mxu0 %vm9589_vm0, %v12406_v36 }
0x16ac   :  { %v5855_v35 = vpop.permute.xlu0 %5854  ;;  %8348 = vmatprep.mubr.msk.f32.mxu1 %vm9589_vm0, %v12406_v36 }
0x16ad   :  { %v5865_v39 = vsel %vm1680_vm14, %v5855_v35, 0.0 }
0x16ae   :  { %5866 = vadd.xlane.f32.xlu0 %v5865_v39  ;;  %8334 = vmatmul.mubr.msk.f32.gmra.mrb[56].mxu0 %vm1331_vm11, %v11655_v59  ;;  %v5847_v59 = vsel %vm1680_vm14, %v5837_v58, 0.0  ;;  %v5864_v28 = vpop.xlane.xlu1 %5863  ;;  %v12490_v39 = vld [vmem:[#allocation67_spill] sm:$0xff]  ;;  %v12492_v58 = vld [vmem:[#allocation72_spill] sm:$0xff] }
0x16af   :  { %8349 = vmatmul.mubr.msk.f32.gmra.mrb[94].mxu1 %vm318_vm1, %v5922_v12  ;;  %8336 = vmatprep.mubr.msk.f32.mxu0 %vm9589_vm0, %v12406_v36 }
0x16b0   :  { %v5835_v21 = vpop.permute.xlu0 %5834  ;;  %8351 = vmatprep.mubr.msk.f32.mxu1 %vm9589_vm0, %v12406_v36 }
0x16b1   :  { %v5844_v17 = vsel %vm1331_vm11, %v5835_v21, 0.0 }
0x16b2   :  { %5842 = vadd.xlane.f32.xlu0 %v5841_v60  ;;  %5845 = vadd.xlane.f32.xlu1 %v5844_v17  ;;  %v12491_v60 = vld [vmem:[#allocation49_spill] sm:$0xff] }
0x16b3   :  { %8337 = vmatmul.mubr.msk.f32.gmra.mrb[58].mxu0 %vm1331_vm11, %v11659_v38  ;;  %8352 = vmatmul.mubr.msk.f32.gmra.mrb[96].mxu1 %vm318_vm1, %v11663_v49  ;;  %vm12482_vm11 = vcmask 125952  }
0x16b4   :  { %8360 = vmatprep.mubr.msk.f32.mxu1 %vm9589_vm0, %v12406_v36  ;;  %8390 = vmatprep.mubr.msk.f32.mxu0 %vm9589_vm0, %v12406_v36 }
0x16b6   :  { %5848 = vadd.xlane.f32.xlu0 %v5847_v59 }
0x1737   :  { %v5861_v22 = vpop.xlane.xlu0 %5860 }
0x1738   :  { %5869 = vxpose.xlu1.b32.start [1/3] (short) (narrow) %v5861_v22, 8  ;;  %v12493_v22 = vld [vmem:[#allocation51_spill] sm:$0xff] }
0x173b   :  { %v5867_v46 = vpop.xlane.xlu0 %5866 }
0x173c   :  { %5870 = vxpose.xlu1.b32.cont [2/3] (short) (narrow) %v5864_v28, 8 }
0x1740   :  { %5871 = vxpose.xlu1.b32.end [3/3] (short) (narrow) %v5867_v46, 8  ;;  %v12494_v46 = vld [vmem:[#allocation70_spill] sm:$0xff] }
0x1759   :  { %v5066_v61 = vpop.f32.mrb[74].mxu1  ;;  %v5252_v38 = vpop.f32.mrb[48].mxu0 }
0x175a   :  { %5452 = vst.msk [vmem:[#allocation3] sm:$0xff] %vm318_vm1, %v5066_v61  ;;  %v8242_v49 = vpop.f32.mrb[75].mxu1  ;;  %v8272_v32 = vpop.f32.mrb[49].mxu0  ;;  %v5362_v31 = vsub.f32 %v5252_v38, %v10160_v50  ;;  %v12495_v38 = vld [vmem:[#allocation54_spill] sm:$0xff] }
0x175b   :  { %v12496_v32 = vld [vmem:[#allocation58_spill] sm:$0xff] }
0x175c   :  { %v5371_v30 = vmul.f32 %v5362_v31, %v10170_v3  ;;  %v5386_v42 = vmul.f32 %v5362_v31, %v12483_v52  ;;  %v5401_v51 = vmul.f32 %v5362_v31, %v12485_v37  ;;  %v12497_v31 = vld [vmem:[#allocation68_spill] sm:$0xff] }
0x175d   :  { %v5071_v2 = vpop.f32.mrb[76].mxu1  ;;  %v5257_v25 = vpop.f32.mrb[50].mxu0 }
0x175e   :  { %5453 = vst.msk [vmem:[#allocation3 + $0x8] sm:$0xff] %vm318_vm1, %v5071_v2  ;;  %9100 = vrot.lane.b32.xlu1 %v11342_v1, %s9608_s2  ;;  %v8245_v6 = vpop.f32.mrb[77].mxu1  ;;  %v8275_v40 = vpop.f32.mrb[51].mxu0  ;;  %v5363_v1 = vsub.f32 %v5257_v25, %v12484_v23 }
0x1760   :  { %v5372_v21 = vmul.f32 %v5363_v1, %v12490_v39  ;;  %v5387_v17 = vmul.f32 %v5363_v1, %v12491_v60  ;;  %v5402_v28 = vmul.f32 %v5363_v1, %v12493_v22  ;;  %v12500_v1 = vld [vmem:[#allocation59_spill] sm:$0xff] }
0x1761   :  { %v5076_v9 = vpop.f32.mrb[78].mxu1  ;;  %v5262_v13 = vpop.f32.mrb[52].mxu0 }
0x1762   :  { %5454 = vst.msk [vmem:[#allocation3 + $0x10] sm:$0xf] %vm12482_vm11, %v5076_v9  ;;  %v8248_v48 = vpop.f32.mrb[79].mxu1  ;;  %v8278_v7 = vpop.f32.mrb[53].mxu0  ;;  %v5364_v59 = vsub.f32 %v5262_v13, %v12492_v58  ;;  %v12499_v13 = vld [vmem:[#allocation55_spill] sm:$0xff] }
0x1765   :  { %v5159_v5 = vpop.f32.mrb[80].mxu1 }
0x1766   :  { %v5359_v29 = vsub.f32 %v5159_v5, %v10182_v16  ;;  %v8257_v11 = vpop.f32.mrb[81].mxu1  ;;  %v5373_v5 = vmul.f32 %v5364_v59, %v12497_v31 }
0x1768   :  { %v5368_v10 = vmul.f32 %v5359_v29, %v12486_v62  ;;  %v5383_v43 = vmul.f32 %v5359_v29, %v12487_v20  ;;  %v5398_v8 = vmul.f32 %v5359_v29, %v12488_v18  ;;  %v12498_v29 = vld [vmem:[#allocation52_spill] sm:$0xff] }
0x1769   :  { %v5164_v41 = vpop.f32.mrb[82].mxu1  ;;  %v5388_v11 = vmul.f32 %v5364_v59, %v12498_v29 }
0x176a   :  { %v5374_v0 = vadd.f32 %v5371_v30, %v5368_v10  ;;  %v5389_v12 = vadd.f32 %v5386_v42, %v5383_v43  ;;  %v5404_v4 = vadd.f32 %v5401_v51, %v5398_v8  ;;  %v5360_v45 = vsub.f32 %v5164_v41, %v12489_v34  ;;  %v8260_v35 = vpop.f32.mrb[83].mxu1  ;;  %v12501_v10 = vld [vmem:[#allocation61_spill] sm:$0xff] }
0x176b   :  { %v5403_v30 = vmul.f32 %v5364_v59, %v12499_v13 }
0x176c   :  { %v5369_v61 = vmul.f32 %v5360_v45, %v12494_v46  ;;  %v5384_v49 = vmul.f32 %v5360_v45, %v12495_v38  ;;  %v5399_v2 = vmul.f32 %v5360_v45, %v12496_v32 }
0x176d   :  { %v5169_v25 = vpop.f32.mrb[84].mxu1 }
0x176e   :  { %v5375_v6 = vadd.f32 %v5372_v21, %v5369_v61  ;;  %v5390_v40 = vadd.f32 %v5387_v17, %v5384_v49  ;;  %v5405_v9 = vadd.f32 %v5402_v28, %v5399_v2  ;;  %v5361_v48 = vsub.f32 %v5169_v25, %v12477_v57  ;;  %v8263_v7 = vpop.f32.mrb[85].mxu1  ;;  %v12502_v21 = vld [vmem:[#allocation78_spill] sm:$0xff]  ;;  %v12503_v61 = vld [vmem:[#allocation75_spill] sm:$0xff]  ;;  %v12504_v2 = vld [vmem:[#allocation60_spill] sm:$0xff] }
0x176f   :  { %v12505_v7 = vld [vmem:[#allocation64_spill] sm:$0xff] }
0x1770   :  { %v5370_v42 = vmul.f32 %v5361_v48, %v12474_v53  ;;  %v5385_v51 = vmul.f32 %v5361_v48, %v12500_v1  ;;  %v5400_v43 = vmul.f32 %v5361_v48, %v12501_v10  ;;  %v12506_v48 = vld [vmem:[#allocation79_spill] sm:$0xff] }
0x1771   :  { %v5345_v8 = vpop.f32.mrb[86].mxu1 }
0x1772   :  { %v5376_v41 = vadd.f32 %v5373_v5, %v5370_v42  ;;  %v5391_v45 = vadd.f32 %v5388_v11, %v5385_v51  ;;  %v5406_v35 = vadd.f32 %v5403_v30, %v5400_v43  ;;  %v5365_v17 = vsub.f32 %v5345_v8, %v12502_v21  ;;  %v8287_v28 = vpop.f32.mrb[87].mxu1  ;;  %v12507_v51 = vld [vmem:[#allocation77_spill] sm:$0xff]  ;;  %v12508_v8 = vld [vmem:[#allocation62_spill] sm:$0xff] }
0x1773   :  { %v12509_v28 = vld [vmem:[#allocation63_spill] sm:$0xff] }
0x1774   :  { %v5377_v49 = vmul.f32 %v5365_v17, %v12503_v61  ;;  %v5392_v25 = vmul.f32 %v5365_v17, %v12504_v2  ;;  %v5407_v29 = vmul.f32 %v5365_v17, %v12505_v7 }
0x1775   :  { %v5350_v59 = vpop.f32.mrb[88].mxu1 }
0x1776   :  { %v11878_v13 = vadd.f32 %v5377_v49, %v5374_v0  ;;  %v11880_v53 = vadd.f32 %v5392_v25, %v5389_v12  ;;  %v11882_v1 = vadd.f32 %v5407_v29, %v5404_v4  ;;  %v5366_v5 = vsub.f32 %v5350_v59, %v12506_v48  ;;  %v8290_v11 = vpop.f32.mrb[89].mxu1 }
0x1778   :  { %v5413_v30 = vmul.f32 %v11878_v13, %v11878_v13  ;;  %v5416_v42 = vmul.f32 %v11880_v53, %v11880_v53  ;;  %v5378_v43 = vmul.f32 %v5366_v5, %v12507_v51  ;;  %v5393_v17 = vmul.f32 %v5366_v5, %v12508_v8 }
0x1779   :  { %v5408_v0 = vmul.f32 %v5366_v5, %v12509_v28  ;;  %v5355_v49 = vpop.f32.mrb[90].mxu1  ;;  %v5422_v4 = vmul.f32 %v11882_v1, %v11882_v1 }
0x177a   :  { %v5419_v12 = vadd.f32 %v5416_v42, %v5413_v30  ;;  %v11894_v29 = vadd.f32 %v5378_v43, %v5375_v6  ;;  %v5367_v25 = vsub.f32 %v5355_v49, %v12465_v14  ;;  %v8293_v59 = vpop.f32.mrb[91].mxu1  ;;  %v11897_v11 = vadd.f32 %v5393_v17, %v5390_v40  ;;  %v12510_v30 = vld [vmem:[#allocation65_spill] sm:$0xff]  ;;  %v12511_v43 = vld [vmem:[#allocation66_spill] sm:$0xff] }
0x177b   :  { %v11899_v48 = vadd.f32 %v5408_v0, %v5405_v9 }
0x177c   :  { %v11901_v7 = vadd.f32 %v5422_v4, %v5419_v12  ;;  %v5414_v8 = vmul.f32 %v11894_v29, %v11894_v29  ;;  %v5379_v5 = vmul.f32 %v5367_v25, %v12466_v54  ;;  %v5394_v42 = vmul.f32 %v5367_v25, %v12510_v30 }
0x177d   :  { %v5417_v6 = vmul.f32 %v11897_v11, %v11897_v11  ;;  %v5409_v28 = vmul.f32 %v5367_v25, %v12511_v43  ;;  %v5815_v49 = vpop.f32.mrb[54].mxu0  ;;  %v5423_v12 = vmul.f32 %v11899_v48, %v11899_v48 }
0x177e   :  { %v11910_v59 = vadd.f32 %v5379_v5, %v5376_v41  ;;  %v5397_v40 = vadd.f32 %v5394_v42, %v5391_v45  ;;  %v6009_v9 = vpop.f32.mrb[92].mxu1  ;;  %v8332_v17 = vpop.f32.mrb[55].mxu0 }
0x177f   :  { %v5420_v0 = vadd.f32 %v5417_v6, %v5414_v8  ;;  %v5412_v4 = vadd.f32 %v5409_v28, %v5406_v35  ;;  %v8347_v14 = vpop.f32.mrb[93].mxu1 }
0x1780   :  { %v5415_v30 = vmul.f32 %v11910_v59, %v11910_v59  ;;  %v5418_v54 = vmul.f32 %v5397_v40, %v5397_v40  ;;  %5477 = vrot.lane.b32.xlu1 %v5397_v40, %s9609_s4 }
0x1781   :  { %v11917_v51 = vadd.f32 %v5423_v12, %v5420_v0  ;;  %v5820_v25 = vpop.f32.mrb[56].mxu0  ;;  %v5424_v5 = vmul.f32 %v5412_v4, %v5412_v4  ;;  %v5843_v12 = vpop.xlane.xlu0 %5842 }
0x1782   :  { %v5421_v41 = vadd.f32 %v5418_v54, %v5415_v30  ;;  %v6014_v45 = vpop.f32.mrb[94].mxu1  ;;  %v8335_v42 = vpop.f32.mrb[57].mxu0 }
0x1783   :  { %v8350_v17 = vpop.f32.mrb[95].mxu1  ;;  %v5846_v30 = vpop.xlane.xlu1 %5845  ;;  %v5908_v42 = vstv %s5868_s18 }
0x1784   :  { %v5427_v8 = vadd.f32 %v5424_v5, %v5421_v41  ;;  %5492 = vrot.lane.b32.xlu1 %v5412_v4, %s9611_s12  ;;  %v5912_v41 = vstv %s5516_s16 }
0x1786   :  { %v5430_v6 = vadd.f32 1e-08, %v5427_v8  ;;  %v5825_v35 = vpop.f32.mrb[58].mxu0  ;;  %v6019_v14 = vpop.f32.mrb[96].mxu1 }
0x1787   :  { %v8338_v28 = vpop.f32.mrb[59].mxu0  ;;  %v8353_v43 = vpop.f32.mrb[97].mxu1 }
0x1788   :  { %9183 = vrsqrt.f32 %v5430_v6  ;;  %vm5447_vm1 = vcmp.eq.f32.partialorder %v5430_v6, inf  ;;  %v5450_v40 = vand.u32 2147483648, %v5430_v6  ;;  %vm5449_vm12 = vcmp.eq.f32.partialorder %v5430_v6, 0.0  ;;  %v5849_v43 = vpop.xlane.xlu0 %5848 }
0x1789   :  { %v5913_v28 = vmul.f32 %v5912_v41, %v5815_v49 }
0x1792   :  { %v9184_v2 = vpop.eup %9183 }
0x1793   :  { %v5446_v61 = vmul.f32 %v9184_v2, %v5430_v6 }
0x1795   :  { %v5448_v0 = vsel %vm5447_vm1, %v5430_v6, %v5446_v61  ;;  %v5914_v61 = vmul.f32 %v5912_v41, %v5820_v25  ;;  %v5915_v6 = vmul.f32 %v5912_v41, %v5825_v35  ;;  %vm12513_vm1 = vcmask 294144  }
0x1796   :  { %v5451_v54 = vsel %vm5449_vm12, %v5450_v40, %v5448_v0  ;;  %vm12514_vm12 = vcmask 326944  }
0x1797   :  { %5507 = vrot.lane.b32.xlu1 %v5451_v54, %s9612_s24 }
0x17b8   :  { %v5885_v4 = vpop.trf.xlu1 }
0x17b9   :  { %v5904_v5 = vrot.slane %v5885_v4, %v12481_v44 }
0x17bb   :  { %v5905_v17 = vadd.f32 %v5904_v5, %v5843_v12  ;;  %v5906_v2 = vadd.f32 %v5904_v5, %v5846_v30  ;;  %v5907_v8 = vadd.f32 %v5904_v5, %v5849_v43 }
0x17bd   :  { %v5909_v40 = vmul.f32 %v5908_v42, %v5905_v17  ;;  %v5910_v0 = vmul.f32 %v5908_v42, %v5906_v2  ;;  %v5911_v54 = vmul.f32 %v5908_v42, %v5907_v8  ;;  %v5428_v8 = vadd.f32 1e-08, %v11901_v7 }
0x17bf   :  { %v5916_v21 = vadd.f32 %v5913_v28, %v5909_v40  ;;  %v5917_v10 = vadd.f32 %v5914_v61, %v5910_v0  ;;  %v5918_v31 = vadd.f32 %v5915_v6, %v5911_v54  ;;  %v12512_v28 = vld [vmem:[#allocation82_spill] sm:$0xff]  ;;  %v5429_v6 = vadd.f32 1e-08, %v11917_v51 }
0x17c0   :  { %vm5433_vm13 = vcmp.eq.f32.partialorder %v5428_v8, inf  ;;  %v5436_v7 = vand.u32 2147483648, %v5428_v8  ;;  %vm5435_vm14 = vcmp.eq.f32.partialorder %v5428_v8, 0.0 }
0x17c1   :  { %v6010_v57 = vadd.f32 %v6009_v9, %v5916_v21  ;;  %v6015_v32 = vadd.f32 %v6014_v45, %v5917_v10  ;;  %v6020_v38 = vadd.f32 %v6019_v14, %v5918_v31  ;;  %vm5442_vm11 = vcmp.eq.f32.partialorder %v5429_v6, 0.0 }
0x17c3   :  { %v6023_v46 = vadd.f32 %v11629_v15, %v6010_v57  ;;  %v6024_v12 = vadd.f32 %v11634_v63, %v6015_v32  ;;  %v6025_v25 = vadd.f32 %v11639_v55, %v6020_v38 }
0x17c5   :  { %v6026_v44 = vsel %vm1878_vm2, %v6023_v46, -inf  ;;  %v6029_v49 = vsel %vm1878_vm2, %v6024_v12, -inf  ;;  %v6032_v35 = vsel %vm1885_vm3, %v6025_v25, -inf }
0x17c6   :  { %6027 = vmax.xlane.f32.xlu0 %v6026_v44 }
0x17ca   :  { %6030 = vmax.xlane.f32.xlu0 %v6029_v49 }
0x17ce   :  { %6033 = vmax.xlane.f32.xlu0 %v6032_v35 }
0x17d0   :  { %v9101_v30 = vpop.permute.xlu1 %9100 }
0x17d1   :  { %v9103_v4 = vunpack.i.h.bf16 %v9101_v30  ;;  %v9102_v21 = vunpack.i.l.bf16 %v9101_v30 }
0x17d3   :  { %v8746_v10 = vpack.c.bf16 %v9103_v4, %v9102_v21 }
0x17d5   :  { %8747 = vmatpush3.bf16.msra.mxu0 %v8746_v10 }
0x17d6   :  { %8388 = vmatprep.subr.mxu0 %v12406_v36 }
0x17e4   :  { %9090 = vrot.lane.b32.xlu0 %v11196_v27, %s9610_s14 }
0x17e8   :  { %6063 = vrot.lane.b32.xlu0 %v11210_v47, %s9610_s14 }
0x17ec   :  { %9095 = vrot.lane.b32.xlu0 %v11346_v24, %s9608_s2 }
0x1853   :  { %v6028_v57 = vpop.xlane.xlu0 %6027 }
0x1854   :  { %v6035_v15 = vsub.f32 %v6023_v46, %v6028_v57 }
0x1856   :  { %v6038_v63 = vmul.f32 1.442695, %v6035_v15 }
0x1857   :  { %v6031_v55 = vpop.xlane.xlu0 %6030 }
0x1858   :  { %9185 = vpow2.f32 %v6038_v63  ;;  %v6036_v38 = vsub.f32 %v6024_v12, %v6031_v55 }
0x185a   :  { %v6040_v32 = vmul.f32 1.442695, %v6036_v38 }
0x185b   :  { %v6034_v31 = vpop.xlane.xlu0 %6033 }
0x185c   :  { %9187 = vpow2.f32 %v6040_v32  ;;  %v6037_v9 = vsub.f32 %v6025_v25, %v6034_v31 }
0x185e   :  { %v6042_v45 = vmul.f32 1.442695, %v6037_v9 }
0x185f   :  { %v9091_v14 = vpop.permute.xlu0 %9090 }
0x1860   :  { %9189 = vpow2.f32 %v6042_v45  ;;  %v9093_v27 = vunpack.i.h.bf16 %v9091_v14  ;;  %v9092_v41 = vunpack.i.l.bf16 %v9091_v14 }
0x1861   :  { %9191 = vrsqrt.f32 %v5428_v8 }
0x1862   :  { %v9186_v5 = vpop.eup %9185  ;;  %v8740_v47 = vpack.c.bf16 %v9093_v27, %v9092_v41  ;;  %9193 = vrsqrt.f32 %v5429_v6 }
0x1863   :  { %v6044_v43 = vsel %vm1878_vm2, %v9186_v5, 0.0  ;;  %v6064_v46 = vpop.permute.xlu0 %6063 }
0x1864   :  { %6045 = vadd.xlane.f32.xlu0 %v6044_v43  ;;  %8741 = vmatpush3.bf16.msra.mxu1 %v8740_v47 }
0x1865   :  { %8358 = vmatprep.subr.mxu1 %v12406_v36 }
0x1866   :  { %v9188_v24 = vpop.eup %9187 }
0x1867   :  { %v6047_v42 = vsel %vm1878_vm2, %v9188_v24, 0.0  ;;  %v9096_v0 = vpop.permute.xlu0 %9095 }
0x1868   :  { %6048 = vadd.xlane.f32.xlu0 %v6047_v42  ;;  %8359 = vmatpush3.msk.msra.mxu1 %vm1930_vm15, %v6064_v46  ;;  %v9098_v44 = vunpack.i.h.bf16 %v9096_v0  ;;  %v9097_v12 = vunpack.i.l.bf16 %v9096_v0 }
0x1869   :  { %8742 = vmatprep.subr.bf16.mxu1 %v12407_v33 }
0x186a   :  { %v9190_v17 = vpop.eup %9189  ;;  %v8743_v35 = vpack.c.bf16 %v9098_v44, %v9097_v12 }
0x186b   :  { %v6050_v2 = vsel %vm1885_vm3, %v9190_v17, 0.0  ;;  %v9192_v61 = vpop.eup %9191  ;;  %vm5440_vm3 = vcmp.eq.f32.partialorder %v5429_v6, inf }
0x186c   :  { %6051 = vadd.xlane.f32.xlu0 %v6050_v2 }
0x1882   :  { %6162 = vrot.lane.b32.xlu0 %v11677_v26, %s9608_s2  ;;  %v5432_v26 = vmul.f32 %v9192_v61, %v5428_v8 }
0x1886   :  { %9105 = vrot.lane.b32.xlu0 %v11411_v19, %s9608_s2  ;;  %v5434_v19 = vsel %vm5433_vm13, %v5428_v8, %v5432_v26  ;;  %vm12515_vm13 = vcmask 359744  }
0x1887   :  { %v5437_v40 = vsel %vm5435_vm14, %v5436_v7, %v5434_v19  ;;  %vm12517_vm14 = vmmov %vm12513_vm1 }
0x188a   :  { %6252 = vrot.lane.b32.xlu0 %v12512_v28, %s9608_s2 }
0x188e   :  { %6342 = vrot.lane.b32.xlu0 %v11698_v56, %s9608_s2  ;;  %v9194_v56 = vpop.eup %9193 }
0x1892   :  { %5458 = vrot.lane.b32.xlu0 %v11878_v13, %s9592_s8 }
0x1896   :  { %5473 = vrot.lane.b32.xlu0 %v11880_v53, %s9609_s4  ;;  %v5439_v53 = vmul.f32 %v9194_v56, %v5429_v6 }
0x1898   :  { %v5441_v13 = vsel %vm5440_vm3, %v5429_v6, %v5439_v53  ;;  %vm12518_vm3 = vmmov %vm12514_vm12 }
0x189a   :  { %5488 = vrot.lane.b32.xlu0 %v11882_v1, %s9611_s12  ;;  %v5443_v1 = vand.u32 2147483648, %v5429_v6 }
0x189c   :  { %v5444_v51 = vsel %vm5442_vm11, %v5443_v1, %v5441_v13  ;;  %vm12519_vm11 = vmmov %vm12515_vm13 }
0x189e   :  { %5503 = vrot.lane.b32.xlu0 %v5437_v40, %s9612_s24 }
0x18a2   :  { %5460 = vrot.lane.b32.xlu0 %v11894_v29, %s9592_s8 }
0x18a6   :  { %5475 = vrot.lane.b32.xlu0 %v11897_v11, %s9609_s4 }
0x18aa   :  { %5490 = vrot.lane.b32.xlu0 %v11899_v48, %s9611_s12 }
0x18ae   :  { %5505 = vrot.lane.b32.xlu0 %v5444_v51, %s9612_s24 }
0x18b2   :  { %5462 = vrot.lane.b32.xlu0 %v11910_v59, %s9592_s8 }
0x18f1   :  { %v6046_v29 = vpop.xlane.xlu0 %6045 }
0x18f2   :  { %9195 = vrcp.f32 %v6046_v29 }
0x18f5   :  { %v6049_v54 = vpop.xlane.xlu0 %6048 }
0x18f6   :  { %9197 = vrcp.f32 %v6049_v54 }
0x18f9   :  { %v6052_v11 = vpop.xlane.xlu0 %6051 }
0x18fa   :  { %9199 = vrcp.f32 %v6052_v11 }
0x18fc   :  { %v9196_v49 = vpop.eup %9195 }
0x18fd   :  { %v6056_v48 = vmul.f32 %v9196_v49, %v9186_v5  ;;  %v6163_v25 = vpop.permute.xlu0 %6162  ;;  %v5478_v5 = vpop.permute.xlu1 %5477 }
0x18ff   :  { %8361 = vmatmul.mubr.msk.f32.vlgmr.msra.gmra.mrb[98].mxu1 %vm1878_vm2, %v6056_v48 }
0x1900   :  { %v9198_v30 = vpop.eup %9197  ;;  %8744 = vmatpush3.bf16.msra.mxu1 %v8743_v35  ;;  %8363 = vmatprep.mubr.msk.f32.mxu1 %vm9589_vm0, %v12406_v36 }
0x1901   :  { %v9106_v59 = vpop.permute.xlu0 %9105  ;;  %8373 = vmatprep.subr.mxu1 %v12406_v36  ;;  %v6057_v4 = vmul.f32 %v9198_v30, %v9188_v24  ;;  %v5493_v43 = vpop.permute.xlu1 %5492 }
0x1902   :  { %v9108_v15 = vunpack.i.h.bf16 %v9106_v59  ;;  %v9107_v63 = vunpack.i.l.bf16 %v9106_v59 }
0x1903   :  { %8364 = vmatmul.mubr.msk.f32.gmra.mrb[100].mxu1 %vm1878_vm2, %v6057_v4 }
0x1904   :  { %v9200_v21 = vpop.eup %9199  ;;  %8374 = vmatpush3.msk.msra.mxu1 %vm1930_vm15, %v6163_v25  ;;  %8366 = vmatprep.mubr.msk.f32.mxu1 %vm9589_vm0, %v12406_v36  ;;  %v8749_v38 = vpack.c.bf16 %v9108_v15, %v9107_v63  ;;  %v12527_v63 = vld [vmem:[#allocation76_spill] sm:$0xff] }
0x1905   :  { %v6253_v10 = vpop.permute.xlu0 %6252  ;;  %v6058_v57 = vmul.f32 %v9200_v21, %v9190_v17  ;;  %8748 = vmatprep.subr.bf16.mxu1 %v12407_v33  ;;  %v5508_v46 = vpop.permute.xlu1 %5507 }
0x1906   :  { %8389 = vmatpush3.msk.msra.mxu0 %vm1930_vm15, %v6253_v10 }
0x1907   :  { %8367 = vmatmul.mubr.msk.f32.gmra.mrb[102].mxu1 %vm1878_vm2, %v6058_v57  ;;  %8391 = vmatmul.mubr.msk.f32.vlgmr.msra.gmra.mrb[60].mxu0 %vm1878_vm2, %v6056_v48 }
0x1908   :  { %8375 = vmatprep.mubr.msk.f32.mxu1 %vm9589_vm0, %v12406_v36  ;;  %8393 = vmatprep.mubr.msk.f32.mxu0 %vm9589_vm0, %v12406_v36 }
0x1909   :  { %v6343_v55 = vpop.permute.xlu0 %6342  ;;  %8751 = vmatprep.subr.bf16.mxu0 %v12407_v33 }
0x190b   :  { %8376 = vmatmul.mubr.msk.f32.vlgmr.msra.gmra.mrb[104].mxu1 %vm1878_vm2, %v6056_v48  ;;  %8394 = vmatmul.mubr.msk.f32.gmra.mrb[62].mxu0 %vm1878_vm2, %v6057_v4 }
0x190c   :  { %8750 = vmatpush3.bf16.msra.mxu1 %v8749_v38  ;;  %8378 = vmatprep.mubr.msk.f32.mxu1 %vm9589_vm0, %v12406_v36 }
0x190d   :  { %v5459_v32 = vpop.permute.xlu0 %5458  ;;  %8396 = vmatprep.mubr.msk.f32.mxu0 %vm9589_vm0, %v12406_v36  ;;  %8403 = vmatprep.subr.mxu1 %v12406_v36 }
0x190e   :  { %5467 = vst.msk [vmem:[#allocation3] sm:$0xff] %vm12513_vm1, %v5459_v32 }
0x190f   :  { %8379 = vmatmul.mubr.msk.f32.gmra.mrb[106].mxu1 %vm1878_vm2, %v6057_v4  ;;  %8397 = vmatmul.mubr.msk.f32.gmra.mrb[64].mxu0 %vm1878_vm2, %v6058_v57 }
0x1910   :  { %8404 = vmatpush3.msk.msra.mxu1 %vm1930_vm15, %v6343_v55  ;;  %8381 = vmatprep.mubr.msk.f32.mxu1 %vm9589_vm0, %v12406_v36  ;;  %vm12516_vm15 = vcmask 490944  }
0x1911   :  { %v5474_v31 = vpop.permute.xlu0 %5473  ;;  %8430 = vmatprep.mubr.msk.f32.mxu0 %vm9589_vm0, %v12406_v36  ;;  %8763 = vmatprep.subr.bf16.mxu1 %v12407_v33  ;;  %vm12520_vm1 = vmmov %vm12516_vm15 }
0x1912   :  { %5482 = vst.msk [vmem:[#allocation3] sm:$0xff] %vm12514_vm12, %v5474_v31  ;;  %vm12521_vm12 = vcmask 290048  }
0x1913   :  { %8382 = vmatmul.mubr.msk.f32.gmra.mrb[108].mxu1 %vm1878_vm2, %v6058_v57 }
0x1914   :  { %8405 = vmatprep.mubr.msk.f32.mxu1 %vm9589_vm0, %v12406_v36 }
0x1915   :  { %v5489_v9 = vpop.permute.xlu0 %5488 }
0x1916   :  { %5497 = vst.msk [vmem:[#allocation3] sm:$0xff] %vm12515_vm13, %v5489_v9  ;;  %vm12522_vm13 = vcmask 322848  }
0x1917   :  { %8406 = vmatmul.mubr.msk.f32.vlgmr.msra.gmra.mrb[110].mxu1 %vm1878_vm2, %v6056_v48 }
0x1918   :  { %8408 = vmatprep.mubr.msk.f32.mxu1 %vm9589_vm0, %v12406_v36 }
0x1919   :  { %v5504_v45 = vpop.permute.xlu0 %5503 }
0x191a   :  { %5512 = vst.msk [vmem:[#allocation3] sm:$0xff] %vm12516_vm15, %v5504_v45 }
0x191b   :  { %8409 = vmatmul.mubr.msk.f32.gmra.mrb[112].mxu1 %vm1878_vm2, %v6057_v4  ;;  %v12526_v4 = vld [vmem:[#allocation58_spill] sm:$0xff] }
0x191c   :  { %8411 = vmatprep.mubr.msk.f32.mxu1 %vm9589_vm0, %v12406_v36 }
0x191d   :  { %v5461_v14 = vpop.permute.xlu0 %5460 }
0x191e   :  { %5468 = vst.msk [vmem:[#allocation3 + $0x8] sm:$0xff] %vm12517_vm14, %v5461_v14  ;;  %v12532_v14 = vld [vmem:[#allocation59_spill] sm:$0xff] }
0x191f   :  { %8412 = vmatmul.mubr.msk.f32.gmra.mrb[114].mxu1 %vm1878_vm2, %v6058_v57  ;;  %vm12523_vm2 = vcmask 355648  }
0x1920   :  { %8455 = vmatprep.mubr.msk.f32.mxu1 %vm9589_vm0, %v12406_v36 }
0x1921   :  { %v5476_v27 = vpop.permute.xlu0 %5475 }
0x1922   :  { %5483 = vst.msk [vmem:[#allocation3 + $0x8] sm:$0xff] %vm12518_vm3, %v5476_v27 }
0x1925   :  { %v5491_v41 = vpop.permute.xlu0 %5490 }
0x1926   :  { %5498 = vst.msk [vmem:[#allocation3 + $0x8] sm:$0xff] %vm12519_vm11, %v5491_v41  ;;  %v12533_v41 = vld [vmem:[#allocation61_spill] sm:$0xff] }
0x1929   :  { %v5506_v47 = vpop.permute.xlu0 %5505 }
0x192a   :  { %5513 = vst.msk [vmem:[#allocation3 + $0x8] sm:$0xff] %vm12520_vm1, %v5506_v47 }
0x192d   :  { %v5463_v24 = vpop.permute.xlu0 %5462 }
0x192e   :  { %5469 = vst.msk [vmem:[#allocation3 + $0x10] sm:$0xf] %vm12521_vm12, %v5463_v24  ;;  %vm12546_vm12 = vcmask 261248  }
0x192f   :  { %5484 = vst.msk [vmem:[#allocation3 + $0x10] sm:$0xf] %vm12522_vm13, %v5478_v5  ;;  %vm12547_vm13 = vmmov %vm12546_vm12 }
0x1930   :  { %5499 = vst.msk [vmem:[#allocation3 + $0x10] sm:$0xf] %vm12523_vm2, %v5493_v43  ;;  %vm12548_vm2 = vcmask 392544  }
0x1931   :  { %5514 = vst.msk [vmem:[#allocation3 + $0x10] sm:$0xf] %vm2455_vm9, %v5508_v46 }
0x19d2   :  { %v6144_v42 = vpop.f32.mrb[98].mxu1 }
0x19d3   :  { %6524 = vrot.lane.b32.xlu1 %v6144_v42, %s9573_s22  ;;  %v8362_v17 = vpop.f32.mrb[99].mxu1  ;;  %v12534_v42 = vld [vmem:[#allocation78_spill] sm:$0xff] }
0x19d6   :  { %v6149_v2 = vpop.f32.mrb[100].mxu1 }
0x19d7   :  { %6526 = vrot.lane.b32.xlu1 %v6149_v2, %s9573_s22  ;;  %v8365_v8 = vpop.f32.mrb[101].mxu1 }
0x19d8   :  { %v12535_v8 = vld [vmem:[#allocation75_spill] sm:$0xff] }
0x19da   :  { %v6154_v28 = vpop.f32.mrb[102].mxu1  ;;  %v6324_v61 = vpop.f32.mrb[60].mxu0 }
0x19db   :  { %6528 = vrot.lane.b32.xlu1 %v6154_v28, %s9573_s22  ;;  %v8368_v6 = vpop.f32.mrb[103].mxu1  ;;  %v8392_v26 = vpop.f32.mrb[61].mxu0  ;;  %v6431_v19 = vsub.f32 %v6324_v61, %v10160_v50  ;;  %v12536_v61 = vld [vmem:[#allocation60_spill] sm:$0xff] }
0x19dc   :  { %v12537_v26 = vld [vmem:[#allocation64_spill] sm:$0xff] }
0x19dd   :  { %v6440_v1 = vmul.f32 %v6431_v19, %v10170_v3  ;;  %v6455_v51 = vmul.f32 %v6431_v19, %v12483_v52  ;;  %v6470_v29 = vmul.f32 %v6431_v19, %v12485_v37 }
0x19de   :  { %v6234_v7 = vpop.f32.mrb[104].mxu1  ;;  %v6329_v40 = vpop.f32.mrb[62].mxu0 }
0x19df   :  { %v6428_v56 = vsub.f32 %v6234_v7, %v10182_v16  ;;  %v8377_v53 = vpop.f32.mrb[105].mxu1  ;;  %v8395_v13 = vpop.f32.mrb[63].mxu0  ;;  %v6432_v0 = vsub.f32 %v6329_v40, %v12484_v23 }
0x19e0   :  { %v12538_v13 = vld [vmem:[#allocation79_spill] sm:$0xff] }
0x19e1   :  { %v6437_v54 = vmul.f32 %v6428_v56, %v12486_v62  ;;  %v6452_v11 = vmul.f32 %v6428_v56, %v12487_v20  ;;  %v6467_v50 = vmul.f32 %v6428_v56, %v12488_v18  ;;  %v6441_v52 = vmul.f32 %v6432_v0, %v12490_v39  ;;  %v12524_v20 = vld [vmem:[#allocation70_spill] sm:$0xff]  ;;  %v12528_v39 = vld [vmem:[#allocation68_spill] sm:$0xff] }
0x19e2   :  { %v6239_v44 = vpop.f32.mrb[106].mxu1  ;;  %v6334_v12 = vpop.f32.mrb[64].mxu0  ;;  %v6456_v23 = vmul.f32 %v6432_v0, %v12491_v60  ;;  %v6471_v62 = vmul.f32 %v6432_v0, %v12493_v22  ;;  %v12525_v18 = vld [vmem:[#allocation54_spill] sm:$0xff]  ;;  %v12529_v60 = vld [vmem:[#allocation52_spill] sm:$0xff] }
0x19e3   :  { %v6443_v49 = vadd.f32 %v6440_v1, %v6437_v54  ;;  %v6458_v16 = vadd.f32 %v6455_v51, %v6452_v11  ;;  %v6473_v48 = vadd.f32 %v6470_v29, %v6467_v50  ;;  %v6429_v25 = vsub.f32 %v6239_v44, %v12489_v34  ;;  %v8380_v3 = vpop.f32.mrb[107].mxu1  ;;  %v8398_v35 = vpop.f32.mrb[65].mxu0  ;;  %v12531_v22 = vld [vmem:[#allocation74_spill] sm:$0xff]  ;;  %v12539_v54 = vld [vmem:[#allocation77_spill] sm:$0xff] }
0x19e4   :  { %v6433_v37 = vsub.f32 %v6334_v12, %v12492_v58  ;;  %v12530_v58 = vld [vmem:[#allocation55_spill] sm:$0xff]  ;;  %v12540_v50 = vld [vmem:[#allocation62_spill] sm:$0xff] }
0x19e5   :  { %v6438_v30 = vmul.f32 %v6429_v25, %v12524_v20  ;;  %v6453_v59 = vmul.f32 %v6429_v25, %v12525_v18  ;;  %v6468_v21 = vmul.f32 %v6429_v25, %v12526_v4  ;;  %v12541_v12 = vld [vmem:[#allocation63_spill] sm:$0xff]  ;;  %v12543_v18 = vld [vmem:[#allocation80_spill] sm:$0xff]  ;;  %v12544_v4 = vld [vmem:[#allocation65_spill] sm:$0xff] }
0x19e6   :  { %v6244_v10 = vpop.f32.mrb[108].mxu1  ;;  %v6442_v32 = vmul.f32 %v6433_v37, %v12528_v39  ;;  %v6457_v31 = vmul.f32 %v6433_v37, %v12529_v60  ;;  %v6472_v9 = vmul.f32 %v6433_v37, %v12530_v58  ;;  %v7418_v39 = vld [vmem:[%s12461_s25 + $0x50] sm:$0xff] }
0x19e7   :  { %v6444_v57 = vadd.f32 %v6441_v52, %v6438_v30  ;;  %v6459_v15 = vadd.f32 %v6456_v23, %v6453_v59  ;;  %v6474_v34 = vadd.f32 %v6471_v62, %v6468_v21  ;;  %v6430_v55 = vsub.f32 %v6244_v10, %v12527_v63  ;;  %v8383_v38 = vpop.f32.mrb[109].mxu1  ;;  %v12545_v63 = vld [vmem:[#allocation66_spill] sm:$0xff] }
0x19e8   :  { %v7417_v38 = vld [vmem:[%s12461_s25 + $0x48] sm:$0xff] }
0x19e9   :  { %v6439_v45 = vmul.f32 %v6430_v55, %v12531_v22  ;;  %v6454_v27 = vmul.f32 %v6430_v55, %v12532_v14  ;;  %v6469_v5 = vmul.f32 %v6430_v55, %v12533_v41 }
0x19ea   :  { %v6414_v47 = vpop.f32.mrb[110].mxu1 }
0x19eb   :  { %v6445_v43 = vadd.f32 %v6442_v32, %v6439_v45  ;;  %v6460_v24 = vadd.f32 %v6457_v31, %v6454_v27  ;;  %v6475_v46 = vadd.f32 %v6472_v9, %v6469_v5  ;;  %v6434_v17 = vsub.f32 %v6414_v47, %v12534_v42  ;;  %v8407_v2 = vpop.f32.mrb[111].mxu1  ;;  %v7419_v31 = vld [vmem:[%s12461_s25 + $0x58] sm:$0xff] }
0x19ec   :  { %v8755_v27 = vpack.c.bf16 %v7419_v31, %v7418_v39  ;;  %v12558_v31 = vld [vmem:[#allocation85_spill] sm:$0xff] }
0x19ed   :  { %v6446_v28 = vmul.f32 %v6434_v17, %v12535_v8  ;;  %v6461_v6 = vmul.f32 %v6434_v17, %v12536_v61  ;;  %v6476_v19 = vmul.f32 %v6434_v17, %v12537_v26  ;;  %v7422_v8 = vld [vmem:[%s12461_s25 + $0x70] sm:$0xff] }
0x19ee   :  { %v6419_v7 = vpop.f32.mrb[112].mxu1 }
0x19ef   :  { %v6449_v40 = vadd.f32 %v6446_v28, %v6443_v49  ;;  %v6464_v56 = vadd.f32 %v6461_v6, %v6458_v16  ;;  %v6479_v53 = vadd.f32 %v6476_v19, %v6473_v48  ;;  %v6435_v1 = vsub.f32 %v6419_v7, %v12538_v13  ;;  %v8410_v51 = vpop.f32.mrb[113].mxu1  ;;  %v12542_v48 = vld [vmem:[#allocation81_spill] sm:$0xff]  ;;  %v7423_v28 = vld [vmem:[%s12461_s25 + $0x78] sm:$0xff] }
0x19f0   :  { %v8761_v61 = vpack.c.bf16 %v7423_v28, %v7422_v8 }
0x19f1   :  { %v6482_v0 = vmul.f32 %v6449_v40, %v6449_v40  ;;  %v6485_v29 = vmul.f32 %v6464_v56, %v6464_v56  ;;  %v6447_v11 = vmul.f32 %v6435_v1, %v12539_v54  ;;  %6539 = vrot.lane.b32.xlu1 %v6449_v40, %s9613_s10  ;;  %v6462_v44 = vmul.f32 %v6435_v1, %v12540_v50 }
0x19f2   :  { %v6477_v25 = vmul.f32 %v6435_v1, %v12541_v12  ;;  %v6424_v3 = vpop.f32.mrb[114].mxu1  ;;  %v6491_v49 = vmul.f32 %v6479_v53, %v6479_v53 }
0x19f3   :  { %v6488_v35 = vadd.f32 %v6485_v29, %v6482_v0  ;;  %v6450_v16 = vadd.f32 %v6447_v11, %v6444_v57  ;;  %v6436_v52 = vsub.f32 %v6424_v3, %v12542_v48  ;;  %v8413_v23 = vpop.f32.mrb[115].mxu1  ;;  %v6465_v37 = vadd.f32 %v6462_v44, %v6459_v15  ;;  %v7416_v57 = vld [vmem:[%s12461_s25 + $0x40] sm:$0xff] }
0x19f4   :  { %v6480_v62 = vadd.f32 %v6477_v25, %v6474_v34  ;;  %v8752_v60 = vpack.c.bf16 %v7417_v38, %v7416_v57  ;;  %v12557_v38 = vld [vmem:[#allocation84_spill] sm:$0xff] }
0x19f5   :  { %v6494_v20 = vadd.f32 %v6491_v49, %v6488_v35  ;;  %v6483_v30 = vmul.f32 %v6450_v16, %v6450_v16  ;;  %v6448_v59 = vmul.f32 %v6436_v52, %v12543_v18  ;;  %v6463_v21 = vmul.f32 %v6436_v52, %v12544_v4  ;;  %6554 = vrot.lane.b32.xlu1 %v6464_v56, %s9610_s14 }
0x19f6   :  { %v6486_v10 = vmul.f32 %v6465_v37, %v6465_v37  ;;  %v6478_v55 = vmul.f32 %v6436_v52, %v12545_v63  ;;  %6541 = vrot.lane.b32.xlu0 %v6450_v16, %s9613_s10  ;;  %v6492_v9 = vmul.f32 %v6480_v62, %v6480_v62  ;;  %8753 = vmatpush3.bf16.msra.mxu0 %v8752_v60 }
0x19f7   :  { %v6497_v32 = vadd.f32 1e-08, %v6494_v20  ;;  %v6451_v15 = vadd.f32 %v6448_v59, %v6445_v43  ;;  %v6466_v34 = vadd.f32 %v6463_v21, %v6460_v24  ;;  %8754 = vmatprep.subr.bf16.mxu0 %v12407_v33  ;;  %v7420_v43 = vld [vmem:[%s12461_s25 + $0x60] sm:$0xff]  ;;  %v7421_v24 = vld [vmem:[%s12461_s25 + $0x68] sm:$0xff] }
0x19f8   :  { %v6489_v58 = vadd.f32 %v6486_v10, %v6483_v30  ;;  %v6481_v22 = vadd.f32 %v6478_v55, %v6475_v46  ;;  %v8758_v17 = vpack.c.bf16 %v7421_v24, %v7420_v43  ;;  %v7424_v10 = vld [vmem:[#allocation14 + $0x1] ss:$0 sm:$0xff] }
0x19f9   :  { %v6484_v45 = vmul.f32 %v6451_v15, %v6451_v15  ;;  %v6487_v14 = vmul.f32 %v6466_v34, %v6466_v34  ;;  %6569 = vrot.lane.b32.xlu1 %v6479_v53, %s9614_s11  ;;  %9201 = vrsqrt.f32 %v6497_v32  ;;  %vm6502_vm9 = vcmp.eq.f32.partialorder %v6497_v32, inf }
0x19fa   :  { %v6495_v41 = vadd.f32 %v6492_v9, %v6489_v58  ;;  %6556 = vrot.lane.b32.xlu0 %v6465_v37, %s9610_s14  ;;  %v6493_v47 = vmul.f32 %v6481_v22, %v6481_v22  ;;  %8756 = vmatpush3.bf16.msra.mxu0 %v8755_v27  ;;  %v6505_v19 = vand.u32 2147483648, %v6497_v32  ;;  %vm6504_vm15 = vcmp.eq.f32.partialorder %v6497_v32, 0.0  ;;  %v12559_v27 = vld [vmem:[#allocation86_spill] sm:$0xff] }
0x19fb   :  { %v6490_v5 = vadd.f32 %v6487_v14, %v6484_v45  ;;  %8757 = vmatprep.subr.bf16.mxu0 %v12407_v33 }
0x19fc   :  { %v6498_v42 = vadd.f32 1e-08, %v6495_v41 }
0x19fd   :  { %v6496_v46 = vadd.f32 %v6493_v47, %v6490_v5  ;;  %6543 = vrot.lane.b32.xlu1 %v6451_v15, %s9613_s10 }
0x19fe   :  { %6571 = vrot.lane.b32.xlu0 %v6480_v62, %s9614_s11  ;;  %9203 = vrsqrt.f32 %v6498_v42  ;;  %8759 = vmatpush3.bf16.msra.mxu0 %v8758_v17  ;;  %vm6509_vm14 = vcmp.eq.f32.partialorder %v6498_v42, inf  ;;  %v6512_v13 = vand.u32 2147483648, %v6498_v42  ;;  %vm6511_vm3 = vcmp.eq.f32.partialorder %v6498_v42, 0.0 }
0x19ff   :  { %v6499_v2 = vadd.f32 1e-08, %v6496_v46  ;;  %8760 = vmatprep.subr.bf16.mxu0 %v12407_v33 }
0x1a01   :  { %6573 = vrot.lane.b32.xlu1 %v6481_v22, %s9614_s11  ;;  %9205 = vrsqrt.f32 %v6499_v2  ;;  %vm6516_vm11 = vcmp.eq.f32.partialorder %v6499_v2, inf  ;;  %v6519_v54 = vand.u32 2147483648, %v6499_v2  ;;  %vm6518_vm1 = vcmp.eq.f32.partialorder %v6499_v2, 0.0 }
0x1a02   :  { %6558 = vrot.lane.b32.xlu0 %v6466_v34, %s9610_s14  ;;  %8762 = vmatpush3.bf16.msra.mxu0 %v8761_v61 }
0x1a03   :  { %v9202_v6 = vpop.eup %9201  ;;  %8775 = vmatprep.subr.bf16.mxu0 %v12407_v33 }
0x1a04   :  { %v6501_v26 = vmul.f32 %v9202_v6, %v6497_v32 }
0x1a06   :  { %v6503_v7 = vsel %vm6502_vm9, %v6497_v32, %v6501_v26  ;;  %vm12549_vm9 = vcmask 425344  }
0x1a07   :  { %v6506_v40 = vsel %vm6504_vm15, %v6505_v19, %v6503_v7  ;;  %vm12550_vm15 = vmmov %vm12548_vm2 }
0x1a08   :  { %v9204_v56 = vpop.eup %9203  ;;  %6584 = vrot.lane.b32.xlu0 %v6506_v40, %s9615_s15 }
0x1a09   :  { %v6508_v53 = vmul.f32 %v9204_v56, %v6498_v42  ;;  %v7430_v56 = vld [vmem:[%s12469_s19 + $0x40] sm:$0xff] }
0x1a0b   :  { %v9206_v1 = vpop.eup %9205  ;;  %v6510_v51 = vsel %vm6509_vm14, %v6498_v42, %v6508_v53  ;;  %vm12551_vm14 = vcmask 458144   ;;  %v7431_v53 = vld [vmem:[%s12469_s19 + $0x48] sm:$0xff] }
0x1a0c   :  { %v6513_v0 = vsel %vm6511_vm3, %v6512_v13, %v6510_v51  ;;  %v6515_v29 = vmul.f32 %v9206_v1, %v6499_v2  ;;  %vm12552_vm3 = vmmov %vm12549_vm9  ;;  %v8764_v13 = vpack.c.bf16 %v7431_v53, %v7430_v56  ;;  %v7432_v1 = vld [vmem:[%s12469_s19 + $0x50] sm:$0xff]  ;;  %v7433_v51 = vld [vmem:[%s12469_s19 + $0x58] sm:$0xff] }
0x1a0d   :  { %6586 = vrot.lane.b32.xlu0 %v6513_v0, %s9615_s15  ;;  %v8767_v0 = vpack.c.bf16 %v7433_v51, %v7432_v1 }
0x1a0e   :  { %v6517_v11 = vsel %vm6516_vm11, %v6499_v2, %v6515_v29  ;;  %vm12554_vm11 = vcmask 523744   ;;  %8765 = vmatpush3.bf16.msra.mxu1 %v8764_v13  ;;  %v7434_v29 = vld [vmem:[%s12469_s19 + $0x60] sm:$0xff] }
0x1a0f   :  { %v6520_v50 = vsel %vm6518_vm1, %v6519_v54, %v6517_v11  ;;  %vm12555_vm1 = vmmov %vm12554_vm11  ;;  %8766 = vmatprep.subr.bf16.mxu1 %v12407_v33  ;;  %v7435_v54 = vld [vmem:[%s12469_s19 + $0x68] sm:$0xff] }
0x1a10   :  { %v8770_v11 = vpack.c.bf16 %v7435_v54, %v7434_v29 }
0x1a11   :  { %6588 = vrot.lane.b32.xlu0 %v6520_v50, %s9615_s15  ;;  %v7436_v50 = vld [vmem:[%s12469_s19 + $0x70] sm:$0xff] }
0x1a12   :  { %8768 = vmatpush3.bf16.msra.mxu1 %v8767_v0 }
0x1a13   :  { %8769 = vmatprep.subr.bf16.mxu1 %v12407_v33 }
0x1a16   :  { %8771 = vmatpush3.bf16.msra.mxu1 %v8770_v11 }
0x1a17   :  { %8772 = vmatprep.subr.bf16.mxu1 %v12407_v33 }
0x1a45   :  { %v6525_v44 = vpop.permute.xlu1 %6524 }
0x1a46   :  { %6533 = vst.msk [vmem:[#allocation3] sm:$0xff] %vm12546_vm12, %v6525_v44  ;;  %vm12556_vm12 = vcmask 519648   ;;  %v7437_v44 = vld [vmem:[%s12469_s19 + $0x78] sm:$0xff] }
0x1a49   :  { %v6527_v12 = vpop.permute.xlu1 %6526 }
0x1a4a   :  { %6534 = vst.msk [vmem:[#allocation3 + $0x8] sm:$0xff] %vm12547_vm13, %v6527_v12  ;;  %v8773_v12 = vpack.c.bf16 %v7437_v44, %v7436_v50 }
0x1a4c   :  { %8774 = vmatpush3.bf16.msra.mxu1 %v8773_v12 }
0x1a4d   :  { %v6529_v25 = vpop.permute.xlu1 %6528  ;;  %8787 = vmatprep.subr.bf16.mxu1 %v12407_v33 }
0x1a4e   :  { %6535 = vst.msk [vmem:[#allocation3 + $0x10] sm:$0xf] %vm3478_vm7, %v6529_v25  ;;  %vm12553_vm7 = vmmov %vm12551_vm14  ;;  %v7442_v25 = vld [vmem:[%s12470_s30 + $0x40] sm:$0xff] }
0x1a63   :  { %v6540_v3 = vpop.permute.xlu1 %6539 }
0x1a64   :  { %6548 = vst.msk [vmem:[#allocation3] sm:$0xff] %vm12548_vm2, %v6540_v3  ;;  %v7443_v3 = vld [vmem:[%s12470_s30 + $0x48] sm:$0xff] }
0x1a67   :  { %v6555_v35 = vpop.permute.xlu1 %6554 }
0x1a68   :  { %6563 = vst.msk [vmem:[#allocation3] sm:$0xff] %vm12549_vm9, %v6555_v35  ;;  %v6542_v49 = vpop.permute.xlu0 %6541  ;;  %v7444_v35 = vld [vmem:[%s12470_s30 + $0x50] sm:$0xff] }
0x1a69   :  { %6549 = vst.msk [vmem:[#allocation3 + $0x8] sm:$0xff] %vm12550_vm15, %v6542_v49  ;;  %v8776_v49 = vpack.c.bf16 %v7443_v3, %v7442_v25 }
0x1a6b   :  { %v6570_v16 = vpop.permute.xlu1 %6569 }
0x1a6c   :  { %6578 = vst.msk [vmem:[#allocation3] sm:$0xff] %vm12551_vm14, %v6570_v16  ;;  %v6557_v48 = vpop.permute.xlu0 %6556  ;;  %v7445_v16 = vld [vmem:[%s12470_s30 + $0x58] sm:$0xff] }
0x1a6d   :  { %6564 = vst.msk [vmem:[#allocation3 + $0x8] sm:$0xff] %vm12552_vm3, %v6557_v48  ;;  %v8779_v48 = vpack.c.bf16 %v7445_v16, %v7444_v35 }
0x1a6f   :  { %v6544_v52 = vpop.permute.xlu1 %6543 }
0x1a70   :  { %v6572_v23 = vpop.permute.xlu0 %6571  ;;  %6550 = vst.msk [vmem:[#allocation3 + $0x10] sm:$0xf] %vm3495_vm8, %v6544_v52  ;;  %v7446_v52 = vld [vmem:[%s12470_s30 + $0x60] sm:$0xff]  ;;  %vm7158_vm8 = vcmask 60416  }
0x1a71   :  { %6579 = vst.msk [vmem:[#allocation3 + $0x8] sm:$0xff] %vm12553_vm7, %v6572_v23  ;;  %v7447_v23 = vld [vmem:[%s12470_s30 + $0x68] sm:$0xff] }
0x1a73   :  { %v6574_v37 = vpop.permute.xlu1 %6573 }
0x1a74   :  { %v6559_v62 = vpop.permute.xlu0 %6558 }
0x1a75   :  { %6565 = vst.msk [vmem:[#allocation3 + $0x10] sm:$0xf] %vm3512_vm5, %v6559_v62  ;;  %vm7155_vm5 = vcmask 64512  }
0x1a76   :  { %6580 = vst.msk [vmem:[#allocation3 + $0x10] sm:$0xf] %vm3529_vm4, %v6574_v37  ;;  %v8782_v37 = vpack.c.bf16 %v7447_v23, %v7446_v52 }
0x1a7a   :  { %v6585_v20 = vpop.permute.xlu0 %6584 }
0x1a7b   :  { %6593 = vst.msk [vmem:[#allocation3] sm:$0xff] %vm12554_vm11, %v6585_v20 }
0x1a7f   :  { %v6587_v30 = vpop.permute.xlu0 %6586 }
0x1a80   :  { %6594 = vst.msk [vmem:[#allocation3 + $0x8] sm:$0xff] %vm12555_vm1, %v6587_v30 }
0x1a82   :  { %v6596_v18 = vld [vmem:[#allocation3] sm:$0xff] }
0x1a83   :  { %v6589_v59 = vpop.permute.xlu0 %6588  ;;  %8431 = vmatmul.mubr.msk.f32.vlgmr.msra.gmra.mrb[66].mxu0 %vm786_vm10, %v6596_v18 }
0x1a84   :  { %6595 = vst.msk [vmem:[#allocation3 + $0x10] sm:$0xf] %vm12556_vm12, %v6589_v59  ;;  %8433 = vmatprep.mubr.msk.f32.mxu0 %vm9589_vm0, %v12406_v36  ;;  %8777 = vmatpush3.bf16.msra.mxu0 %v8776_v49 }
0x1a85   :  { %8778 = vmatprep.subr.bf16.mxu0 %v12407_v33 }
0x1a87   :  { %v6597_v4 = vld [vmem:[#allocation3 + $0x8] sm:$0xff] }
0x1a88   :  { %8434 = vmatmul.mubr.msk.f32.gmra.mrb[68].mxu0 %vm786_vm10, %v6597_v4 }
0x1a89   :  { %8436 = vmatprep.mubr.msk.f32.mxu0 %vm9589_vm0, %v12406_v36  ;;  %8780 = vmatpush3.bf16.msra.mxu0 %v8779_v48 }
0x1a8a   :  { %8781 = vmatprep.subr.bf16.mxu0 %v12407_v33 }
0x1a8b   :  { %v6598_v21 = vld [vmem:[#allocation3 + $0x10] sm:$0xf] }
0x1a8c   :  { %8437 = vmatmul.mubr.msk.f32.gmra.mrb[70].mxu0 %vm786_vm10, %v6598_v21 }
0x1a8d   :  { %8480 = vmatprep.mubr.msk.f32.mxu0 %vm9589_vm0, %v12406_v36  ;;  %8783 = vmatpush3.bf16.msra.mxu0 %v8782_v37 }
0x1a8e   :  { %8784 = vmatprep.subr.bf16.mxu0 %v12407_v33 }
0x1b56   :  { %v6691_v63 = vpop.f32.mrb[66].mxu0 }
0x1b57   :  { %v6692_v55 = vadd.f32 %v7424_v10, %v6691_v63  ;;  %v8432_v57 = vpop.f32.mrb[67].mxu0 }
0x1b58   :  { %v7428_v57 = vld [vmem:[#allocation16 + $0x1] ss:$0 sm:$0xff] }
0x1b59   :  { %v6705_v39 = vadd.f32 %v6692_v55, %v12557_v38 }
0x1b5b   :  { %v6696_v32 = vpop.f32.mrb[68].mxu0  ;;  %v6712_v15 = vsel %vm786_vm10, %v6705_v39, 0.0 }
0x1b5c   :  { %v6697_v34 = vadd.f32 %v7424_v10, %v6696_v32  ;;  %v8435_v60 = vpop.f32.mrb[69].mxu0  ;;  %6713 = vadd.xlane.f32.xlu1 %v6712_v15 }
0x1b5e   :  { %v6706_v58 = vadd.f32 %v6697_v34, %v12558_v31 }
0x1b5f   :  { %v6701_v9 = vpop.f32.mrb[70].mxu0 }
0x1b60   :  { %v6702_v22 = vadd.f32 %v7424_v10, %v6701_v9  ;;  %v8438_v45 = vpop.f32.mrb[71].mxu0  ;;  %v6715_v14 = vsel %vm786_vm10, %v6706_v58, 0.0 }
0x1b61   :  { %6716 = vadd.xlane.f32.xlu0 %v6715_v14 }
0x1b62   :  { %v6707_v41 = vadd.f32 %v6702_v22, %v12559_v27  ;;  %v7448_v27 = vld [vmem:[%s12470_s30 + $0x70] sm:$0xff] }
0x1b64   :  { %v6718_v5 = vsel %vm3666_vm6, %v6707_v41, 0.0 }
0x1b65   :  { %6719 = vadd.xlane.f32.xlu0 %v6718_v5 }
0x1be9   :  { %v6714_v47 = vpop.xlane.xlu1 %6713 }
0x1bea   :  { %v6721_v43 = vmul.f32 0.015625, %v6714_v47  ;;  %v7438_v47 = vld [vmem:[#allocation19 + $0x1] ss:$0 sm:$0xff] }
0x1bec   :  { %v12116_v24 = vsub.f32 %v6705_v39, %v6721_v43  ;;  %v7429_v39 = vld [vmem:[#allocation17 + $0x1] ss:$0 sm:$0xff] }
0x1bee   :  { %v6717_v42 = vpop.xlane.xlu0 %6716  ;;  %v6727_v46 = vmul.f32 %v12116_v24, %v12116_v24 }
0x1bef   :  { %v6722_v17 = vmul.f32 0.015625, %v6717_v42 }
0x1bf0   :  { %v6730_v2 = vsel %vm786_vm10, %v6727_v46, 0.0 }
0x1bf1   :  { %v12121_v8 = vsub.f32 %v6706_v58, %v6722_v17  ;;  %6731 = vadd.xlane.f32.xlu1 %v6730_v2 }
0x1bf2   :  { %v6720_v28 = vpop.xlane.xlu0 %6719 }
0x1bf3   :  { %v6723_v61 = vmul.f32 0.015625, %v6720_v28  ;;  %v6728_v6 = vmul.f32 %v12121_v8, %v12121_v8 }
0x1bf5   :  { %v12125_v26 = vsub.f32 %v6707_v41, %v6723_v61  ;;  %v6733_v19 = vsel %vm786_vm10, %v6728_v6, 0.0  ;;  %v7449_v41 = vld [vmem:[%s12470_s30 + $0x78] sm:$0xff] }
0x1bf6   :  { %6734 = vadd.xlane.f32.xlu0 %v6733_v19  ;;  %v8785_v5 = vpack.c.bf16 %v7449_v41, %v7448_v27 }
0x1bf7   :  { %v6729_v7 = vmul.f32 %v12125_v26, %v12125_v26 }
0x1bf8   :  { %8786 = vmatpush3.bf16.msra.mxu0 %v8785_v5 }
0x1bf9   :  { %v6736_v40 = vsel %vm3666_vm6, %v6729_v7, 0.0  ;;  %v7450_v7 = vld [vmem:[#allocation20 + $0x1] ss:$0 sm:$0xff] }
0x1bfa   :  { %6737 = vadd.xlane.f32.xlu1 %v6736_v40 }
0x1c7e   :  { %v6732_v62 = vpop.xlane.xlu1 %6731 }
0x1c7f   :  { %v6739_v20 = vmul.f32 0.015625, %v6732_v62 }
0x1c81   :  { %v6742_v30 = vadd.f32 1e-05, %v6739_v20 }
0x1c83   :  { %9207 = vrsqrt.f32 %v6742_v30  ;;  %v6735_v18 = vpop.xlane.xlu0 %6734 }
0x1c84   :  { %v6740_v59 = vmul.f32 0.015625, %v6735_v18 }
0x1c86   :  { %v6743_v4 = vadd.f32 1e-05, %v6740_v59 }
0x1c87   :  { %v6738_v21 = vpop.xlane.xlu1 %6737 }
0x1c88   :  { %9209 = vrsqrt.f32 %v6743_v4  ;;  %v6741_v10 = vmul.f32 0.015625, %v6738_v21 }
0x1c8a   :  { %v6744_v63 = vadd.f32 1e-05, %v6741_v10 }
0x1c8c   :  { %9211 = vrsqrt.f32 %v6744_v63  ;;  %v7051_v63 = vld [vmem:[%s9764_s6] sm:$0xff] }
0x1c8d   :  { %v9208_v55 = vpop.eup %9207 }
0x1c8e   :  { %v6748_v38 = vmul.f32 %v9208_v55, %v12116_v24  ;;  %v7052_v55 = vld [vmem:[%s9764_s6 + $0x8] sm:$0xff] }
0x1c90   :  { %v6757_v32 = vmul.f32 %v7428_v57, %v6748_v38  ;;  %v7053_v38 = vld [vmem:[%s9764_s6 + $0x10] sm:$0xff] }
0x1c92   :  { %v9210_v15 = vpop.eup %9209  ;;  %v6766_v34 = vadd.f32 %v7429_v39, %v6757_v32 }
0x1c93   :  { %v6749_v60 = vmul.f32 %v9210_v15, %v12121_v8  ;;  %v7055_v15 = vld [vmem:[%s9764_s6 + $0x20] sm:$0xff] }
0x1c94   :  { %8456 = vmatmul.mubr.msk.f32.vlgmr.msra.gmra.mrb[116].mxu1 %vm786_vm10, %v6766_v34 }
0x1c95   :  { %8458 = vmatprep.mubr.msk.f32.mxu1 %vm9589_vm0, %v12406_v36  ;;  %v6758_v31 = vmul.f32 %v7428_v57, %v6749_v60  ;;  %v7057_v60 = vld [vmem:[%s9764_s6 + $0x30] sm:$0xff] }
0x1c96   :  { %v9212_v58 = vpop.eup %9211 }
0x1c97   :  { %v6767_v9 = vadd.f32 %v7429_v39, %v6758_v31  ;;  %v6750_v22 = vmul.f32 %v9212_v58, %v12125_v26  ;;  %v7058_v58 = vld [vmem:[%s9764_s6 + $0x38] sm:$0xff] }
0x1c99   :  { %8459 = vmatmul.mubr.msk.f32.gmra.mrb[118].mxu1 %vm786_vm10, %v6767_v9  ;;  %v6759_v45 = vmul.f32 %v7428_v57, %v6750_v22  ;;  %v8788_v57 = vpack.c.bf16 %v7052_v55, %v7051_v63 }
0x1c9a   :  { %8461 = vmatprep.mubr.msk.f32.mxu1 %vm9589_vm0, %v12406_v36 }
0x1c9b   :  { %v6768_v14 = vadd.f32 %v7429_v39, %v6759_v45  ;;  %8789 = vmatpush3.bf16.msra.mxu1 %v8788_v57  ;;  %v7054_v39 = vld [vmem:[%s9764_s6 + $0x18] sm:$0xff] }
0x1c9c   :  { %8790 = vmatprep.subr.bf16.mxu1 %v12407_v33  ;;  %v8791_v32 = vpack.c.bf16 %v7054_v39, %v7053_v38 }
0x1c9d   :  { %8462 = vmatmul.mubr.msk.f32.gmra.mrb[120].mxu1 %vm786_vm10, %v6768_v14 }
0x1c9e   :  { %8505 = vmatprep.mubr.msk.f32.mxu1 %vm9589_vm0, %v12406_v36 }
0x1c9f   :  { %8792 = vmatpush3.bf16.msra.mxu1 %v8791_v32 }
0x1ca0   :  { %8793 = vmatprep.subr.bf16.mxu1 %v12407_v33 }
0x1d67   :  { %v6861_v43 = vpop.f32.mrb[116].mxu1 }
0x1d68   :  { %v6862_v24 = vadd.f32 %v7438_v47, %v6861_v43  ;;  %v8457_v42 = vpop.f32.mrb[117].mxu1 }
0x1d6a   :  { %v6875_v46 = vmax.f32 %v6862_v24, 0.0 }
0x1d6c   :  { %v6866_v17 = vpop.f32.mrb[118].mxu1  ;;  %8481 = vmatmul.mubr.msk.f32.vlgmr.msra.gmra.mrb[72].mxu0 %vm786_vm10, %v6875_v46  ;;  %v7454_v46 = vld [vmem:[#allocation22 + $0x1] ss:$0 sm:$0xff] }
0x1d6d   :  { %v6867_v2 = vadd.f32 %v7438_v47, %v6866_v17  ;;  %v8460_v8 = vpop.f32.mrb[119].mxu1  ;;  %8483 = vmatprep.mubr.msk.f32.mxu0 %vm9589_vm0, %v12406_v36 }
0x1d6f   :  { %v6876_v28 = vmax.f32 %v6867_v2, 0.0  ;;  %v7455_v2 = vld [vmem:[#allocation23 + $0x1] ss:$0 sm:$0xff] }
0x1d70   :  { %v6871_v61 = vpop.f32.mrb[120].mxu1 }
0x1d71   :  { %v6872_v6 = vadd.f32 %v7438_v47, %v6871_v61  ;;  %v8463_v26 = vpop.f32.mrb[121].mxu1  ;;  %8484 = vmatmul.mubr.msk.f32.gmra.mrb[74].mxu0 %vm786_vm10, %v6876_v28 }
0x1d72   :  { %8486 = vmatprep.mubr.msk.f32.mxu0 %vm9589_vm0, %v12406_v36 }
0x1d73   :  { %v6877_v19 = vmax.f32 %v6872_v6, 0.0 }
0x1d75   :  { %8487 = vmatmul.mubr.msk.f32.gmra.mrb[76].mxu0 %vm786_vm10, %v6877_v19 }
0x1e3f   :  { %v6970_v40 = vpop.f32.mrb[72].mxu0 }
0x1e40   :  { %v6971_v56 = vadd.f32 %v7450_v7, %v6970_v40  ;;  %v8482_v53 = vpop.f32.mrb[73].mxu0 }
0x1e41   :  { %v7456_v53 = vld [vmem:[#allocation25] ss:$0 sm:$0xff] }
0x1e42   :  { %v6984_v13 = vadd.f32 %v6971_v56, %v6766_v34  ;;  %v7056_v34 = vld [vmem:[%s9764_s6 + $0x28] sm:$0xff] }
0x1e43   :  { %v8794_v31 = vpack.c.bf16 %v7056_v34, %v7055_v15 }
0x1e44   :  { %v6975_v1 = vpop.f32.mrb[74].mxu0  ;;  %v6991_v51 = vsel %vm786_vm10, %v6984_v13, 0.0 }
0x1e45   :  { %v6976_v0 = vadd.f32 %v7450_v7, %v6975_v1  ;;  %v8485_v29 = vpop.f32.mrb[75].mxu0  ;;  %6992 = vadd.xlane.f32.xlu0 %v6991_v51  ;;  %8795 = vmatpush3.bf16.msra.mxu1 %v8794_v31 }
0x1e46   :  { %8796 = vmatprep.subr.bf16.mxu1 %v12407_v33 }
0x1e47   :  { %v6985_v54 = vadd.f32 %v6976_v0, %v6767_v9  ;;  %v8797_v9 = vpack.c.bf16 %v7058_v58, %v7057_v60 }
0x1e48   :  { %v6980_v11 = vpop.f32.mrb[76].mxu0 }
0x1e49   :  { %v6981_v50 = vadd.f32 %v7450_v7, %v6980_v11  ;;  %v8488_v44 = vpop.f32.mrb[77].mxu0  ;;  %v6994_v12 = vsel %vm786_vm10, %v6985_v54, 0.0  ;;  %8798 = vmatpush3.bf16.msra.mxu1 %v8797_v9 }
0x1e4a   :  { %6995 = vadd.xlane.f32.xlu1 %v6994_v12 }
0x1e4b   :  { %v6986_v25 = vadd.f32 %v6981_v50, %v6768_v14 }
0x1e4d   :  { %v6997_v3 = vsel %vm3666_vm6, %v6986_v25, 0.0 }
0x1e4e   :  { %6998 = vadd.xlane.f32.xlu0 %v6997_v3 }
0x1ed2   :  { %v6993_v35 = vpop.xlane.xlu0 %6992 }
0x1ed3   :  { %v7000_v49 = vmul.f32 0.015625, %v6993_v35 }
0x1ed5   :  { %v7003_v16 = vsub.f32 %v6984_v13, %v7000_v49 }
0x1ed7   :  { %v6996_v48 = vpop.xlane.xlu1 %6995  ;;  %v7006_v52 = vmul.f32 %v7003_v16, %v7003_v16 }
0x1ed8   :  { %v7001_v23 = vmul.f32 0.015625, %v6996_v48 }
0x1ed9   :  { %v7009_v37 = vsel %vm786_vm10, %v7006_v52, 0.0 }
0x1eda   :  { %v7004_v62 = vsub.f32 %v6985_v54, %v7001_v23  ;;  %7010 = vadd.xlane.f32.xlu1 %v7009_v37 }
0x1edb   :  { %v6999_v20 = vpop.xlane.xlu0 %6998 }
0x1edc   :  { %v7002_v30 = vmul.f32 0.015625, %v6999_v20  ;;  %v7007_v18 = vmul.f32 %v7004_v62, %v7004_v62 }
0x1ede   :  { %v7005_v59 = vsub.f32 %v6986_v25, %v7002_v30  ;;  %v7012_v4 = vsel %vm786_vm10, %v7007_v18, 0.0 }
0x1edf   :  { %7013 = vadd.xlane.f32.xlu0 %v7012_v4 }
0x1ee0   :  { %v7008_v21 = vmul.f32 %v7005_v59, %v7005_v59 }
0x1ee2   :  { %v7015_v10 = vsel %vm3666_vm6, %v7008_v21, 0.0 }
0x1ee3   :  { %7016 = vadd.xlane.f32.xlu1 %v7015_v10 }
0x1f67   :  { %v7011_v22 = vpop.xlane.xlu1 %7010 }
0x1f68   :  { %v7018_v45 = vmul.f32 0.015625, %v7011_v22 }
0x1f6a   :  { %v7021_v14 = vadd.f32 1e-05, %v7018_v45 }
0x1f6c   :  { %9213 = vrsqrt.f32 %v7021_v14  ;;  %v7014_v27 = vpop.xlane.xlu0 %7013 }
0x1f6d   :  { %v7019_v41 = vmul.f32 0.015625, %v7014_v27 }
0x1f6f   :  { %v7022_v5 = vadd.f32 1e-05, %v7019_v41 }
0x1f70   :  { %v7017_v47 = vpop.xlane.xlu1 %7016 }
0x1f71   :  { %9215 = vrsqrt.f32 %v7022_v5  ;;  %v7020_v43 = vmul.f32 0.015625, %v7017_v47 }
0x1f73   :  { %v7023_v24 = vadd.f32 1e-05, %v7020_v43 }
0x1f75   :  { %9217 = vrsqrt.f32 %v7023_v24 }
0x1f76   :  { %v9214_v42 = vpop.eup %9213 }
0x1f77   :  { %v7027_v17 = vmul.f32 %v9214_v42, %v7003_v16 }
0x1f79   :  { %v7036_v33 = vmul.f32 %v7454_v46, %v7027_v17 }
0x1f7b   :  { %v9216_v8 = vpop.eup %9215  ;;  %v7045_v28 = vadd.f32 %v7455_v2, %v7036_v33 }
0x1f7c   :  { %v7028_v61 = vmul.f32 %v9216_v8, %v7004_v62 }
0x1f7d   :  { %7048 = vst.msk [vmem:[%s9774_s17] sm:$0xff] %vm786_vm10, %v7045_v28  ;;  %8506 = vmatmul.mubr.msk.f32.vlgmr.msra.gmra.mrb[122].mxu1 %vm786_vm10, %v7045_v28 }
0x1f7e   :  { %8508 = vmatprep.mubr.msk.f32.mxu1 %vm9589_vm0, %v12406_v36  ;;  %v7037_v6 = vmul.f32 %v7454_v46, %v7028_v61 }
0x1f7f   :  { %v9218_v26 = vpop.eup %9217 }
0x1f80   :  { %v7046_v19 = vadd.f32 %v7455_v2, %v7037_v6  ;;  %v7029_v7 = vmul.f32 %v9218_v26, %v7005_v59 }
0x1f82   :  { %7049 = vst.msk [vmem:[%s9774_s17 + $0x8] sm:$0xff] %vm786_vm10, %v7046_v19  ;;  %8509 = vmatmul.mubr.msk.f32.gmra.mrb[124].mxu1 %vm786_vm10, %v7046_v19  ;;  %v7038_v40 = vmul.f32 %v7454_v46, %v7029_v7 }
0x1f83   :  { %8511 = vmatprep.mubr.msk.f32.mxu1 %vm9589_vm0, %v12406_v36 }
0x1f84   :  { %v7047_v56 = vadd.f32 %v7455_v2, %v7038_v40 }
0x1f86   :  { %7050 = vst.msk [vmem:[%s9774_s17 + $0x10] sm:$0xf] %vm3666_vm6, %v7047_v56  ;;  %8512 = vmatmul.mubr.msk.f32.gmra.mrb[126].mxu1 %vm786_vm10, %v7047_v56 }
0x2050   :  { %v7141_v13 = vpop.f32.mrb[122].mxu1 }
0x2051   :  { %v7142_v1 = vadd.f32 %v7456_v53, %v7141_v13  ;;  %v8507_v51 = vpop.f32.mrb[123].mxu1 }
0x2053   :  { %7156 = vst.msk [vmem:[%s9779_s13] sm:$0xff] %vm7155_vm5, %v7142_v1 }
0x2055   :  { %v7146_v0 = vpop.f32.mrb[124].mxu1 }
0x2056   :  { %v7147_v29 = vadd.f32 %v7456_v53, %v7146_v0  ;;  %v8510_v54 = vpop.f32.mrb[125].mxu1 }
0x2058   :  { %7157 = vst.msk [vmem:[%s9779_s13 + $0x8] sm:$0xff] %vm7155_vm5, %v7147_v29 }
0x2059   :  { %v7151_v11 = vpop.f32.mrb[126].mxu1 }
0x205a   :  { %v7152_v50 = vadd.f32 %v7456_v53, %v7151_v11  ;;  %v8513_v36 = vpop.f32.mrb[127].mxu1 }
0x205c   :  { %7159 = vst.msk [vmem:[%s9779_s13 + $0x10] sm:$0xf] %vm7158_vm8, %v7152_v50 }
0x205d   :  { %7168 = vsyncpa [#allocation5], 1 }
0x205e   :  { %7169 = vsyncpa [#allocation9], 1 }
0x205f   :  { %7170 = vsyncpa [#allocation12], 1 }
0x2060   :  { %7171 = vsyncpa [#allocation15], 1 }
0x2061   :  { %7172 = vsyncpa [#allocation18], 1 }
0x2062   :  { %7173 = vsyncpa [#allocation21], 1 }
0x2063   :  { %7174 = vsyncpa [#allocation24], 1 }
0x2064   :  { %7175 = vsyncpa [#allocation6], 1 }

</bundles_post_ra>
